<compile_context>
chip_gen: v6e
topology: v6e:2x2x1
jax: 0.10.0
libtpu: 0.0.40
codegen_flags: <defaults>
</compile_context>

<pallas_src>
import functools
import math

import jax
import jax.numpy as jnp
from jax import lax
from jax.experimental import pallas as pl
from jax.experimental.pallas import tpu as pltpu

MXU_DTYPE = jnp.bfloat16            # MXU inputs; accumulation/elementwise stay f32
_VMEM_LIMIT = 32 * 1024 * 1024      # fits v5e/v6e/v7x scoped VMEM


def _pick_row_tile(m, target=512):
    """Row tile for M-tiled dense kernels (multiple of 8 or the full dim)."""
    if m <= target:
        return m
    return (target // 8) * 8


def _largest_divisor(n, upper):
    for d in range(min(n, upper), 0, -1):
        if n % d == 0:
            return d
    return n


# --------------------------- dense (Linear + activation) --------------------

def _dense_kernel(*refs, n_in, act, alpha):
    x_refs = refs[:n_in]
    w_refs = refs[n_in:2 * n_in]
    b_ref = refs[2 * n_in]
    o_ref = refs[2 * n_in + 1]
    y = jnp.dot(x_refs[0][...].astype(MXU_DTYPE), w_refs[0][...],
                preferred_element_type=jnp.float32)
    for xr, wr in zip(x_refs[1:], w_refs[1:]):
        y = y + jnp.dot(xr[...].astype(MXU_DTYPE), wr[...],
                        preferred_element_type=jnp.float32)
    y = y + b_ref[...]
    if act == "prelu":
        y = jnp.where(y >= 0.0, y, alpha * y)
    elif act == "tanh":
        y = jnp.tanh(y)
    elif act == "relu":
        y = jnp.maximum(y, 0.0)
    o_ref[...] = y


def dense(xs, wts, b, *, act="none", alpha=0.25, tm=512):
    """y = act(sum_i xs[i] @ wts[i] + b).

    xs[i]: (M, K_i) f32 activations, wts[i]: (K_i, O) bf16 (pre-transposed at
    init), b: (1, O) f32.  Tiled over M with the weights/bias resident; MXU
    inputs in bf16, f32 accumulation and activation.  PReLU alpha is a
    compile-time constant.
    """
    if not isinstance(xs, (list, tuple)):
        xs, wts = [xs], [wts]
    n_in = len(xs)
    M = xs[0].shape[0]
    O = wts[0].shape[1]
    TM = _pick_row_tile(M, tm)
    grid = (pl.cdiv(M, TM),)

    in_specs = []
    for x in xs:
        in_specs.append(pl.BlockSpec((TM, x.shape[1]), lambda i: (i, 0)))
    for w in wts:
        in_specs.append(pl.BlockSpec((w.shape[0], O), lambda i: (0, 0)))
    in_specs.append(pl.BlockSpec((1, O), lambda i: (0, 0)))

    kernel = functools.partial(_dense_kernel, n_in=n_in, act=act, alpha=alpha)
    return pl.pallas_call(
        kernel,
        out_shape=jax.ShapeDtypeStruct((M, O), jnp.float32),
        grid=grid,
        in_specs=in_specs,
        out_specs=pl.BlockSpec((TM, O), lambda i: (i, 0)),
        compiler_params=pltpu.CompilerParams(
            dimension_semantics=("parallel",),
            vmem_limit_bytes=_VMEM_LIMIT),
    )(*xs, *wts, b)


# --------------------------- GRU: hoisted input projection ------------------

def _gru_inproj_kernel(x_ref, wr_ref, wz_ref, wn_ref, br_ref, bz_ref, bn_ref,
                       or_ref, oz_ref, on_ref):
    x = x_ref[...].astype(MXU_DTYPE)
    or_ref[...] = jnp.dot(x, wr_ref[...], preferred_element_type=jnp.float32) + br_ref[...]
    oz_ref[...] = jnp.dot(x, wz_ref[...], preferred_element_type=jnp.float32) + bz_ref[...]
    on_ref[...] = jnp.dot(x, wn_ref[...], preferred_element_type=jnp.float32) + bn_ref[...]


def gru_input_projection(x, p):
    """x: (M, N) -> (gx_r, gx_z, gx_n), each (M, H).  One pass over x; the
    r/z biases already include bhh_r/bhh_z (folded at init)."""
    M, N = x.shape
    H = p["w_r"].shape[1]
    TM = _pick_row_tile(M)
    grid = (pl.cdiv(M, TM),)
    xspec = pl.BlockSpec((TM, N), lambda i: (i, 0))
    wspec = pl.BlockSpec((N, H), lambda i: (0, 0))
    bspec = pl.BlockSpec((1, H), lambda i: (0, 0))
    ospec = pl.BlockSpec((TM, H), lambda i: (i, 0))
    return pl.pallas_call(
        _gru_inproj_kernel,
        out_shape=tuple(jax.ShapeDtypeStruct((M, H), jnp.float32) for _ in range(3)),
        grid=grid,
        in_specs=[xspec, wspec, wspec, wspec, bspec, bspec, bspec],
        out_specs=(ospec, ospec, ospec),
        compiler_params=pltpu.CompilerParams(
            dimension_semantics=("parallel",),
            vmem_limit_bytes=_VMEM_LIMIT),
    )(x, p["w_r"], p["w_z"], p["w_n"], p["b_r"], p["b_z"], p["b_n"])


# --------------------------- GRU: blocked recurrence -------------------------

def _gru_rec_kernel(gxr_ref, gxz_ref, gxn_ref, whr_ref, whz_ref, whn_ref,
                    bhn_ref, o_ref, h_scr, *, tt):
    @pl.when(pl.program_id(1) == 0)     # new (b, g) batch block -> h0 = 0
    def _():
        h_scr[...] = jnp.zeros_like(h_scr)

    whr = whr_ref[...]
    whz = whz_ref[...]
    whn = whn_ref[...]
    bhn = bhn_ref[...]

    h = h_scr[...]
    for i in range(tt):                 # fully unrolled; tt <= 32
        hb = h.astype(MXU_DTYPE)
        ghr = jnp.dot(hb, whr, preferred_element_type=jnp.float32)
        ghz = jnp.dot(hb, whz, preferred_element_type=jnp.float32)
        ghn = jnp.dot(hb, whn, preferred_element_type=jnp.float32)
        r = jax.nn.sigmoid(gxr_ref[i] + ghr)
        z = jax.nn.sigmoid(gxz_ref[i] + ghz)
        n = jnp.tanh(gxn_ref[i] + r * (ghn + bhn))
        h = (1.0 - z) * n + z * h
        o_ref[i] = h
    h_scr[...] = h


def gru_recurrence(gxr, gxz, gxn, p):
    """gx*: (T, BG, H) gate pre-activations (time-major).  Returns (T, BG, H)."""
    T, BG, H = gxr.shape
    Tt = _largest_divisor(T, 32)
    BGt = BG // 2 if (BG % 16 == 0) else BG     # split sequences across 2 TCs
    grid = (BG // BGt, T // Tt)
    gx_spec = pl.BlockSpec((Tt, BGt, H), lambda b, t: (t, b, 0))
    w_spec = pl.BlockSpec((H, H), lambda b, t: (0, 0))
    b_spec = pl.BlockSpec((1, H), lambda b, t: (0, 0))
    kernel = functools.partial(_gru_rec_kernel, tt=Tt)
    return pl.pallas_call(
        kernel,
        out_shape=jax.ShapeDtypeStruct((T, BG, H), jnp.float32),
        grid=grid,
        in_specs=[gx_spec, gx_spec, gx_spec, w_spec, w_spec, w_spec, b_spec],
        out_specs=pl.BlockSpec((Tt, BGt, H), lambda b, t: (t, b, 0)),
        scratch_shapes=[pltpu.VMEM((BGt, H), jnp.float32)],
        compiler_params=pltpu.CompilerParams(
            dimension_semantics=("parallel", "arbitrary"),
            vmem_limit_bytes=_VMEM_LIMIT),
    )(gxr, gxz, gxn, p["wh_r"], p["wh_z"], p["wh_n"], p["bh_n"])


# --------------------------- GroupNorm(1, C) (+ fused residual) --------------

def _groupnorm_kernel(*refs, eps, residual):
    if residual:
        y_ref, x_ref, g_ref, b_ref, o_ref = refs
    else:
        y_ref, g_ref, b_ref, o_ref = refs
        x_ref = None
    y = y_ref[...]                                   # (T, BGt, C)
    T, _, C = y_ref.shape
    inv_n = 1.0 / float(T * C)
    s = jnp.sum(y, axis=2, keepdims=True)            # lane reduce
    mean = jnp.sum(s, axis=0, keepdims=True) * inv_n # (1, BGt, 1) per-sample
    d = y - mean
    s2 = jnp.sum(d * d, axis=2, keepdims=True)
    var = jnp.sum(s2, axis=0, keepdims=True) * inv_n # biased, like torch
    out = d * lax.rsqrt(var + eps)
    out = out * g_ref[...][None] + b_ref[...][None]  # per-channel affine
    if residual:
        out = out + x_ref[...]
    o_ref[...] = out


def group_norm(y, gamma, beta, *, residual=None, eps=1e-5):
    """nn.GroupNorm(1, C) on time-major y: (T, BG, C); per-(b,g) stats over
    (T, C), per-channel affine; optionally fuses a residual add."""
    T, BG, C = y.shape
    BGt = 8 if BG % 8 == 0 else BG
    grid = (BG // BGt,)
    y_spec = pl.BlockSpec((T, BGt, C), lambda i: (0, i, 0))
    p_spec = pl.BlockSpec((1, C), lambda i: (0, 0))
    args = [y] if residual is None else [y, residual]
    in_specs = [y_spec] * len(args) + [p_spec, p_spec]
    kernel = functools.partial(_groupnorm_kernel, eps=eps,
                               residual=residual is not None)
    return pl.pallas_call(
        kernel,
        out_shape=jax.ShapeDtypeStruct((T, BG, C), jnp.float32),
        grid=grid,
        in_specs=in_specs,
        out_specs=y_spec,
        compiler_params=pltpu.CompilerParams(
            dimension_semantics=("parallel",),
            vmem_limit_bytes=_VMEM_LIMIT),
    )(*args, gamma, beta)


# --------------------------- model forward (glue in JAX) ---------------------

def subinter_forward(x, p):
    # x: (T, B, G, N) time-major, channel-last.
    T, B, G, N = x.shape
    xf = x.reshape(T * B * G, N)
    go = dense(xf, p["Wt_in"], p["b_in"], act="prelu", alpha=p["alpha"])
    Ht = go.shape[-1]
    gm = jnp.mean(go.reshape(T, B, G, Ht), axis=2)            # mean over groups
    gm = dense(gm.reshape(T * B, Ht), p["Wt_mean"], p["b_mean"],
               act="prelu", alpha=p["alpha"])
    gm = jnp.broadcast_to(gm.reshape(T, B, 1, Ht),
                          (T, B, G, Ht)).reshape(T * B * G, Ht)
    # concat([go, gm]) @ W_out == go @ W_a + gm @ W_b  (no concat materialized)
    out = dense([go, gm], [p["Wt_out_a"], p["Wt_out_b"]], p["b_out"],
                act="prelu", alpha=p["alpha"])
    out = group_norm(out.reshape(T, B * G, N), p["gn_g"], p["gn_b"],
                     residual=x.reshape(T, B * G, N))         # fused residual
    return out.reshape(T, B, G, N)


def sil_block_forward(x, p):
    T, B, G, N = x.shape
    x = subinter_forward(x, p["subinter"])
    gxr, gxz, gxn = gru_input_projection(x.reshape(T * B * G, N), p["gru"])
    H = gxr.shape[-1]
    ht = gru_recurrence(gxr.reshape(T, B * G, H),
                        gxz.reshape(T, B * G, H),
                        gxn.reshape(T, B * G, H), p["gru"])
    o = group_norm(ht, p["gn_g"], p["gn_b"])
    return o.reshape(T, B, G, H)


def model_forward(x, params, output_activate_function="Tanh"):
    # x: [B, G, N, T] (PyTorch layout) -> single transpose to time-major.
    x = jnp.transpose(jnp.asarray(x, jnp.float32), (3, 0, 1, 2))   # (T,B,G,N)
    for p in params["blocks"]:
        x = sil_block_forward(x, p)
    T, B, G, H = x.shape
    act = {"Tanh": "tanh", "ReLU": "relu", None: "none"}[output_activate_function]
    o = dense(x.reshape(T * B * G, H), params["fc"]["Wt"], params["fc"]["b"],
              act=act)
    O = o.shape[-1]
    # single transpose back to the module's (B*G, output_size, T) layout
    return jnp.transpose(o.reshape(T, B * G, O), (1, 2, 0))


# --------------------------- deterministic init ------------------------------

def _uniform(key, shape, bound):
    return jax.random.uniform(key, shape, jnp.float32, -bound, bound)


def init_params(key, input_size, output_size, hidden_size, num_layers,
                middle_tac_hidden_times=0.66):
    keys = iter(jax.random.split(key, 32 * num_layers + 8))
    nk = lambda: next(keys)

    def linear(in_f, out_f):
        bnd = 1.0 / math.sqrt(in_f)
        W = _uniform(nk(), (out_f, in_f), bnd)
        b = _uniform(nk(), (out_f,), bnd)
        return {"Wt": jnp.asarray(W.T, MXU_DTYPE), "b": b.reshape(1, out_f)}

    def subinter(in_size, tac_hidden):
        lin_in = linear(in_size, tac_hidden)
        lin_mean = linear(tac_hidden, tac_hidden)
        bnd = 1.0 / math.sqrt(2 * tac_hidden)
        W = _uniform(nk(), (in_size, 2 * tac_hidden), bnd)     # Linear(2Ht -> N)
        b = _uniform(nk(), (in_size,), bnd)
        Wt = W.T                                               # (2Ht, N)
        return {
            "Wt_in": lin_in["Wt"], "b_in": lin_in["b"],
            "Wt_mean": lin_mean["Wt"], "b_mean": lin_mean["b"],
            "Wt_out_a": jnp.asarray(Wt[:tac_hidden], MXU_DTYPE),
            "Wt_out_b": jnp.asarray(Wt[tac_hidden:], MXU_DTYPE),
            "b_out": b.reshape(1, in_size),
            "alpha": 0.25,                                     # nn.PReLU default
            "gn_g": jnp.ones((1, in_size), jnp.float32),
            "gn_b": jnp.zeros((1, in_size), jnp.float32),
        }

    def gru_params(in_size, hidden):
        bnd = 1.0 / math.sqrt(hidden)
        wih = _uniform(nk(), (3 * hidden, in_size), bnd)       # (r|z|n, in)
        whh = _uniform(nk(), (3 * hidden, hidden), bnd)
        bih = _uniform(nk(), (3 * hidden,), bnd)
        bhh = _uniform(nk(), (3 * hidden,), bnd)
        H = hidden
        sl = lambda a, g: a[g * H:(g + 1) * H]
        return {
            # hoisted input projection (pre-transposed, bhh_r/z folded in)
            "w_r": jnp.asarray(sl(wih, 0).T, MXU_DTYPE),
            "w_z": jnp.asarray(sl(wih, 1).T, MXU_DTYPE),
            "w_n": jnp.asarray(sl(wih, 2).T, MXU_DTYPE),
            "b_r": (sl(bih, 0) + sl(bhh, 0)).reshape(1, H),
            "b_z": (sl(bih, 1) + sl(bhh, 1)).reshape(1, H),
            "b_n": sl(bih, 2).reshape(1, H),
            # recurrent weights (separate per gate, pre-transposed)
            "wh_r": jnp.asarray(sl(whh, 0).T, MXU_DTYPE),
            "wh_z": jnp.asarray(sl(whh, 1).T, MXU_DTYPE),
            "wh_n": jnp.asarray(sl(whh, 2).T, MXU_DTYPE),
            "bh_n": sl(bhh, 2).reshape(1, H),
        }

    blocks = []
    for i in range(num_layers):
        in_size = input_size if i == 0 else hidden_size
        tac_hidden = 3 * input_size if i == 0 else int(middle_tac_hidden_times * hidden_size)
        blocks.append({
            "subinter": subinter(in_size, tac_hidden),
            "gru": gru_params(in_size, hidden_size),
            "gn_g": jnp.ones((1, hidden_size), jnp.float32),
            "gn_b": jnp.zeros((1, hidden_size), jnp.float32),
        })
    return {"blocks": blocks, "fc": linear(hidden_size, output_size)}


# --------------------------- demo --------------------------------------------

if __name__ == "__main__":
    B, G, N, T = 2, 4, 16, 16          # [B, F(groups), N(features), T]
    hidden_size = 32
    output_size = 16
    num_layers = 2

    key = jax.random.PRNGKey(0)
    kx, kp = jax.random.split(key)
    x = jax.random.normal(kx, (B, G, N, T), jnp.float32)
    params = init_params(kp, N, output_size, hidden_size, num_layers)

    fwd = jax.jit(lambda inp: model_forward(inp, params, "Tanh"))
    out = jax.block_until_ready(fwd(x))

    assert out.shape == (B * G, output_size, T), out.shape
    assert bool(jnp.all(jnp.isfinite(out)))
    print("KERNEL_OK")
</pallas_src>

<mosaic_0001>
module attributes {stable_mosaic.version = 11 : i64} {
  func.func @_dense_kernel(%arg0: i32, %arg1: memref<128x16xf32, #tpu.memory_space<vmem>>, %arg2: memref<16x48xbf16, #tpu.memory_space<vmem>>, %arg3: memref<1x48xf32, #tpu.memory_space<vmem>>, %arg4: memref<128x48xf32, #tpu.memory_space<vmem>>) attributes {dimension_semantics = [#tpu.dimension_semantics<parallel>], iteration_bounds = array<i64: 1>, scalar_prefetch = 0 : i64, scratch_operands = 0 : i64, tpu.core_type = #tpu.core_type<tc>, window_params = [{transform_indices = @transform_0, window_bounds = array<i64: 128, 16>}, {pipeline_mode = #tpu.pipeline_mode<synchronous>, transform_indices = @transform_1, window_bounds = array<i64: 16, 48>}, {pipeline_mode = #tpu.pipeline_mode<synchronous>, transform_indices = @transform_2, window_bounds = array<i64: 1, 48>}, {transform_indices = @transform_3, window_bounds = array<i64: 128, 48>}]} {
    %c0 = arith.constant 0 : index
    %c0_0 = arith.constant 0 : index
    %0 = vector.load %arg1[%c0, %c0_0] : memref<128x16xf32, #tpu.memory_space<vmem>>, vector<128x16xf32>
    %1 = arith.truncf %0 : vector<128x16xf32> to vector<128x16xbf16>
    %c0_1 = arith.constant 0 : index
    %c0_2 = arith.constant 0 : index
    %2 = vector.load %arg2[%c0_1, %c0_2] : memref<16x48xbf16, #tpu.memory_space<vmem>>, vector<16x48xbf16>
    %cst = arith.constant dense<0.000000e+00> : vector<128x48xf32>
    %3 = tpu.matmul %1, %2, %cst {dimension_numbers = #tpu.dot_dimension_numbers<[1], [0], [0], [1], [0, 0, 1, 1], [], []>} : vector<128x16xbf16>, vector<16x48xbf16>, vector<128x48xf32> -> vector<128x48xf32>
    %c0_3 = arith.constant 0 : index
    %c0_4 = arith.constant 0 : index
    %4 = vector.load %arg3[%c0_3, %c0_4] : memref<1x48xf32, #tpu.memory_space<vmem>>, vector<1x48xf32>
    %5 = vector.broadcast %4 : vector<1x48xf32> to vector<128x48xf32>
    %6 = arith.addf %3, %5 : vector<128x48xf32>
    %cst_5 = arith.constant 0.000000e+00 : f32
    %7 = vector.broadcast %cst_5 : f32 to vector<128x48xf32>
    %8 = arith.cmpf oge, %6, %7 : vector<128x48xf32>
    %cst_6 = arith.constant 2.500000e-01 : f32
    %9 = vector.broadcast %cst_6 : f32 to vector<128x48xf32>
    %10 = arith.mulf %9, %6 : vector<128x48xf32>
    %11 = arith.select %8, %6, %10 : vector<128x48xi1>, vector<128x48xf32>
    %c0_7 = arith.constant 0 : index
    %c0_8 = arith.constant 0 : index
    %12 = vector.load %arg4[%c0_7, %c0_8] : memref<128x48xf32, #tpu.memory_space<vmem>>, vector<128x48xf32>
    tpu.vector_store %arg4[%c0_7, %c0_8], %11 {strides = array<i32>} : memref<128x48xf32, #tpu.memory_space<vmem>>, vector<128x48xf32>,
    return
  }
  func.func @transform_0(%arg0: i32) -> (i32, i32) {
    %c0_i32 = arith.constant 0 : i32
    %c0_i32_0 = arith.constant 0 : i32
    return %arg0, %c0_i32 : i32, i32
  }
  func.func @transform_1(%arg0: i32) -> (i32, i32) {
    %c0_i32 = arith.constant 0 : i32
    %c0_i32_0 = arith.constant 0 : i32
    %c0_i32_1 = arith.constant 0 : i32
    return %c0_i32, %c0_i32_0 : i32, i32
  }
  func.func @transform_2(%arg0: i32) -> (i32, i32) {
    %c0_i32 = arith.constant 0 : i32
    %c0_i32_0 = arith.constant 0 : i32
    %c0_i32_1 = arith.constant 0 : i32
    return %c0_i32, %c0_i32_0 : i32, i32
  }
  func.func @transform_3(%arg0: i32) -> (i32, i32) {
    %c0_i32 = arith.constant 0 : i32
    %c0_i32_0 = arith.constant 0 : i32
    return %arg0, %c0_i32 : i32, i32
  }
}

module attributes {stable_mosaic.version = 11 : i64} {
  func.func @_dense_kernel(%arg0: i32, %arg1: memref<128x48xf32, #tpu.memory_space<vmem>>, %arg2: memref<128x48xf32, #tpu.memory_space<vmem>>, %arg3: memref<48x16xbf16, #tpu.memory_space<vmem>>, %arg4: memref<48x16xbf16, #tpu.memory_space<vmem>>, %arg5: memref<1x16xf32, #tpu.memory_space<vmem>>, %arg6: memref<128x16xf32, #tpu.memory_space<vmem>>) attributes {dimension_semantics = [#tpu.dimension_semantics<parallel>], iteration_bounds = array<i64: 1>, scalar_prefetch = 0 : i64, scratch_operands = 0 : i64, tpu.core_type = #tpu.core_type<tc>, window_params = [{transform_indices = @transform_0, window_bounds = array<i64: 128, 48>}, {transform_indices = @transform_1, window_bounds = array<i64: 128, 48>}, {pipeline_mode = #tpu.pipeline_mode<synchronous>, transform_indices = @transform_2, window_bounds = array<i64: 48, 16>}, {pipeline_mode = #tpu.pipeline_mode<synchronous>, transform_indices = @transform_3, window_bounds = array<i64: 48, 16>}, {pipeline_mode = #tpu.pipeline_mode<synchronous>, transform_indices = @transform_4, window_bounds = array<i64: 1, 16>}, {transform_indices = @transform_5, window_bounds = array<i64: 128, 16>}]} {
    %c0 = arith.constant 0 : index
    %c0_0 = arith.constant 0 : index
    %0 = vector.load %arg1[%c0, %c0_0] : memref<128x48xf32, #tpu.memory_space<vmem>>, vector<128x48xf32>
    %1 = arith.truncf %0 : vector<128x48xf32> to vector<128x48xbf16>
    %c0_1 = arith.constant 0 : index
    %c0_2 = arith.constant 0 : index
    %2 = vector.load %arg3[%c0_1, %c0_2] : memref<48x16xbf16, #tpu.memory_space<vmem>>, vector<48x16xbf16>
    %cst = arith.constant dense<0.000000e+00> : vector<128x16xf32>
    %3 = tpu.matmul %1, %2, %cst {dimension_numbers = #tpu.dot_dimension_numbers<[1], [0], [0], [1], [0, 0, 1, 1], [], []>} : vector<128x48xbf16>, vector<48x16xbf16>, vector<128x16xf32> -> vector<128x16xf32>
    %c0_3 = arith.constant 0 : index
    %c0_4 = arith.constant 0 : index
    %4 = vector.load %arg2[%c0_3, %c0_4] : memref<128x48xf32, #tpu.memory_space<vmem>>, vector<128x48xf32>
    %5 = arith.truncf %4 : vector<128x48xf32> to vector<128x48xbf16>
    %c0_5 = arith.constant 0 : index
    %c0_6 = arith.constant 0 : index
    %6 = vector.load %arg4[%c0_5, %c0_6] : memref<48x16xbf16, #tpu.memory_space<vmem>>, vector<48x16xbf16>
    %cst_7 = arith.constant dense<0.000000e+00> : vector<128x16xf32>
    %7 = tpu.matmul %5, %6, %cst_7 {dimension_numbers = #tpu.dot_dimension_numbers<[1], [0], [0], [1], [0, 0, 1, 1], [], []>} : vector<128x48xbf16>, vector<48x16xbf16>, vector<128x16xf32> -> vector<128x16xf32>
    %8 = arith.addf %3, %7 : vector<128x16xf32>
    %c0_8 = arith.constant 0 : index
    %c0_9 = arith.constant 0 : index
    %9 = vector.load %arg5[%c0_8, %c0_9] : memref<1x16xf32, #tpu.memory_space<vmem>>, vector<1x16xf32>
    %10 = vector.broadcast %9 : vector<1x16xf32> to vector<128x16xf32>
    %11 = arith.addf %8, %10 : vector<128x16xf32>
    %cst_10 = arith.constant 0.000000e+00 : f32
    %12 = vector.broadcast %cst_10 : f32 to vector<128x16xf32>
    %13 = arith.cmpf oge, %11, %12 : vector<128x16xf32>
    %cst_11 = arith.constant 2.500000e-01 : f32
    %14 = vector.broadcast %cst_11 : f32 to vector<128x16xf32>
    %15 = arith.mulf %14, %11 : vector<128x16xf32>
    %16 = arith.select %13, %11, %15 : vector<128x16xi1>, vector<128x16xf32>
    %c0_12 = arith.constant 0 : index
    %c0_13 = arith.constant 0 : index
    %17 = vector.load %arg6[%c0_12, %c0_13] : memref<128x16xf32, #tpu.memory_space<vmem>>, vector<128x16xf32>
    tpu.vector_store %arg6[%c0_12, %c0_13], %16 {strides = array<i32>} : memref<128x16xf32, #tpu.memory_space<vmem>>, vector<128x16xf32>,
    return
  }
  func.func @transform_0(%arg0: i32) -> (i32, i32) {
    %c0_i32 = arith.constant 0 : i32
    %c0_i32_0 = arith.constant 0 : i32
    return %arg0, %c0_i32 : i32, i32
  }
  func.func @transform_1(%arg0: i32) -> (i32, i32) {
    %c0_i32 = arith.constant 0 : i32
    %c0_i32_0 = arith.constant 0 : i32
    return %arg0, %c0_i32 : i32, i32
  }
  func.func @transform_2(%arg0: i32) -> (i32, i32) {
    %c0_i32 = arith.constant 0 : i32
    %c0_i32_0 = arith.constant 0 : i32
    %c0_i32_1 = arith.constant 0 : i32
    return %c0_i32, %c0_i32_0 : i32, i32
  }
  func.func @transform_3(%arg0: i32) -> (i32, i32) {
    %c0_i32 = arith.constant 0 : i32
    %c0_i32_0 = arith.constant 0 : i32
    %c0_i32_1 = arith.constant 0 : i32
    return %c0_i32, %c0_i32_0 : i32, i32
  }
  func.func @transform_4(%arg0: i32) -> (i32, i32) {
    %c0_i32 = arith.constant 0 : i32
    %c0_i32_0 = arith.constant 0 : i32
    %c0_i32_1 = arith.constant 0 : i32
    return %c0_i32, %c0_i32_0 : i32, i32
  }
  func.func @transform_5(%arg0: i32) -> (i32, i32) {
    %c0_i32 = arith.constant 0 : i32
    %c0_i32_0 = arith.constant 0 : i32
    return %arg0, %c0_i32 : i32, i32
  }
}

module attributes {stable_mosaic.version = 11 : i64} {
  func.func @_dense_kernel(%arg0: i32, %arg1: memref<32x48xf32, #tpu.memory_space<vmem>>, %arg2: memref<48x48xbf16, #tpu.memory_space<vmem>>, %arg3: memref<1x48xf32, #tpu.memory_space<vmem>>, %arg4: memref<32x48xf32, #tpu.memory_space<vmem>>) attributes {dimension_semantics = [#tpu.dimension_semantics<parallel>], iteration_bounds = array<i64: 1>, scalar_prefetch = 0 : i64, scratch_operands = 0 : i64, tpu.core_type = #tpu.core_type<tc>, window_params = [{transform_indices = @transform_0, window_bounds = array<i64: 32, 48>}, {pipeline_mode = #tpu.pipeline_mode<synchronous>, transform_indices = @transform_1, window_bounds = array<i64: 48, 48>}, {pipeline_mode = #tpu.pipeline_mode<synchronous>, transform_indices = @transform_2, window_bounds = array<i64: 1, 48>}, {transform_indices = @transform_3, window_bounds = array<i64: 32, 48>}]} {
    %c0 = arith.constant 0 : index
    %c0_0 = arith.constant 0 : index
    %0 = vector.load %arg1[%c0, %c0_0] : memref<32x48xf32, #tpu.memory_space<vmem>>, vector<32x48xf32>
    %1 = arith.truncf %0 : vector<32x48xf32> to vector<32x48xbf16>
    %c0_1 = arith.constant 0 : index
    %c0_2 = arith.constant 0 : index
    %2 = vector.load %arg2[%c0_1, %c0_2] : memref<48x48xbf16, #tpu.memory_space<vmem>>, vector<48x48xbf16>
    %cst = arith.constant dense<0.000000e+00> : vector<32x48xf32>
    %3 = tpu.matmul %1, %2, %cst {dimension_numbers = #tpu.dot_dimension_numbers<[1], [0], [0], [1], [0, 0, 1, 1], [], []>} : vector<32x48xbf16>, vector<48x48xbf16>, vector<32x48xf32> -> vector<32x48xf32>
    %c0_3 = arith.constant 0 : index
    %c0_4 = arith.constant 0 : index
    %4 = vector.load %arg3[%c0_3, %c0_4] : memref<1x48xf32, #tpu.memory_space<vmem>>, vector<1x48xf32>
    %5 = vector.broadcast %4 : vector<1x48xf32> to vector<32x48xf32>
    %6 = arith.addf %3, %5 : vector<32x48xf32>
    %cst_5 = arith.constant 0.000000e+00 : f32
    %7 = vector.broadcast %cst_5 : f32 to vector<32x48xf32>
    %8 = arith.cmpf oge, %6, %7 : vector<32x48xf32>
    %cst_6 = arith.constant 2.500000e-01 : f32
    %9 = vector.broadcast %cst_6 : f32 to vector<32x48xf32>
    %10 = arith.mulf %9, %6 : vector<32x48xf32>
    %11 = arith.select %8, %6, %10 : vector<32x48xi1>, vector<32x48xf32>
    %c0_7 = arith.constant 0 : index
    %c0_8 = arith.constant 0 : index
    %12 = vector.load %arg4[%c0_7, %c0_8] : memref<32x48xf32, #tpu.memory_space<vmem>>, vector<32x48xf32>
    tpu.vector_store %arg4[%c0_7, %c0_8], %11 {strides = array<i32>} : memref<32x48xf32, #tpu.memory_space<vmem>>, vector<32x48xf32>,
    return
  }
  func.func @transform_0(%arg0: i32) -> (i32, i32) {
    %c0_i32 = arith.constant 0 : i32
    %c0_i32_0 = arith.constant 0 : i32
    return %arg0, %c0_i32 : i32, i32
  }
  func.func @transform_1(%arg0: i32) -> (i32, i32) {
    %c0_i32 = arith.constant 0 : i32
    %c0_i32_0 = arith.constant 0 : i32
    %c0_i32_1 = arith.constant 0 : i32
    return %c0_i32, %c0_i32_0 : i32, i32
  }
  func.func @transform_2(%arg0: i32) -> (i32, i32) {
    %c0_i32 = arith.constant 0 : i32
    %c0_i32_0 = arith.constant 0 : i32
    %c0_i32_1 = arith.constant 0 : i32
    return %c0_i32, %c0_i32_0 : i32, i32
  }
  func.func @transform_3(%arg0: i32) -> (i32, i32) {
    %c0_i32 = arith.constant 0 : i32
    %c0_i32_0 = arith.constant 0 : i32
    return %arg0, %c0_i32 : i32, i32
  }
}

module attributes {stable_mosaic.version = 11 : i64} {
  func.func @_groupnorm_kernel(%arg0: i32, %arg1: memref<16x8x16xf32, #tpu.memory_space<vmem>>, %arg2: memref<16x8x16xf32, #tpu.memory_space<vmem>>, %arg3: memref<1x16xf32, #tpu.memory_space<vmem>>, %arg4: memref<1x16xf32, #tpu.memory_space<vmem>>, %arg5: memref<16x8x16xf32, #tpu.memory_space<vmem>>) attributes {dimension_semantics = [#tpu.dimension_semantics<parallel>], iteration_bounds = array<i64: 1>, scalar_prefetch = 0 : i64, scratch_operands = 0 : i64, tpu.core_type = #tpu.core_type<tc>, window_params = [{transform_indices = @transform_0, window_bounds = array<i64: 16, 8, 16>}, {transform_indices = @transform_1, window_bounds = array<i64: 16, 8, 16>}, {pipeline_mode = #tpu.pipeline_mode<synchronous>, transform_indices = @transform_2, window_bounds = array<i64: 1, 16>}, {pipeline_mode = #tpu.pipeline_mode<synchronous>, transform_indices = @transform_3, window_bounds = array<i64: 1, 16>}, {transform_indices = @transform_4, window_bounds = array<i64: 16, 8, 16>}]} {
    %c0 = arith.constant 0 : index
    %c0_0 = arith.constant 0 : index
    %c0_1 = arith.constant 0 : index
    %0 = vector.load %arg1[%c0, %c0_0, %c0_1] : memref<16x8x16xf32, #tpu.memory_space<vmem>>, vector<16x8x16xf32>
    %cst = arith.constant dense<0.000000e+00> : vector<16x8xf32>
    %1 = vector.multi_reduction <add>, %0, %cst [2] : vector<16x8x16xf32> to vector<16x8xf32>
    %2 = vector.shape_cast %1 : vector<16x8xf32> to vector<16x8x1xf32>
    %cst_2 = arith.constant dense<0.000000e+00> : vector<8x1xf32>
    %3 = vector.multi_reduction <add>, %2, %cst_2 [0] : vector<16x8x1xf32> to vector<8x1xf32>
    %4 = vector.shape_cast %3 : vector<8x1xf32> to vector<1x8x1xf32>
    %cst_3 = arith.constant 3.906250e-03 : f32
    %5 = vector.broadcast %cst_3 : f32 to vector<1x8x1xf32>
    %6 = arith.mulf %4, %5 : vector<1x8x1xf32>
    %7 = vector.broadcast %6 : vector<1x8x1xf32> to vector<16x8x16xf32>
    %8 = arith.subf %0, %7 : vector<16x8x16xf32>
    %9 = arith.mulf %8, %8 : vector<16x8x16xf32>
    %cst_4 = arith.constant dense<0.000000e+00> : vector<16x8xf32>
    %10 = vector.multi_reduction <add>, %9, %cst_4 [2] : vector<16x8x16xf32> to vector<16x8xf32>
    %11 = vector.shape_cast %10 : vector<16x8xf32> to vector<16x8x1xf32>
    %cst_5 = arith.constant dense<0.000000e+00> : vector<8x1xf32>
    %12 = vector.multi_reduction <add>, %11, %cst_5 [0] : vector<16x8x1xf32> to vector<8x1xf32>
    %13 = vector.shape_cast %12 : vector<8x1xf32> to vector<1x8x1xf32>
    %cst_6 = arith.constant 3.906250e-03 : f32
    %14 = vector.broadcast %cst_6 : f32 to vector<1x8x1xf32>
    %15 = arith.mulf %13, %14 : vector<1x8x1xf32>
    %cst_7 = arith.constant 9.99999974E-6 : f32
    %16 = vector.broadcast %cst_7 : f32 to vector<1x8x1xf32>
    %17 = arith.addf %15, %16 : vector<1x8x1xf32>
    %18 = math.rsqrt %17 : vector<1x8x1xf32>
    %19 = vector.broadcast %18 : vector<1x8x1xf32> to vector<16x8x16xf32>
    %20 = arith.mulf %8, %19 : vector<16x8x16xf32>
    %c0_8 = arith.constant 0 : index
    %c0_9 = arith.constant 0 : index
    %21 = vector.load %arg3[%c0_8, %c0_9] : memref<1x16xf32, #tpu.memory_space<vmem>>, vector<1x16xf32>
    %22 = vector.shape_cast %21 : vector<1x16xf32> to vector<1x1x16xf32>
    %23 = vector.broadcast %22 : vector<1x1x16xf32> to vector<16x8x16xf32>
    %24 = arith.mulf %20, %23 : vector<16x8x16xf32>
    %c0_10 = arith.constant 0 : index
    %c0_11 = arith.constant 0 : index
    %25 = vector.load %arg4[%c0_10, %c0_11] : memref<1x16xf32, #tpu.memory_space<vmem>>, vector<1x16xf32>
    %26 = vector.shape_cast %25 : vector<1x16xf32> to vector<1x1x16xf32>
    %27 = vector.broadcast %26 : vector<1x1x16xf32> to vector<16x8x16xf32>
    %28 = arith.addf %24, %27 : vector<16x8x16xf32>
    %c0_12 = arith.constant 0 : index
    %c0_13 = arith.constant 0 : index
    %c0_14 = arith.constant 0 : index
    %29 = vector.load %arg2[%c0_12, %c0_13, %c0_14] : memref<16x8x16xf32, #tpu.memory_space<vmem>>, vector<16x8x16xf32>
    %30 = arith.addf %28, %29 : vector<16x8x16xf32>
    %c0_15 = arith.constant 0 : index
    %c0_16 = arith.constant 0 : index
    %c0_17 = arith.constant 0 : index
    %31 = vector.load %arg5[%c0_15, %c0_16, %c0_17] : memref<16x8x16xf32, #tpu.memory_space<vmem>>, vector<16x8x16xf32>
    tpu.vector_store %arg5[%c0_15, %c0_16, %c0_17], %30 {strides = array<i32>} : memref<16x8x16xf32, #tpu.memory_space<vmem>>, vector<16x8x16xf32>,
    return
  }
  func.func @transform_0(%arg0: i32) -> (i32, i32, i32) {
    %c0_i32 = arith.constant 0 : i32
    %c0_i32_0 = arith.constant 0 : i32
    %c0_i32_1 = arith.constant 0 : i32
    return %c0_i32, %arg0, %c0_i32_0 : i32, i32, i32
  }
  func.func @transform_1(%arg0: i32) -> (i32, i32, i32) {
    %c0_i32 = arith.constant 0 : i32
    %c0_i32_0 = arith.constant 0 : i32
    %c0_i32_1 = arith.constant 0 : i32
    return %c0_i32, %arg0, %c0_i32_0 : i32, i32, i32
  }
  func.func @transform_2(%arg0: i32) -> (i32, i32) {
    %c0_i32 = arith.constant 0 : i32
    %c0_i32_0 = arith.constant 0 : i32
    %c0_i32_1 = arith.constant 0 : i32
    return %c0_i32, %c0_i32_0 : i32, i32
  }
  func.func @transform_3(%arg0: i32) -> (i32, i32) {
    %c0_i32 = arith.constant 0 : i32
    %c0_i32_0 = arith.constant 0 : i32
    %c0_i32_1 = arith.constant 0 : i32
    return %c0_i32, %c0_i32_0 : i32, i32
  }
  func.func @transform_4(%arg0: i32) -> (i32, i32, i32) {
    %c0_i32 = arith.constant 0 : i32
    %c0_i32_0 = arith.constant 0 : i32
    %c0_i32_1 = arith.constant 0 : i32
    return %c0_i32, %arg0, %c0_i32_0 : i32, i32, i32
  }
}

module attributes {stable_mosaic.version = 11 : i64} {
  func.func @_gru_inproj_kernel(%arg0: i32, %arg1: memref<128x16xf32, #tpu.memory_space<vmem>>, %arg2: memref<16x32xbf16, #tpu.memory_space<vmem>>, %arg3: memref<16x32xbf16, #tpu.memory_space<vmem>>, %arg4: memref<16x32xbf16, #tpu.memory_space<vmem>>, %arg5: memref<1x32xf32, #tpu.memory_space<vmem>>, %arg6: memref<1x32xf32, #tpu.memory_space<vmem>>, %arg7: memref<1x32xf32, #tpu.memory_space<vmem>>, %arg8: memref<128x32xf32, #tpu.memory_space<vmem>>, %arg9: memref<128x32xf32, #tpu.memory_space<vmem>>, %arg10: memref<128x32xf32, #tpu.memory_space<vmem>>) attributes {dimension_semantics = [#tpu.dimension_semantics<parallel>], iteration_bounds = array<i64: 1>, scalar_prefetch = 0 : i64, scratch_operands = 0 : i64, tpu.core_type = #tpu.core_type<tc>, window_params = [{transform_indices = @transform_0, window_bounds = array<i64: 128, 16>}, {pipeline_mode = #tpu.pipeline_mode<synchronous>, transform_indices = @transform_1, window_bounds = array<i64: 16, 32>}, {pipeline_mode = #tpu.pipeline_mode<synchronous>, transform_indices = @transform_2, window_bounds = array<i64: 16, 32>}, {pipeline_mode = #tpu.pipeline_mode<synchronous>, transform_indices = @transform_3, window_bounds = array<i64: 16, 32>}, {pipeline_mode = #tpu.pipeline_mode<synchronous>, transform_indices = @transform_4, window_bounds = array<i64: 1, 32>}, {pipeline_mode = #tpu.pipeline_mode<synchronous>, transform_indices = @transform_5, window_bounds = array<i64: 1, 32>}, {pipeline_mode = #tpu.pipeline_mode<synchronous>, transform_indices = @transform_6, window_bounds = array<i64: 1, 32>}, {transform_indices = @transform_7, window_bounds = array<i64: 128, 32>}, {transform_indices = @transform_8, window_bounds = array<i64: 128, 32>}, {transform_indices = @transform_9, window_bounds = array<i64: 128, 32>}]} {
    %c0 = arith.constant 0 : index
    %c0_0 = arith.constant 0 : index
    %0 = vector.load %arg1[%c0, %c0_0] : memref<128x16xf32, #tpu.memory_space<vmem>>, vector<128x16xf32>
    %1 = arith.truncf %0 : vector<128x16xf32> to vector<128x16xbf16>
    %c0_1 = arith.constant 0 : index
    %c0_2 = arith.constant 0 : index
    %2 = vector.load %arg2[%c0_1, %c0_2] : memref<16x32xbf16, #tpu.memory_space<vmem>>, vector<16x32xbf16>
    %cst = arith.constant dense<0.000000e+00> : vector<128x32xf32>
    %3 = tpu.matmul %1, %2, %cst {dimension_numbers = #tpu.dot_dimension_numbers<[1], [0], [0], [1], [0, 0, 1, 1], [], []>} : vector<128x16xbf16>, vector<16x32xbf16>, vector<128x32xf32> -> vector<128x32xf32>
    %c0_3 = arith.constant 0 : index
    %c0_4 = arith.constant 0 : index
    %4 = vector.load %arg5[%c0_3, %c0_4] : memref<1x32xf32, #tpu.memory_space<vmem>>, vector<1x32xf32>
    %5 = vector.broadcast %4 : vector<1x32xf32> to vector<128x32xf32>
    %6 = arith.addf %3, %5 : vector<128x32xf32>
    %c0_5 = arith.constant 0 : index
    %c0_6 = arith.constant 0 : index
    %7 = vector.load %arg8[%c0_5, %c0_6] : memref<128x32xf32, #tpu.memory_space<vmem>>, vector<128x32xf32>
    tpu.vector_store %arg8[%c0_5, %c0_6], %6 {strides = array<i32>} : memref<128x32xf32, #tpu.memory_space<vmem>>, vector<128x32xf32>,
    %c0_7 = arith.constant 0 : index
    %c0_8 = arith.constant 0 : index
    %8 = vector.load %arg3[%c0_7, %c0_8] : memref<16x32xbf16, #tpu.memory_space<vmem>>, vector<16x32xbf16>
    %cst_9 = arith.constant dense<0.000000e+00> : vector<128x32xf32>
    %9 = tpu.matmul %1, %8, %cst_9 {dimension_numbers = #tpu.dot_dimension_numbers<[1], [0], [0], [1], [0, 0, 1, 1], [], []>} : vector<128x16xbf16>, vector<16x32xbf16>, vector<128x32xf32> -> vector<128x32xf32>
    %c0_10 = arith.constant 0 : index
    %c0_11 = arith.constant 0 : index
    %10 = vector.load %arg6[%c0_10, %c0_11] : memref<1x32xf32, #tpu.memory_space<vmem>>, vector<1x32xf32>
    %11 = vector.broadcast %10 : vector<1x32xf32> to vector<128x32xf32>
    %12 = arith.addf %9, %11 : vector<128x32xf32>
    %c0_12 = arith.constant 0 : index
    %c0_13 = arith.constant 0 : index
    %13 = vector.load %arg9[%c0_12, %c0_13] : memref<128x32xf32, #tpu.memory_space<vmem>>, vector<128x32xf32>
    tpu.vector_store %arg9[%c0_12, %c0_13], %12 {strides = array<i32>} : memref<128x32xf32, #tpu.memory_space<vmem>>, vector<128x32xf32>,
    %c0_14 = arith.constant 0 : index
    %c0_15 = arith.constant 0 : index
    %14 = vector.load %arg4[%c0_14, %c0_15] : memref<16x32xbf16, #tpu.memory_space<vmem>>, vector<16x32xbf16>
    %cst_16 = arith.constant dense<0.000000e+00> : vector<128x32xf32>
    %15 = tpu.matmul %1, %14, %cst_16 {dimension_numbers = #tpu.dot_dimension_numbers<[1], [0], [0], [1], [0, 0, 1, 1], [], []>} : vector<128x16xbf16>, vector<16x32xbf16>, vector<128x32xf32> -> vector<128x32xf32>
    %c0_17 = arith.constant 0 : index
    %c0_18 = arith.constant 0 : index
    %16 = vector.load %arg7[%c0_17, %c0_18] : memref<1x32xf32, #tpu.memory_space<vmem>>, vector<1x32xf32>
    %17 = vector.broadcast %16 : vector<1x32xf32> to vector<128x32xf32>
    %18 = arith.addf %15, %17 : vector<128x32xf32>
    %c0_19 = arith.constant 0 : index
    %c0_20 = arith.constant 0 : index
    %19 = vector.load %arg10[%c0_19, %c0_20] : memref<128x32xf32, #tpu.memory_space<vmem>>, vector<128x32xf32>
    tpu.vector_store %arg10[%c0_19, %c0_20], %18 {strides = array<i32>} : memref<128x32xf32, #tpu.memory_space<vmem>>, vector<128x32xf32>,
    return
  }
  func.func @transform_0(%arg0: i32) -> (i32, i32) {
    %c0_i32 = arith.constant 0 : i32
    %c0_i32_0 = arith.constant 0 : i32
    return %arg0, %c0_i32 : i32, i32
  }
  func.func @transform_1(%arg0: i32) -> (i32, i32) {
    %c0_i32 = arith.constant 0 : i32
    %c0_i32_0 = arith.constant 0 : i32
    %c0_i32_1 = arith.constant 0 : i32
    return %c0_i32, %c0_i32_0 : i32, i32
  }
  func.func @transform_2(%arg0: i32) -> (i32, i32) {
    %c0_i32 = arith.constant 0 : i32
    %c0_i32_0 = arith.constant 0 : i32
    %c0_i32_1 = arith.constant 0 : i32
    return %c0_i32, %c0_i32_0 : i32, i32
  }
  func.func @transform_3(%arg0: i32) -> (i32, i32) {
    %c0_i32 = arith.constant 0 : i32
    %c0_i32_0 = arith.constant 0 : i32
    %c0_i32_1 = arith.constant 0 : i32
    return %c0_i32, %c0_i32_0 : i32, i32
  }
  func.func @transform_4(%arg0: i32) -> (i32, i32) {
    %c0_i32 = arith.constant 0 : i32
    %c0_i32_0 = arith.constant 0 : i32
    %c0_i32_1 = arith.constant 0 : i32
    return %c0_i32, %c0_i32_0 : i32, i32
  }
  func.func @transform_5(%arg0: i32) -> (i32, i32) {
    %c0_i32 = arith.constant 0 : i32
    %c0_i32_0 = arith.constant 0 : i32
    %c0_i32_1 = arith.constant 0 : i32
    return %c0_i32, %c0_i32_0 : i32, i32
  }
  func.func @transform_6(%arg0: i32) -> (i32, i32) {
    %c0_i32 = arith.constant 0 : i32
    %c0_i32_0 = arith.constant 0 : i32
    %c0_i32_1 = arith.constant 0 : i32
    return %c0_i32, %c0_i32_0 : i32, i32
  }
  func.func @transform_7(%arg0: i32) -> (i32, i32) {
    %c0_i32 = arith.constant 0 : i32
    %c0_i32_0 = arith.constant 0 : i32
    return %arg0, %c0_i32 : i32, i32
  }
  func.func @transform_8(%arg0: i32) -> (i32, i32) {
    %c0_i32 = arith.constant 0 : i32
    %c0_i32_0 = arith.constant 0 : i32
    return %arg0, %c0_i32 : i32, i32
  }
  func.func @transform_9(%arg0: i32) -> (i32, i32) {
    %c0_i32 = arith.constant 0 : i32
    %c0_i32_0 = arith.constant 0 : i32
    return %arg0, %c0_i32 : i32, i32
  }
}

module attributes {stable_mosaic.version = 11 : i64} {
  func.func @_gru_rec_kernel(%arg0: i32, %arg1: i32, %arg2: memref<16x8x32xf32, #tpu.memory_space<vmem>>, %arg3: memref<16x8x32xf32, #tpu.memory_space<vmem>>, %arg4: memref<16x8x32xf32, #tpu.memory_space<vmem>>, %arg5: memref<32x32xbf16, #tpu.memory_space<vmem>>, %arg6: memref<32x32xbf16, #tpu.memory_space<vmem>>, %arg7: memref<32x32xbf16, #tpu.memory_space<vmem>>, %arg8: memref<1x32xf32, #tpu.memory_space<vmem>>, %arg9: memref<16x8x32xf32, #tpu.memory_space<vmem>>, %arg10: memref<8x32xf32, #tpu.memory_space<vmem>>) attributes {dimension_semantics = [#tpu.dimension_semantics<parallel>, #tpu.dimension_semantics<arbitrary>], iteration_bounds = array<i64: 1, 1>, scalar_prefetch = 0 : i64, scratch_operands = 1 : i64, tpu.core_type = #tpu.core_type<tc>, window_params = [{transform_indices = @transform_0, window_bounds = array<i64: 16, 8, 32>}, {transform_indices = @transform_1, window_bounds = array<i64: 16, 8, 32>}, {transform_indices = @transform_2, window_bounds = array<i64: 16, 8, 32>}, {pipeline_mode = #tpu.pipeline_mode<synchronous>, transform_indices = @transform_3, window_bounds = array<i64: 32, 32>}, {pipeline_mode = #tpu.pipeline_mode<synchronous>, transform_indices = @transform_4, window_bounds = array<i64: 32, 32>}, {pipeline_mode = #tpu.pipeline_mode<synchronous>, transform_indices = @transform_5, window_bounds = array<i64: 32, 32>}, {pipeline_mode = #tpu.pipeline_mode<synchronous>, transform_indices = @transform_6, window_bounds = array<i64: 1, 32>}, {transform_indices = @transform_7, window_bounds = array<i64: 16, 8, 32>}]} {
    %c0_i32 = arith.constant 0 : i32
    %0 = arith.cmpi eq, %arg1, %c0_i32 : i32
    %1 = arith.extui %0 : i1 to i32
    %c0_i32_0 = arith.constant 0 : i32
    %2 = arith.cmpi ne, %1, %c0_i32_0 : i32
    scf.if %2 {
      %cst_284 = arith.constant 0.000000e+00 : f32
      %569 = vector.broadcast %cst_284 : f32 to vector<8x32xf32>
      %c0_285 = arith.constant 0 : index
      %c0_286 = arith.constant 0 : index
      %570 = vector.load %arg10[%c0_285, %c0_286] : memref<8x32xf32, #tpu.memory_space<vmem>>, vector<8x32xf32>
      tpu.vector_store %arg10[%c0_285, %c0_286], %569 {strides = array<i32>} : memref<8x32xf32, #tpu.memory_space<vmem>>, vector<8x32xf32>,
    } else {
    }
    %c0 = arith.constant 0 : index
    %c0_1 = arith.constant 0 : index
    %3 = vector.load %arg5[%c0, %c0_1] : memref<32x32xbf16, #tpu.memory_space<vmem>>, vector<32x32xbf16>
    %c0_2 = arith.constant 0 : index
    %c0_3 = arith.constant 0 : index
    %4 = vector.load %arg6[%c0_2, %c0_3] : memref<32x32xbf16, #tpu.memory_space<vmem>>, vector<32x32xbf16>
    %c0_4 = arith.constant 0 : index
    %c0_5 = arith.constant 0 : index
    %5 = vector.load %arg7[%c0_4, %c0_5] : memref<32x32xbf16, #tpu.memory_space<vmem>>, vector<32x32xbf16>
    %c0_6 = arith.constant 0 : index
    %c0_7 = arith.constant 0 : index
    %6 = vector.load %arg8[%c0_6, %c0_7] : memref<1x32xf32, #tpu.memory_space<vmem>>, vector<1x32xf32>
    %c0_8 = arith.constant 0 : index
    %c0_9 = arith.constant 0 : index
    %7 = vector.load %arg10[%c0_8, %c0_9] : memref<8x32xf32, #tpu.memory_space<vmem>>, vector<8x32xf32>
    %8 = arith.truncf %7 : vector<8x32xf32> to vector<8x32xbf16>
    %cst = arith.constant dense<0.000000e+00> : vector<8x32xf32>
    %9 = tpu.matmul %8, %3, %cst {dimension_numbers = #tpu.dot_dimension_numbers<[1], [0], [0], [1], [0, 0, 1, 1], [], []>} : vector<8x32xbf16>, vector<32x32xbf16>, vector<8x32xf32> -> vector<8x32xf32>
    %cst_10 = arith.constant dense<0.000000e+00> : vector<8x32xf32>
    %10 = tpu.matmul %8, %4, %cst_10 {dimension_numbers = #tpu.dot_dimension_numbers<[1], [0], [0], [1], [0, 0, 1, 1], [], []>} : vector<8x32xbf16>, vector<32x32xbf16>, vector<8x32xf32> -> vector<8x32xf32>
    %cst_11 = arith.constant dense<0.000000e+00> : vector<8x32xf32>
    %11 = tpu.matmul %8, %5, %cst_11 {dimension_numbers = #tpu.dot_dimension_numbers<[1], [0], [0], [1], [0, 0, 1, 1], [], []>} : vector<8x32xbf16>, vector<32x32xbf16>, vector<8x32xf32> -> vector<8x32xf32>
    %c0_12 = arith.constant 0 : index
    %c0_13 = arith.constant 0 : index
    %c0_14 = arith.constant 0 : index
    %12 = vector.load %arg2[%c0_12, %c0_13, %c0_14] : memref<16x8x32xf32, #tpu.memory_space<vmem>>, vector<1x8x32xf32>
    %13 = vector.shape_cast %12 : vector<1x8x32xf32> to vector<8x32xf32>
    %14 = arith.addf %13, %9 : vector<8x32xf32>
    %15 = arith.negf %14 : vector<8x32xf32>
    %16 = math.exp %15 : vector<8x32xf32>
    %cst_15 = arith.constant 1.000000e+00 : f32
    %17 = vector.broadcast %cst_15 : f32 to vector<8x32xf32>
    %18 = arith.addf %17, %16 : vector<8x32xf32>
    %19 = arith.divf %17, %18 : vector<8x32xf32>
    %c0_16 = arith.constant 0 : index
    %c0_17 = arith.constant 0 : index
    %c0_18 = arith.constant 0 : index
    %20 = vector.load %arg3[%c0_16, %c0_17, %c0_18] : memref<16x8x32xf32, #tpu.memory_space<vmem>>, vector<1x8x32xf32>
    %21 = vector.shape_cast %20 : vector<1x8x32xf32> to vector<8x32xf32>
    %22 = arith.addf %21, %10 : vector<8x32xf32>
    %23 = arith.negf %22 : vector<8x32xf32>
    %24 = math.exp %23 : vector<8x32xf32>
    %cst_19 = arith.constant 1.000000e+00 : f32
    %25 = vector.broadcast %cst_19 : f32 to vector<8x32xf32>
    %26 = arith.addf %25, %24 : vector<8x32xf32>
    %27 = arith.divf %25, %26 : vector<8x32xf32>
    %c0_20 = arith.constant 0 : index
    %c0_21 = arith.constant 0 : index
    %c0_22 = arith.constant 0 : index
    %28 = vector.load %arg4[%c0_20, %c0_21, %c0_22] : memref<16x8x32xf32, #tpu.memory_space<vmem>>, vector<1x8x32xf32>
    %29 = vector.shape_cast %28 : vector<1x8x32xf32> to vector<8x32xf32>
    %30 = vector.broadcast %6 : vector<1x32xf32> to vector<8x32xf32>
    %31 = arith.addf %11, %30 : vector<8x32xf32>
    %32 = arith.mulf %19, %31 : vector<8x32xf32>
    %33 = arith.addf %29, %32 : vector<8x32xf32>
    %34 = math.tanh %33 : vector<8x32xf32>
    %cst_23 = arith.constant 1.000000e+00 : f32
    %35 = vector.broadcast %cst_23 : f32 to vector<8x32xf32>
    %36 = arith.subf %35, %27 : vector<8x32xf32>
    %37 = arith.mulf %36, %34 : vector<8x32xf32>
    %38 = arith.mulf %27, %7 : vector<8x32xf32>
    %39 = arith.addf %37, %38 : vector<8x32xf32>
    %c0_24 = arith.constant 0 : index
    %c0_25 = arith.constant 0 : index
    %c0_26 = arith.constant 0 : index
    %40 = vector.load %arg9[%c0_24, %c0_25, %c0_26] : memref<16x8x32xf32, #tpu.memory_space<vmem>>, vector<1x8x32xf32>
    %41 = vector.shape_cast %40 : vector<1x8x32xf32> to vector<8x32xf32>
    %42 = vector.shape_cast %39 : vector<8x32xf32> to vector<1x8x32xf32>
    tpu.vector_store %arg9[%c0_24, %c0_25, %c0_26], %42 {strides = array<i32>} : memref<16x8x32xf32, #tpu.memory_space<vmem>>, vector<1x8x32xf32>,
    %43 = arith.truncf %39 : vector<8x32xf32> to vector<8x32xbf16>
    %cst_27 = arith.constant dense<0.000000e+00> : vector<8x32xf32>
    %44 = tpu.matmul %43, %3, %cst_27 {dimension_numbers = #tpu.dot_dimension_numbers<[1], [0], [0], [1], [0, 0, 1, 1], [], []>} : vector<8x32xbf16>, vector<32x32xbf16>, vector<8x32xf32> -> vector<8x32xf32>
    %cst_28 = arith.constant dense<0.000000e+00> : vector<8x32xf32>
    %45 = tpu.matmul %43, %4, %cst_28 {dimension_numbers = #tpu.dot_dimension_numbers<[1], [0], [0], [1], [0, 0, 1, 1], [], []>} : vector<8x32xbf16>, vector<32x32xbf16>, vector<8x32xf32> -> vector<8x32xf32>
    %cst_29 = arith.constant dense<0.000000e+00> : vector<8x32xf32>
    %46 = tpu.matmul %43, %5, %cst_29 {dimension_numbers = #tpu.dot_dimension_numbers<[1], [0], [0], [1], [0, 0, 1, 1], [], []>} : vector<8x32xbf16>, vector<32x32xbf16>, vector<8x32xf32> -> vector<8x32xf32>
    %c1 = arith.constant 1 : index
    %c0_30 = arith.constant 0 : index
    %c0_31 = arith.constant 0 : index
    %47 = vector.load %arg2[%c1, %c0_30, %c0_31] : memref<16x8x32xf32, #tpu.memory_space<vmem>>, vector<1x8x32xf32>
    %48 = vector.shape_cast %47 : vector<1x8x32xf32> to vector<8x32xf32>
    %49 = arith.addf %48, %44 : vector<8x32xf32>
    %50 = arith.negf %49 : vector<8x32xf32>
    %51 = math.exp %50 : vector<8x32xf32>
    %cst_32 = arith.constant 1.000000e+00 : f32
    %52 = vector.broadcast %cst_32 : f32 to vector<8x32xf32>
    %53 = arith.addf %52, %51 : vector<8x32xf32>
    %54 = arith.divf %52, %53 : vector<8x32xf32>
    %c1_33 = arith.constant 1 : index
    %c0_34 = arith.constant 0 : index
    %c0_35 = arith.constant 0 : index
    %55 = vector.load %arg3[%c1_33, %c0_34, %c0_35] : memref<16x8x32xf32, #tpu.memory_space<vmem>>, vector<1x8x32xf32>
    %56 = vector.shape_cast %55 : vector<1x8x32xf32> to vector<8x32xf32>
    %57 = arith.addf %56, %45 : vector<8x32xf32>
    %58 = arith.negf %57 : vector<8x32xf32>
    %59 = math.exp %58 : vector<8x32xf32>
    %cst_36 = arith.constant 1.000000e+00 : f32
    %60 = vector.broadcast %cst_36 : f32 to vector<8x32xf32>
    %61 = arith.addf %60, %59 : vector<8x32xf32>
    %62 = arith.divf %60, %61 : vector<8x32xf32>
    %c1_37 = arith.constant 1 : index
    %c0_38 = arith.constant 0 : index
    %c0_39 = arith.constant 0 : index
    %63 = vector.load %arg4[%c1_37, %c0_38, %c0_39] : memref<16x8x32xf32, #tpu.memory_space<vmem>>, vector<1x8x32xf32>
    %64 = vector.shape_cast %63 : vector<1x8x32xf32> to vector<8x32xf32>
    %65 = vector.broadcast %6 : vector<1x32xf32> to vector<8x32xf32>
    %66 = arith.addf %46, %65 : vector<8x32xf32>
    %67 = arith.mulf %54, %66 : vector<8x32xf32>
    %68 = arith.addf %64, %67 : vector<8x32xf32>
    %69 = math.tanh %68 : vector<8x32xf32>
    %cst_40 = arith.constant 1.000000e+00 : f32
    %70 = vector.broadcast %cst_40 : f32 to vector<8x32xf32>
    %71 = arith.subf %70, %62 : vector<8x32xf32>
    %72 = arith.mulf %71, %69 : vector<8x32xf32>
    %73 = arith.mulf %62, %39 : vector<8x32xf32>
    %74 = arith.addf %72, %73 : vector<8x32xf32>
    %c1_41 = arith.constant 1 : index
    %c0_42 = arith.constant 0 : index
    %c0_43 = arith.constant 0 : index
    %75 = vector.load %arg9[%c1_41, %c0_42, %c0_43] : memref<16x8x32xf32, #tpu.memory_space<vmem>>, vector<1x8x32xf32>
    %76 = vector.shape_cast %75 : vector<1x8x32xf32> to vector<8x32xf32>
    %77 = vector.shape_cast %74 : vector<8x32xf32> to vector<1x8x32xf32>
    tpu.vector_store %arg9[%c1_41, %c0_42, %c0_43], %77 {strides = array<i32>} : memref<16x8x32xf32, #tpu.memory_space<vmem>>, vector<1x8x32xf32>,
    %78 = arith.truncf %74 : vector<8x32xf32> to vector<8x32xbf16>
    %cst_44 = arith.constant dense<0.000000e+00> : vector<8x32xf32>
    %79 = tpu.matmul %78, %3, %cst_44 {dimension_numbers = #tpu.dot_dimension_numbers<[1], [0], [0], [1], [0, 0, 1, 1], [], []>} : vector<8x32xbf16>, vector<32x32xbf16>, vector<8x32xf32> -> vector<8x32xf32>
    %cst_45 = arith.constant dense<0.000000e+00> : vector<8x32xf32>
    %80 = tpu.matmul %78, %4, %cst_45 {dimension_numbers = #tpu.dot_dimension_numbers<[1], [0], [0], [1], [0, 0, 1, 1], [], []>} : vector<8x32xbf16>, vector<32x32xbf16>, vector<8x32xf32> -> vector<8x32xf32>
    %cst_46 = arith.constant dense<0.000000e+00> : vector<8x32xf32>
    %81 = tpu.matmul %78, %5, %cst_46 {dimension_numbers = #tpu.dot_dimension_numbers<[1], [0], [0], [1], [0, 0, 1, 1], [], []>} : vector<8x32xbf16>, vector<32x32xbf16>, vector<8x32xf32> -> vector<8x32xf32>
    %c2 = arith.constant 2 : index
    %c0_47 = arith.constant 0 : index
    %c0_48 = arith.constant 0 : index
    %82 = vector.load %arg2[%c2, %c0_47, %c0_48] : memref<16x8x32xf32, #tpu.memory_space<vmem>>, vector<1x8x32xf32>
    %83 = vector.shape_cast %82 : vector<1x8x32xf32> to vector<8x32xf32>
    %84 = arith.addf %83, %79 : vector<8x32xf32>
    %85 = arith.negf %84 : vector<8x32xf32>
    %86 = math.exp %85 : vector<8x32xf32>
    %cst_49 = arith.constant 1.000000e+00 : f32
    %87 = vector.broadcast %cst_49 : f32 to vector<8x32xf32>
    %88 = arith.addf %87, %86 : vector<8x32xf32>
    %89 = arith.divf %87, %88 : vector<8x32xf32>
    %c2_50 = arith.constant 2 : index
    %c0_51 = arith.constant 0 : index
    %c0_52 = arith.constant 0 : index
    %90 = vector.load %arg3[%c2_50, %c0_51, %c0_52] : memref<16x8x32xf32, #tpu.memory_space<vmem>>, vector<1x8x32xf32>
    %91 = vector.shape_cast %90 : vector<1x8x32xf32> to vector<8x32xf32>
    %92 = arith.addf %91, %80 : vector<8x32xf32>
    %93 = arith.negf %92 : vector<8x32xf32>
    %94 = math.exp %93 : vector<8x32xf32>
    %cst_53 = arith.constant 1.000000e+00 : f32
    %95 = vector.broadcast %cst_53 : f32 to vector<8x32xf32>
    %96 = arith.addf %95, %94 : vector<8x32xf32>
    %97 = arith.divf %95, %96 : vector<8x32xf32>
    %c2_54 = arith.constant 2 : index
    %c0_55 = arith.constant 0 : index
    %c0_56 = arith.constant 0 : index
    %98 = vector.load %arg4[%c2_54, %c0_55, %c0_56] : memref<16x8x32xf32, #tpu.memory_space<vmem>>, vector<1x8x32xf32>
    %99 = vector.shape_cast %98 : vector<1x8x32xf32> to vector<8x32xf32>
    %100 = vector.broadcast %6 : vector<1x32xf32> to vector<8x32xf32>
    %101 = arith.addf %81, %100 : vector<8x32xf32>
    %102 = arith.mulf %89, %101 : vector<8x32xf32>
    %103 = arith.addf %99, %102 : vector<8x32xf32>
    %104 = math.tanh %103 : vector<8x32xf32>
    %cst_57 = arith.constant 1.000000e+00 : f32
    %105 = vector.broadcast %cst_57 : f32 to vector<8x32xf32>
    %106 = arith.subf %105, %97 : vector<8x32xf32>
    %107 = arith.mulf %106, %104 : vector<8x32xf32>
    %108 = arith.mulf %97, %74 : vector<8x32xf32>
    %109 = arith.addf %107, %108 : vector<8x32xf32>
    %c2_58 = arith.constant 2 : index
    %c0_59 = arith.constant 0 : index
    %c0_60 = arith.constant 0 : index
    %110 = vector.load %arg9[%c2_58, %c0_59, %c0_60] : memref<16x8x32xf32, #tpu.memory_space<vmem>>, vector<1x8x32xf32>
    %111 = vector.shape_cast %110 : vector<1x8x32xf32> to vector<8x32xf32>
    %112 = vector.shape_cast %109 : vector<8x32xf32> to vector<1x8x32xf32>
    tpu.vector_store %arg9[%c2_58, %c0_59, %c0_60], %112 {strides = array<i32>} : memref<16x8x32xf32, #tpu.memory_space<vmem>>, vector<1x8x32xf32>,
    %113 = arith.truncf %109 : vector<8x32xf32> to vector<8x32xbf16>
    %cst_61 = arith.constant dense<0.000000e+00> : vector<8x32xf32>
    %114 = tpu.matmul %113, %3, %cst_61 {dimension_numbers = #tpu.dot_dimension_numbers<[1], [0], [0], [1], [0, 0, 1, 1], [], []>} : vector<8x32xbf16>, vector<32x32xbf16>, vector<8x32xf32> -> vector<8x32xf32>
    %cst_62 = arith.constant dense<0.000000e+00> : vector<8x32xf32>
    %115 = tpu.matmul %113, %4, %cst_62 {dimension_numbers = #tpu.dot_dimension_numbers<[1], [0], [0], [1], [0, 0, 1, 1], [], []>} : vector<8x32xbf16>, vector<32x32xbf16>, vector<8x32xf32> -> vector<8x32xf32>
    %cst_63 = arith.constant dense<0.000000e+00> : vector<8x32xf32>
    %116 = tpu.matmul %113, %5, %cst_63 {dimension_numbers = #tpu.dot_dimension_numbers<[1], [0], [0], [1], [0, 0, 1, 1], [], []>} : vector<8x32xbf16>, vector<32x32xbf16>, vector<8x32xf32> -> vector<8x32xf32>
    %c3 = arith.constant 3 : index
    %c0_64 = arith.constant 0 : index
    %c0_65 = arith.constant 0 : index
    %117 = vector.load %arg2[%c3, %c0_64, %c0_65] : memref<16x8x32xf32, #tpu.memory_space<vmem>>, vector<1x8x32xf32>
    %118 = vector.shape_cast %117 : vector<1x8x32xf32> to vector<8x32xf32>
    %119 = arith.addf %118, %114 : vector<8x32xf32>
    %120 = arith.negf %119 : vector<8x32xf32>
    %121 = math.exp %120 : vector<8x32xf32>
    %cst_66 = arith.constant 1.000000e+00 : f32
    %122 = vector.broadcast %cst_66 : f32 to vector<8x32xf32>
    %123 = arith.addf %122, %121 : vector<8x32xf32>
    %124 = arith.divf %122, %123 : vector<8x32xf32>
    %c3_67 = arith.constant 3 : index
    %c0_68 = arith.constant 0 : index
    %c0_69 = arith.constant 0 : index
    %125 = vector.load %arg3[%c3_67, %c0_68, %c0_69] : memref<16x8x32xf32, #tpu.memory_space<vmem>>, vector<1x8x32xf32>
    %126 = vector.shape_cast %125 : vector<1x8x32xf32> to vector<8x32xf32>
    %127 = arith.addf %126, %115 : vector<8x32xf32>
    %128 = arith.negf %127 : vector<8x32xf32>
    %129 = math.exp %128 : vector<8x32xf32>
    %cst_70 = arith.constant 1.000000e+00 : f32
    %130 = vector.broadcast %cst_70 : f32 to vector<8x32xf32>
    %131 = arith.addf %130, %129 : vector<8x32xf32>
    %132 = arith.divf %130, %131 : vector<8x32xf32>
    %c3_71 = arith.constant 3 : index
    %c0_72 = arith.constant 0 : index
    %c0_73 = arith.constant 0 : index
    %133 = vector.load %arg4[%c3_71, %c0_72, %c0_73] : memref<16x8x32xf32, #tpu.memory_space<vmem>>, vector<1x8x32xf32>
    %134 = vector.shape_cast %133 : vector<1x8x32xf32> to vector<8x32xf32>
    %135 = vector.broadcast %6 : vector<1x32xf32> to vector<8x32xf32>
    %136 = arith.addf %116, %135 : vector<8x32xf32>
    %137 = arith.mulf %124, %136 : vector<8x32xf32>
    %138 = arith.addf %134, %137 : vector<8x32xf32>
    %139 = math.tanh %138 : vector<8x32xf32>
    %cst_74 = arith.constant 1.000000e+00 : f32
    %140 = vector.broadcast %cst_74 : f32 to vector<8x32xf32>
    %141 = arith.subf %140, %132 : vector<8x32xf32>
    %142 = arith.mulf %141, %139 : vector<8x32xf32>
    %143 = arith.mulf %132, %109 : vector<8x32xf32>
    %144 = arith.addf %142, %143 : vector<8x32xf32>
    %c3_75 = arith.constant 3 : index
    %c0_76 = arith.constant 0 : index
    %c0_77 = arith.constant 0 : index
    %145 = vector.load %arg9[%c3_75, %c0_76, %c0_77] : memref<16x8x32xf32, #tpu.memory_space<vmem>>, vector<1x8x32xf32>
    %146 = vector.shape_cast %145 : vector<1x8x32xf32> to vector<8x32xf32>
    %147 = vector.shape_cast %144 : vector<8x32xf32> to vector<1x8x32xf32>
    tpu.vector_store %arg9[%c3_75, %c0_76, %c0_77], %147 {strides = array<i32>} : memref<16x8x32xf32, #tpu.memory_space<vmem>>, vector<1x8x32xf32>,
    %148 = arith.truncf %144 : vector<8x32xf32> to vector<8x32xbf16>
    %cst_78 = arith.constant dense<0.000000e+00> : vector<8x32xf32>
    %149 = tpu.matmul %148, %3, %cst_78 {dimension_numbers = #tpu.dot_dimension_numbers<[1], [0], [0], [1], [0, 0, 1, 1], [], []>} : vector<8x32xbf16>, vector<32x32xbf16>, vector<8x32xf32> -> vector<8x32xf32>
    %cst_79 = arith.constant dense<0.000000e+00> : vector<8x32xf32>
    %150 = tpu.matmul %148, %4, %cst_79 {dimension_numbers = #tpu.dot_dimension_numbers<[1], [0], [0], [1], [0, 0, 1, 1], [], []>} : vector<8x32xbf16>, vector<32x32xbf16>, vector<8x32xf32> -> vector<8x32xf32>
    %cst_80 = arith.constant dense<0.000000e+00> : vector<8x32xf32>
    %151 = tpu.matmul %148, %5, %cst_80 {dimension_numbers = #tpu.dot_dimension_numbers<[1], [0], [0], [1], [0, 0, 1, 1], [], []>} : vector<8x32xbf16>, vector<32x32xbf16>, vector<8x32xf32> -> vector<8x32xf32>
    %c4 = arith.constant 4 : index
    %c0_81 = arith.constant 0 : index
    %c0_82 = arith.constant 0 : index
    %152 = vector.load %arg2[%c4, %c0_81, %c0_82] : memref<16x8x32xf32, #tpu.memory_space<vmem>>, vector<1x8x32xf32>
    %153 = vector.shape_cast %152 : vector<1x8x32xf32> to vector<8x32xf32>
    %154 = arith.addf %153, %149 : vector<8x32xf32>
    %155 = arith.negf %154 : vector<8x32xf32>
    %156 = math.exp %155 : vector<8x32xf32>
    %cst_83 = arith.constant 1.000000e+00 : f32
    %157 = vector.broadcast %cst_83 : f32 to vector<8x32xf32>
    %158 = arith.addf %157, %156 : vector<8x32xf32>
    %159 = arith.divf %157, %158 : vector<8x32xf32>
    %c4_84 = arith.constant 4 : index
    %c0_85 = arith.constant 0 : index
    %c0_86 = arith.constant 0 : index
    %160 = vector.load %arg3[%c4_84, %c0_85, %c0_86] : memref<16x8x32xf32, #tpu.memory_space<vmem>>, vector<1x8x32xf32>
    %161 = vector.shape_cast %160 : vector<1x8x32xf32> to vector<8x32xf32>
    %162 = arith.addf %161, %150 : vector<8x32xf32>
    %163 = arith.negf %162 : vector<8x32xf32>
    %164 = math.exp %163 : vector<8x32xf32>
    %cst_87 = arith.constant 1.000000e+00 : f32
    %165 = vector.broadcast %cst_87 : f32 to vector<8x32xf32>
    %166 = arith.addf %165, %164 : vector<8x32xf32>
    %167 = arith.divf %165, %166 : vector<8x32xf32>
    %c4_88 = arith.constant 4 : index
    %c0_89 = arith.constant 0 : index
    %c0_90 = arith.constant 0 : index
    %168 = vector.load %arg4[%c4_88, %c0_89, %c0_90] : memref<16x8x32xf32, #tpu.memory_space<vmem>>, vector<1x8x32xf32>
    %169 = vector.shape_cast %168 : vector<1x8x32xf32> to vector<8x32xf32>
    %170 = vector.broadcast %6 : vector<1x32xf32> to vector<8x32xf32>
    %171 = arith.addf %151, %170 : vector<8x32xf32>
    %172 = arith.mulf %159, %171 : vector<8x32xf32>
    %173 = arith.addf %169, %172 : vector<8x32xf32>
    %174 = math.tanh %173 : vector<8x32xf32>
    %cst_91 = arith.constant 1.000000e+00 : f32
    %175 = vector.broadcast %cst_91 : f32 to vector<8x32xf32>
    %176 = arith.subf %175, %167 : vector<8x32xf32>
    %177 = arith.mulf %176, %174 : vector<8x32xf32>
    %178 = arith.mulf %167, %144 : vector<8x32xf32>
    %179 = arith.addf %177, %178 : vector<8x32xf32>
    %c4_92 = arith.constant 4 : index
    %c0_93 = arith.constant 0 : index
    %c0_94 = arith.constant 0 : index
    %180 = vector.load %arg9[%c4_92, %c0_93, %c0_94] : memref<16x8x32xf32, #tpu.memory_space<vmem>>, vector<1x8x32xf32>
    %181 = vector.shape_cast %180 : vector<1x8x32xf32> to vector<8x32xf32>
    %182 = vector.shape_cast %179 : vector<8x32xf32> to vector<1x8x32xf32>
    tpu.vector_store %arg9[%c4_92, %c0_93, %c0_94], %182 {strides = array<i32>} : memref<16x8x32xf32, #tpu.memory_space<vmem>>, vector<1x8x32xf32>,
    %183 = arith.truncf %179 : vector<8x32xf32> to vector<8x32xbf16>
    %cst_95 = arith.constant dense<0.000000e+00> : vector<8x32xf32>
    %184 = tpu.matmul %183, %3, %cst_95 {dimension_numbers = #tpu.dot_dimension_numbers<[1], [0], [0], [1], [0, 0, 1, 1], [], []>} : vector<8x32xbf16>, vector<32x32xbf16>, vector<8x32xf32> -> vector<8x32xf32>
    %cst_96 = arith.constant dense<0.000000e+00> : vector<8x32xf32>
    %185 = tpu.matmul %183, %4, %cst_96 {dimension_numbers = #tpu.dot_dimension_numbers<[1], [0], [0], [1], [0, 0, 1, 1], [], []>} : vector<8x32xbf16>, vector<32x32xbf16>, vector<8x32xf32> -> vector<8x32xf32>
    %cst_97 = arith.constant dense<0.000000e+00> : vector<8x32xf32>
    %186 = tpu.matmul %183, %5, %cst_97 {dimension_numbers = #tpu.dot_dimension_numbers<[1], [0], [0], [1], [0, 0, 1, 1], [], []>} : vector<8x32xbf16>, vector<32x32xbf16>, vector<8x32xf32> -> vector<8x32xf32>
    %c5 = arith.constant 5 : index
    %c0_98 = arith.constant 0 : index
    %c0_99 = arith.constant 0 : index
    %187 = vector.load %arg2[%c5, %c0_98, %c0_99] : memref<16x8x32xf32, #tpu.memory_space<vmem>>, vector<1x8x32xf32>
    %188 = vector.shape_cast %187 : vector<1x8x32xf32> to vector<8x32xf32>
    %189 = arith.addf %188, %184 : vector<8x32xf32>
    %190 = arith.negf %189 : vector<8x32xf32>
    %191 = math.exp %190 : vector<8x32xf32>
    %cst_100 = arith.constant 1.000000e+00 : f32
    %192 = vector.broadcast %cst_100 : f32 to vector<8x32xf32>
    %193 = arith.addf %192, %191 : vector<8x32xf32>
    %194 = arith.divf %192, %193 : vector<8x32xf32>
    %c5_101 = arith.constant 5 : index
    %c0_102 = arith.constant 0 : index
    %c0_103 = arith.constant 0 : index
    %195 = vector.load %arg3[%c5_101, %c0_102, %c0_103] : memref<16x8x32xf32, #tpu.memory_space<vmem>>, vector<1x8x32xf32>
    %196 = vector.shape_cast %195 : vector<1x8x32xf32> to vector<8x32xf32>
    %197 = arith.addf %196, %185 : vector<8x32xf32>
    %198 = arith.negf %197 : vector<8x32xf32>
    %199 = math.exp %198 : vector<8x32xf32>
    %cst_104 = arith.constant 1.000000e+00 : f32
    %200 = vector.broadcast %cst_104 : f32 to vector<8x32xf32>
    %201 = arith.addf %200, %199 : vector<8x32xf32>
    %202 = arith.divf %200, %201 : vector<8x32xf32>
    %c5_105 = arith.constant 5 : index
    %c0_106 = arith.constant 0 : index
    %c0_107 = arith.constant 0 : index
    %203 = vector.load %arg4[%c5_105, %c0_106, %c0_107] : memref<16x8x32xf32, #tpu.memory_space<vmem>>, vector<1x8x32xf32>
    %204 = vector.shape_cast %203 : vector<1x8x32xf32> to vector<8x32xf32>
    %205 = vector.broadcast %6 : vector<1x32xf32> to vector<8x32xf32>
    %206 = arith.addf %186, %205 : vector<8x32xf32>
    %207 = arith.mulf %194, %206 : vector<8x32xf32>
    %208 = arith.addf %204, %207 : vector<8x32xf32>
    %209 = math.tanh %208 : vector<8x32xf32>
    %cst_108 = arith.constant 1.000000e+00 : f32
    %210 = vector.broadcast %cst_108 : f32 to vector<8x32xf32>
    %211 = arith.subf %210, %202 : vector<8x32xf32>
    %212 = arith.mulf %211, %209 : vector<8x32xf32>
    %213 = arith.mulf %202, %179 : vector<8x32xf32>
    %214 = arith.addf %212, %213 : vector<8x32xf32>
    %c5_109 = arith.constant 5 : index
    %c0_110 = arith.constant 0 : index
    %c0_111 = arith.constant 0 : index
    %215 = vector.load %arg9[%c5_109, %c0_110, %c0_111] : memref<16x8x32xf32, #tpu.memory_space<vmem>>, vector<1x8x32xf32>
    %216 = vector.shape_cast %215 : vector<1x8x32xf32> to vector<8x32xf32>
    %217 = vector.shape_cast %214 : vector<8x32xf32> to vector<1x8x32xf32>
    tpu.vector_store %arg9[%c5_109, %c0_110, %c0_111], %217 {strides = array<i32>} : memref<16x8x32xf32, #tpu.memory_space<vmem>>, vector<1x8x32xf32>,
    %218 = arith.truncf %214 : vector<8x32xf32> to vector<8x32xbf16>
    %cst_112 = arith.constant dense<0.000000e+00> : vector<8x32xf32>
    %219 = tpu.matmul %218, %3, %cst_112 {dimension_numbers = #tpu.dot_dimension_numbers<[1], [0], [0], [1], [0, 0, 1, 1], [], []>} : vector<8x32xbf16>, vector<32x32xbf16>, vector<8x32xf32> -> vector<8x32xf32>
    %cst_113 = arith.constant dense<0.000000e+00> : vector<8x32xf32>
    %220 = tpu.matmul %218, %4, %cst_113 {dimension_numbers = #tpu.dot_dimension_numbers<[1], [0], [0], [1], [0, 0, 1, 1], [], []>} : vector<8x32xbf16>, vector<32x32xbf16>, vector<8x32xf32> -> vector<8x32xf32>
    %cst_114 = arith.constant dense<0.000000e+00> : vector<8x32xf32>
    %221 = tpu.matmul %218, %5, %cst_114 {dimension_numbers = #tpu.dot_dimension_numbers<[1], [0], [0], [1], [0, 0, 1, 1], [], []>} : vector<8x32xbf16>, vector<32x32xbf16>, vector<8x32xf32> -> vector<8x32xf32>
    %c6 = arith.constant 6 : index
    %c0_115 = arith.constant 0 : index
    %c0_116 = arith.constant 0 : index
    %222 = vector.load %arg2[%c6, %c0_115, %c0_116] : memref<16x8x32xf32, #tpu.memory_space<vmem>>, vector<1x8x32xf32>
    %223 = vector.shape_cast %222 : vector<1x8x32xf32> to vector<8x32xf32>
    %224 = arith.addf %223, %219 : vector<8x32xf32>
    %225 = arith.negf %224 : vector<8x32xf32>
    %226 = math.exp %225 : vector<8x32xf32>
    %cst_117 = arith.constant 1.000000e+00 : f32
    %227 = vector.broadcast %cst_117 : f32 to vector<8x32xf32>
    %228 = arith.addf %227, %226 : vector<8x32xf32>
    %229 = arith.divf %227, %228 : vector<8x32xf32>
    %c6_118 = arith.constant 6 : index
    %c0_119 = arith.constant 0 : index
    %c0_120 = arith.constant 0 : index
    %230 = vector.load %arg3[%c6_118, %c0_119, %c0_120] : memref<16x8x32xf32, #tpu.memory_space<vmem>>, vector<1x8x32xf32>
    %231 = vector.shape_cast %230 : vector<1x8x32xf32> to vector<8x32xf32>
    %232 = arith.addf %231, %220 : vector<8x32xf32>
    %233 = arith.negf %232 : vector<8x32xf32>
    %234 = math.exp %233 : vector<8x32xf32>
    %cst_121 = arith.constant 1.000000e+00 : f32
    %235 = vector.broadcast %cst_121 : f32 to vector<8x32xf32>
    %236 = arith.addf %235, %234 : vector<8x32xf32>
    %237 = arith.divf %235, %236 : vector<8x32xf32>
    %c6_122 = arith.constant 6 : index
    %c0_123 = arith.constant 0 : index
    %c0_124 = arith.constant 0 : index
    %238 = vector.load %arg4[%c6_122, %c0_123, %c0_124] : memref<16x8x32xf32, #tpu.memory_space<vmem>>, vector<1x8x32xf32>
    %239 = vector.shape_cast %238 : vector<1x8x32xf32> to vector<8x32xf32>
    %240 = vector.broadcast %6 : vector<1x32xf32> to vector<8x32xf32>
    %241 = arith.addf %221, %240 : vector<8x32xf32>
    %242 = arith.mulf %229, %241 : vector<8x32xf32>
    %243 = arith.addf %239, %242 : vector<8x32xf32>
    %244 = math.tanh %243 : vector<8x32xf32>
    %cst_125 = arith.constant 1.000000e+00 : f32
    %245 = vector.broadcast %cst_125 : f32 to vector<8x32xf32>
    %246 = arith.subf %245, %237 : vector<8x32xf32>
    %247 = arith.mulf %246, %244 : vector<8x32xf32>
    %248 = arith.mulf %237, %214 : vector<8x32xf32>
    %249 = arith.addf %247, %248 : vector<8x32xf32>
    %c6_126 = arith.constant 6 : index
    %c0_127 = arith.constant 0 : index
    %c0_128 = arith.constant 0 : index
    %250 = vector.load %arg9[%c6_126, %c0_127, %c0_128] : memref<16x8x32xf32, #tpu.memory_space<vmem>>, vector<1x8x32xf32>
    %251 = vector.shape_cast %250 : vector<1x8x32xf32> to vector<8x32xf32>
    %252 = vector.shape_cast %249 : vector<8x32xf32> to vector<1x8x32xf32>
    tpu.vector_store %arg9[%c6_126, %c0_127, %c0_128], %252 {strides = array<i32>} : memref<16x8x32xf32, #tpu.memory_space<vmem>>, vector<1x8x32xf32>,
    %253 = arith.truncf %249 : vector<8x32xf32> to vector<8x32xbf16>
    %cst_129 = arith.constant dense<0.000000e+00> : vector<8x32xf32>
    %254 = tpu.matmul %253, %3, %cst_129 {dimension_numbers = #tpu.dot_dimension_numbers<[1], [0], [0], [1], [0, 0, 1, 1], [], []>} : vector<8x32xbf16>, vector<32x32xbf16>, vector<8x32xf32> -> vector<8x32xf32>
    %cst_130 = arith.constant dense<0.000000e+00> : vector<8x32xf32>
    %255 = tpu.matmul %253, %4, %cst_130 {dimension_numbers = #tpu.dot_dimension_numbers<[1], [0], [0], [1], [0, 0, 1, 1], [], []>} : vector<8x32xbf16>, vector<32x32xbf16>, vector<8x32xf32> -> vector<8x32xf32>
    %cst_131 = arith.constant dense<0.000000e+00> : vector<8x32xf32>
    %256 = tpu.matmul %253, %5, %cst_131 {dimension_numbers = #tpu.dot_dimension_numbers<[1], [0], [0], [1], [0, 0, 1, 1], [], []>} : vector<8x32xbf16>, vector<32x32xbf16>, vector<8x32xf32> -> vector<8x32xf32>
    %c7 = arith.constant 7 : index
    %c0_132 = arith.constant 0 : index
    %c0_133 = arith.constant 0 : index
    %257 = vector.load %arg2[%c7, %c0_132, %c0_133] : memref<16x8x32xf32, #tpu.memory_space<vmem>>, vector<1x8x32xf32>
    %258 = vector.shape_cast %257 : vector<1x8x32xf32> to vector<8x32xf32>
    %259 = arith.addf %258, %254 : vector<8x32xf32>
    %260 = arith.negf %259 : vector<8x32xf32>
    %261 = math.exp %260 : vector<8x32xf32>
    %cst_134 = arith.constant 1.000000e+00 : f32
    %262 = vector.broadcast %cst_134 : f32 to vector<8x32xf32>
    %263 = arith.addf %262, %261 : vector<8x32xf32>
    %264 = arith.divf %262, %263 : vector<8x32xf32>
    %c7_135 = arith.constant 7 : index
    %c0_136 = arith.constant 0 : index
    %c0_137 = arith.constant 0 : index
    %265 = vector.load %arg3[%c7_135, %c0_136, %c0_137] : memref<16x8x32xf32, #tpu.memory_space<vmem>>, vector<1x8x32xf32>
    %266 = vector.shape_cast %265 : vector<1x8x32xf32> to vector<8x32xf32>
    %267 = arith.addf %266, %255 : vector<8x32xf32>
    %268 = arith.negf %267 : vector<8x32xf32>
    %269 = math.exp %268 : vector<8x32xf32>
    %cst_138 = arith.constant 1.000000e+00 : f32
    %270 = vector.broadcast %cst_138 : f32 to vector<8x32xf32>
    %271 = arith.addf %270, %269 : vector<8x32xf32>
    %272 = arith.divf %270, %271 : vector<8x32xf32>
    %c7_139 = arith.constant 7 : index
    %c0_140 = arith.constant 0 : index
    %c0_141 = arith.constant 0 : index
    %273 = vector.load %arg4[%c7_139, %c0_140, %c0_141] : memref<16x8x32xf32, #tpu.memory_space<vmem>>, vector<1x8x32xf32>
    %274 = vector.shape_cast %273 : vector<1x8x32xf32> to vector<8x32xf32>
    %275 = vector.broadcast %6 : vector<1x32xf32> to vector<8x32xf32>
    %276 = arith.addf %256, %275 : vector<8x32xf32>
    %277 = arith.mulf %264, %276 : vector<8x32xf32>
    %278 = arith.addf %274, %277 : vector<8x32xf32>
    %279 = math.tanh %278 : vector<8x32xf32>
    %cst_142 = arith.constant 1.000000e+00 : f32
    %280 = vector.broadcast %cst_142 : f32 to vector<8x32xf32>
    %281 = arith.subf %280, %272 : vector<8x32xf32>
    %282 = arith.mulf %281, %279 : vector<8x32xf32>
    %283 = arith.mulf %272, %249 : vector<8x32xf32>
    %284 = arith.addf %282, %283 : vector<8x32xf32>
    %c7_143 = arith.constant 7 : index
    %c0_144 = arith.constant 0 : index
    %c0_145 = arith.constant 0 : index
    %285 = vector.load %arg9[%c7_143, %c0_144, %c0_145] : memref<16x8x32xf32, #tpu.memory_space<vmem>>, vector<1x8x32xf32>
    %286 = vector.shape_cast %285 : vector<1x8x32xf32> to vector<8x32xf32>
    %287 = vector.shape_cast %284 : vector<8x32xf32> to vector<1x8x32xf32>
    tpu.vector_store %arg9[%c7_143, %c0_144, %c0_145], %287 {strides = array<i32>} : memref<16x8x32xf32, #tpu.memory_space<vmem>>, vector<1x8x32xf32>,
    %288 = arith.truncf %284 : vector<8x32xf32> to vector<8x32xbf16>
    %cst_146 = arith.constant dense<0.000000e+00> : vector<8x32xf32>
    %289 = tpu.matmul %288, %3, %cst_146 {dimension_numbers = #tpu.dot_dimension_numbers<[1], [0], [0], [1], [0, 0, 1, 1], [], []>} : vector<8x32xbf16>, vector<32x32xbf16>, vector<8x32xf32> -> vector<8x32xf32>
    %cst_147 = arith.constant dense<0.000000e+00> : vector<8x32xf32>
    %290 = tpu.matmul %288, %4, %cst_147 {dimension_numbers = #tpu.dot_dimension_numbers<[1], [0], [0], [1], [0, 0, 1, 1], [], []>} : vector<8x32xbf16>, vector<32x32xbf16>, vector<8x32xf32> -> vector<8x32xf32>
    %cst_148 = arith.constant dense<0.000000e+00> : vector<8x32xf32>
    %291 = tpu.matmul %288, %5, %cst_148 {dimension_numbers = #tpu.dot_dimension_numbers<[1], [0], [0], [1], [0, 0, 1, 1], [], []>} : vector<8x32xbf16>, vector<32x32xbf16>, vector<8x32xf32> -> vector<8x32xf32>
    %c8 = arith.constant 8 : index
    %c0_149 = arith.constant 0 : index
    %c0_150 = arith.constant 0 : index
    %292 = vector.load %arg2[%c8, %c0_149, %c0_150] : memref<16x8x32xf32, #tpu.memory_space<vmem>>, vector<1x8x32xf32>
    %293 = vector.shape_cast %292 : vector<1x8x32xf32> to vector<8x32xf32>
    %294 = arith.addf %293, %289 : vector<8x32xf32>
    %295 = arith.negf %294 : vector<8x32xf32>
    %296 = math.exp %295 : vector<8x32xf32>
    %cst_151 = arith.constant 1.000000e+00 : f32
    %297 = vector.broadcast %cst_151 : f32 to vector<8x32xf32>
    %298 = arith.addf %297, %296 : vector<8x32xf32>
    %299 = arith.divf %297, %298 : vector<8x32xf32>
    %c8_152 = arith.constant 8 : index
    %c0_153 = arith.constant 0 : index
    %c0_154 = arith.constant 0 : index
    %300 = vector.load %arg3[%c8_152, %c0_153, %c0_154] : memref<16x8x32xf32, #tpu.memory_space<vmem>>, vector<1x8x32xf32>
    %301 = vector.shape_cast %300 : vector<1x8x32xf32> to vector<8x32xf32>
    %302 = arith.addf %301, %290 : vector<8x32xf32>
    %303 = arith.negf %302 : vector<8x32xf32>
    %304 = math.exp %303 : vector<8x32xf32>
    %cst_155 = arith.constant 1.000000e+00 : f32
    %305 = vector.broadcast %cst_155 : f32 to vector<8x32xf32>
    %306 = arith.addf %305, %304 : vector<8x32xf32>
    %307 = arith.divf %305, %306 : vector<8x32xf32>
    %c8_156 = arith.constant 8 : index
    %c0_157 = arith.constant 0 : index
    %c0_158 = arith.constant 0 : index
    %308 = vector.load %arg4[%c8_156, %c0_157, %c0_158] : memref<16x8x32xf32, #tpu.memory_space<vmem>>, vector<1x8x32xf32>
    %309 = vector.shape_cast %308 : vector<1x8x32xf32> to vector<8x32xf32>
    %310 = vector.broadcast %6 : vector<1x32xf32> to vector<8x32xf32>
    %311 = arith.addf %291, %310 : vector<8x32xf32>
    %312 = arith.mulf %299, %311 : vector<8x32xf32>
    %313 = arith.addf %309, %312 : vector<8x32xf32>
    %314 = math.tanh %313 : vector<8x32xf32>
    %cst_159 = arith.constant 1.000000e+00 : f32
    %315 = vector.broadcast %cst_159 : f32 to vector<8x32xf32>
    %316 = arith.subf %315, %307 : vector<8x32xf32>
    %317 = arith.mulf %316, %314 : vector<8x32xf32>
    %318 = arith.mulf %307, %284 : vector<8x32xf32>
    %319 = arith.addf %317, %318 : vector<8x32xf32>
    %c8_160 = arith.constant 8 : index
    %c0_161 = arith.constant 0 : index
    %c0_162 = arith.constant 0 : index
    %320 = vector.load %arg9[%c8_160, %c0_161, %c0_162] : memref<16x8x32xf32, #tpu.memory_space<vmem>>, vector<1x8x32xf32>
    %321 = vector.shape_cast %320 : vector<1x8x32xf32> to vector<8x32xf32>
    %322 = vector.shape_cast %319 : vector<8x32xf32> to vector<1x8x32xf32>
    tpu.vector_store %arg9[%c8_160, %c0_161, %c0_162], %322 {strides = array<i32>} : memref<16x8x32xf32, #tpu.memory_space<vmem>>, vector<1x8x32xf32>,
    %323 = arith.truncf %319 : vector<8x32xf32> to vector<8x32xbf16>
    %cst_163 = arith.constant dense<0.000000e+00> : vector<8x32xf32>
    %324 = tpu.matmul %323, %3, %cst_163 {dimension_numbers = #tpu.dot_dimension_numbers<[1], [0], [0], [1], [0, 0, 1, 1], [], []>} : vector<8x32xbf16>, vector<32x32xbf16>, vector<8x32xf32> -> vector<8x32xf32>
    %cst_164 = arith.constant dense<0.000000e+00> : vector<8x32xf32>
    %325 = tpu.matmul %323, %4, %cst_164 {dimension_numbers = #tpu.dot_dimension_numbers<[1], [0], [0], [1], [0, 0, 1, 1], [], []>} : vector<8x32xbf16>, vector<32x32xbf16>, vector<8x32xf32> -> vector<8x32xf32>
    %cst_165 = arith.constant dense<0.000000e+00> : vector<8x32xf32>
    %326 = tpu.matmul %323, %5, %cst_165 {dimension_numbers = #tpu.dot_dimension_numbers<[1], [0], [0], [1], [0, 0, 1, 1], [], []>} : vector<8x32xbf16>, vector<32x32xbf16>, vector<8x32xf32> -> vector<8x32xf32>
    %c9 = arith.constant 9 : index
    %c0_166 = arith.constant 0 : index
    %c0_167 = arith.constant 0 : index
    %327 = vector.load %arg2[%c9, %c0_166, %c0_167] : memref<16x8x32xf32, #tpu.memory_space<vmem>>, vector<1x8x32xf32>
    %328 = vector.shape_cast %327 : vector<1x8x32xf32> to vector<8x32xf32>
    %329 = arith.addf %328, %324 : vector<8x32xf32>
    %330 = arith.negf %329 : vector<8x32xf32>
    %331 = math.exp %330 : vector<8x32xf32>
    %cst_168 = arith.constant 1.000000e+00 : f32
    %332 = vector.broadcast %cst_168 : f32 to vector<8x32xf32>
    %333 = arith.addf %332, %331 : vector<8x32xf32>
    %334 = arith.divf %332, %333 : vector<8x32xf32>
    %c9_169 = arith.constant 9 : index
    %c0_170 = arith.constant 0 : index
    %c0_171 = arith.constant 0 : index
    %335 = vector.load %arg3[%c9_169, %c0_170, %c0_171] : memref<16x8x32xf32, #tpu.memory_space<vmem>>, vector<1x8x32xf32>
    %336 = vector.shape_cast %335 : vector<1x8x32xf32> to vector<8x32xf32>
    %337 = arith.addf %336, %325 : vector<8x32xf32>
    %338 = arith.negf %337 : vector<8x32xf32>
    %339 = math.exp %338 : vector<8x32xf32>
    %cst_172 = arith.constant 1.000000e+00 : f32
    %340 = vector.broadcast %cst_172 : f32 to vector<8x32xf32>
    %341 = arith.addf %340, %339 : vector<8x32xf32>
    %342 = arith.divf %340, %341 : vector<8x32xf32>
    %c9_173 = arith.constant 9 : index
    %c0_174 = arith.constant 0 : index
    %c0_175 = arith.constant 0 : index
    %343 = vector.load %arg4[%c9_173, %c0_174, %c0_175] : memref<16x8x32xf32, #tpu.memory_space<vmem>>, vector<1x8x32xf32>
    %344 = vector.shape_cast %343 : vector<1x8x32xf32> to vector<8x32xf32>
    %345 = vector.broadcast %6 : vector<1x32xf32> to vector<8x32xf32>
    %346 = arith.addf %326, %345 : vector<8x32xf32>
    %347 = arith.mulf %334, %346 : vector<8x32xf32>
    %348 = arith.addf %344, %347 : vector<8x32xf32>
    %349 = math.tanh %348 : vector<8x32xf32>
    %cst_176 = arith.constant 1.000000e+00 : f32
    %350 = vector.broadcast %cst_176 : f32 to vector<8x32xf32>
    %351 = arith.subf %350, %342 : vector<8x32xf32>
    %352 = arith.mulf %351, %349 : vector<8x32xf32>
    %353 = arith.mulf %342, %319 : vector<8x32xf32>
    %354 = arith.addf %352, %353 : vector<8x32xf32>
    %c9_177 = arith.constant 9 : index
    %c0_178 = arith.constant 0 : index
    %c0_179 = arith.constant 0 : index
    %355 = vector.load %arg9[%c9_177, %c0_178, %c0_179] : memref<16x8x32xf32, #tpu.memory_space<vmem>>, vector<1x8x32xf32>
    %356 = vector.shape_cast %355 : vector<1x8x32xf32> to vector<8x32xf32>
    %357 = vector.shape_cast %354 : vector<8x32xf32> to vector<1x8x32xf32>
    tpu.vector_store %arg9[%c9_177, %c0_178, %c0_179], %357 {strides = array<i32>} : memref<16x8x32xf32, #tpu.memory_space<vmem>>, vector<1x8x32xf32>,
    %358 = arith.truncf %354 : vector<8x32xf32> to vector<8x32xbf16>
    %cst_180 = arith.constant dense<0.000000e+00> : vector<8x32xf32>
    %359 = tpu.matmul %358, %3, %cst_180 {dimension_numbers = #tpu.dot_dimension_numbers<[1], [0], [0], [1], [0, 0, 1, 1], [], []>} : vector<8x32xbf16>, vector<32x32xbf16>, vector<8x32xf32> -> vector<8x32xf32>
    %cst_181 = arith.constant dense<0.000000e+00> : vector<8x32xf32>
    %360 = tpu.matmul %358, %4, %cst_181 {dimension_numbers = #tpu.dot_dimension_numbers<[1], [0], [0], [1], [0, 0, 1, 1], [], []>} : vector<8x32xbf16>, vector<32x32xbf16>, vector<8x32xf32> -> vector<8x32xf32>
    %cst_182 = arith.constant dense<0.000000e+00> : vector<8x32xf32>
    %361 = tpu.matmul %358, %5, %cst_182 {dimension_numbers = #tpu.dot_dimension_numbers<[1], [0], [0], [1], [0, 0, 1, 1], [], []>} : vector<8x32xbf16>, vector<32x32xbf16>, vector<8x32xf32> -> vector<8x32xf32>
    %c10 = arith.constant 10 : index
    %c0_183 = arith.constant 0 : index
    %c0_184 = arith.constant 0 : index
    %362 = vector.load %arg2[%c10, %c0_183, %c0_184] : memref<16x8x32xf32, #tpu.memory_space<vmem>>, vector<1x8x32xf32>
    %363 = vector.shape_cast %362 : vector<1x8x32xf32> to vector<8x32xf32>
    %364 = arith.addf %363, %359 : vector<8x32xf32>
    %365 = arith.negf %364 : vector<8x32xf32>
    %366 = math.exp %365 : vector<8x32xf32>
    %cst_185 = arith.constant 1.000000e+00 : f32
    %367 = vector.broadcast %cst_185 : f32 to vector<8x32xf32>
    %368 = arith.addf %367, %366 : vector<8x32xf32>
    %369 = arith.divf %367, %368 : vector<8x32xf32>
    %c10_186 = arith.constant 10 : index
    %c0_187 = arith.constant 0 : index
    %c0_188 = arith.constant 0 : index
    %370 = vector.load %arg3[%c10_186, %c0_187, %c0_188] : memref<16x8x32xf32, #tpu.memory_space<vmem>>, vector<1x8x32xf32>
    %371 = vector.shape_cast %370 : vector<1x8x32xf32> to vector<8x32xf32>
    %372 = arith.addf %371, %360 : vector<8x32xf32>
    %373 = arith.negf %372 : vector<8x32xf32>
    %374 = math.exp %373 : vector<8x32xf32>
    %cst_189 = arith.constant 1.000000e+00 : f32
    %375 = vector.broadcast %cst_189 : f32 to vector<8x32xf32>
    %376 = arith.addf %375, %374 : vector<8x32xf32>
    %377 = arith.divf %375, %376 : vector<8x32xf32>
    %c10_190 = arith.constant 10 : index
    %c0_191 = arith.constant 0 : index
    %c0_192 = arith.constant 0 : index
    %378 = vector.load %arg4[%c10_190, %c0_191, %c0_192] : memref<16x8x32xf32, #tpu.memory_space<vmem>>, vector<1x8x32xf32>
    %379 = vector.shape_cast %378 : vector<1x8x32xf32> to vector<8x32xf32>
    %380 = vector.broadcast %6 : vector<1x32xf32> to vector<8x32xf32>
    %381 = arith.addf %361, %380 : vector<8x32xf32>
    %382 = arith.mulf %369, %381 : vector<8x32xf32>
    %383 = arith.addf %379, %382 : vector<8x32xf32>
    %384 = math.tanh %383 : vector<8x32xf32>
    %cst_193 = arith.constant 1.000000e+00 : f32
    %385 = vector.broadcast %cst_193 : f32 to vector<8x32xf32>
    %386 = arith.subf %385, %377 : vector<8x32xf32>
    %387 = arith.mulf %386, %384 : vector<8x32xf32>
    %388 = arith.mulf %377, %354 : vector<8x32xf32>
    %389 = arith.addf %387, %388 : vector<8x32xf32>
    %c10_194 = arith.constant 10 : index
    %c0_195 = arith.constant 0 : index
    %c0_196 = arith.constant 0 : index
    %390 = vector.load %arg9[%c10_194, %c0_195, %c0_196] : memref<16x8x32xf32, #tpu.memory_space<vmem>>, vector<1x8x32xf32>
    %391 = vector.shape_cast %390 : vector<1x8x32xf32> to vector<8x32xf32>
    %392 = vector.shape_cast %389 : vector<8x32xf32> to vector<1x8x32xf32>
    tpu.vector_store %arg9[%c10_194, %c0_195, %c0_196], %392 {strides = array<i32>} : memref<16x8x32xf32, #tpu.memory_space<vmem>>, vector<1x8x32xf32>,
    %393 = arith.truncf %389 : vector<8x32xf32> to vector<8x32xbf16>
    %cst_197 = arith.constant dense<0.000000e+00> : vector<8x32xf32>
    %394 = tpu.matmul %393, %3, %cst_197 {dimension_numbers = #tpu.dot_dimension_numbers<[1], [0], [0], [1], [0, 0, 1, 1], [], []>} : vector<8x32xbf16>, vector<32x32xbf16>, vector<8x32xf32> -> vector<8x32xf32>
    %cst_198 = arith.constant dense<0.000000e+00> : vector<8x32xf32>
    %395 = tpu.matmul %393, %4, %cst_198 {dimension_numbers = #tpu.dot_dimension_numbers<[1], [0], [0], [1], [0, 0, 1, 1], [], []>} : vector<8x32xbf16>, vector<32x32xbf16>, vector<8x32xf32> -> vector<8x32xf32>
    %cst_199 = arith.constant dense<0.000000e+00> : vector<8x32xf32>
    %396 = tpu.matmul %393, %5, %cst_199 {dimension_numbers = #tpu.dot_dimension_numbers<[1], [0], [0], [1], [0, 0, 1, 1], [], []>} : vector<8x32xbf16>, vector<32x32xbf16>, vector<8x32xf32> -> vector<8x32xf32>
    %c11 = arith.constant 11 : index
    %c0_200 = arith.constant 0 : index
    %c0_201 = arith.constant 0 : index
    %397 = vector.load %arg2[%c11, %c0_200, %c0_201] : memref<16x8x32xf32, #tpu.memory_space<vmem>>, vector<1x8x32xf32>
    %398 = vector.shape_cast %397 : vector<1x8x32xf32> to vector<8x32xf32>
    %399 = arith.addf %398, %394 : vector<8x32xf32>
    %400 = arith.negf %399 : vector<8x32xf32>
    %401 = math.exp %400 : vector<8x32xf32>
    %cst_202 = arith.constant 1.000000e+00 : f32
    %402 = vector.broadcast %cst_202 : f32 to vector<8x32xf32>
    %403 = arith.addf %402, %401 : vector<8x32xf32>
    %404 = arith.divf %402, %403 : vector<8x32xf32>
    %c11_203 = arith.constant 11 : index
    %c0_204 = arith.constant 0 : index
    %c0_205 = arith.constant 0 : index
    %405 = vector.load %arg3[%c11_203, %c0_204, %c0_205] : memref<16x8x32xf32, #tpu.memory_space<vmem>>, vector<1x8x32xf32>
    %406 = vector.shape_cast %405 : vector<1x8x32xf32> to vector<8x32xf32>
    %407 = arith.addf %406, %395 : vector<8x32xf32>
    %408 = arith.negf %407 : vector<8x32xf32>
    %409 = math.exp %408 : vector<8x32xf32>
    %cst_206 = arith.constant 1.000000e+00 : f32
    %410 = vector.broadcast %cst_206 : f32 to vector<8x32xf32>
    %411 = arith.addf %410, %409 : vector<8x32xf32>
    %412 = arith.divf %410, %411 : vector<8x32xf32>
    %c11_207 = arith.constant 11 : index
    %c0_208 = arith.constant 0 : index
    %c0_209 = arith.constant 0 : index
    %413 = vector.load %arg4[%c11_207, %c0_208, %c0_209] : memref<16x8x32xf32, #tpu.memory_space<vmem>>, vector<1x8x32xf32>
    %414 = vector.shape_cast %413 : vector<1x8x32xf32> to vector<8x32xf32>
    %415 = vector.broadcast %6 : vector<1x32xf32> to vector<8x32xf32>
    %416 = arith.addf %396, %415 : vector<8x32xf32>
    %417 = arith.mulf %404, %416 : vector<8x32xf32>
    %418 = arith.addf %414, %417 : vector<8x32xf32>
    %419 = math.tanh %418 : vector<8x32xf32>
    %cst_210 = arith.constant 1.000000e+00 : f32
    %420 = vector.broadcast %cst_210 : f32 to vector<8x32xf32>
    %421 = arith.subf %420, %412 : vector<8x32xf32>
    %422 = arith.mulf %421, %419 : vector<8x32xf32>
    %423 = arith.mulf %412, %389 : vector<8x32xf32>
    %424 = arith.addf %422, %423 : vector<8x32xf32>
    %c11_211 = arith.constant 11 : index
    %c0_212 = arith.constant 0 : index
    %c0_213 = arith.constant 0 : index
    %425 = vector.load %arg9[%c11_211, %c0_212, %c0_213] : memref<16x8x32xf32, #tpu.memory_space<vmem>>, vector<1x8x32xf32>
    %426 = vector.shape_cast %425 : vector<1x8x32xf32> to vector<8x32xf32>
    %427 = vector.shape_cast %424 : vector<8x32xf32> to vector<1x8x32xf32>
    tpu.vector_store %arg9[%c11_211, %c0_212, %c0_213], %427 {strides = array<i32>} : memref<16x8x32xf32, #tpu.memory_space<vmem>>, vector<1x8x32xf32>,
    %428 = arith.truncf %424 : vector<8x32xf32> to vector<8x32xbf16>
    %cst_214 = arith.constant dense<0.000000e+00> : vector<8x32xf32>
    %429 = tpu.matmul %428, %3, %cst_214 {dimension_numbers = #tpu.dot_dimension_numbers<[1], [0], [0], [1], [0, 0, 1, 1], [], []>} : vector<8x32xbf16>, vector<32x32xbf16>, vector<8x32xf32> -> vector<8x32xf32>
    %cst_215 = arith.constant dense<0.000000e+00> : vector<8x32xf32>
    %430 = tpu.matmul %428, %4, %cst_215 {dimension_numbers = #tpu.dot_dimension_numbers<[1], [0], [0], [1], [0, 0, 1, 1], [], []>} : vector<8x32xbf16>, vector<32x32xbf16>, vector<8x32xf32> -> vector<8x32xf32>
    %cst_216 = arith.constant dense<0.000000e+00> : vector<8x32xf32>
    %431 = tpu.matmul %428, %5, %cst_216 {dimension_numbers = #tpu.dot_dimension_numbers<[1], [0], [0], [1], [0, 0, 1, 1], [], []>} : vector<8x32xbf16>, vector<32x32xbf16>, vector<8x32xf32> -> vector<8x32xf32>
    %c12 = arith.constant 12 : index
    %c0_217 = arith.constant 0 : index
    %c0_218 = arith.constant 0 : index
    %432 = vector.load %arg2[%c12, %c0_217, %c0_218] : memref<16x8x32xf32, #tpu.memory_space<vmem>>, vector<1x8x32xf32>
    %433 = vector.shape_cast %432 : vector<1x8x32xf32> to vector<8x32xf32>
    %434 = arith.addf %433, %429 : vector<8x32xf32>
    %435 = arith.negf %434 : vector<8x32xf32>
    %436 = math.exp %435 : vector<8x32xf32>
    %cst_219 = arith.constant 1.000000e+00 : f32
    %437 = vector.broadcast %cst_219 : f32 to vector<8x32xf32>
    %438 = arith.addf %437, %436 : vector<8x32xf32>
    %439 = arith.divf %437, %438 : vector<8x32xf32>
    %c12_220 = arith.constant 12 : index
    %c0_221 = arith.constant 0 : index
    %c0_222 = arith.constant 0 : index
    %440 = vector.load %arg3[%c12_220, %c0_221, %c0_222] : memref<16x8x32xf32, #tpu.memory_space<vmem>>, vector<1x8x32xf32>
    %441 = vector.shape_cast %440 : vector<1x8x32xf32> to vector<8x32xf32>
    %442 = arith.addf %441, %430 : vector<8x32xf32>
    %443 = arith.negf %442 : vector<8x32xf32>
    %444 = math.exp %443 : vector<8x32xf32>
    %cst_223 = arith.constant 1.000000e+00 : f32
    %445 = vector.broadcast %cst_223 : f32 to vector<8x32xf32>
    %446 = arith.addf %445, %444 : vector<8x32xf32>
    %447 = arith.divf %445, %446 : vector<8x32xf32>
    %c12_224 = arith.constant 12 : index
    %c0_225 = arith.constant 0 : index
    %c0_226 = arith.constant 0 : index
    %448 = vector.load %arg4[%c12_224, %c0_225, %c0_226] : memref<16x8x32xf32, #tpu.memory_space<vmem>>, vector<1x8x32xf32>
    %449 = vector.shape_cast %448 : vector<1x8x32xf32> to vector<8x32xf32>
    %450 = vector.broadcast %6 : vector<1x32xf32> to vector<8x32xf32>
    %451 = arith.addf %431, %450 : vector<8x32xf32>
    %452 = arith.mulf %439, %451 : vector<8x32xf32>
    %453 = arith.addf %449, %452 : vector<8x32xf32>
    %454 = math.tanh %453 : vector<8x32xf32>
    %cst_227 = arith.constant 1.000000e+00 : f32
    %455 = vector.broadcast %cst_227 : f32 to vector<8x32xf32>
    %456 = arith.subf %455, %447 : vector<8x32xf32>
    %457 = arith.mulf %456, %454 : vector<8x32xf32>
    %458 = arith.mulf %447, %424 : vector<8x32xf32>
    %459 = arith.addf %457, %458 : vector<8x32xf32>
    %c12_228 = arith.constant 12 : index
    %c0_229 = arith.constant 0 : index
    %c0_230 = arith.constant 0 : index
    %460 = vector.load %arg9[%c12_228, %c0_229, %c0_230] : memref<16x8x32xf32, #tpu.memory_space<vmem>>, vector<1x8x32xf32>
    %461 = vector.shape_cast %460 : vector<1x8x32xf32> to vector<8x32xf32>
    %462 = vector.shape_cast %459 : vector<8x32xf32> to vector<1x8x32xf32>
    tpu.vector_store %arg9[%c12_228, %c0_229, %c0_230], %462 {strides = array<i32>} : memref<16x8x32xf32, #tpu.memory_space<vmem>>, vector<1x8x32xf32>,
    %463 = arith.truncf %459 : vector<8x32xf32> to vector<8x32xbf16>
    %cst_231 = arith.constant dense<0.000000e+00> : vector<8x32xf32>
    %464 = tpu.matmul %463, %3, %cst_231 {dimension_numbers = #tpu.dot_dimension_numbers<[1], [0], [0], [1], [0, 0, 1, 1], [], []>} : vector<8x32xbf16>, vector<32x32xbf16>, vector<8x32xf32> -> vector<8x32xf32>
    %cst_232 = arith.constant dense<0.000000e+00> : vector<8x32xf32>
    %465 = tpu.matmul %463, %4, %cst_232 {dimension_numbers = #tpu.dot_dimension_numbers<[1], [0], [0], [1], [0, 0, 1, 1], [], []>} : vector<8x32xbf16>, vector<32x32xbf16>, vector<8x32xf32> -> vector<8x32xf32>
    %cst_233 = arith.constant dense<0.000000e+00> : vector<8x32xf32>
    %466 = tpu.matmul %463, %5, %cst_233 {dimension_numbers = #tpu.dot_dimension_numbers<[1], [0], [0], [1], [0, 0, 1, 1], [], []>} : vector<8x32xbf16>, vector<32x32xbf16>, vector<8x32xf32> -> vector<8x32xf32>
    %c13 = arith.constant 13 : index
    %c0_234 = arith.constant 0 : index
    %c0_235 = arith.constant 0 : index
    %467 = vector.load %arg2[%c13, %c0_234, %c0_235] : memref<16x8x32xf32, #tpu.memory_space<vmem>>, vector<1x8x32xf32>
    %468 = vector.shape_cast %467 : vector<1x8x32xf32> to vector<8x32xf32>
    %469 = arith.addf %468, %464 : vector<8x32xf32>
    %470 = arith.negf %469 : vector<8x32xf32>
    %471 = math.exp %470 : vector<8x32xf32>
    %cst_236 = arith.constant 1.000000e+00 : f32
    %472 = vector.broadcast %cst_236 : f32 to vector<8x32xf32>
    %473 = arith.addf %472, %471 : vector<8x32xf32>
    %474 = arith.divf %472, %473 : vector<8x32xf32>
    %c13_237 = arith.constant 13 : index
    %c0_238 = arith.constant 0 : index
    %c0_239 = arith.constant 0 : index
    %475 = vector.load %arg3[%c13_237, %c0_238, %c0_239] : memref<16x8x32xf32, #tpu.memory_space<vmem>>, vector<1x8x32xf32>
    %476 = vector.shape_cast %475 : vector<1x8x32xf32> to vector<8x32xf32>
    %477 = arith.addf %476, %465 : vector<8x32xf32>
    %478 = arith.negf %477 : vector<8x32xf32>
    %479 = math.exp %478 : vector<8x32xf32>
    %cst_240 = arith.constant 1.000000e+00 : f32
    %480 = vector.broadcast %cst_240 : f32 to vector<8x32xf32>
    %481 = arith.addf %480, %479 : vector<8x32xf32>
    %482 = arith.divf %480, %481 : vector<8x32xf32>
    %c13_241 = arith.constant 13 : index
    %c0_242 = arith.constant 0 : index
    %c0_243 = arith.constant 0 : index
    %483 = vector.load %arg4[%c13_241, %c0_242, %c0_243] : memref<16x8x32xf32, #tpu.memory_space<vmem>>, vector<1x8x32xf32>
    %484 = vector.shape_cast %483 : vector<1x8x32xf32> to vector<8x32xf32>
    %485 = vector.broadcast %6 : vector<1x32xf32> to vector<8x32xf32>
    %486 = arith.addf %466, %485 : vector<8x32xf32>
    %487 = arith.mulf %474, %486 : vector<8x32xf32>
    %488 = arith.addf %484, %487 : vector<8x32xf32>
    %489 = math.tanh %488 : vector<8x32xf32>
    %cst_244 = arith.constant 1.000000e+00 : f32
    %490 = vector.broadcast %cst_244 : f32 to vector<8x32xf32>
    %491 = arith.subf %490, %482 : vector<8x32xf32>
    %492 = arith.mulf %491, %489 : vector<8x32xf32>
    %493 = arith.mulf %482, %459 : vector<8x32xf32>
    %494 = arith.addf %492, %493 : vector<8x32xf32>
    %c13_245 = arith.constant 13 : index
    %c0_246 = arith.constant 0 : index
    %c0_247 = arith.constant 0 : index
    %495 = vector.load %arg9[%c13_245, %c0_246, %c0_247] : memref<16x8x32xf32, #tpu.memory_space<vmem>>, vector<1x8x32xf32>
    %496 = vector.shape_cast %495 : vector<1x8x32xf32> to vector<8x32xf32>
    %497 = vector.shape_cast %494 : vector<8x32xf32> to vector<1x8x32xf32>
    tpu.vector_store %arg9[%c13_245, %c0_246, %c0_247], %497 {strides = array<i32>} : memref<16x8x32xf32, #tpu.memory_space<vmem>>, vector<1x8x32xf32>,
    %498 = arith.truncf %494 : vector<8x32xf32> to vector<8x32xbf16>
    %cst_248 = arith.constant dense<0.000000e+00> : vector<8x32xf32>
    %499 = tpu.matmul %498, %3, %cst_248 {dimension_numbers = #tpu.dot_dimension_numbers<[1], [0], [0], [1], [0, 0, 1, 1], [], []>} : vector<8x32xbf16>, vector<32x32xbf16>, vector<8x32xf32> -> vector<8x32xf32>
    %cst_249 = arith.constant dense<0.000000e+00> : vector<8x32xf32>
    %500 = tpu.matmul %498, %4, %cst_249 {dimension_numbers = #tpu.dot_dimension_numbers<[1], [0], [0], [1], [0, 0, 1, 1], [], []>} : vector<8x32xbf16>, vector<32x32xbf16>, vector<8x32xf32> -> vector<8x32xf32>
    %cst_250 = arith.constant dense<0.000000e+00> : vector<8x32xf32>
    %501 = tpu.matmul %498, %5, %cst_250 {dimension_numbers = #tpu.dot_dimension_numbers<[1], [0], [0], [1], [0, 0, 1, 1], [], []>} : vector<8x32xbf16>, vector<32x32xbf16>, vector<8x32xf32> -> vector<8x32xf32>
    %c14 = arith.constant 14 : index
    %c0_251 = arith.constant 0 : index
    %c0_252 = arith.constant 0 : index
    %502 = vector.load %arg2[%c14, %c0_251, %c0_252] : memref<16x8x32xf32, #tpu.memory_space<vmem>>, vector<1x8x32xf32>
    %503 = vector.shape_cast %502 : vector<1x8x32xf32> to vector<8x32xf32>
    %504 = arith.addf %503, %499 : vector<8x32xf32>
    %505 = arith.negf %504 : vector<8x32xf32>
    %506 = math.exp %505 : vector<8x32xf32>
    %cst_253 = arith.constant 1.000000e+00 : f32
    %507 = vector.broadcast %cst_253 : f32 to vector<8x32xf32>
    %508 = arith.addf %507, %506 : vector<8x32xf32>
    %509 = arith.divf %507, %508 : vector<8x32xf32>
    %c14_254 = arith.constant 14 : index
    %c0_255 = arith.constant 0 : index
    %c0_256 = arith.constant 0 : index
    %510 = vector.load %arg3[%c14_254, %c0_255, %c0_256] : memref<16x8x32xf32, #tpu.memory_space<vmem>>, vector<1x8x32xf32>
    %511 = vector.shape_cast %510 : vector<1x8x32xf32> to vector<8x32xf32>
    %512 = arith.addf %511, %500 : vector<8x32xf32>
    %513 = arith.negf %512 : vector<8x32xf32>
    %514 = math.exp %513 : vector<8x32xf32>
    %cst_257 = arith.constant 1.000000e+00 : f32
    %515 = vector.broadcast %cst_257 : f32 to vector<8x32xf32>
    %516 = arith.addf %515, %514 : vector<8x32xf32>
    %517 = arith.divf %515, %516 : vector<8x32xf32>
    %c14_258 = arith.constant 14 : index
    %c0_259 = arith.constant 0 : index
    %c0_260 = arith.constant 0 : index
    %518 = vector.load %arg4[%c14_258, %c0_259, %c0_260] : memref<16x8x32xf32, #tpu.memory_space<vmem>>, vector<1x8x32xf32>
    %519 = vector.shape_cast %518 : vector<1x8x32xf32> to vector<8x32xf32>
    %520 = vector.broadcast %6 : vector<1x32xf32> to vector<8x32xf32>
    %521 = arith.addf %501, %520 : vector<8x32xf32>
    %522 = arith.mulf %509, %521 : vector<8x32xf32>
    %523 = arith.addf %519, %522 : vector<8x32xf32>
    %524 = math.tanh %523 : vector<8x32xf32>
    %cst_261 = arith.constant 1.000000e+00 : f32
    %525 = vector.broadcast %cst_261 : f32 to vector<8x32xf32>
    %526 = arith.subf %525, %517 : vector<8x32xf32>
    %527 = arith.mulf %526, %524 : vector<8x32xf32>
    %528 = arith.mulf %517, %494 : vector<8x32xf32>
    %529 = arith.addf %527, %528 : vector<8x32xf32>
    %c14_262 = arith.constant 14 : index
    %c0_263 = arith.constant 0 : index
    %c0_264 = arith.constant 0 : index
    %530 = vector.load %arg9[%c14_262, %c0_263, %c0_264] : memref<16x8x32xf32, #tpu.memory_space<vmem>>, vector<1x8x32xf32>
    %531 = vector.shape_cast %530 : vector<1x8x32xf32> to vector<8x32xf32>
    %532 = vector.shape_cast %529 : vector<8x32xf32> to vector<1x8x32xf32>
    tpu.vector_store %arg9[%c14_262, %c0_263, %c0_264], %532 {strides = array<i32>} : memref<16x8x32xf32, #tpu.memory_space<vmem>>, vector<1x8x32xf32>,
    %533 = arith.truncf %529 : vector<8x32xf32> to vector<8x32xbf16>
    %cst_265 = arith.constant dense<0.000000e+00> : vector<8x32xf32>
    %534 = tpu.matmul %533, %3, %cst_265 {dimension_numbers = #tpu.dot_dimension_numbers<[1], [0], [0], [1], [0, 0, 1, 1], [], []>} : vector<8x32xbf16>, vector<32x32xbf16>, vector<8x32xf32> -> vector<8x32xf32>
    %cst_266 = arith.constant dense<0.000000e+00> : vector<8x32xf32>
    %535 = tpu.matmul %533, %4, %cst_266 {dimension_numbers = #tpu.dot_dimension_numbers<[1], [0], [0], [1], [0, 0, 1, 1], [], []>} : vector<8x32xbf16>, vector<32x32xbf16>, vector<8x32xf32> -> vector<8x32xf32>
    %cst_267 = arith.constant dense<0.000000e+00> : vector<8x32xf32>
    %536 = tpu.matmul %533, %5, %cst_267 {dimension_numbers = #tpu.dot_dimension_numbers<[1], [0], [0], [1], [0, 0, 1, 1], [], []>} : vector<8x32xbf16>, vector<32x32xbf16>, vector<8x32xf32> -> vector<8x32xf32>
    %c15 = arith.constant 15 : index
    %c0_268 = arith.constant 0 : index
    %c0_269 = arith.constant 0 : index
    %537 = vector.load %arg2[%c15, %c0_268, %c0_269] : memref<16x8x32xf32, #tpu.memory_space<vmem>>, vector<1x8x32xf32>
    %538 = vector.shape_cast %537 : vector<1x8x32xf32> to vector<8x32xf32>
    %539 = arith.addf %538, %534 : vector<8x32xf32>
    %540 = arith.negf %539 : vector<8x32xf32>
    %541 = math.exp %540 : vector<8x32xf32>
    %cst_270 = arith.constant 1.000000e+00 : f32
    %542 = vector.broadcast %cst_270 : f32 to vector<8x32xf32>
    %543 = arith.addf %542, %541 : vector<8x32xf32>
    %544 = arith.divf %542, %543 : vector<8x32xf32>
    %c15_271 = arith.constant 15 : index
    %c0_272 = arith.constant 0 : index
    %c0_273 = arith.constant 0 : index
    %545 = vector.load %arg3[%c15_271, %c0_272, %c0_273] : memref<16x8x32xf32, #tpu.memory_space<vmem>>, vector<1x8x32xf32>
    %546 = vector.shape_cast %545 : vector<1x8x32xf32> to vector<8x32xf32>
    %547 = arith.addf %546, %535 : vector<8x32xf32>
    %548 = arith.negf %547 : vector<8x32xf32>
    %549 = math.exp %548 : vector<8x32xf32>
    %cst_274 = arith.constant 1.000000e+00 : f32
    %550 = vector.broadcast %cst_274 : f32 to vector<8x32xf32>
    %551 = arith.addf %550, %549 : vector<8x32xf32>
    %552 = arith.divf %550, %551 : vector<8x32xf32>
    %c15_275 = arith.constant 15 : index
    %c0_276 = arith.constant 0 : index
    %c0_277 = arith.constant 0 : index
    %553 = vector.load %arg4[%c15_275, %c0_276, %c0_277] : memref<16x8x32xf32, #tpu.memory_space<vmem>>, vector<1x8x32xf32>
    %554 = vector.shape_cast %553 : vector<1x8x32xf32> to vector<8x32xf32>
    %555 = vector.broadcast %6 : vector<1x32xf32> to vector<8x32xf32>
    %556 = arith.addf %536, %555 : vector<8x32xf32>
    %557 = arith.mulf %544, %556 : vector<8x32xf32>
    %558 = arith.addf %554, %557 : vector<8x32xf32>
    %559 = math.tanh %558 : vector<8x32xf32>
    %cst_278 = arith.constant 1.000000e+00 : f32
    %560 = vector.broadcast %cst_278 : f32 to vector<8x32xf32>
    %561 = arith.subf %560, %552 : vector<8x32xf32>
    %562 = arith.mulf %561, %559 : vector<8x32xf32>
    %563 = arith.mulf %552, %529 : vector<8x32xf32>
    %564 = arith.addf %562, %563 : vector<8x32xf32>
    %c15_279 = arith.constant 15 : index
    %c0_280 = arith.constant 0 : index
    %c0_281 = arith.constant 0 : index
    %565 = vector.load %arg9[%c15_279, %c0_280, %c0_281] : memref<16x8x32xf32, #tpu.memory_space<vmem>>, vector<1x8x32xf32>
    %566 = vector.shape_cast %565 : vector<1x8x32xf32> to vector<8x32xf32>
    %567 = vector.shape_cast %564 : vector<8x32xf32> to vector<1x8x32xf32>
    tpu.vector_store %arg9[%c15_279, %c0_280, %c0_281], %567 {strides = array<i32>} : memref<16x8x32xf32, #tpu.memory_space<vmem>>, vector<1x8x32xf32>,
    %c0_282 = arith.constant 0 : index
    %c0_283 = arith.constant 0 : index
    %568 = vector.load %arg10[%c0_282, %c0_283] : memref<8x32xf32, #tpu.memory_space<vmem>>, vector<8x32xf32>
    tpu.vector_store %arg10[%c0_282, %c0_283], %564 {strides = array<i32>} : memref<8x32xf32, #tpu.memory_space<vmem>>, vector<8x32xf32>,
    return
  }
  func.func @transform_0(%arg0: i32, %arg1: i32) -> (i32, i32, i32) {
    %c0_i32 = arith.constant 0 : i32
    %c0_i32_0 = arith.constant 0 : i32
    return %arg1, %arg0, %c0_i32 : i32, i32, i32
  }
  func.func @transform_1(%arg0: i32, %arg1: i32) -> (i32, i32, i32) {
    %c0_i32 = arith.constant 0 : i32
    %c0_i32_0 = arith.constant 0 : i32
    return %arg1, %arg0, %c0_i32 : i32, i32, i32
  }
  func.func @transform_2(%arg0: i32, %arg1: i32) -> (i32, i32, i32) {
    %c0_i32 = arith.constant 0 : i32
    %c0_i32_0 = arith.constant 0 : i32
    return %arg1, %arg0, %c0_i32 : i32, i32, i32
  }
  func.func @transform_3(%arg0: i32, %arg1: i32) -> (i32, i32) {
    %c0_i32 = arith.constant 0 : i32
    %c0_i32_0 = arith.constant 0 : i32
    %c0_i32_1 = arith.constant 0 : i32
    return %c0_i32, %c0_i32_0 : i32, i32
  }
  func.func @transform_4(%arg0: i32, %arg1: i32) -> (i32, i32) {
    %c0_i32 = arith.constant 0 : i32
    %c0_i32_0 = arith.constant 0 : i32
    %c0_i32_1 = arith.constant 0 : i32
    return %c0_i32, %c0_i32_0 : i32, i32
  }
  func.func @transform_5(%arg0: i32, %arg1: i32) -> (i32, i32) {
    %c0_i32 = arith.constant 0 : i32
    %c0_i32_0 = arith.constant 0 : i32
    %c0_i32_1 = arith.constant 0 : i32
    return %c0_i32, %c0_i32_0 : i32, i32
  }
  func.func @transform_6(%arg0: i32, %arg1: i32) -> (i32, i32) {
    %c0_i32 = arith.constant 0 : i32
    %c0_i32_0 = arith.constant 0 : i32
    %c0_i32_1 = arith.constant 0 : i32
    return %c0_i32, %c0_i32_0 : i32, i32
  }
  func.func @transform_7(%arg0: i32, %arg1: i32) -> (i32, i32, i32) {
    %c0_i32 = arith.constant 0 : i32
    %c0_i32_0 = arith.constant 0 : i32
    return %arg1, %arg0, %c0_i32 : i32, i32, i32
  }
}

module attributes {stable_mosaic.version = 11 : i64} {
  func.func @_groupnorm_kernel(%arg0: i32, %arg1: memref<16x8x32xf32, #tpu.memory_space<vmem>>, %arg2: memref<1x32xf32, #tpu.memory_space<vmem>>, %arg3: memref<1x32xf32, #tpu.memory_space<vmem>>, %arg4: memref<16x8x32xf32, #tpu.memory_space<vmem>>) attributes {dimension_semantics = [#tpu.dimension_semantics<parallel>], iteration_bounds = array<i64: 1>, scalar_prefetch = 0 : i64, scratch_operands = 0 : i64, tpu.core_type = #tpu.core_type<tc>, window_params = [{transform_indices = @transform_0, window_bounds = array<i64: 16, 8, 32>}, {pipeline_mode = #tpu.pipeline_mode<synchronous>, transform_indices = @transform_1, window_bounds = array<i64: 1, 32>}, {pipeline_mode = #tpu.pipeline_mode<synchronous>, transform_indices = @transform_2, window_bounds = array<i64: 1, 32>}, {transform_indices = @transform_3, window_bounds = array<i64: 16, 8, 32>}]} {
    %c0 = arith.constant 0 : index
    %c0_0 = arith.constant 0 : index
    %c0_1 = arith.constant 0 : index
    %0 = vector.load %arg1[%c0, %c0_0, %c0_1] : memref<16x8x32xf32, #tpu.memory_space<vmem>>, vector<16x8x32xf32>
    %cst = arith.constant dense<0.000000e+00> : vector<16x8xf32>
    %1 = vector.multi_reduction <add>, %0, %cst [2] : vector<16x8x32xf32> to vector<16x8xf32>
    %2 = vector.shape_cast %1 : vector<16x8xf32> to vector<16x8x1xf32>
    %cst_2 = arith.constant dense<0.000000e+00> : vector<8x1xf32>
    %3 = vector.multi_reduction <add>, %2, %cst_2 [0] : vector<16x8x1xf32> to vector<8x1xf32>
    %4 = vector.shape_cast %3 : vector<8x1xf32> to vector<1x8x1xf32>
    %cst_3 = arith.constant 0.001953125 : f32
    %5 = vector.broadcast %cst_3 : f32 to vector<1x8x1xf32>
    %6 = arith.mulf %4, %5 : vector<1x8x1xf32>
    %7 = vector.broadcast %6 : vector<1x8x1xf32> to vector<16x8x32xf32>
    %8 = arith.subf %0, %7 : vector<16x8x32xf32>
    %9 = arith.mulf %8, %8 : vector<16x8x32xf32>
    %cst_4 = arith.constant dense<0.000000e+00> : vector<16x8xf32>
    %10 = vector.multi_reduction <add>, %9, %cst_4 [2] : vector<16x8x32xf32> to vector<16x8xf32>
    %11 = vector.shape_cast %10 : vector<16x8xf32> to vector<16x8x1xf32>
    %cst_5 = arith.constant dense<0.000000e+00> : vector<8x1xf32>
    %12 = vector.multi_reduction <add>, %11, %cst_5 [0] : vector<16x8x1xf32> to vector<8x1xf32>
    %13 = vector.shape_cast %12 : vector<8x1xf32> to vector<1x8x1xf32>
    %cst_6 = arith.constant 0.001953125 : f32
    %14 = vector.broadcast %cst_6 : f32 to vector<1x8x1xf32>
    %15 = arith.mulf %13, %14 : vector<1x8x1xf32>
    %cst_7 = arith.constant 9.99999974E-6 : f32
    %16 = vector.broadcast %cst_7 : f32 to vector<1x8x1xf32>
    %17 = arith.addf %15, %16 : vector<1x8x1xf32>
    %18 = math.rsqrt %17 : vector<1x8x1xf32>
    %19 = vector.broadcast %18 : vector<1x8x1xf32> to vector<16x8x32xf32>
    %20 = arith.mulf %8, %19 : vector<16x8x32xf32>
    %c0_8 = arith.constant 0 : index
    %c0_9 = arith.constant 0 : index
    %21 = vector.load %arg2[%c0_8, %c0_9] : memref<1x32xf32, #tpu.memory_space<vmem>>, vector<1x32xf32>
    %22 = vector.shape_cast %21 : vector<1x32xf32> to vector<1x1x32xf32>
    %23 = vector.broadcast %22 : vector<1x1x32xf32> to vector<16x8x32xf32>
    %24 = arith.mulf %20, %23 : vector<16x8x32xf32>
    %c0_10 = arith.constant 0 : index
    %c0_11 = arith.constant 0 : index
    %25 = vector.load %arg3[%c0_10, %c0_11] : memref<1x32xf32, #tpu.memory_space<vmem>>, vector<1x32xf32>
    %26 = vector.shape_cast %25 : vector<1x32xf32> to vector<1x1x32xf32>
    %27 = vector.broadcast %26 : vector<1x1x32xf32> to vector<16x8x32xf32>
    %28 = arith.addf %24, %27 : vector<16x8x32xf32>
    %c0_12 = arith.constant 0 : index
    %c0_13 = arith.constant 0 : index
    %c0_14 = arith.constant 0 : index
    %29 = vector.load %arg4[%c0_12, %c0_13, %c0_14] : memref<16x8x32xf32, #tpu.memory_space<vmem>>, vector<16x8x32xf32>
    tpu.vector_store %arg4[%c0_12, %c0_13, %c0_14], %28 {strides = array<i32>} : memref<16x8x32xf32, #tpu.memory_space<vmem>>, vector<16x8x32xf32>,
    return
  }
  func.func @transform_0(%arg0: i32) -> (i32, i32, i32) {
    %c0_i32 = arith.constant 0 : i32
    %c0_i32_0 = arith.constant 0 : i32
    %c0_i32_1 = arith.constant 0 : i32
    return %c0_i32, %arg0, %c0_i32_0 : i32, i32, i32
  }
  func.func @transform_1(%arg0: i32) -> (i32, i32) {
    %c0_i32 = arith.constant 0 : i32
    %c0_i32_0 = arith.constant 0 : i32
    %c0_i32_1 = arith.constant 0 : i32
    return %c0_i32, %c0_i32_0 : i32, i32
  }
  func.func @transform_2(%arg0: i32) -> (i32, i32) {
    %c0_i32 = arith.constant 0 : i32
    %c0_i32_0 = arith.constant 0 : i32
    %c0_i32_1 = arith.constant 0 : i32
    return %c0_i32, %c0_i32_0 : i32, i32
  }
  func.func @transform_3(%arg0: i32) -> (i32, i32, i32) {
    %c0_i32 = arith.constant 0 : i32
    %c0_i32_0 = arith.constant 0 : i32
    %c0_i32_1 = arith.constant 0 : i32
    return %c0_i32, %arg0, %c0_i32_0 : i32, i32, i32
  }
}

module attributes {stable_mosaic.version = 11 : i64} {
  func.func @_dense_kernel(%arg0: i32, %arg1: memref<128x32xf32, #tpu.memory_space<vmem>>, %arg2: memref<32x21xbf16, #tpu.memory_space<vmem>>, %arg3: memref<1x21xf32, #tpu.memory_space<vmem>>, %arg4: memref<128x21xf32, #tpu.memory_space<vmem>>) attributes {dimension_semantics = [#tpu.dimension_semantics<parallel>], iteration_bounds = array<i64: 1>, scalar_prefetch = 0 : i64, scratch_operands = 0 : i64, tpu.core_type = #tpu.core_type<tc>, window_params = [{transform_indices = @transform_0, window_bounds = array<i64: 128, 32>}, {pipeline_mode = #tpu.pipeline_mode<synchronous>, transform_indices = @transform_1, window_bounds = array<i64: 32, 21>}, {pipeline_mode = #tpu.pipeline_mode<synchronous>, transform_indices = @transform_2, window_bounds = array<i64: 1, 21>}, {transform_indices = @transform_3, window_bounds = array<i64: 128, 21>}]} {
    %c0 = arith.constant 0 : index
    %c0_0 = arith.constant 0 : index
    %0 = vector.load %arg1[%c0, %c0_0] : memref<128x32xf32, #tpu.memory_space<vmem>>, vector<128x32xf32>
    %1 = arith.truncf %0 : vector<128x32xf32> to vector<128x32xbf16>
    %c0_1 = arith.constant 0 : index
    %c0_2 = arith.constant 0 : index
    %2 = vector.load %arg2[%c0_1, %c0_2] : memref<32x21xbf16, #tpu.memory_space<vmem>>, vector<32x21xbf16>
    %cst = arith.constant dense<0.000000e+00> : vector<128x21xf32>
    %3 = tpu.matmul %1, %2, %cst {dimension_numbers = #tpu.dot_dimension_numbers<[1], [0], [0], [1], [0, 0, 1, 1], [], []>} : vector<128x32xbf16>, vector<32x21xbf16>, vector<128x21xf32> -> vector<128x21xf32>
    %c0_3 = arith.constant 0 : index
    %c0_4 = arith.constant 0 : index
    %4 = vector.load %arg3[%c0_3, %c0_4] : memref<1x21xf32, #tpu.memory_space<vmem>>, vector<1x21xf32>
    %5 = vector.broadcast %4 : vector<1x21xf32> to vector<128x21xf32>
    %6 = arith.addf %3, %5 : vector<128x21xf32>
    %cst_5 = arith.constant 0.000000e+00 : f32
    %7 = vector.broadcast %cst_5 : f32 to vector<128x21xf32>
    %8 = arith.cmpf oge, %6, %7 : vector<128x21xf32>
    %cst_6 = arith.constant 2.500000e-01 : f32
    %9 = vector.broadcast %cst_6 : f32 to vector<128x21xf32>
    %10 = arith.mulf %9, %6 : vector<128x21xf32>
    %11 = arith.select %8, %6, %10 : vector<128x21xi1>, vector<128x21xf32>
    %c0_7 = arith.constant 0 : index
    %c0_8 = arith.constant 0 : index
    %12 = vector.load %arg4[%c0_7, %c0_8] : memref<128x21xf32, #tpu.memory_space<vmem>>, vector<128x21xf32>
    tpu.vector_store %arg4[%c0_7, %c0_8], %11 {strides = array<i32>} : memref<128x21xf32, #tpu.memory_space<vmem>>, vector<128x21xf32>,
    return
  }
  func.func @transform_0(%arg0: i32) -> (i32, i32) {
    %c0_i32 = arith.constant 0 : i32
    %c0_i32_0 = arith.constant 0 : i32
    return %arg0, %c0_i32 : i32, i32
  }
  func.func @transform_1(%arg0: i32) -> (i32, i32) {
    %c0_i32 = arith.constant 0 : i32
    %c0_i32_0 = arith.constant 0 : i32
    %c0_i32_1 = arith.constant 0 : i32
    return %c0_i32, %c0_i32_0 : i32, i32
  }
  func.func @transform_2(%arg0: i32) -> (i32, i32) {
    %c0_i32 = arith.constant 0 : i32
    %c0_i32_0 = arith.constant 0 : i32
    %c0_i32_1 = arith.constant 0 : i32
    return %c0_i32, %c0_i32_0 : i32, i32
  }
  func.func @transform_3(%arg0: i32) -> (i32, i32) {
    %c0_i32 = arith.constant 0 : i32
    %c0_i32_0 = arith.constant 0 : i32
    return %arg0, %c0_i32 : i32, i32
  }
}

module attributes {stable_mosaic.version = 11 : i64} {
  func.func @_dense_kernel(%arg0: i32, %arg1: memref<32x21xf32, #tpu.memory_space<vmem>>, %arg2: memref<21x21xbf16, #tpu.memory_space<vmem>>, %arg3: memref<1x21xf32, #tpu.memory_space<vmem>>, %arg4: memref<32x21xf32, #tpu.memory_space<vmem>>) attributes {dimension_semantics = [#tpu.dimension_semantics<parallel>], iteration_bounds = array<i64: 1>, scalar_prefetch = 0 : i64, scratch_operands = 0 : i64, tpu.core_type = #tpu.core_type<tc>, window_params = [{transform_indices = @transform_0, window_bounds = array<i64: 32, 21>}, {pipeline_mode = #tpu.pipeline_mode<synchronous>, transform_indices = @transform_1, window_bounds = array<i64: 21, 21>}, {pipeline_mode = #tpu.pipeline_mode<synchronous>, transform_indices = @transform_2, window_bounds = array<i64: 1, 21>}, {transform_indices = @transform_3, window_bounds = array<i64: 32, 21>}]} {
    %c0 = arith.constant 0 : index
    %c0_0 = arith.constant 0 : index
    %0 = vector.load %arg1[%c0, %c0_0] : memref<32x21xf32, #tpu.memory_space<vmem>>, vector<32x21xf32>
    %1 = arith.truncf %0 : vector<32x21xf32> to vector<32x21xbf16>
    %c0_1 = arith.constant 0 : index
    %c0_2 = arith.constant 0 : index
    %2 = vector.load %arg2[%c0_1, %c0_2] : memref<21x21xbf16, #tpu.memory_space<vmem>>, vector<21x21xbf16>
    %cst = arith.constant dense<0.000000e+00> : vector<32x21xf32>
    %3 = tpu.matmul %1, %2, %cst {dimension_numbers = #tpu.dot_dimension_numbers<[1], [0], [0], [1], [0, 0, 1, 1], [], []>} : vector<32x21xbf16>, vector<21x21xbf16>, vector<32x21xf32> -> vector<32x21xf32>
    %c0_3 = arith.constant 0 : index
    %c0_4 = arith.constant 0 : index
    %4 = vector.load %arg3[%c0_3, %c0_4] : memref<1x21xf32, #tpu.memory_space<vmem>>, vector<1x21xf32>
    %5 = vector.broadcast %4 : vector<1x21xf32> to vector<32x21xf32>
    %6 = arith.addf %3, %5 : vector<32x21xf32>
    %cst_5 = arith.constant 0.000000e+00 : f32
    %7 = vector.broadcast %cst_5 : f32 to vector<32x21xf32>
    %8 = arith.cmpf oge, %6, %7 : vector<32x21xf32>
    %cst_6 = arith.constant 2.500000e-01 : f32
    %9 = vector.broadcast %cst_6 : f32 to vector<32x21xf32>
    %10 = arith.mulf %9, %6 : vector<32x21xf32>
    %11 = arith.select %8, %6, %10 : vector<32x21xi1>, vector<32x21xf32>
    %c0_7 = arith.constant 0 : index
    %c0_8 = arith.constant 0 : index
    %12 = vector.load %arg4[%c0_7, %c0_8] : memref<32x21xf32, #tpu.memory_space<vmem>>, vector<32x21xf32>
    tpu.vector_store %arg4[%c0_7, %c0_8], %11 {strides = array<i32>} : memref<32x21xf32, #tpu.memory_space<vmem>>, vector<32x21xf32>,
    return
  }
  func.func @transform_0(%arg0: i32) -> (i32, i32) {
    %c0_i32 = arith.constant 0 : i32
    %c0_i32_0 = arith.constant 0 : i32
    return %arg0, %c0_i32 : i32, i32
  }
  func.func @transform_1(%arg0: i32) -> (i32, i32) {
    %c0_i32 = arith.constant 0 : i32
    %c0_i32_0 = arith.constant 0 : i32
    %c0_i32_1 = arith.constant 0 : i32
    return %c0_i32, %c0_i32_0 : i32, i32
  }
  func.func @transform_2(%arg0: i32) -> (i32, i32) {
    %c0_i32 = arith.constant 0 : i32
    %c0_i32_0 = arith.constant 0 : i32
    %c0_i32_1 = arith.constant 0 : i32
    return %c0_i32, %c0_i32_0 : i32, i32
  }
  func.func @transform_3(%arg0: i32) -> (i32, i32) {
    %c0_i32 = arith.constant 0 : i32
    %c0_i32_0 = arith.constant 0 : i32
    return %arg0, %c0_i32 : i32, i32
  }
}

module attributes {stable_mosaic.version = 11 : i64} {
  func.func @_dense_kernel(%arg0: i32, %arg1: memref<128x21xf32, #tpu.memory_space<vmem>>, %arg2: memref<128x21xf32, #tpu.memory_space<vmem>>, %arg3: memref<21x32xbf16, #tpu.memory_space<vmem>>, %arg4: memref<21x32xbf16, #tpu.memory_space<vmem>>, %arg5: memref<1x32xf32, #tpu.memory_space<vmem>>, %arg6: memref<128x32xf32, #tpu.memory_space<vmem>>) attributes {dimension_semantics = [#tpu.dimension_semantics<parallel>], iteration_bounds = array<i64: 1>, scalar_prefetch = 0 : i64, scratch_operands = 0 : i64, tpu.core_type = #tpu.core_type<tc>, window_params = [{transform_indices = @transform_0, window_bounds = array<i64: 128, 21>}, {transform_indices = @transform_1, window_bounds = array<i64: 128, 21>}, {pipeline_mode = #tpu.pipeline_mode<synchronous>, transform_indices = @transform_2, window_bounds = array<i64: 21, 32>}, {pipeline_mode = #tpu.pipeline_mode<synchronous>, transform_indices = @transform_3, window_bounds = array<i64: 21, 32>}, {pipeline_mode = #tpu.pipeline_mode<synchronous>, transform_indices = @transform_4, window_bounds = array<i64: 1, 32>}, {transform_indices = @transform_5, window_bounds = array<i64: 128, 32>}]} {
    %c0 = arith.constant 0 : index
    %c0_0 = arith.constant 0 : index
    %0 = vector.load %arg1[%c0, %c0_0] : memref<128x21xf32, #tpu.memory_space<vmem>>, vector<128x21xf32>
    %1 = arith.truncf %0 : vector<128x21xf32> to vector<128x21xbf16>
    %c0_1 = arith.constant 0 : index
    %c0_2 = arith.constant 0 : index
    %2 = vector.load %arg3[%c0_1, %c0_2] : memref<21x32xbf16, #tpu.memory_space<vmem>>, vector<21x32xbf16>
    %cst = arith.constant dense<0.000000e+00> : vector<128x32xf32>
    %3 = tpu.matmul %1, %2, %cst {dimension_numbers = #tpu.dot_dimension_numbers<[1], [0], [0], [1], [0, 0, 1, 1], [], []>} : vector<128x21xbf16>, vector<21x32xbf16>, vector<128x32xf32> -> vector<128x32xf32>
    %c0_3 = arith.constant 0 : index
    %c0_4 = arith.constant 0 : index
    %4 = vector.load %arg2[%c0_3, %c0_4] : memref<128x21xf32, #tpu.memory_space<vmem>>, vector<128x21xf32>
    %5 = arith.truncf %4 : vector<128x21xf32> to vector<128x21xbf16>
    %c0_5 = arith.constant 0 : index
    %c0_6 = arith.constant 0 : index
    %6 = vector.load %arg4[%c0_5, %c0_6] : memref<21x32xbf16, #tpu.memory_space<vmem>>, vector<21x32xbf16>
    %cst_7 = arith.constant dense<0.000000e+00> : vector<128x32xf32>
    %7 = tpu.matmul %5, %6, %cst_7 {dimension_numbers = #tpu.dot_dimension_numbers<[1], [0], [0], [1], [0, 0, 1, 1], [], []>} : vector<128x21xbf16>, vector<21x32xbf16>, vector<128x32xf32> -> vector<128x32xf32>
    %8 = arith.addf %3, %7 : vector<128x32xf32>
    %c0_8 = arith.constant 0 : index
    %c0_9 = arith.constant 0 : index
    %9 = vector.load %arg5[%c0_8, %c0_9] : memref<1x32xf32, #tpu.memory_space<vmem>>, vector<1x32xf32>
    %10 = vector.broadcast %9 : vector<1x32xf32> to vector<128x32xf32>
    %11 = arith.addf %8, %10 : vector<128x32xf32>
    %cst_10 = arith.constant 0.000000e+00 : f32
    %12 = vector.broadcast %cst_10 : f32 to vector<128x32xf32>
    %13 = arith.cmpf oge, %11, %12 : vector<128x32xf32>
    %cst_11 = arith.constant 2.500000e-01 : f32
    %14 = vector.broadcast %cst_11 : f32 to vector<128x32xf32>
    %15 = arith.mulf %14, %11 : vector<128x32xf32>
    %16 = arith.select %13, %11, %15 : vector<128x32xi1>, vector<128x32xf32>
    %c0_12 = arith.constant 0 : index
    %c0_13 = arith.constant 0 : index
    %17 = vector.load %arg6[%c0_12, %c0_13] : memref<128x32xf32, #tpu.memory_space<vmem>>, vector<128x32xf32>
    tpu.vector_store %arg6[%c0_12, %c0_13], %16 {strides = array<i32>} : memref<128x32xf32, #tpu.memory_space<vmem>>, vector<128x32xf32>,
    return
  }
  func.func @transform_0(%arg0: i32) -> (i32, i32) {
    %c0_i32 = arith.constant 0 : i32
    %c0_i32_0 = arith.constant 0 : i32
    return %arg0, %c0_i32 : i32, i32
  }
  func.func @transform_1(%arg0: i32) -> (i32, i32) {
    %c0_i32 = arith.constant 0 : i32
    %c0_i32_0 = arith.constant 0 : i32
    return %arg0, %c0_i32 : i32, i32
  }
  func.func @transform_2(%arg0: i32) -> (i32, i32) {
    %c0_i32 = arith.constant 0 : i32
    %c0_i32_0 = arith.constant 0 : i32
    %c0_i32_1 = arith.constant 0 : i32
    return %c0_i32, %c0_i32_0 : i32, i32
  }
  func.func @transform_3(%arg0: i32) -> (i32, i32) {
    %c0_i32 = arith.constant 0 : i32
    %c0_i32_0 = arith.constant 0 : i32
    %c0_i32_1 = arith.constant 0 : i32
    return %c0_i32, %c0_i32_0 : i32, i32
  }
  func.func @transform_4(%arg0: i32) -> (i32, i32) {
    %c0_i32 = arith.constant 0 : i32
    %c0_i32_0 = arith.constant 0 : i32
    %c0_i32_1 = arith.constant 0 : i32
    return %c0_i32, %c0_i32_0 : i32, i32
  }
  func.func @transform_5(%arg0: i32) -> (i32, i32) {
    %c0_i32 = arith.constant 0 : i32
    %c0_i32_0 = arith.constant 0 : i32
    return %arg0, %c0_i32 : i32, i32
  }
}

module attributes {stable_mosaic.version = 11 : i64} {
  func.func @_groupnorm_kernel(%arg0: i32, %arg1: memref<16x8x32xf32, #tpu.memory_space<vmem>>, %arg2: memref<16x8x32xf32, #tpu.memory_space<vmem>>, %arg3: memref<1x32xf32, #tpu.memory_space<vmem>>, %arg4: memref<1x32xf32, #tpu.memory_space<vmem>>, %arg5: memref<16x8x32xf32, #tpu.memory_space<vmem>>) attributes {dimension_semantics = [#tpu.dimension_semantics<parallel>], iteration_bounds = array<i64: 1>, scalar_prefetch = 0 : i64, scratch_operands = 0 : i64, tpu.core_type = #tpu.core_type<tc>, window_params = [{transform_indices = @transform_0, window_bounds = array<i64: 16, 8, 32>}, {transform_indices = @transform_1, window_bounds = array<i64: 16, 8, 32>}, {pipeline_mode = #tpu.pipeline_mode<synchronous>, transform_indices = @transform_2, window_bounds = array<i64: 1, 32>}, {pipeline_mode = #tpu.pipeline_mode<synchronous>, transform_indices = @transform_3, window_bounds = array<i64: 1, 32>}, {transform_indices = @transform_4, window_bounds = array<i64: 16, 8, 32>}]} {
    %c0 = arith.constant 0 : index
    %c0_0 = arith.constant 0 : index
    %c0_1 = arith.constant 0 : index
    %0 = vector.load %arg1[%c0, %c0_0, %c0_1] : memref<16x8x32xf32, #tpu.memory_space<vmem>>, vector<16x8x32xf32>
    %cst = arith.constant dense<0.000000e+00> : vector<16x8xf32>
    %1 = vector.multi_reduction <add>, %0, %cst [2] : vector<16x8x32xf32> to vector<16x8xf32>
    %2 = vector.shape_cast %1 : vector<16x8xf32> to vector<16x8x1xf32>
    %cst_2 = arith.constant dense<0.000000e+00> : vector<8x1xf32>
    %3 = vector.multi_reduction <add>, %2, %cst_2 [0] : vector<16x8x1xf32> to vector<8x1xf32>
    %4 = vector.shape_cast %3 : vector<8x1xf32> to vector<1x8x1xf32>
    %cst_3 = arith.constant 0.001953125 : f32
    %5 = vector.broadcast %cst_3 : f32 to vector<1x8x1xf32>
    %6 = arith.mulf %4, %5 : vector<1x8x1xf32>
    %7 = vector.broadcast %6 : vector<1x8x1xf32> to vector<16x8x32xf32>
    %8 = arith.subf %0, %7 : vector<16x8x32xf32>
    %9 = arith.mulf %8, %8 : vector<16x8x32xf32>
    %cst_4 = arith.constant dense<0.000000e+00> : vector<16x8xf32>
    %10 = vector.multi_reduction <add>, %9, %cst_4 [2] : vector<16x8x32xf32> to vector<16x8xf32>
    %11 = vector.shape_cast %10 : vector<16x8xf32> to vector<16x8x1xf32>
    %cst_5 = arith.constant dense<0.000000e+00> : vector<8x1xf32>
    %12 = vector.multi_reduction <add>, %11, %cst_5 [0] : vector<16x8x1xf32> to vector<8x1xf32>
    %13 = vector.shape_cast %12 : vector<8x1xf32> to vector<1x8x1xf32>
    %cst_6 = arith.constant 0.001953125 : f32
    %14 = vector.broadcast %cst_6 : f32 to vector<1x8x1xf32>
    %15 = arith.mulf %13, %14 : vector<1x8x1xf32>
    %cst_7 = arith.constant 9.99999974E-6 : f32
    %16 = vector.broadcast %cst_7 : f32 to vector<1x8x1xf32>
    %17 = arith.addf %15, %16 : vector<1x8x1xf32>
    %18 = math.rsqrt %17 : vector<1x8x1xf32>
    %19 = vector.broadcast %18 : vector<1x8x1xf32> to vector<16x8x32xf32>
    %20 = arith.mulf %8, %19 : vector<16x8x32xf32>
    %c0_8 = arith.constant 0 : index
    %c0_9 = arith.constant 0 : index
    %21 = vector.load %arg3[%c0_8, %c0_9] : memref<1x32xf32, #tpu.memory_space<vmem>>, vector<1x32xf32>
    %22 = vector.shape_cast %21 : vector<1x32xf32> to vector<1x1x32xf32>
    %23 = vector.broadcast %22 : vector<1x1x32xf32> to vector<16x8x32xf32>
    %24 = arith.mulf %20, %23 : vector<16x8x32xf32>
    %c0_10 = arith.constant 0 : index
    %c0_11 = arith.constant 0 : index
    %25 = vector.load %arg4[%c0_10, %c0_11] : memref<1x32xf32, #tpu.memory_space<vmem>>, vector<1x32xf32>
    %26 = vector.shape_cast %25 : vector<1x32xf32> to vector<1x1x32xf32>
    %27 = vector.broadcast %26 : vector<1x1x32xf32> to vector<16x8x32xf32>
    %28 = arith.addf %24, %27 : vector<16x8x32xf32>
    %c0_12 = arith.constant 0 : index
    %c0_13 = arith.constant 0 : index
    %c0_14 = arith.constant 0 : index
    %29 = vector.load %arg2[%c0_12, %c0_13, %c0_14] : memref<16x8x32xf32, #tpu.memory_space<vmem>>, vector<16x8x32xf32>
    %30 = arith.addf %28, %29 : vector<16x8x32xf32>
    %c0_15 = arith.constant 0 : index
    %c0_16 = arith.constant 0 : index
    %c0_17 = arith.constant 0 : index
    %31 = vector.load %arg5[%c0_15, %c0_16, %c0_17] : memref<16x8x32xf32, #tpu.memory_space<vmem>>, vector<16x8x32xf32>
    tpu.vector_store %arg5[%c0_15, %c0_16, %c0_17], %30 {strides = array<i32>} : memref<16x8x32xf32, #tpu.memory_space<vmem>>, vector<16x8x32xf32>,
    return
  }
  func.func @transform_0(%arg0: i32) -> (i32, i32, i32) {
    %c0_i32 = arith.constant 0 : i32
    %c0_i32_0 = arith.constant 0 : i32
    %c0_i32_1 = arith.constant 0 : i32
    return %c0_i32, %arg0, %c0_i32_0 : i32, i32, i32
  }
  func.func @transform_1(%arg0: i32) -> (i32, i32, i32) {
    %c0_i32 = arith.constant 0 : i32
    %c0_i32_0 = arith.constant 0 : i32
    %c0_i32_1 = arith.constant 0 : i32
    return %c0_i32, %arg0, %c0_i32_0 : i32, i32, i32
  }
  func.func @transform_2(%arg0: i32) -> (i32, i32) {
    %c0_i32 = arith.constant 0 : i32
    %c0_i32_0 = arith.constant 0 : i32
    %c0_i32_1 = arith.constant 0 : i32
    return %c0_i32, %c0_i32_0 : i32, i32
  }
  func.func @transform_3(%arg0: i32) -> (i32, i32) {
    %c0_i32 = arith.constant 0 : i32
    %c0_i32_0 = arith.constant 0 : i32
    %c0_i32_1 = arith.constant 0 : i32
    return %c0_i32, %c0_i32_0 : i32, i32
  }
  func.func @transform_4(%arg0: i32) -> (i32, i32, i32) {
    %c0_i32 = arith.constant 0 : i32
    %c0_i32_0 = arith.constant 0 : i32
    %c0_i32_1 = arith.constant 0 : i32
    return %c0_i32, %arg0, %c0_i32_0 : i32, i32, i32
  }
}

module attributes {stable_mosaic.version = 11 : i64} {
  func.func @_gru_inproj_kernel(%arg0: i32, %arg1: memref<128x32xf32, #tpu.memory_space<vmem>>, %arg2: memref<32x32xbf16, #tpu.memory_space<vmem>>, %arg3: memref<32x32xbf16, #tpu.memory_space<vmem>>, %arg4: memref<32x32xbf16, #tpu.memory_space<vmem>>, %arg5: memref<1x32xf32, #tpu.memory_space<vmem>>, %arg6: memref<1x32xf32, #tpu.memory_space<vmem>>, %arg7: memref<1x32xf32, #tpu.memory_space<vmem>>, %arg8: memref<128x32xf32, #tpu.memory_space<vmem>>, %arg9: memref<128x32xf32, #tpu.memory_space<vmem>>, %arg10: memref<128x32xf32, #tpu.memory_space<vmem>>) attributes {dimension_semantics = [#tpu.dimension_semantics<parallel>], iteration_bounds = array<i64: 1>, scalar_prefetch = 0 : i64, scratch_operands = 0 : i64, tpu.core_type = #tpu.core_type<tc>, window_params = [{transform_indices = @transform_0, window_bounds = array<i64: 128, 32>}, {pipeline_mode = #tpu.pipeline_mode<synchronous>, transform_indices = @transform_1, window_bounds = array<i64: 32, 32>}, {pipeline_mode = #tpu.pipeline_mode<synchronous>, transform_indices = @transform_2, window_bounds = array<i64: 32, 32>}, {pipeline_mode = #tpu.pipeline_mode<synchronous>, transform_indices = @transform_3, window_bounds = array<i64: 32, 32>}, {pipeline_mode = #tpu.pipeline_mode<synchronous>, transform_indices = @transform_4, window_bounds = array<i64: 1, 32>}, {pipeline_mode = #tpu.pipeline_mode<synchronous>, transform_indices = @transform_5, window_bounds = array<i64: 1, 32>}, {pipeline_mode = #tpu.pipeline_mode<synchronous>, transform_indices = @transform_6, window_bounds = array<i64: 1, 32>}, {transform_indices = @transform_7, window_bounds = array<i64: 128, 32>}, {transform_indices = @transform_8, window_bounds = array<i64: 128, 32>}, {transform_indices = @transform_9, window_bounds = array<i64: 128, 32>}]} {
    %c0 = arith.constant 0 : index
    %c0_0 = arith.constant 0 : index
    %0 = vector.load %arg1[%c0, %c0_0] : memref<128x32xf32, #tpu.memory_space<vmem>>, vector<128x32xf32>
    %1 = arith.truncf %0 : vector<128x32xf32> to vector<128x32xbf16>
    %c0_1 = arith.constant 0 : index
    %c0_2 = arith.constant 0 : index
    %2 = vector.load %arg2[%c0_1, %c0_2] : memref<32x32xbf16, #tpu.memory_space<vmem>>, vector<32x32xbf16>
    %cst = arith.constant dense<0.000000e+00> : vector<128x32xf32>
    %3 = tpu.matmul %1, %2, %cst {dimension_numbers = #tpu.dot_dimension_numbers<[1], [0], [0], [1], [0, 0, 1, 1], [], []>} : vector<128x32xbf16>, vector<32x32xbf16>, vector<128x32xf32> -> vector<128x32xf32>
    %c0_3 = arith.constant 0 : index
    %c0_4 = arith.constant 0 : index
    %4 = vector.load %arg5[%c0_3, %c0_4] : memref<1x32xf32, #tpu.memory_space<vmem>>, vector<1x32xf32>
    %5 = vector.broadcast %4 : vector<1x32xf32> to vector<128x32xf32>
    %6 = arith.addf %3, %5 : vector<128x32xf32>
    %c0_5 = arith.constant 0 : index
    %c0_6 = arith.constant 0 : index
    %7 = vector.load %arg8[%c0_5, %c0_6] : memref<128x32xf32, #tpu.memory_space<vmem>>, vector<128x32xf32>
    tpu.vector_store %arg8[%c0_5, %c0_6], %6 {strides = array<i32>} : memref<128x32xf32, #tpu.memory_space<vmem>>, vector<128x32xf32>,
    %c0_7 = arith.constant 0 : index
    %c0_8 = arith.constant 0 : index
    %8 = vector.load %arg3[%c0_7, %c0_8] : memref<32x32xbf16, #tpu.memory_space<vmem>>, vector<32x32xbf16>
    %cst_9 = arith.constant dense<0.000000e+00> : vector<128x32xf32>
    %9 = tpu.matmul %1, %8, %cst_9 {dimension_numbers = #tpu.dot_dimension_numbers<[1], [0], [0], [1], [0, 0, 1, 1], [], []>} : vector<128x32xbf16>, vector<32x32xbf16>, vector<128x32xf32> -> vector<128x32xf32>
    %c0_10 = arith.constant 0 : index
    %c0_11 = arith.constant 0 : index
    %10 = vector.load %arg6[%c0_10, %c0_11] : memref<1x32xf32, #tpu.memory_space<vmem>>, vector<1x32xf32>
    %11 = vector.broadcast %10 : vector<1x32xf32> to vector<128x32xf32>
    %12 = arith.addf %9, %11 : vector<128x32xf32>
    %c0_12 = arith.constant 0 : index
    %c0_13 = arith.constant 0 : index
    %13 = vector.load %arg9[%c0_12, %c0_13] : memref<128x32xf32, #tpu.memory_space<vmem>>, vector<128x32xf32>
    tpu.vector_store %arg9[%c0_12, %c0_13], %12 {strides = array<i32>} : memref<128x32xf32, #tpu.memory_space<vmem>>, vector<128x32xf32>,
    %c0_14 = arith.constant 0 : index
    %c0_15 = arith.constant 0 : index
    %14 = vector.load %arg4[%c0_14, %c0_15] : memref<32x32xbf16, #tpu.memory_space<vmem>>, vector<32x32xbf16>
    %cst_16 = arith.constant dense<0.000000e+00> : vector<128x32xf32>
    %15 = tpu.matmul %1, %14, %cst_16 {dimension_numbers = #tpu.dot_dimension_numbers<[1], [0], [0], [1], [0, 0, 1, 1], [], []>} : vector<128x32xbf16>, vector<32x32xbf16>, vector<128x32xf32> -> vector<128x32xf32>
    %c0_17 = arith.constant 0 : index
    %c0_18 = arith.constant 0 : index
    %16 = vector.load %arg7[%c0_17, %c0_18] : memref<1x32xf32, #tpu.memory_space<vmem>>, vector<1x32xf32>
    %17 = vector.broadcast %16 : vector<1x32xf32> to vector<128x32xf32>
    %18 = arith.addf %15, %17 : vector<128x32xf32>
    %c0_19 = arith.constant 0 : index
    %c0_20 = arith.constant 0 : index
    %19 = vector.load %arg10[%c0_19, %c0_20] : memref<128x32xf32, #tpu.memory_space<vmem>>, vector<128x32xf32>
    tpu.vector_store %arg10[%c0_19, %c0_20], %18 {strides = array<i32>} : memref<128x32xf32, #tpu.memory_space<vmem>>, vector<128x32xf32>,
    return
  }
  func.func @transform_0(%arg0: i32) -> (i32, i32) {
    %c0_i32 = arith.constant 0 : i32
    %c0_i32_0 = arith.constant 0 : i32
    return %arg0, %c0_i32 : i32, i32
  }
  func.func @transform_1(%arg0: i32) -> (i32, i32) {
    %c0_i32 = arith.constant 0 : i32
    %c0_i32_0 = arith.constant 0 : i32
    %c0_i32_1 = arith.constant 0 : i32
    return %c0_i32, %c0_i32_0 : i32, i32
  }
  func.func @transform_2(%arg0: i32) -> (i32, i32) {
    %c0_i32 = arith.constant 0 : i32
    %c0_i32_0 = arith.constant 0 : i32
    %c0_i32_1 = arith.constant 0 : i32
    return %c0_i32, %c0_i32_0 : i32, i32
  }
  func.func @transform_3(%arg0: i32) -> (i32, i32) {
    %c0_i32 = arith.constant 0 : i32
    %c0_i32_0 = arith.constant 0 : i32
    %c0_i32_1 = arith.constant 0 : i32
    return %c0_i32, %c0_i32_0 : i32, i32
  }
  func.func @transform_4(%arg0: i32) -> (i32, i32) {
    %c0_i32 = arith.constant 0 : i32
    %c0_i32_0 = arith.constant 0 : i32
    %c0_i32_1 = arith.constant 0 : i32
    return %c0_i32, %c0_i32_0 : i32, i32
  }
  func.func @transform_5(%arg0: i32) -> (i32, i32) {
    %c0_i32 = arith.constant 0 : i32
    %c0_i32_0 = arith.constant 0 : i32
    %c0_i32_1 = arith.constant 0 : i32
    return %c0_i32, %c0_i32_0 : i32, i32
  }
  func.func @transform_6(%arg0: i32) -> (i32, i32) {
    %c0_i32 = arith.constant 0 : i32
    %c0_i32_0 = arith.constant 0 : i32
    %c0_i32_1 = arith.constant 0 : i32
    return %c0_i32, %c0_i32_0 : i32, i32
  }
  func.func @transform_7(%arg0: i32) -> (i32, i32) {
    %c0_i32 = arith.constant 0 : i32
    %c0_i32_0 = arith.constant 0 : i32
    return %arg0, %c0_i32 : i32, i32
  }
  func.func @transform_8(%arg0: i32) -> (i32, i32) {
    %c0_i32 = arith.constant 0 : i32
    %c0_i32_0 = arith.constant 0 : i32
    return %arg0, %c0_i32 : i32, i32
  }
  func.func @transform_9(%arg0: i32) -> (i32, i32) {
    %c0_i32 = arith.constant 0 : i32
    %c0_i32_0 = arith.constant 0 : i32
    return %arg0, %c0_i32 : i32, i32
  }
}

module attributes {stable_mosaic.version = 11 : i64} {
  func.func @_dense_kernel(%arg0: i32, %arg1: memref<128x32xf32, #tpu.memory_space<vmem>>, %arg2: memref<32x16xbf16, #tpu.memory_space<vmem>>, %arg3: memref<1x16xf32, #tpu.memory_space<vmem>>, %arg4: memref<128x16xf32, #tpu.memory_space<vmem>>) attributes {dimension_semantics = [#tpu.dimension_semantics<parallel>], iteration_bounds = array<i64: 1>, scalar_prefetch = 0 : i64, scratch_operands = 0 : i64, tpu.core_type = #tpu.core_type<tc>, window_params = [{transform_indices = @transform_0, window_bounds = array<i64: 128, 32>}, {pipeline_mode = #tpu.pipeline_mode<synchronous>, transform_indices = @transform_1, window_bounds = array<i64: 32, 16>}, {pipeline_mode = #tpu.pipeline_mode<synchronous>, transform_indices = @transform_2, window_bounds = array<i64: 1, 16>}, {transform_indices = @transform_3, window_bounds = array<i64: 128, 16>}]} {
    %c0 = arith.constant 0 : index
    %c0_0 = arith.constant 0 : index
    %0 = vector.load %arg1[%c0, %c0_0] : memref<128x32xf32, #tpu.memory_space<vmem>>, vector<128x32xf32>
    %1 = arith.truncf %0 : vector<128x32xf32> to vector<128x32xbf16>
    %c0_1 = arith.constant 0 : index
    %c0_2 = arith.constant 0 : index
    %2 = vector.load %arg2[%c0_1, %c0_2] : memref<32x16xbf16, #tpu.memory_space<vmem>>, vector<32x16xbf16>
    %cst = arith.constant dense<0.000000e+00> : vector<128x16xf32>
    %3 = tpu.matmul %1, %2, %cst {dimension_numbers = #tpu.dot_dimension_numbers<[1], [0], [0], [1], [0, 0, 1, 1], [], []>} : vector<128x32xbf16>, vector<32x16xbf16>, vector<128x16xf32> -> vector<128x16xf32>
    %c0_3 = arith.constant 0 : index
    %c0_4 = arith.constant 0 : index
    %4 = vector.load %arg3[%c0_3, %c0_4] : memref<1x16xf32, #tpu.memory_space<vmem>>, vector<1x16xf32>
    %5 = vector.broadcast %4 : vector<1x16xf32> to vector<128x16xf32>
    %6 = arith.addf %3, %5 : vector<128x16xf32>
    %7 = math.tanh %6 : vector<128x16xf32>
    %c0_5 = arith.constant 0 : index
    %c0_6 = arith.constant 0 : index
    %8 = vector.load %arg4[%c0_5, %c0_6] : memref<128x16xf32, #tpu.memory_space<vmem>>, vector<128x16xf32>
    tpu.vector_store %arg4[%c0_5, %c0_6], %7 {strides = array<i32>} : memref<128x16xf32, #tpu.memory_space<vmem>>, vector<128x16xf32>,
    return
  }
  func.func @transform_0(%arg0: i32) -> (i32, i32) {
    %c0_i32 = arith.constant 0 : i32
    %c0_i32_0 = arith.constant 0 : i32
    return %arg0, %c0_i32 : i32, i32
  }
  func.func @transform_1(%arg0: i32) -> (i32, i32) {
    %c0_i32 = arith.constant 0 : i32
    %c0_i32_0 = arith.constant 0 : i32
    %c0_i32_1 = arith.constant 0 : i32
    return %c0_i32, %c0_i32_0 : i32, i32
  }
  func.func @transform_2(%arg0: i32) -> (i32, i32) {
    %c0_i32 = arith.constant 0 : i32
    %c0_i32_0 = arith.constant 0 : i32
    %c0_i32_1 = arith.constant 0 : i32
    return %c0_i32, %c0_i32_0 : i32, i32
  }
  func.func @transform_3(%arg0: i32) -> (i32, i32) {
    %c0_i32 = arith.constant 0 : i32
    %c0_i32_0 = arith.constant 0 : i32
    return %arg0, %c0_i32 : i32, i32
  }
}

</mosaic_0001>

<bundles_post_ra>
// kernel: _lambda_.15
= control target key start
LH: loop header
LB: loop body
LE: loop exit
PB: predicated region body
PF: predicated region fallthrough
CT: control target
= control target key end

     0   :  { %vm54_vm0 = vcmask 130048   ;;  %vm224_vm1 = vcmask 392192   ;;  %s449_s1 = inlined_call_operand.vmem [shape: bf16[16,48], index: 1, kind: input, shape index: {}]   ;;  %s450_s0 = inlined_call_operand.vmem [shape: f32[128,16], index: 0, kind: input, shape index: {}]   ;;  %s451_s2 = inlined_call_operand.vmem [shape: f32[1,48], index: 2, kind: input, shape index: {}]   ;;  %s452_s3 = inlined_call_operand.vmem [shape: f32[128,48], index: 3, kind: output, shape index: {}]  }
   0x1   :  { %v284_v0 = vld [vmem:[%s449_s1] sm:$0xff]   ;;  %v16_v2 = vld [vmem:[%s450_s0 + $0x8] sm:$0xff]  ;;  %v17_v6 = vld [vmem:[%s450_s0 + $0x10] sm:$0xff] }
   0x2   :  { %v15_v1 = vld [vmem:[%s450_s0] sm:$0xff]  ;;  %264 = vmatprep.subr.bf16.mxu0 %v284_v0  ;;  %282 = vmatprep.subr.bf16.mxu1 %v284_v0  ;;  %v24_v5 = vld [vmem:[%s450_s0 + $0x48] sm:$0xff]  ;;  %v18_v7 = vld [vmem:[%s450_s0 + $0x18] sm:$0xff] }
   0x3   :  { %v23_v3 = vld [vmem:[%s450_s0 + $0x40] sm:$0xff]  ;;  %v31_v4 = vpack.c.bf16 %v16_v2, %v15_v1  ;;  %265 = vmatpush3.bf16.msra.mxu0 %v284_v0  ;;  %283 = vmatpush3.bf16.msra.mxu1 %v284_v0  ;;  %v32_v9 = vpack.c.bf16 %v18_v7, %v17_v6  ;;  %v25_v10 = vld [vmem:[%s450_s0 + $0x50] sm:$0xff]  ;;  %v26_v11 = vld [vmem:[%s450_s0 + $0x58] sm:$0xff] }
   0x4   :  { %v35_v8 = vpack.c.bf16 %v24_v5, %v23_v3  ;;  %v19_v12 = vld [vmem:[%s450_s0 + $0x20] sm:$0xff]  ;;  %v36_v13 = vpack.c.bf16 %v26_v11, %v25_v10  ;;  %v20_v14 = vld [vmem:[%s450_s0 + $0x28] sm:$0xff]  ;;  %v21_v19 = vld [vmem:[%s450_s0 + $0x30] sm:$0xff] }
   0x5   :  { %266 = vmatprep.mubr.msk.bf16.mxu0 %vm54_vm0, %v31_v4  ;;  %v27_v15 = vld [vmem:[%s450_s0 + $0x60] sm:$0xff]  ;;  %v28_v16 = vld [vmem:[%s450_s0 + $0x68] sm:$0xff]  ;;  %v33_v17 = vpack.c.bf16 %v20_v14, %v19_v12  ;;  %v22_v20 = vld [vmem:[%s450_s0 + $0x38] sm:$0xff] }
   0x6   :  { %274 = vmatprep.mubr.msk.bf16.mxu1 %vm54_vm0, %v35_v8  ;;  %v37_v18 = vpack.c.bf16 %v28_v16, %v27_v15  ;;  %267 = vmatmul.mubr.msk.bf16.vlgmr.msra.gmra.mxu0 %vm54_vm0, %v32_v9  ;;  %v29_v21 = vld [vmem:[%s450_s0 + $0x70] sm:$0xff]  ;;  %v30_v22 = vld [vmem:[%s450_s0 + $0x78] sm:$0xff]  ;;  %v34_v23 = vpack.c.bf16 %v22_v20, %v21_v19  ;;  %v367_v25 = vld [vmem:[%s451_s2] ss:$0 sm:$0xff] }
   0x7   :  { %275 = vmatmul.mubr.msk.bf16.vlgmr.msra.gmra.mxu1 %vm54_vm0, %v36_v13  ;;  %270 = vmatprep.mubr.msk.bf16.mxu0 %vm54_vm0, %v33_v17  ;;  %v38_v24 = vpack.c.bf16 %v30_v22, %v29_v21 }
   0x8   :  { %278 = vmatprep.mubr.msk.bf16.mxu1 %vm54_vm0, %v37_v18 }
   0xe   :  { %271 = vmatmul.mubr.msk.bf16.gmra.mxu0 %vm54_vm0, %v34_v23 }
   0xf   :  { %279 = vmatmul.mubr.msk.bf16.gmra.mxu1 %vm54_vm0, %v38_v24 }
  0xc6   :  { %v268_v26 = vpop.f32.mrf.mxu0 }
  0xc7   :  { %v276_v27 = vpop.f32.mrf.mxu1  ;;  %v122_v28 = vadd.f32 %v268_v26, %v367_v25 }
  0xc8   :  { %v154_v29 = vadd.f32 %v276_v27, %v367_v25  ;;  %v113_v30 = vpop.f32.mrf.mxu0 }
  0xc9   :  { %v145_v31 = vpop.f32.mrf.mxu1  ;;  %vm178_vm2 = vcmp.ge.f32.partialorder %v122_v28, 0.0  ;;  %v194_v32 = vmul.f32 0.25, %v122_v28  ;;  %v114_v34 = vadd.f32 %v367_v25, %v113_v30 }
  0xca   :  { %vm186_vm3 = vcmp.ge.f32.partialorder %v154_v29, 0.0  ;;  %v202_v33 = vmul.f32 0.25, %v154_v29  ;;  %v146_v35 = vadd.f32 %v367_v25, %v145_v31  ;;  %v269_v36 = vpop.f32.mrf.mxu0 }
  0xcb   :  { %v277_v37 = vpop.f32.mrf.mxu1  ;;  %v210_v38 = vsel %vm178_vm2, %v122_v28, %v194_v32  ;;  %v125_v40 = vadd.f32 %v269_v36, %v367_v25  ;;  %vm176_vm4 = vcmp.ge.f32.partialorder %v114_v34, 0.0  ;;  %v192_v42 = vmul.f32 0.25, %v114_v34 }
  0xcc   :  { %v218_v39 = vsel %vm186_vm3, %v154_v29, %v202_v33  ;;  %v157_v41 = vadd.f32 %v277_v37, %v367_v25  ;;  %227 = vst.msk [vmem:[%s452_s3 + $0x10] sm:$0xff] %vm224_vm1, %v210_v38  ;;  %vm184_vm5 = vcmp.ge.f32.partialorder %v146_v35, 0.0  ;;  %v200_v43 = vmul.f32 0.25, %v146_v35  ;;  %v116_v44 = vpop.f32.mrf.mxu0 }
  0xcd   :  { %235 = vst.msk [vmem:[%s452_s3 + $0x50] sm:$0xff] %vm224_vm1, %v218_v39  ;;  %v148_v45 = vpop.f32.mrf.mxu1  ;;  %vm179_vm6 = vcmp.ge.f32.partialorder %v125_v40, 0.0  ;;  %v195_v46 = vmul.f32 0.25, %v125_v40  ;;  %v208_v48 = vsel %vm176_vm4, %v114_v34, %v192_v42  ;;  %v117_v50 = vadd.f32 %v367_v25, %v116_v44 }
  0xce   :  { %vm187_vm7 = vcmp.ge.f32.partialorder %v157_v41, 0.0  ;;  %v203_v47 = vmul.f32 0.25, %v157_v41  ;;  %v216_v49 = vsel %vm184_vm5, %v146_v35, %v200_v43  ;;  %v149_v51 = vadd.f32 %v367_v25, %v148_v45  ;;  %v272_v52 = vpop.f32.mrf.mxu0  ;;  %225 = vst.msk [vmem:[%s452_s3] sm:$0xff] %vm224_vm1, %v208_v48 }
  0xcf   :  { %v280_v53 = vpop.f32.mrf.mxu1  ;;  %233 = vst.msk [vmem:[%s452_s3 + $0x40] sm:$0xff] %vm224_vm1, %v216_v49  ;;  %v211_v54 = vsel %vm179_vm6, %v125_v40, %v195_v46  ;;  %v138_v56 = vadd.f32 %v272_v52, %v367_v25  ;;  %vm177_vm8 = vcmp.ge.f32.partialorder %v117_v50, 0.0  ;;  %v193_v58 = vmul.f32 0.25, %v117_v50 }
  0xd0   :  { %v219_v55 = vsel %vm187_vm7, %v157_v41, %v203_v47  ;;  %v170_v57 = vadd.f32 %v280_v53, %v367_v25  ;;  %228 = vst.msk [vmem:[%s452_s3 + $0x18] sm:$0xff] %vm224_vm1, %v211_v54  ;;  %vm185_vm9 = vcmp.ge.f32.partialorder %v149_v51, 0.0  ;;  %v201_v59 = vmul.f32 0.25, %v149_v51  ;;  %v129_v60 = vpop.f32.mrf.mxu0 }
  0xd1   :  { %236 = vst.msk [vmem:[%s452_s3 + $0x58] sm:$0xff] %vm224_vm1, %v219_v55  ;;  %v161_v61 = vpop.f32.mrf.mxu1  ;;  %vm182_vm10 = vcmp.ge.f32.partialorder %v138_v56, 0.0  ;;  %v198_v62 = vmul.f32 0.25, %v138_v56  ;;  %v209_v0 = vsel %vm177_vm8, %v117_v50, %v193_v58  ;;  %v130_v2 = vadd.f32 %v367_v25, %v129_v60 }
  0xd2   :  { %vm190_vm11 = vcmp.ge.f32.partialorder %v170_v57, 0.0  ;;  %v206_v63 = vmul.f32 0.25, %v170_v57  ;;  %v217_v1 = vsel %vm185_vm9, %v149_v51, %v201_v59  ;;  %v162_v3 = vadd.f32 %v367_v25, %v161_v61  ;;  %v273_v4 = vpop.f32.mrf.mxu0  ;;  %226 = vst.msk [vmem:[%s452_s3 + $0x8] sm:$0xff] %vm224_vm1, %v209_v0 }
  0xd3   :  { %v281_v5 = vpop.f32.mrf.mxu1  ;;  %234 = vst.msk [vmem:[%s452_s3 + $0x48] sm:$0xff] %vm224_vm1, %v217_v1  ;;  %v214_v6 = vsel %vm182_vm10, %v138_v56, %v198_v62  ;;  %v141_v8 = vadd.f32 %v273_v4, %v367_v25  ;;  %vm180_vm12 = vcmp.ge.f32.partialorder %v130_v2, 0.0  ;;  %v196_v10 = vmul.f32 0.25, %v130_v2 }
  0xd4   :  { %v222_v7 = vsel %vm190_vm11, %v170_v57, %v206_v63  ;;  %v173_v9 = vadd.f32 %v281_v5, %v367_v25  ;;  %231 = vst.msk [vmem:[%s452_s3 + $0x30] sm:$0xff] %vm224_vm1, %v214_v6  ;;  %vm188_vm13 = vcmp.ge.f32.partialorder %v162_v3, 0.0  ;;  %v204_v11 = vmul.f32 0.25, %v162_v3  ;;  %v132_v12 = vpop.f32.mrf.mxu0 }
  0xd5   :  { %239 = vst.msk [vmem:[%s452_s3 + $0x70] sm:$0xff] %vm224_vm1, %v222_v7  ;;  %v164_v13 = vpop.f32.mrf.mxu1  ;;  %vm183_vm14 = vcmp.ge.f32.partialorder %v141_v8, 0.0  ;;  %v199_v14 = vmul.f32 0.25, %v141_v8  ;;  %v212_v16 = vsel %vm180_vm12, %v130_v2, %v196_v10  ;;  %v133_v18 = vadd.f32 %v367_v25, %v132_v12 }
  0xd6   :  { %vm191_vm15 = vcmp.ge.f32.partialorder %v173_v9, 0.0  ;;  %v207_v15 = vmul.f32 0.25, %v173_v9  ;;  %v220_v17 = vsel %vm188_vm13, %v162_v3, %v204_v11  ;;  %v165_v19 = vadd.f32 %v367_v25, %v164_v13  ;;  %229 = vst.msk [vmem:[%s452_s3 + $0x20] sm:$0xff] %vm224_vm1, %v212_v16 }
  0xd7   :  { %237 = vst.msk [vmem:[%s452_s3 + $0x60] sm:$0xff] %vm224_vm1, %v220_v17  ;;  %v215_v20 = vsel %vm183_vm14, %v141_v8, %v199_v14  ;;  %vm181_vm0 = vcmp.ge.f32.partialorder %v133_v18, 0.0  ;;  %v197_v22 = vmul.f32 0.25, %v133_v18 }
  0xd8   :  { %v223_v21 = vsel %vm191_vm15, %v173_v9, %v207_v15  ;;  %232 = vst.msk [vmem:[%s452_s3 + $0x38] sm:$0xff] %vm224_vm1, %v215_v20  ;;  %vm189_vm2 = vcmp.ge.f32.partialorder %v165_v19, 0.0  ;;  %v205_v23 = vmul.f32 0.25, %v165_v19 }
  0xd9   :  { %240 = vst.msk [vmem:[%s452_s3 + $0x78] sm:$0xff] %vm224_vm1, %v223_v21  ;;  %v213_v24 = vsel %vm181_vm0, %v133_v18, %v197_v22 }
  0xda   :  { %v221_v25 = vsel %vm189_vm2, %v165_v19, %v205_v23  ;;  %230 = vst.msk [vmem:[%s452_s3 + $0x28] sm:$0xff] %vm224_vm1, %v213_v24 }
  0xdb   :  { %238 = vst.msk [vmem:[%s452_s3 + $0x68] sm:$0xff] %vm224_vm1, %v221_v25 }

// kernel: _lambda_.16
= control target key start
LH: loop header
LB: loop body
LE: loop exit
PB: predicated region body
PF: predicated region fallthrough
CT: control target
= control target key end

     0   :  { %vm52_vm0 = vcmask 392192   ;;  %s214_s1 = inlined_call_operand.vmem [shape: bf16[48,48], index: 1, kind: input, shape index: {}]   ;;  %s215_s0 = inlined_call_operand.vmem [shape: f32[32,48], index: 0, kind: input, shape index: {}]   ;;  %s216_s2 = inlined_call_operand.vmem [shape: f32[1,48], index: 2, kind: input, shape index: {}]   ;;  %s217_s3 = inlined_call_operand.vmem [shape: f32[32,48], index: 3, kind: output, shape index: {}]  }
   0x1   :  { %v149_v0 = vld [vmem:[%s214_s1 + $0x10] sm:$0xff]   ;;  %v150_v1 = vld [vmem:[%s214_s1 + $0x8] sm:$0xff]   ;;  %v15_v2 = vld [vmem:[%s215_s0] sm:$0xff] }
   0x2   :  { %139 = vmatprep.subr.bf16.mxu0 %v149_v0  ;;  %v16_v3 = vld [vmem:[%s215_s0 + $0x8] sm:$0xff]  ;;  %v151_v4 = vld [vmem:[%s214_s1] sm:$0xff]   ;;  %v17_v6 = vld [vmem:[%s215_s0 + $0x10] sm:$0xff] }
   0x3   :  { %140 = vmatpush3.bf16.msra.mxu0 %v149_v0  ;;  %v19_v5 = vpack.c.bf16 %v16_v3, %v15_v2  ;;  %v18_v7 = vld [vmem:[%s215_s0 + $0x18] sm:$0xff]  ;;  %v128_v9 = vld [vmem:[%s216_s2] ss:$0 sm:$0xff] }
   0x4   :  { %141 = vmatprep.subr.bf16.mxu0 %v150_v1  ;;  %v20_v8 = vpack.c.bf16 %v18_v7, %v17_v6 }
   0x5   :  { %145 = vmatprep.mubr.msk.bf16.mxu0 %vm52_vm0, %v19_v5 }
   0x7   :  { %142 = vmatpush3.bf16.msra.mxu0 %v150_v1 }
   0x8   :  { %143 = vmatprep.subr.bf16.mxu0 %v151_v4 }
   0xb   :  { %144 = vmatpush3.bf16.msra.mxu0 %v151_v4 }
   0xe   :  { %146 = vmatmul.mubr.msk.bf16.vlgmr.msra.gmra.mxu0 %vm52_vm0, %v20_v8 }
  0xce   :  { %v147_v10 = vpop.f32.mrf.mxu0 }
  0xcf   :  { %v102_v11 = vadd.f32 %v147_v10, %v128_v9 }
  0xd0   :  { %v93_v12 = vpop.f32.mrf.mxu0 }
  0xd1   :  { %vm110_vm1 = vcmp.ge.f32.partialorder %v102_v11, 0.0  ;;  %v114_v13 = vmul.f32 0.25, %v102_v11  ;;  %v94_v14 = vadd.f32 %v128_v9, %v93_v12 }
  0xd2   :  { %v148_v15 = vpop.f32.mrf.mxu0 }
  0xd3   :  { %v118_v16 = vsel %vm110_vm1, %v102_v11, %v114_v13  ;;  %vm108_vm2 = vcmp.ge.f32.partialorder %v94_v14, 0.0  ;;  %v112_v17 = vmul.f32 0.25, %v94_v14  ;;  %v105_v18 = vadd.f32 %v148_v15, %v128_v9 }
  0xd4   :  { %122 = vst.msk [vmem:[%s217_s3 + $0x10] sm:$0xff] %vm52_vm0, %v118_v16  ;;  %v96_v19 = vpop.f32.mrf.mxu0 }
  0xd5   :  { %v116_v20 = vsel %vm108_vm2, %v94_v14, %v112_v17  ;;  %vm111_vm3 = vcmp.ge.f32.partialorder %v105_v18, 0.0  ;;  %v115_v21 = vmul.f32 0.25, %v105_v18  ;;  %v97_v22 = vadd.f32 %v128_v9, %v96_v19 }
  0xd6   :  { %120 = vst.msk [vmem:[%s217_s3] sm:$0xff] %vm52_vm0, %v116_v20 }
  0xd7   :  { %v119_v23 = vsel %vm111_vm3, %v105_v18, %v115_v21  ;;  %vm109_vm4 = vcmp.ge.f32.partialorder %v97_v22, 0.0  ;;  %v113_v24 = vmul.f32 0.25, %v97_v22 }
  0xd8   :  { %123 = vst.msk [vmem:[%s217_s3 + $0x18] sm:$0xff] %vm52_vm0, %v119_v23 }
  0xd9   :  { %v117_v25 = vsel %vm109_vm4, %v97_v22, %v113_v24 }
  0xda   :  { %121 = vst.msk [vmem:[%s217_s3 + $0x8] sm:$0xff] %vm52_vm0, %v117_v25 }

// kernel: _lambda_.17
= control target key start
LH: loop header
LB: loop body
LE: loop exit
PB: predicated region body
PF: predicated region fallthrough
CT: control target
= control target key end

     0   :  { %vm99_vm0 = vcmask 392192   ;;  %vm431_vm1 = vcmask 130048   ;;  %s792_s3 = inlined_call_operand.vmem [shape: bf16[48,16], index: 3, kind: input, shape index: {}]   ;;  %s793_s2 = inlined_call_operand.vmem [shape: bf16[48,16], index: 2, kind: input, shape index: {}]   ;;  %s794_s1 = inlined_call_operand.vmem [shape: f32[128,48], index: 1, kind: input, shape index: {}]   ;;  %s795_s0 = inlined_call_operand.vmem [shape: f32[128,48], index: 0, kind: input, shape index: {}]   ;;  %s796_s4 = inlined_call_operand.vmem [shape: f32[1,16], index: 4, kind: input, shape index: {}]   ;;  %s797_s5 = inlined_call_operand.vmem [shape: f32[128,16], index: 5, kind: output, shape index: {}]  }
   0x1   :  { %v541_v0 = vld [vmem:[%s792_s3 + $0x10] sm:$0xff]   ;;  %v543_v2 = vld [vmem:[%s792_s3 + $0x8] sm:$0xff]   ;;  %v545_v4 = vld [vmem:[%s792_s3] sm:$0xff]  }
   0x2   :  { %v542_v1 = vld [vmem:[%s793_s2 + $0x10] sm:$0xff]   ;;  %497 = vmatprep.subr.bf16.mxu0 %v541_v0  ;;  %v544_v3 = vld [vmem:[%s793_s2 + $0x8] sm:$0xff]   ;;  %v546_v5 = vld [vmem:[%s793_s2] sm:$0xff]  }
   0x3   :  { %519 = vmatprep.subr.bf16.mxu1 %v542_v1  ;;  %498 = vmatpush3.bf16.msra.mxu0 %v541_v0  ;;  %v51_v6 = vld [vmem:[%s794_s1] sm:$0xff]  ;;  %v52_v7 = vld [vmem:[%s794_s1 + $0x8] sm:$0xff]  ;;  %v53_v11 = vld [vmem:[%s794_s1 + $0x10] sm:$0xff] }
   0x4   :  { %520 = vmatpush3.bf16.msra.mxu1 %v542_v1  ;;  %499 = vmatprep.subr.bf16.mxu0 %v543_v2  ;;  %v21_v8 = vld [vmem:[%s795_s0] sm:$0xff]  ;;  %v67_v9 = vpack.c.bf16 %v52_v7, %v51_v6  ;;  %v22_v10 = vld [vmem:[%s795_s0 + $0x8] sm:$0xff]  ;;  %v54_v12 = vld [vmem:[%s794_s1 + $0x18] sm:$0xff] }
   0x5   :  { %521 = vmatprep.subr.bf16.mxu1 %v544_v3  ;;  %v37_v13 = vpack.c.bf16 %v22_v10, %v21_v8  ;;  %v23_v14 = vld [vmem:[%s795_s0 + $0x10] sm:$0xff]  ;;  %v24_v15 = vld [vmem:[%s795_s0 + $0x18] sm:$0xff]  ;;  %v55_v16 = vld [vmem:[%s794_s1 + $0x20] sm:$0xff]  ;;  %v68_v20 = vpack.c.bf16 %v54_v12, %v53_v11 }
   0x6   :  { %503 = vmatprep.mubr.msk.bf16.mxu0 %vm99_vm0, %v67_v9  ;;  %v56_v17 = vld [vmem:[%s794_s1 + $0x28] sm:$0xff]  ;;  %v25_v18 = vld [vmem:[%s795_s0 + $0x20] sm:$0xff]  ;;  %v38_v21 = vpack.c.bf16 %v24_v15, %v23_v14  ;;  %v57_v24 = vld [vmem:[%s794_s1 + $0x30] sm:$0xff] }
   0x7   :  { %500 = vmatpush3.bf16.msra.mxu0 %v543_v2  ;;  %v26_v19 = vld [vmem:[%s795_s0 + $0x28] sm:$0xff]  ;;  %525 = vmatprep.mubr.msk.bf16.mxu1 %vm99_vm0, %v37_v13  ;;  %v69_v22 = vpack.c.bf16 %v56_v17, %v55_v16  ;;  %v58_v25 = vld [vmem:[%s794_s1 + $0x38] sm:$0xff]  ;;  %v27_v26 = vld [vmem:[%s795_s0 + $0x30] sm:$0xff] }
   0x8   :  { %522 = vmatpush3.bf16.msra.mxu1 %v544_v3  ;;  %501 = vmatprep.subr.bf16.mxu0 %v545_v4  ;;  %v39_v23 = vpack.c.bf16 %v26_v19, %v25_v18  ;;  %v28_v27 = vld [vmem:[%s795_s0 + $0x38] sm:$0xff]  ;;  %v59_v28 = vld [vmem:[%s794_s1 + $0x40] sm:$0xff]  ;;  %v60_v29 = vld [vmem:[%s794_s1 + $0x48] sm:$0xff]  ;;  %v70_v32 = vpack.c.bf16 %v58_v25, %v57_v24 }
   0x9   :  { %523 = vmatprep.subr.bf16.mxu1 %v546_v5  ;;  %v29_v30 = vld [vmem:[%s795_s0 + $0x40] sm:$0xff]  ;;  %v30_v31 = vld [vmem:[%s795_s0 + $0x48] sm:$0xff]  ;;  %v40_v33 = vpack.c.bf16 %v28_v27, %v27_v26  ;;  %v71_v34 = vpack.c.bf16 %v60_v29, %v59_v28  ;;  %v61_v36 = vld [vmem:[%s794_s1 + $0x50] sm:$0xff] }
   0xa   :  { %v41_v35 = vpack.c.bf16 %v30_v31, %v29_v30  ;;  %v62_v37 = vld [vmem:[%s794_s1 + $0x58] sm:$0xff]  ;;  %v31_v38 = vld [vmem:[%s795_s0 + $0x50] sm:$0xff]  ;;  %v63_v40 = vld [vmem:[%s794_s1 + $0x60] sm:$0xff] }
   0xb   :  { %502 = vmatpush3.bf16.msra.mxu0 %v545_v4  ;;  %v32_v39 = vld [vmem:[%s795_s0 + $0x58] sm:$0xff]  ;;  %v64_v41 = vld [vmem:[%s794_s1 + $0x68] sm:$0xff]  ;;  %v33_v42 = vld [vmem:[%s795_s0 + $0x60] sm:$0xff]  ;;  %v72_v44 = vpack.c.bf16 %v62_v37, %v61_v36 }
   0xc   :  { %524 = vmatpush3.bf16.msra.mxu1 %v546_v5  ;;  %v34_v43 = vld [vmem:[%s795_s0 + $0x68] sm:$0xff]  ;;  %v42_v45 = vpack.c.bf16 %v32_v39, %v31_v38  ;;  %v73_v46 = vpack.c.bf16 %v64_v41, %v63_v40  ;;  %v65_v48 = vld [vmem:[%s794_s1 + $0x70] sm:$0xff]  ;;  %v66_v49 = vld [vmem:[%s794_s1 + $0x78] sm:$0xff] }
   0xd   :  { %v43_v47 = vpack.c.bf16 %v34_v43, %v33_v42  ;;  %v35_v50 = vld [vmem:[%s795_s0 + $0x70] sm:$0xff]  ;;  %v36_v51 = vld [vmem:[%s795_s0 + $0x78] sm:$0xff]  ;;  %v74_v52 = vpack.c.bf16 %v66_v49, %v65_v48  ;;  %v710_v56 = vld [vmem:[%s796_s4] ss:$0 sm:$0xff] }
   0xe   :  { %504 = vmatmul.mubr.msk.bf16.vlgmr.msra.gmra.mxu0 %vm99_vm0, %v68_v20  ;;  %v44_v53 = vpack.c.bf16 %v36_v51, %v35_v50 }
   0xf   :  { %526 = vmatmul.mubr.msk.bf16.vlgmr.msra.gmra.mxu1 %vm99_vm0, %v38_v21  ;;  %507 = vmatprep.mubr.msk.bf16.mxu0 %vm99_vm0, %v69_v22 }
  0x10   :  { %529 = vmatprep.mubr.msk.bf16.mxu1 %vm99_vm0, %v39_v23 }
  0x16   :  { %508 = vmatmul.mubr.msk.bf16.gmra.mxu0 %vm99_vm0, %v70_v32 }
  0x17   :  { %530 = vmatmul.mubr.msk.bf16.gmra.mxu1 %vm99_vm0, %v40_v33  ;;  %511 = vmatprep.mubr.msk.bf16.mxu0 %vm99_vm0, %v71_v34 }
  0x18   :  { %533 = vmatprep.mubr.msk.bf16.mxu1 %vm99_vm0, %v41_v35 }
  0x1e   :  { %512 = vmatmul.mubr.msk.bf16.gmra.mxu0 %vm99_vm0, %v72_v44 }
  0x1f   :  { %534 = vmatmul.mubr.msk.bf16.gmra.mxu1 %vm99_vm0, %v42_v45  ;;  %515 = vmatprep.mubr.msk.bf16.mxu0 %vm99_vm0, %v73_v46 }
  0x20   :  { %537 = vmatprep.mubr.msk.bf16.mxu1 %vm99_vm0, %v43_v47 }
  0x26   :  { %516 = vmatmul.mubr.msk.bf16.gmra.mxu0 %vm99_vm0, %v74_v52 }
  0x27   :  { %538 = vmatmul.mubr.msk.bf16.gmra.mxu1 %vm99_vm0, %v44_v53 }
  0xce   :  { %v505_v54 = vpop.f32.mrf.mxu0 }
  0xcf   :  { %v527_v55 = vpop.f32.mrf.mxu1 }
  0xd0   :  { %v306_v57 = vadd.f32 %v527_v55, %v505_v54  ;;  %v158_v58 = vpop.f32.mrf.mxu0 }
  0xd1   :  { %v297_v59 = vpop.f32.mrf.mxu1 }
  0xd2   :  { %v369_v60 = vadd.f32 %v710_v56, %v306_v57  ;;  %v298_v61 = vadd.f32 %v297_v59, %v158_v58  ;;  %v506_v62 = vpop.f32.mrf.mxu0 }
  0xd3   :  { %v528_v63 = vpop.f32.mrf.mxu1 }
  0xd4   :  { %vm385_vm2 = vcmp.ge.f32.partialorder %v369_v60, 0.0  ;;  %v401_v0 = vmul.f32 0.25, %v369_v60  ;;  %v367_v1 = vadd.f32 %v710_v56, %v298_v61  ;;  %v309_v2 = vadd.f32 %v528_v63, %v506_v62  ;;  %v161_v3 = vpop.f32.mrf.mxu0 }
  0xd5   :  { %v300_v4 = vpop.f32.mrf.mxu1 }
  0xd6   :  { %v417_v5 = vsel %vm385_vm2, %v369_v60, %v401_v0  ;;  %vm383_vm3 = vcmp.ge.f32.partialorder %v367_v1, 0.0  ;;  %v399_v6 = vmul.f32 0.25, %v367_v1  ;;  %v370_v7 = vadd.f32 %v710_v56, %v309_v2  ;;  %v509_v8 = vpop.f32.mrf.mxu0 }
  0xd7   :  { %434 = vst.msk [vmem:[%s797_s5 + $0x10] sm:$0xff] %vm431_vm1, %v417_v5  ;;  %v301_v9 = vadd.f32 %v300_v4, %v161_v3  ;;  %v531_v10 = vpop.f32.mrf.mxu1 }
  0xd8   :  { %v415_v11 = vsel %vm383_vm3, %v367_v1, %v399_v6  ;;  %vm386_vm4 = vcmp.ge.f32.partialorder %v370_v7, 0.0  ;;  %v402_v12 = vmul.f32 0.25, %v370_v7  ;;  %v322_v13 = vadd.f32 %v531_v10, %v509_v8  ;;  %v174_v14 = vpop.f32.mrf.mxu0 }
  0xd9   :  { %432 = vst.msk [vmem:[%s797_s5] sm:$0xff] %vm431_vm1, %v415_v11  ;;  %v368_v15 = vadd.f32 %v710_v56, %v301_v9  ;;  %v313_v16 = vpop.f32.mrf.mxu1 }
  0xda   :  { %v418_v17 = vsel %vm386_vm4, %v370_v7, %v402_v12  ;;  %v373_v18 = vadd.f32 %v710_v56, %v322_v13  ;;  %v314_v19 = vadd.f32 %v313_v16, %v174_v14  ;;  %v510_v20 = vpop.f32.mrf.mxu0 }
  0xdb   :  { %435 = vst.msk [vmem:[%s797_s5 + $0x18] sm:$0xff] %vm431_vm1, %v418_v17  ;;  %vm384_vm5 = vcmp.ge.f32.partialorder %v368_v15, 0.0  ;;  %v400_v21 = vmul.f32 0.25, %v368_v15  ;;  %v532_v22 = vpop.f32.mrf.mxu1 }
  0xdc   :  { %vm389_vm6 = vcmp.ge.f32.partialorder %v373_v18, 0.0  ;;  %v405_v23 = vmul.f32 0.25, %v373_v18  ;;  %v371_v24 = vadd.f32 %v710_v56, %v314_v19  ;;  %v325_v25 = vadd.f32 %v532_v22, %v510_v20  ;;  %v177_v26 = vpop.f32.mrf.mxu0 }
  0xdd   :  { %v416_v27 = vsel %vm384_vm5, %v368_v15, %v400_v21  ;;  %v316_v28 = vpop.f32.mrf.mxu1 }
  0xde   :  { %433 = vst.msk [vmem:[%s797_s5 + $0x8] sm:$0xff] %vm431_vm1, %v416_v27  ;;  %v421_v29 = vsel %vm389_vm6, %v373_v18, %v405_v23  ;;  %vm387_vm7 = vcmp.ge.f32.partialorder %v371_v24, 0.0  ;;  %v403_v30 = vmul.f32 0.25, %v371_v24  ;;  %v374_v31 = vadd.f32 %v710_v56, %v325_v25  ;;  %v513_v32 = vpop.f32.mrf.mxu0 }
  0xdf   :  { %438 = vst.msk [vmem:[%s797_s5 + $0x30] sm:$0xff] %vm431_vm1, %v421_v29  ;;  %v317_v33 = vadd.f32 %v316_v28, %v177_v26  ;;  %v535_v34 = vpop.f32.mrf.mxu1 }
  0xe0   :  { %v419_v35 = vsel %vm387_vm7, %v371_v24, %v403_v30  ;;  %vm390_vm8 = vcmp.ge.f32.partialorder %v374_v31, 0.0  ;;  %v406_v36 = vmul.f32 0.25, %v374_v31  ;;  %v338_v37 = vadd.f32 %v535_v34, %v513_v32  ;;  %v190_v38 = vpop.f32.mrf.mxu0 }
  0xe1   :  { %436 = vst.msk [vmem:[%s797_s5 + $0x20] sm:$0xff] %vm431_vm1, %v419_v35  ;;  %v372_v39 = vadd.f32 %v710_v56, %v317_v33  ;;  %v329_v40 = vpop.f32.mrf.mxu1 }
  0xe2   :  { %v422_v41 = vsel %vm390_vm8, %v374_v31, %v406_v36  ;;  %v377_v42 = vadd.f32 %v710_v56, %v338_v37  ;;  %v330_v43 = vadd.f32 %v329_v40, %v190_v38  ;;  %v514_v44 = vpop.f32.mrf.mxu0 }
  0xe3   :  { %439 = vst.msk [vmem:[%s797_s5 + $0x38] sm:$0xff] %vm431_vm1, %v422_v41  ;;  %vm388_vm9 = vcmp.ge.f32.partialorder %v372_v39, 0.0  ;;  %v404_v45 = vmul.f32 0.25, %v372_v39  ;;  %v536_v46 = vpop.f32.mrf.mxu1 }
  0xe4   :  { %vm393_vm10 = vcmp.ge.f32.partialorder %v377_v42, 0.0  ;;  %v409_v47 = vmul.f32 0.25, %v377_v42  ;;  %v375_v48 = vadd.f32 %v710_v56, %v330_v43  ;;  %v341_v49 = vadd.f32 %v536_v46, %v514_v44  ;;  %v193_v50 = vpop.f32.mrf.mxu0 }
  0xe5   :  { %v420_v51 = vsel %vm388_vm9, %v372_v39, %v404_v45  ;;  %v332_v52 = vpop.f32.mrf.mxu1 }
  0xe6   :  { %437 = vst.msk [vmem:[%s797_s5 + $0x28] sm:$0xff] %vm431_vm1, %v420_v51  ;;  %v425_v53 = vsel %vm393_vm10, %v377_v42, %v409_v47  ;;  %vm391_vm11 = vcmp.ge.f32.partialorder %v375_v48, 0.0  ;;  %v407_v54 = vmul.f32 0.25, %v375_v48  ;;  %v378_v55 = vadd.f32 %v710_v56, %v341_v49  ;;  %v517_v57 = vpop.f32.mrf.mxu0 }
  0xe7   :  { %442 = vst.msk [vmem:[%s797_s5 + $0x50] sm:$0xff] %vm431_vm1, %v425_v53  ;;  %v333_v58 = vadd.f32 %v332_v52, %v193_v50  ;;  %v539_v59 = vpop.f32.mrf.mxu1 }
  0xe8   :  { %v423_v60 = vsel %vm391_vm11, %v375_v48, %v407_v54  ;;  %vm394_vm12 = vcmp.ge.f32.partialorder %v378_v55, 0.0  ;;  %v410_v61 = vmul.f32 0.25, %v378_v55  ;;  %v354_v62 = vadd.f32 %v539_v59, %v517_v57  ;;  %v206_v63 = vpop.f32.mrf.mxu0 }
  0xe9   :  { %440 = vst.msk [vmem:[%s797_s5 + $0x40] sm:$0xff] %vm431_vm1, %v423_v60  ;;  %v376_v0 = vadd.f32 %v710_v56, %v333_v58  ;;  %v345_v1 = vpop.f32.mrf.mxu1 }
  0xea   :  { %v426_v2 = vsel %vm394_vm12, %v378_v55, %v410_v61  ;;  %v381_v3 = vadd.f32 %v710_v56, %v354_v62  ;;  %v346_v4 = vadd.f32 %v345_v1, %v206_v63  ;;  %v518_v5 = vpop.f32.mrf.mxu0 }
  0xeb   :  { %443 = vst.msk [vmem:[%s797_s5 + $0x58] sm:$0xff] %vm431_vm1, %v426_v2  ;;  %vm392_vm13 = vcmp.ge.f32.partialorder %v376_v0, 0.0  ;;  %v408_v6 = vmul.f32 0.25, %v376_v0  ;;  %v540_v7 = vpop.f32.mrf.mxu1 }
  0xec   :  { %vm397_vm14 = vcmp.ge.f32.partialorder %v381_v3, 0.0  ;;  %v413_v8 = vmul.f32 0.25, %v381_v3  ;;  %v379_v9 = vadd.f32 %v710_v56, %v346_v4  ;;  %v357_v10 = vadd.f32 %v540_v7, %v518_v5  ;;  %v209_v11 = vpop.f32.mrf.mxu0 }
  0xed   :  { %v424_v12 = vsel %vm392_vm13, %v376_v0, %v408_v6  ;;  %v348_v13 = vpop.f32.mrf.mxu1 }
  0xee   :  { %441 = vst.msk [vmem:[%s797_s5 + $0x48] sm:$0xff] %vm431_vm1, %v424_v12  ;;  %v429_v14 = vsel %vm397_vm14, %v381_v3, %v413_v8  ;;  %vm395_vm15 = vcmp.ge.f32.partialorder %v379_v9, 0.0  ;;  %v411_v15 = vmul.f32 0.25, %v379_v9  ;;  %v382_v16 = vadd.f32 %v710_v56, %v357_v10 }
  0xef   :  { %446 = vst.msk [vmem:[%s797_s5 + $0x70] sm:$0xff] %vm431_vm1, %v429_v14  ;;  %v349_v17 = vadd.f32 %v348_v13, %v209_v11 }
  0xf0   :  { %v427_v18 = vsel %vm395_vm15, %v379_v9, %v411_v15  ;;  %vm398_vm0 = vcmp.ge.f32.partialorder %v382_v16, 0.0  ;;  %v414_v19 = vmul.f32 0.25, %v382_v16 }
  0xf1   :  { %444 = vst.msk [vmem:[%s797_s5 + $0x60] sm:$0xff] %vm431_vm1, %v427_v18  ;;  %v380_v20 = vadd.f32 %v710_v56, %v349_v17 }
  0xf2   :  { %v430_v21 = vsel %vm398_vm0, %v382_v16, %v414_v19 }
  0xf3   :  { %447 = vst.msk [vmem:[%s797_s5 + $0x78] sm:$0xff] %vm431_vm1, %v430_v21  ;;  %vm396_vm2 = vcmp.ge.f32.partialorder %v380_v20, 0.0  ;;  %v412_v22 = vmul.f32 0.25, %v380_v20 }
  0xf5   :  { %v428_v23 = vsel %vm396_vm2, %v380_v20, %v412_v22 }
  0xf6   :  { %445 = vst.msk [vmem:[%s797_s5 + $0x68] sm:$0xff] %vm431_vm1, %v428_v23 }

// kernel: _lambda_.18
= control target key start
LH: loop header
LB: loop body
LE: loop exit
PB: predicated region body
PF: predicated region fallthrough
CT: control target
= control target key end

     0   :  { %vm33_vm0 = vcmask 130048   ;;  %s681_s0 = inlined_call_operand.vmem [shape: f32[16,8,16], index: 0, kind: input, shape index: {}]   ;;  %s682_s2 = inlined_call_operand.vmem [shape: f32[1,16], index: 2, kind: input, shape index: {}]   ;;  %s683_s3 = inlined_call_operand.vmem [shape: f32[1,16], index: 3, kind: input, shape index: {}]   ;;  %s684_s1 = inlined_call_operand.vmem [shape: f32[16,8,16], index: 1, kind: input, shape index: {}]   ;;  %s685_s4 = inlined_call_operand.vmem [shape: f32[16,8,16], index: 4, kind: output, shape index: {}]  }
   0x1   :  { %v342_v0 = vld [vmem:[%s681_s0] sm:$0xff]  ;;  %v347_v1 = vld [vmem:[%s681_s0 + $0x10] sm:$0xff]  ;;  %v352_v2 = vld [vmem:[%s681_s0 + $0x8] sm:$0xff] }
   0x2   :  { %v34_v3 = vsel %vm33_vm0, %v342_v0, 0.0  ;;  %v40_v4 = vsel %vm33_vm0, %v347_v1, 0.0  ;;  %v361_v5 = vld [vmem:[%s681_s0 + $0x18] sm:$0xff]  ;;  %v37_v6 = vsel %vm33_vm0, %v352_v2, 0.0  ;;  %v370_v8 = vld [vmem:[%s681_s0 + $0x20] sm:$0xff]  ;;  %v375_v9 = vld [vmem:[%s681_s0 + $0x28] sm:$0xff] }
   0x3   :  { %35 = vadd.xlane.f32.xlu0 %v34_v3  ;;  %41 = vadd.xlane.f32.xlu1 %v40_v4  ;;  %v43_v7 = vsel %vm33_vm0, %v361_v5, 0.0  ;;  %v46_v10 = vsel %vm33_vm0, %v370_v8, 0.0  ;;  %v49_v11 = vsel %vm33_vm0, %v375_v9, 0.0  ;;  %v384_v12 = vld [vmem:[%s681_s0 + $0x30] sm:$0xff]  ;;  %v389_v13 = vld [vmem:[%s681_s0 + $0x38] sm:$0xff]  ;;  %v398_v16 = vld [vmem:[%s681_s0 + $0x40] sm:$0xff] }
   0x4   :  { %v52_v14 = vsel %vm33_vm0, %v384_v12, 0.0  ;;  %v55_v15 = vsel %vm33_vm0, %v389_v13, 0.0  ;;  %v403_v17 = vld [vmem:[%s681_s0 + $0x48] sm:$0xff]  ;;  %v58_v18 = vsel %vm33_vm0, %v398_v16, 0.0  ;;  %v412_v20 = vld [vmem:[%s681_s0 + $0x50] sm:$0xff]  ;;  %v417_v21 = vld [vmem:[%s681_s0 + $0x58] sm:$0xff] }
   0x5   :  { %v61_v19 = vsel %vm33_vm0, %v403_v17, 0.0  ;;  %v64_v22 = vsel %vm33_vm0, %v412_v20, 0.0  ;;  %v67_v23 = vsel %vm33_vm0, %v417_v21, 0.0  ;;  %v426_v24 = vld [vmem:[%s681_s0 + $0x60] sm:$0xff]  ;;  %v431_v25 = vld [vmem:[%s681_s0 + $0x68] sm:$0xff]  ;;  %v440_v28 = vld [vmem:[%s681_s0 + $0x70] sm:$0xff] }
   0x6   :  { %v70_v26 = vsel %vm33_vm0, %v426_v24, 0.0  ;;  %v73_v27 = vsel %vm33_vm0, %v431_v25, 0.0  ;;  %v445_v29 = vld [vmem:[%s681_s0 + $0x78] sm:$0xff]  ;;  %v76_v30 = vsel %vm33_vm0, %v440_v28, 0.0 }
   0x7   :  { %38 = vadd.xlane.f32.xlu0 %v37_v6  ;;  %44 = vadd.xlane.f32.xlu1 %v43_v7  ;;  %v79_v31 = vsel %vm33_vm0, %v445_v29, 0.0 }
   0xb   :  { %47 = vadd.xlane.f32.xlu0 %v46_v10  ;;  %50 = vadd.xlane.f32.xlu1 %v49_v11 }
   0xf   :  { %53 = vadd.xlane.f32.xlu0 %v52_v14  ;;  %56 = vadd.xlane.f32.xlu1 %v55_v15 }
  0x13   :  { %59 = vadd.xlane.f32.xlu0 %v58_v18  ;;  %62 = vadd.xlane.f32.xlu1 %v61_v19 }
  0x17   :  { %65 = vadd.xlane.f32.xlu0 %v64_v22  ;;  %68 = vadd.xlane.f32.xlu1 %v67_v23 }
  0x1b   :  { %71 = vadd.xlane.f32.xlu0 %v70_v26  ;;  %74 = vadd.xlane.f32.xlu1 %v73_v27 }
  0x1f   :  { %77 = vadd.xlane.f32.xlu0 %v76_v30  ;;  %80 = vadd.xlane.f32.xlu1 %v79_v31 }
  0x8c   :  { %v36_v32 = vpop.xlane.xlu0 %35  ;;  %v42_v33 = vpop.xlane.xlu1 %41 }
  0x90   :  { %v39_v34 = vpop.xlane.xlu0 %38  ;;  %v45_v35 = vpop.xlane.xlu1 %44 }
  0x91   :  { %v82_v36 = vadd.f32 %v39_v34, %v36_v32 }
  0x93   :  { %v83_v37 = vadd.f32 %v82_v36, %v42_v33 }
  0x94   :  { %v48_v38 = vpop.xlane.xlu0 %47  ;;  %v51_v39 = vpop.xlane.xlu1 %50 }
  0x95   :  { %v84_v40 = vadd.f32 %v83_v37, %v45_v35 }
  0x97   :  { %v85_v41 = vadd.f32 %v84_v40, %v48_v38 }
  0x98   :  { %v54_v42 = vpop.xlane.xlu0 %53  ;;  %v57_v43 = vpop.xlane.xlu1 %56 }
  0x99   :  { %v86_v44 = vadd.f32 %v85_v41, %v51_v39 }
  0x9b   :  { %v87_v45 = vadd.f32 %v86_v44, %v54_v42 }
  0x9c   :  { %v60_v46 = vpop.xlane.xlu0 %59  ;;  %v63_v47 = vpop.xlane.xlu1 %62 }
  0x9d   :  { %v88_v48 = vadd.f32 %v87_v45, %v57_v43 }
  0x9f   :  { %v89_v49 = vadd.f32 %v88_v48, %v60_v46 }
  0xa0   :  { %v66_v50 = vpop.xlane.xlu0 %65  ;;  %v69_v51 = vpop.xlane.xlu1 %68 }
  0xa1   :  { %v90_v52 = vadd.f32 %v89_v49, %v63_v47 }
  0xa3   :  { %v91_v53 = vadd.f32 %v90_v52, %v66_v50 }
  0xa4   :  { %v72_v54 = vpop.xlane.xlu0 %71  ;;  %v75_v55 = vpop.xlane.xlu1 %74 }
  0xa5   :  { %v92_v56 = vadd.f32 %v91_v53, %v69_v51 }
  0xa7   :  { %v93_v57 = vadd.f32 %v92_v56, %v72_v54 }
  0xa8   :  { %v78_v58 = vpop.xlane.xlu0 %77  ;;  %v81_v60 = vpop.xlane.xlu1 %80 }
  0xa9   :  { %v94_v59 = vadd.f32 %v93_v57, %v75_v55 }
  0xab   :  { %v95_v61 = vadd.f32 %v94_v59, %v78_v58 }
  0xad   :  { %v96_v62 = vadd.f32 %v95_v61, %v81_v60 }
  0xaf   :  { %v97_v63 = vmul.f32 0.00390625, %v96_v62 }
  0xb1   :  { %v452_v3 = vsub.f32 %v352_v2, %v97_v63  ;;  %v455_v4 = vsub.f32 %v342_v0, %v97_v63  ;;  %v458_v6 = vsub.f32 %v361_v5, %v97_v63  ;;  %v461_v7 = vsub.f32 %v347_v1, %v97_v63 }
  0xb2   :  { %v468_v14 = vsub.f32 %v375_v9, %v97_v63  ;;  %v471_v2 = vsub.f32 %v370_v8, %v97_v63  ;;  %v480_v18 = vsub.f32 %v389_v13, %v97_v63  ;;  %v483_v9 = vsub.f32 %v384_v12, %v97_v63 }
  0xb3   :  { %v115_v10 = vmul.f32 %v452_v3, %v452_v3  ;;  %v114_v11 = vmul.f32 %v455_v4, %v455_v4  ;;  %v117_v1 = vmul.f32 %v458_v6, %v458_v6  ;;  %v116_v15 = vmul.f32 %v461_v7, %v461_v7 }
  0xb4   :  { %v119_v22 = vmul.f32 %v468_v14, %v468_v14  ;;  %v118_v23 = vmul.f32 %v471_v2, %v471_v2  ;;  %v121_v26 = vmul.f32 %v480_v18, %v480_v18  ;;  %v120_v13 = vmul.f32 %v483_v9, %v483_v9 }
  0xb5   :  { %v133_v0 = vsel %vm33_vm0, %v115_v10, 0.0  ;;  %v130_v5 = vsel %vm33_vm0, %v114_v11, 0.0  ;;  %v139_v8 = vsel %vm33_vm0, %v117_v1, 0.0  ;;  %v136_v19 = vsel %vm33_vm0, %v116_v15, 0.0 }
  0xb6   :  { %134 = vadd.xlane.f32.xlu1 %v133_v0  ;;  %131 = vadd.xlane.f32.xlu0 %v130_v5  ;;  %v145_v12 = vsel %vm33_vm0, %v119_v22, 0.0  ;;  %v142_v27 = vsel %vm33_vm0, %v118_v23, 0.0  ;;  %v498_v30 = vsub.f32 %v403_v17, %v97_v63  ;;  %v501_v31 = vsub.f32 %v398_v16, %v97_v63 }
  0xb7   :  { %v151_v32 = vsel %vm33_vm0, %v121_v26, 0.0  ;;  %v148_v33 = vsel %vm33_vm0, %v120_v13, 0.0  ;;  %v510_v36 = vsub.f32 %v417_v21, %v97_v63  ;;  %v513_v17 = vsub.f32 %v412_v20, %v97_v63 }
  0xb8   :  { %v123_v34 = vmul.f32 %v498_v30, %v498_v30  ;;  %v122_v35 = vmul.f32 %v501_v31, %v501_v31  ;;  %v516_v16 = vsub.f32 %v431_v25, %v97_v63  ;;  %v519_v37 = vsub.f32 %v426_v24, %v97_v63 }
  0xb9   :  { %v125_v40 = vmul.f32 %v510_v36, %v510_v36  ;;  %v124_v21 = vmul.f32 %v513_v17, %v513_v17  ;;  %v528_v20 = vsub.f32 %v445_v29, %v97_v63  ;;  %v531_v25 = vsub.f32 %v440_v28, %v97_v63 }
  0xba   :  { %140 = vadd.xlane.f32.xlu1 %v139_v8  ;;  %137 = vadd.xlane.f32.xlu0 %v136_v19  ;;  %v157_v38 = vsel %vm33_vm0, %v123_v34, 0.0  ;;  %v154_v39 = vsel %vm33_vm0, %v122_v35, 0.0  ;;  %v127_v42 = vmul.f32 %v516_v16, %v516_v16  ;;  %v126_v43 = vmul.f32 %v519_v37, %v519_v37 }
  0xbb   :  { %v163_v24 = vsel %vm33_vm0, %v125_v40, 0.0  ;;  %v160_v41 = vsel %vm33_vm0, %v124_v21, 0.0  ;;  %v129_v28 = vmul.f32 %v528_v20, %v528_v20  ;;  %v128_v45 = vmul.f32 %v531_v25, %v531_v25 }
  0xbc   :  { %v169_v44 = vsel %vm33_vm0, %v127_v42, 0.0  ;;  %v166_v29 = vsel %vm33_vm0, %v126_v43, 0.0 }
  0xbd   :  { %v175_v46 = vsel %vm33_vm0, %v129_v28, 0.0  ;;  %v172_v47 = vsel %vm33_vm0, %v128_v45, 0.0 }
  0xbe   :  { %146 = vadd.xlane.f32.xlu1 %v145_v12  ;;  %143 = vadd.xlane.f32.xlu0 %v142_v27 }
  0xc2   :  { %152 = vadd.xlane.f32.xlu1 %v151_v32  ;;  %149 = vadd.xlane.f32.xlu0 %v148_v33 }
  0xc6   :  { %158 = vadd.xlane.f32.xlu1 %v157_v38  ;;  %155 = vadd.xlane.f32.xlu0 %v154_v39 }
  0xca   :  { %164 = vadd.xlane.f32.xlu1 %v163_v24  ;;  %161 = vadd.xlane.f32.xlu0 %v160_v41  ;;  %v310_v24 = vld [vmem:[%s682_s2] ss:$0 sm:$0xff] }
  0xce   :  { %170 = vadd.xlane.f32.xlu1 %v169_v44  ;;  %167 = vadd.xlane.f32.xlu0 %v166_v29 }
  0xd2   :  { %176 = vadd.xlane.f32.xlu1 %v175_v46  ;;  %173 = vadd.xlane.f32.xlu0 %v172_v47 }
 0x13f   :  { %v135_v48 = vpop.xlane.xlu1 %134  ;;  %v132_v49 = vpop.xlane.xlu0 %131 }
 0x140   :  { %v178_v50 = vadd.f32 %v135_v48, %v132_v49 }
 0x143   :  { %v141_v51 = vpop.xlane.xlu1 %140  ;;  %v138_v52 = vpop.xlane.xlu0 %137 }
 0x144   :  { %v179_v53 = vadd.f32 %v178_v50, %v138_v52 }
 0x146   :  { %v180_v54 = vadd.f32 %v179_v53, %v141_v51  ;;  %v259_v53 = vld [vmem:[%s684_s1 + $0x8] sm:$0xff] }
 0x147   :  { %v147_v55 = vpop.xlane.xlu1 %146  ;;  %v144_v56 = vpop.xlane.xlu0 %143 }
 0x148   :  { %v181_v57 = vadd.f32 %v180_v54, %v144_v56  ;;  %v260_v54 = vld [vmem:[%s684_s1 + $0x10] sm:$0xff] }
 0x14a   :  { %v182_v58 = vadd.f32 %v181_v57, %v147_v55  ;;  %v261_v55 = vld [vmem:[%s684_s1 + $0x18] sm:$0xff] }
 0x14b   :  { %v153_v59 = vpop.xlane.xlu1 %152  ;;  %v150_v60 = vpop.xlane.xlu0 %149 }
 0x14c   :  { %v183_v61 = vadd.f32 %v182_v58, %v150_v60  ;;  %v262_v60 = vld [vmem:[%s684_s1 + $0x20] sm:$0xff] }
 0x14e   :  { %v184_v62 = vadd.f32 %v183_v61, %v153_v59  ;;  %v263_v61 = vld [vmem:[%s684_s1 + $0x28] sm:$0xff] }
 0x14f   :  { %v159_v63 = vpop.xlane.xlu1 %158  ;;  %v156_v10 = vpop.xlane.xlu0 %155 }
 0x150   :  { %v185_v11 = vadd.f32 %v184_v62, %v156_v10  ;;  %v264_v62 = vld [vmem:[%s684_s1 + $0x30] sm:$0xff] }
 0x152   :  { %v186_v0 = vadd.f32 %v185_v11, %v159_v63 }
 0x153   :  { %v165_v5 = vpop.xlane.xlu1 %164  ;;  %v162_v1 = vpop.xlane.xlu0 %161 }
 0x154   :  { %v187_v15 = vadd.f32 %v186_v0, %v162_v1  ;;  %v266_v1 = vld [vmem:[%s684_s1 + $0x40] sm:$0xff] }
 0x156   :  { %v188_v8 = vadd.f32 %v187_v15, %v165_v5  ;;  %v265_v5 = vld [vmem:[%s684_s1 + $0x38] sm:$0xff]  ;;  %v267_v15 = vld [vmem:[%s684_s1 + $0x48] sm:$0xff] }
 0x157   :  { %v171_v19 = vpop.xlane.xlu1 %170  ;;  %v168_v22 = vpop.xlane.xlu0 %167 }
 0x158   :  { %v189_v23 = vadd.f32 %v188_v8, %v168_v22 }
 0x15a   :  { %v190_v26 = vadd.f32 %v189_v23, %v171_v19 }
 0x15b   :  { %v174_v13 = vpop.xlane.xlu0 %173  ;;  %v177_v27 = vpop.xlane.xlu1 %176 }
 0x15c   :  { %v191_v12 = vadd.f32 %v190_v26, %v174_v13  ;;  %v268_v26 = vld [vmem:[%s684_s1 + $0x50] sm:$0xff]  ;;  %v269_v13 = vld [vmem:[%s684_s1 + $0x58] sm:$0xff] }
 0x15e   :  { %v192_v32 = vadd.f32 %v191_v12, %v177_v27  ;;  %v270_v12 = vld [vmem:[%s684_s1 + $0x60] sm:$0xff] }
 0x160   :  { %v193_v33 = vmul.f32 0.00390625, %v192_v32 }
 0x162   :  { %v194_v34 = vadd.f32 1e-05, %v193_v33 }
 0x164   :  { %312 = vrsqrt.f32 %v194_v34 }
 0x171   :  { %v313_v35 = vpop.eup %312 }
 0x172   :  { %v196_v38 = vmul.f32 %v313_v35, %v455_v4  ;;  %v197_v39 = vmul.f32 %v313_v35, %v452_v3  ;;  %v198_v40 = vmul.f32 %v313_v35, %v461_v7  ;;  %v199_v21 = vmul.f32 %v313_v35, %v458_v6 }
 0x173   :  { %v200_v41 = vmul.f32 %v313_v35, %v471_v2  ;;  %v201_v42 = vmul.f32 %v313_v35, %v468_v14  ;;  %v202_v43 = vmul.f32 %v313_v35, %v483_v9  ;;  %v203_v44 = vmul.f32 %v313_v35, %v480_v18 }
 0x174   :  { %v204_v4 = vmul.f32 %v313_v35, %v501_v31  ;;  %v205_v3 = vmul.f32 %v313_v35, %v498_v30  ;;  %v206_v7 = vmul.f32 %v313_v35, %v513_v17  ;;  %v207_v6 = vmul.f32 %v313_v35, %v510_v36  ;;  %v311_v30 = vld [vmem:[%s683_s3] ss:$0 sm:$0xff] }
 0x175   :  { %v208_v29 = vmul.f32 %v313_v35, %v519_v37  ;;  %v209_v28 = vmul.f32 %v313_v35, %v516_v16  ;;  %v210_v2 = vmul.f32 %v313_v35, %v531_v25  ;;  %v211_v14 = vmul.f32 %v313_v35, %v528_v20  ;;  %v258_v20 = vld [vmem:[%s684_s1] sm:$0xff]  ;;  %v271_v35 = vld [vmem:[%s684_s1 + $0x68] sm:$0xff] }
 0x176   :  { %v219_v45 = vmul.f32 %v310_v24, %v196_v38  ;;  %v220_v9 = vmul.f32 %v310_v24, %v197_v39  ;;  %v221_v46 = vmul.f32 %v310_v24, %v198_v40  ;;  %v222_v18 = vmul.f32 %v310_v24, %v199_v21  ;;  %v272_v38 = vld [vmem:[%s684_s1 + $0x70] sm:$0xff]  ;;  %v273_v39 = vld [vmem:[%s684_s1 + $0x78] sm:$0xff] }
 0x177   :  { %v223_v31 = vmul.f32 %v310_v24, %v200_v41  ;;  %v224_v17 = vmul.f32 %v310_v24, %v201_v42  ;;  %v225_v47 = vmul.f32 %v310_v24, %v202_v43  ;;  %v226_v36 = vmul.f32 %v310_v24, %v203_v44 }
 0x178   :  { %v227_v48 = vmul.f32 %v310_v24, %v204_v4  ;;  %v228_v37 = vmul.f32 %v310_v24, %v205_v3  ;;  %v229_v49 = vmul.f32 %v310_v24, %v206_v7  ;;  %v230_v16 = vmul.f32 %v310_v24, %v207_v6 }
 0x179   :  { %v231_v25 = vmul.f32 %v310_v24, %v208_v29  ;;  %v232_v50 = vmul.f32 %v310_v24, %v209_v28  ;;  %v233_v51 = vmul.f32 %v310_v24, %v210_v2  ;;  %v234_v52 = vmul.f32 %v310_v24, %v211_v14 }
 0x17a   :  { %v242_v56 = vadd.f32 %v311_v30, %v219_v45  ;;  %v243_v57 = vadd.f32 %v311_v30, %v220_v9  ;;  %v244_v58 = vadd.f32 %v311_v30, %v221_v46  ;;  %v245_v59 = vadd.f32 %v311_v30, %v222_v18 }
 0x17b   :  { %v246_v63 = vadd.f32 %v311_v30, %v223_v31  ;;  %v247_v10 = vadd.f32 %v311_v30, %v224_v17  ;;  %v248_v11 = vadd.f32 %v311_v30, %v225_v47  ;;  %v249_v0 = vadd.f32 %v311_v30, %v226_v36 }
 0x17c   :  { %v250_v8 = vadd.f32 %v311_v30, %v227_v48  ;;  %v251_v19 = vadd.f32 %v311_v30, %v228_v37  ;;  %v252_v22 = vadd.f32 %v311_v30, %v229_v49  ;;  %v253_v23 = vadd.f32 %v311_v30, %v230_v16 }
 0x17d   :  { %v254_v27 = vadd.f32 %v311_v30, %v231_v25  ;;  %v255_v32 = vadd.f32 %v311_v30, %v232_v50  ;;  %v256_v33 = vadd.f32 %v311_v30, %v233_v51  ;;  %v257_v34 = vadd.f32 %v311_v30, %v234_v52 }
 0x17e   :  { %v274_v40 = vadd.f32 %v258_v20, %v242_v56  ;;  %v275_v21 = vadd.f32 %v259_v53, %v243_v57  ;;  %v276_v24 = vadd.f32 %v260_v54, %v244_v58  ;;  %v277_v41 = vadd.f32 %v261_v55, %v245_v59 }
 0x17f   :  { %v278_v42 = vadd.f32 %v262_v60, %v246_v63  ;;  %v279_v43 = vadd.f32 %v263_v61, %v247_v10  ;;  %v280_v44 = vadd.f32 %v264_v62, %v248_v11  ;;  %v281_v4 = vadd.f32 %v265_v5, %v249_v0 }
 0x180   :  { %v282_v3 = vadd.f32 %v266_v1, %v250_v8  ;;  %v283_v7 = vadd.f32 %v267_v15, %v251_v19  ;;  %v284_v6 = vadd.f32 %v268_v26, %v252_v22  ;;  %v285_v29 = vadd.f32 %v269_v13, %v253_v23  ;;  %290 = vst.msk [vmem:[%s685_s4] sm:$0xff] %vm33_vm0, %v274_v40 }
 0x181   :  { %291 = vst.msk [vmem:[%s685_s4 + $0x8] sm:$0xff] %vm33_vm0, %v275_v21  ;;  %292 = vst.msk [vmem:[%s685_s4 + $0x10] sm:$0xff] %vm33_vm0, %v276_v24  ;;  %v286_v28 = vadd.f32 %v270_v12, %v254_v27  ;;  %v287_v2 = vadd.f32 %v271_v35, %v255_v32  ;;  %v288_v14 = vadd.f32 %v272_v38, %v256_v33 }
 0x182   :  { %293 = vst.msk [vmem:[%s685_s4 + $0x18] sm:$0xff] %vm33_vm0, %v277_v41  ;;  %v289_v45 = vadd.f32 %v273_v39, %v257_v34  ;;  %294 = vst.msk [vmem:[%s685_s4 + $0x20] sm:$0xff] %vm33_vm0, %v278_v42 }
 0x183   :  { %295 = vst.msk [vmem:[%s685_s4 + $0x28] sm:$0xff] %vm33_vm0, %v279_v43  ;;  %296 = vst.msk [vmem:[%s685_s4 + $0x30] sm:$0xff] %vm33_vm0, %v280_v44 }
 0x184   :  { %297 = vst.msk [vmem:[%s685_s4 + $0x38] sm:$0xff] %vm33_vm0, %v281_v4  ;;  %298 = vst.msk [vmem:[%s685_s4 + $0x40] sm:$0xff] %vm33_vm0, %v282_v3 }
 0x185   :  { %299 = vst.msk [vmem:[%s685_s4 + $0x48] sm:$0xff] %vm33_vm0, %v283_v7  ;;  %300 = vst.msk [vmem:[%s685_s4 + $0x50] sm:$0xff] %vm33_vm0, %v284_v6 }
 0x186   :  { %301 = vst.msk [vmem:[%s685_s4 + $0x58] sm:$0xff] %vm33_vm0, %v285_v29  ;;  %302 = vst.msk [vmem:[%s685_s4 + $0x60] sm:$0xff] %vm33_vm0, %v286_v28 }
 0x187   :  { %303 = vst.msk [vmem:[%s685_s4 + $0x68] sm:$0xff] %vm33_vm0, %v287_v2  ;;  %304 = vst.msk [vmem:[%s685_s4 + $0x70] sm:$0xff] %vm33_vm0, %v288_v14 }
 0x188   :  { %305 = vst.msk [vmem:[%s685_s4 + $0x78] sm:$0xff] %vm33_vm0, %v289_v45 }

// kernel: _lambda_.19
= control target key start
LH: loop header
LB: loop body
LE: loop exit
PB: predicated region body
PF: predicated region fallthrough
CT: control target
= control target key end

     0   :  { %vm69_vm0 = vcmask 130048   ;;  %vm191_vm1 = vcmask 261120   ;;  %s960_s1 = inlined_call_operand.vmem [shape: bf16[16,32], index: 1, kind: input, shape index: {}]   ;;  %s961_s0 = inlined_call_operand.vmem [shape: f32[128,16], index: 0, kind: input, shape index: {}]   ;;  %s962_s2 = inlined_call_operand.vmem [shape: bf16[16,32], index: 2, kind: input, shape index: {}]   ;;  %s963_s3 = inlined_call_operand.vmem [shape: bf16[16,32], index: 3, kind: input, shape index: {}]   ;;  %s964_s4 = inlined_call_operand.vmem [shape: f32[1,32], index: 4, kind: input, shape index: {}]   ;;  %s965_s7 = inlined_call_operand.vmem [shape: f32[128,32], index: 7, kind: output, shape index: {0}]   ;;  %s966_s5 = inlined_call_operand.vmem [shape: f32[1,32], index: 5, kind: input, shape index: {}]   ;;  %s967_s6 = inlined_call_operand.vmem [shape: f32[1,32], index: 6, kind: input, shape index: {}]   ;;  %s968_s8 = inlined_call_operand.vmem [shape: f32[128,32], index: 8, kind: output, shape index: {1}]   ;;  %s969_s9 = inlined_call_operand.vmem [shape: f32[128,32], index: 9, kind: output, shape index: {2}]  }
   0x1   :  { %v589_v0 = vld [vmem:[%s960_s1] sm:$0xff]   ;;  %v31_v2 = vld [vmem:[%s961_s0 + $0x8] sm:$0xff]  ;;  %v32_v6 = vld [vmem:[%s961_s0 + $0x10] sm:$0xff] }
   0x2   :  { %v30_v1 = vld [vmem:[%s961_s0] sm:$0xff]  ;;  %533 = vmatprep.subr.bf16.mxu0 %v589_v0  ;;  %587 = vmatprep.subr.bf16.mxu1 %v589_v0  ;;  %v39_v5 = vld [vmem:[%s961_s0 + $0x48] sm:$0xff]  ;;  %v33_v7 = vld [vmem:[%s961_s0 + $0x18] sm:$0xff] }
   0x3   :  { %v38_v3 = vld [vmem:[%s961_s0 + $0x40] sm:$0xff]  ;;  %v46_v4 = vpack.c.bf16 %v31_v2, %v30_v1  ;;  %534 = vmatpush3.bf16.msra.mxu0 %v589_v0  ;;  %588 = vmatpush3.bf16.msra.mxu1 %v589_v0  ;;  %v47_v9 = vpack.c.bf16 %v33_v7, %v32_v6  ;;  %v40_v10 = vld [vmem:[%s961_s0 + $0x50] sm:$0xff]  ;;  %v41_v11 = vld [vmem:[%s961_s0 + $0x58] sm:$0xff] }
   0x4   :  { %v50_v8 = vpack.c.bf16 %v39_v5, %v38_v3  ;;  %v51_v12 = vpack.c.bf16 %v41_v11, %v40_v10  ;;  %v590_v13 = vld [vmem:[%s962_s2] sm:$0xff]   ;;  %v35_v16 = vld [vmem:[%s961_s0 + $0x28] sm:$0xff]  ;;  %v36_v21 = vld [vmem:[%s961_s0 + $0x30] sm:$0xff] }
   0x5   :  { %535 = vmatprep.mubr.msk.bf16.mxu0 %vm69_vm0, %v46_v4  ;;  %v591_v14 = vld [vmem:[%s963_s3] sm:$0xff]   ;;  %v43_v18 = vld [vmem:[%s961_s0 + $0x68] sm:$0xff]  ;;  %551 = vmatprep.subr.bf16.mxu1 %v590_v13  ;;  %v37_v22 = vld [vmem:[%s961_s0 + $0x38] sm:$0xff] }
   0x6   :  { %543 = vmatprep.mubr.msk.bf16.mxu1 %vm69_vm0, %v50_v8  ;;  %v34_v15 = vld [vmem:[%s961_s0 + $0x20] sm:$0xff]  ;;  %536 = vmatmul.mubr.msk.bf16.vlgmr.msra.gmra.mxu0 %vm69_vm0, %v47_v9  ;;  %v44_v23 = vld [vmem:[%s961_s0 + $0x70] sm:$0xff]  ;;  %v45_v24 = vld [vmem:[%s961_s0 + $0x78] sm:$0xff]  ;;  %v49_v25 = vpack.c.bf16 %v37_v22, %v36_v21 }
   0x7   :  { %544 = vmatmul.mubr.msk.bf16.vlgmr.msra.gmra.mxu1 %vm69_vm0, %v51_v12  ;;  %v42_v17 = vld [vmem:[%s961_s0 + $0x60] sm:$0xff]  ;;  %569 = vmatprep.subr.bf16.mxu0 %v591_v14  ;;  %v48_v19 = vpack.c.bf16 %v35_v16, %v34_v15  ;;  %v53_v26 = vpack.c.bf16 %v45_v24, %v44_v23 }
   0x8   :  { %v52_v20 = vpack.c.bf16 %v43_v18, %v42_v17  ;;  %552 = vmatpush3.bf16.msra.mxu1 %v590_v13  ;;  %570 = vmatpush3.bf16.msra.mxu0 %v591_v14  ;;  %v476_v27 = vld [vmem:[%s964_s4] ss:$0 sm:$0xff] }
   0x9   :  { %539 = vmatprep.mubr.msk.bf16.mxu0 %vm69_vm0, %v48_v19  ;;  %v777_v58 = vld [vmem:[%s966_s5] ss:$0 sm:$0xff] }
   0xa   :  { %547 = vmatprep.mubr.msk.bf16.mxu1 %vm69_vm0, %v52_v20  ;;  %v782_v59 = vld [vmem:[%s967_s6] ss:$0 sm:$0xff] }
   0xe   :  { %540 = vmatmul.mubr.msk.bf16.gmra.mxu0 %vm69_vm0, %v49_v25 }
   0xf   :  { %548 = vmatmul.mubr.msk.bf16.gmra.mxu1 %vm69_vm0, %v53_v26  ;;  %571 = vmatprep.mubr.msk.bf16.mxu0 %vm69_vm0, %v46_v4 }
  0x10   :  { %553 = vmatprep.mubr.msk.bf16.mxu1 %vm69_vm0, %v46_v4 }
  0x16   :  { %572 = vmatmul.mubr.msk.bf16.vlgmr.msra.gmra.mxu0 %vm69_vm0, %v47_v9 }
  0x17   :  { %554 = vmatmul.mubr.msk.bf16.vlgmr.msra.gmra.mxu1 %vm69_vm0, %v47_v9  ;;  %575 = vmatprep.mubr.msk.bf16.mxu0 %vm69_vm0, %v48_v19 }
  0x18   :  { %557 = vmatprep.mubr.msk.bf16.mxu1 %vm69_vm0, %v48_v19 }
  0x1e   :  { %576 = vmatmul.mubr.msk.bf16.gmra.mxu0 %vm69_vm0, %v49_v25 }
  0x1f   :  { %558 = vmatmul.mubr.msk.bf16.gmra.mxu1 %vm69_vm0, %v49_v25  ;;  %579 = vmatprep.mubr.msk.bf16.mxu0 %vm69_vm0, %v50_v8 }
  0x20   :  { %561 = vmatprep.mubr.msk.bf16.mxu1 %vm69_vm0, %v50_v8 }
  0x26   :  { %580 = vmatmul.mubr.msk.bf16.gmra.mxu0 %vm69_vm0, %v51_v12 }
  0x27   :  { %562 = vmatmul.mubr.msk.bf16.gmra.mxu1 %vm69_vm0, %v51_v12  ;;  %583 = vmatprep.mubr.msk.bf16.mxu0 %vm69_vm0, %v52_v20 }
  0x28   :  { %565 = vmatprep.mubr.msk.bf16.mxu1 %vm69_vm0, %v52_v20 }
  0x2e   :  { %584 = vmatmul.mubr.msk.bf16.gmra.mxu0 %vm69_vm0, %v53_v26 }
  0x2f   :  { %566 = vmatmul.mubr.msk.bf16.gmra.mxu1 %vm69_vm0, %v53_v26 }
  0xc6   :  { %v537_v28 = vpop.f32.mrf.mxu0 }
  0xc7   :  { %v545_v29 = vpop.f32.mrf.mxu1  ;;  %v137_v30 = vadd.f32 %v537_v28, %v476_v27 }
  0xc8   :  { %v169_v31 = vadd.f32 %v545_v29, %v476_v27  ;;  %v128_v32 = vpop.f32.mrf.mxu0 }
  0xc9   :  { %v160_v33 = vpop.f32.mrf.mxu1  ;;  %194 = vst.msk [vmem:[%s965_s7 + $0x10] sm:$0xff] %vm191_vm1, %v137_v30  ;;  %v129_v34 = vadd.f32 %v476_v27, %v128_v32 }
  0xca   :  { %202 = vst.msk [vmem:[%s965_s7 + $0x50] sm:$0xff] %vm191_vm1, %v169_v31  ;;  %v161_v35 = vadd.f32 %v476_v27, %v160_v33  ;;  %v538_v36 = vpop.f32.mrf.mxu0 }
  0xcb   :  { %v546_v37 = vpop.f32.mrf.mxu1  ;;  %192 = vst.msk [vmem:[%s965_s7] sm:$0xff] %vm191_vm1, %v129_v34  ;;  %v140_v38 = vadd.f32 %v538_v36, %v476_v27 }
  0xcc   :  { %200 = vst.msk [vmem:[%s965_s7 + $0x40] sm:$0xff] %vm191_vm1, %v161_v35  ;;  %v172_v39 = vadd.f32 %v546_v37, %v476_v27  ;;  %v131_v40 = vpop.f32.mrf.mxu0 }
  0xcd   :  { %v163_v41 = vpop.f32.mrf.mxu1  ;;  %195 = vst.msk [vmem:[%s965_s7 + $0x18] sm:$0xff] %vm191_vm1, %v140_v38  ;;  %v132_v42 = vadd.f32 %v476_v27, %v131_v40 }
  0xce   :  { %203 = vst.msk [vmem:[%s965_s7 + $0x58] sm:$0xff] %vm191_vm1, %v172_v39  ;;  %v164_v43 = vadd.f32 %v476_v27, %v163_v41  ;;  %v541_v44 = vpop.f32.mrf.mxu0 }
  0xcf   :  { %v549_v45 = vpop.f32.mrf.mxu1  ;;  %193 = vst.msk [vmem:[%s965_s7 + $0x8] sm:$0xff] %vm191_vm1, %v132_v42  ;;  %v153_v46 = vadd.f32 %v541_v44, %v476_v27 }
  0xd0   :  { %201 = vst.msk [vmem:[%s965_s7 + $0x48] sm:$0xff] %vm191_vm1, %v164_v43  ;;  %v185_v47 = vadd.f32 %v549_v45, %v476_v27  ;;  %v144_v48 = vpop.f32.mrf.mxu0 }
  0xd1   :  { %v176_v49 = vpop.f32.mrf.mxu1  ;;  %198 = vst.msk [vmem:[%s965_s7 + $0x30] sm:$0xff] %vm191_vm1, %v153_v46  ;;  %v145_v50 = vadd.f32 %v476_v27, %v144_v48 }
  0xd2   :  { %206 = vst.msk [vmem:[%s965_s7 + $0x70] sm:$0xff] %vm191_vm1, %v185_v47  ;;  %v177_v51 = vadd.f32 %v476_v27, %v176_v49  ;;  %v542_v52 = vpop.f32.mrf.mxu0 }
  0xd3   :  { %v550_v53 = vpop.f32.mrf.mxu1  ;;  %196 = vst.msk [vmem:[%s965_s7 + $0x20] sm:$0xff] %vm191_vm1, %v145_v50  ;;  %v156_v54 = vadd.f32 %v542_v52, %v476_v27 }
  0xd4   :  { %204 = vst.msk [vmem:[%s965_s7 + $0x60] sm:$0xff] %vm191_vm1, %v177_v51  ;;  %v188_v55 = vadd.f32 %v550_v53, %v476_v27  ;;  %v147_v56 = vpop.f32.mrf.mxu0 }
  0xd5   :  { %v179_v57 = vpop.f32.mrf.mxu1  ;;  %199 = vst.msk [vmem:[%s965_s7 + $0x38] sm:$0xff] %vm191_vm1, %v156_v54  ;;  %v148_v60 = vadd.f32 %v476_v27, %v147_v56 }
  0xd6   :  { %207 = vst.msk [vmem:[%s965_s7 + $0x78] sm:$0xff] %vm191_vm1, %v188_v55  ;;  %v180_v61 = vadd.f32 %v476_v27, %v179_v57  ;;  %v573_v63 = vpop.f32.mrf.mxu0 }
  0xd7   :  { %v555_v62 = vpop.f32.mrf.mxu1  ;;  %197 = vst.msk [vmem:[%s965_s7 + $0x28] sm:$0xff] %vm191_vm1, %v148_v60  ;;  %v394_v1 = vadd.f32 %v573_v63, %v782_v59 }
  0xd8   :  { %205 = vst.msk [vmem:[%s965_s7 + $0x68] sm:$0xff] %vm191_vm1, %v180_v61  ;;  %v266_v0 = vadd.f32 %v555_v62, %v777_v58  ;;  %v385_v3 = vpop.f32.mrf.mxu0 }
  0xd9   :  { %v257_v2 = vpop.f32.mrf.mxu1  ;;  %450 = vst.msk [vmem:[%s969_s9 + $0x10] sm:$0xff] %vm191_vm1, %v394_v1  ;;  %v386_v5 = vadd.f32 %v782_v59, %v385_v3 }
  0xda   :  { %322 = vst.msk [vmem:[%s968_s8 + $0x10] sm:$0xff] %vm191_vm1, %v266_v0  ;;  %v258_v4 = vadd.f32 %v777_v58, %v257_v2  ;;  %v574_v7 = vpop.f32.mrf.mxu0 }
  0xdb   :  { %v556_v6 = vpop.f32.mrf.mxu1  ;;  %448 = vst.msk [vmem:[%s969_s9] sm:$0xff] %vm191_vm1, %v386_v5  ;;  %v397_v9 = vadd.f32 %v574_v7, %v782_v59 }
  0xdc   :  { %320 = vst.msk [vmem:[%s968_s8] sm:$0xff] %vm191_vm1, %v258_v4  ;;  %v269_v8 = vadd.f32 %v556_v6, %v777_v58  ;;  %v388_v11 = vpop.f32.mrf.mxu0 }
  0xdd   :  { %v260_v10 = vpop.f32.mrf.mxu1  ;;  %451 = vst.msk [vmem:[%s969_s9 + $0x18] sm:$0xff] %vm191_vm1, %v397_v9  ;;  %v389_v13 = vadd.f32 %v782_v59, %v388_v11 }
  0xde   :  { %323 = vst.msk [vmem:[%s968_s8 + $0x18] sm:$0xff] %vm191_vm1, %v269_v8  ;;  %v261_v12 = vadd.f32 %v777_v58, %v260_v10  ;;  %v577_v15 = vpop.f32.mrf.mxu0 }
  0xdf   :  { %v559_v14 = vpop.f32.mrf.mxu1  ;;  %449 = vst.msk [vmem:[%s969_s9 + $0x8] sm:$0xff] %vm191_vm1, %v389_v13  ;;  %v410_v17 = vadd.f32 %v577_v15, %v782_v59 }
  0xe0   :  { %321 = vst.msk [vmem:[%s968_s8 + $0x8] sm:$0xff] %vm191_vm1, %v261_v12  ;;  %v282_v16 = vadd.f32 %v559_v14, %v777_v58  ;;  %v401_v19 = vpop.f32.mrf.mxu0 }
  0xe1   :  { %v273_v18 = vpop.f32.mrf.mxu1  ;;  %454 = vst.msk [vmem:[%s969_s9 + $0x30] sm:$0xff] %vm191_vm1, %v410_v17  ;;  %v402_v21 = vadd.f32 %v782_v59, %v401_v19 }
  0xe2   :  { %326 = vst.msk [vmem:[%s968_s8 + $0x30] sm:$0xff] %vm191_vm1, %v282_v16  ;;  %v274_v20 = vadd.f32 %v777_v58, %v273_v18  ;;  %v578_v23 = vpop.f32.mrf.mxu0 }
  0xe3   :  { %v560_v22 = vpop.f32.mrf.mxu1  ;;  %452 = vst.msk [vmem:[%s969_s9 + $0x20] sm:$0xff] %vm191_vm1, %v402_v21  ;;  %v413_v25 = vadd.f32 %v578_v23, %v782_v59 }
  0xe4   :  { %324 = vst.msk [vmem:[%s968_s8 + $0x20] sm:$0xff] %vm191_vm1, %v274_v20  ;;  %v285_v24 = vadd.f32 %v560_v22, %v777_v58  ;;  %v404_v27 = vpop.f32.mrf.mxu0 }
  0xe5   :  { %v276_v26 = vpop.f32.mrf.mxu1  ;;  %455 = vst.msk [vmem:[%s969_s9 + $0x38] sm:$0xff] %vm191_vm1, %v413_v25  ;;  %v405_v29 = vadd.f32 %v782_v59, %v404_v27 }
  0xe6   :  { %327 = vst.msk [vmem:[%s968_s8 + $0x38] sm:$0xff] %vm191_vm1, %v285_v24  ;;  %v277_v28 = vadd.f32 %v777_v58, %v276_v26  ;;  %v581_v31 = vpop.f32.mrf.mxu0 }
  0xe7   :  { %v563_v30 = vpop.f32.mrf.mxu1  ;;  %453 = vst.msk [vmem:[%s969_s9 + $0x28] sm:$0xff] %vm191_vm1, %v405_v29  ;;  %v426_v33 = vadd.f32 %v581_v31, %v782_v59 }
  0xe8   :  { %325 = vst.msk [vmem:[%s968_s8 + $0x28] sm:$0xff] %vm191_vm1, %v277_v28  ;;  %v298_v32 = vadd.f32 %v563_v30, %v777_v58  ;;  %v417_v35 = vpop.f32.mrf.mxu0 }
  0xe9   :  { %v289_v34 = vpop.f32.mrf.mxu1  ;;  %458 = vst.msk [vmem:[%s969_s9 + $0x50] sm:$0xff] %vm191_vm1, %v426_v33  ;;  %v418_v37 = vadd.f32 %v782_v59, %v417_v35 }
  0xea   :  { %330 = vst.msk [vmem:[%s968_s8 + $0x50] sm:$0xff] %vm191_vm1, %v298_v32  ;;  %v290_v36 = vadd.f32 %v777_v58, %v289_v34  ;;  %v582_v39 = vpop.f32.mrf.mxu0 }
  0xeb   :  { %v564_v38 = vpop.f32.mrf.mxu1  ;;  %456 = vst.msk [vmem:[%s969_s9 + $0x40] sm:$0xff] %vm191_vm1, %v418_v37  ;;  %v429_v41 = vadd.f32 %v582_v39, %v782_v59 }
  0xec   :  { %328 = vst.msk [vmem:[%s968_s8 + $0x40] sm:$0xff] %vm191_vm1, %v290_v36  ;;  %v301_v40 = vadd.f32 %v564_v38, %v777_v58  ;;  %v420_v43 = vpop.f32.mrf.mxu0 }
  0xed   :  { %v292_v42 = vpop.f32.mrf.mxu1  ;;  %459 = vst.msk [vmem:[%s969_s9 + $0x58] sm:$0xff] %vm191_vm1, %v429_v41  ;;  %v421_v45 = vadd.f32 %v782_v59, %v420_v43 }
  0xee   :  { %331 = vst.msk [vmem:[%s968_s8 + $0x58] sm:$0xff] %vm191_vm1, %v301_v40  ;;  %v293_v44 = vadd.f32 %v777_v58, %v292_v42  ;;  %v585_v47 = vpop.f32.mrf.mxu0 }
  0xef   :  { %v567_v46 = vpop.f32.mrf.mxu1  ;;  %457 = vst.msk [vmem:[%s969_s9 + $0x48] sm:$0xff] %vm191_vm1, %v421_v45  ;;  %v442_v49 = vadd.f32 %v585_v47, %v782_v59 }
  0xf0   :  { %329 = vst.msk [vmem:[%s968_s8 + $0x48] sm:$0xff] %vm191_vm1, %v293_v44  ;;  %v314_v48 = vadd.f32 %v567_v46, %v777_v58  ;;  %v433_v51 = vpop.f32.mrf.mxu0 }
  0xf1   :  { %v305_v50 = vpop.f32.mrf.mxu1  ;;  %462 = vst.msk [vmem:[%s969_s9 + $0x70] sm:$0xff] %vm191_vm1, %v442_v49  ;;  %v434_v53 = vadd.f32 %v782_v59, %v433_v51 }
  0xf2   :  { %334 = vst.msk [vmem:[%s968_s8 + $0x70] sm:$0xff] %vm191_vm1, %v314_v48  ;;  %v306_v52 = vadd.f32 %v777_v58, %v305_v50  ;;  %v586_v55 = vpop.f32.mrf.mxu0 }
  0xf3   :  { %v568_v54 = vpop.f32.mrf.mxu1  ;;  %460 = vst.msk [vmem:[%s969_s9 + $0x60] sm:$0xff] %vm191_vm1, %v434_v53  ;;  %v445_v57 = vadd.f32 %v586_v55, %v782_v59 }
  0xf4   :  { %332 = vst.msk [vmem:[%s968_s8 + $0x60] sm:$0xff] %vm191_vm1, %v306_v52  ;;  %v317_v56 = vadd.f32 %v568_v54, %v777_v58  ;;  %v436_v61 = vpop.f32.mrf.mxu0 }
  0xf5   :  { %v308_v60 = vpop.f32.mrf.mxu1  ;;  %463 = vst.msk [vmem:[%s969_s9 + $0x78] sm:$0xff] %vm191_vm1, %v445_v57  ;;  %v437_v63 = vadd.f32 %v782_v59, %v436_v61 }
  0xf6   :  { %335 = vst.msk [vmem:[%s968_s8 + $0x78] sm:$0xff] %vm191_vm1, %v317_v56  ;;  %v309_v62 = vadd.f32 %v777_v58, %v308_v60 }
  0xf7   :  { %461 = vst.msk [vmem:[%s969_s9 + $0x68] sm:$0xff] %vm191_vm1, %v437_v63 }
  0xf8   :  { %333 = vst.msk [vmem:[%s968_s8 + $0x68] sm:$0xff] %vm191_vm1, %v309_v62 }

// kernel: _lambda_.21
= control target key start
LH: loop header
LB: loop body
LE: loop exit
PB: predicated region body
PF: predicated region fallthrough
CT: control target
= control target key end

     0   :  { %vm30_vm0 = vcmask 261120   ;;  %s593_s0 = inlined_call_operand.vmem [shape: f32[16,8,32], index: 0, kind: input, shape index: {}]   ;;  %s594_s1 = inlined_call_operand.vmem [shape: f32[1,32], index: 1, kind: input, shape index: {}]   ;;  %s595_s2 = inlined_call_operand.vmem [shape: f32[1,32], index: 2, kind: input, shape index: {}]   ;;  %s596_s3 = inlined_call_operand.vmem [shape: f32[16,8,32], index: 3, kind: output, shape index: {}]  }
   0x1   :  { %v302_v0 = vld [vmem:[%s593_s0] sm:$0xff]  ;;  %v307_v1 = vld [vmem:[%s593_s0 + $0x10] sm:$0xff]  ;;  %v312_v2 = vld [vmem:[%s593_s0 + $0x8] sm:$0xff] }
   0x2   :  { %v31_v3 = vsel %vm30_vm0, %v302_v0, 0.0  ;;  %v37_v4 = vsel %vm30_vm0, %v307_v1, 0.0  ;;  %v321_v5 = vld [vmem:[%s593_s0 + $0x18] sm:$0xff]  ;;  %v34_v6 = vsel %vm30_vm0, %v312_v2, 0.0  ;;  %v330_v8 = vld [vmem:[%s593_s0 + $0x20] sm:$0xff]  ;;  %v335_v9 = vld [vmem:[%s593_s0 + $0x28] sm:$0xff] }
   0x3   :  { %32 = vadd.xlane.f32.xlu0 %v31_v3  ;;  %38 = vadd.xlane.f32.xlu1 %v37_v4  ;;  %v40_v7 = vsel %vm30_vm0, %v321_v5, 0.0  ;;  %v43_v10 = vsel %vm30_vm0, %v330_v8, 0.0  ;;  %v46_v11 = vsel %vm30_vm0, %v335_v9, 0.0  ;;  %v344_v12 = vld [vmem:[%s593_s0 + $0x30] sm:$0xff]  ;;  %v349_v13 = vld [vmem:[%s593_s0 + $0x38] sm:$0xff]  ;;  %v358_v16 = vld [vmem:[%s593_s0 + $0x40] sm:$0xff] }
   0x4   :  { %v49_v14 = vsel %vm30_vm0, %v344_v12, 0.0  ;;  %v52_v15 = vsel %vm30_vm0, %v349_v13, 0.0  ;;  %v363_v17 = vld [vmem:[%s593_s0 + $0x48] sm:$0xff]  ;;  %v55_v18 = vsel %vm30_vm0, %v358_v16, 0.0  ;;  %v372_v20 = vld [vmem:[%s593_s0 + $0x50] sm:$0xff]  ;;  %v377_v21 = vld [vmem:[%s593_s0 + $0x58] sm:$0xff] }
   0x5   :  { %v58_v19 = vsel %vm30_vm0, %v363_v17, 0.0  ;;  %v61_v22 = vsel %vm30_vm0, %v372_v20, 0.0  ;;  %v64_v23 = vsel %vm30_vm0, %v377_v21, 0.0  ;;  %v386_v24 = vld [vmem:[%s593_s0 + $0x60] sm:$0xff]  ;;  %v391_v25 = vld [vmem:[%s593_s0 + $0x68] sm:$0xff]  ;;  %v400_v28 = vld [vmem:[%s593_s0 + $0x70] sm:$0xff] }
   0x6   :  { %v67_v26 = vsel %vm30_vm0, %v386_v24, 0.0  ;;  %v70_v27 = vsel %vm30_vm0, %v391_v25, 0.0  ;;  %v405_v29 = vld [vmem:[%s593_s0 + $0x78] sm:$0xff]  ;;  %v73_v30 = vsel %vm30_vm0, %v400_v28, 0.0 }
   0x7   :  { %35 = vadd.xlane.f32.xlu0 %v34_v6  ;;  %41 = vadd.xlane.f32.xlu1 %v40_v7  ;;  %v76_v31 = vsel %vm30_vm0, %v405_v29, 0.0 }
   0xb   :  { %44 = vadd.xlane.f32.xlu0 %v43_v10  ;;  %47 = vadd.xlane.f32.xlu1 %v46_v11 }
   0xf   :  { %50 = vadd.xlane.f32.xlu0 %v49_v14  ;;  %53 = vadd.xlane.f32.xlu1 %v52_v15 }
  0x13   :  { %56 = vadd.xlane.f32.xlu0 %v55_v18  ;;  %59 = vadd.xlane.f32.xlu1 %v58_v19 }
  0x17   :  { %62 = vadd.xlane.f32.xlu0 %v61_v22  ;;  %65 = vadd.xlane.f32.xlu1 %v64_v23 }
  0x1b   :  { %68 = vadd.xlane.f32.xlu0 %v67_v26  ;;  %71 = vadd.xlane.f32.xlu1 %v70_v27 }
  0x1f   :  { %74 = vadd.xlane.f32.xlu0 %v73_v30  ;;  %77 = vadd.xlane.f32.xlu1 %v76_v31 }
  0x8c   :  { %v33_v32 = vpop.xlane.xlu0 %32  ;;  %v39_v33 = vpop.xlane.xlu1 %38 }
  0x90   :  { %v36_v34 = vpop.xlane.xlu0 %35  ;;  %v42_v35 = vpop.xlane.xlu1 %41 }
  0x91   :  { %v79_v36 = vadd.f32 %v36_v34, %v33_v32 }
  0x93   :  { %v80_v37 = vadd.f32 %v79_v36, %v39_v33 }
  0x94   :  { %v45_v38 = vpop.xlane.xlu0 %44  ;;  %v48_v39 = vpop.xlane.xlu1 %47 }
  0x95   :  { %v81_v40 = vadd.f32 %v80_v37, %v42_v35 }
  0x97   :  { %v82_v41 = vadd.f32 %v81_v40, %v45_v38 }
  0x98   :  { %v51_v42 = vpop.xlane.xlu0 %50  ;;  %v54_v43 = vpop.xlane.xlu1 %53 }
  0x99   :  { %v83_v44 = vadd.f32 %v82_v41, %v48_v39 }
  0x9b   :  { %v84_v45 = vadd.f32 %v83_v44, %v51_v42 }
  0x9c   :  { %v57_v46 = vpop.xlane.xlu0 %56  ;;  %v60_v47 = vpop.xlane.xlu1 %59 }
  0x9d   :  { %v85_v48 = vadd.f32 %v84_v45, %v54_v43 }
  0x9f   :  { %v86_v49 = vadd.f32 %v85_v48, %v57_v46 }
  0xa0   :  { %v63_v50 = vpop.xlane.xlu0 %62  ;;  %v66_v51 = vpop.xlane.xlu1 %65 }
  0xa1   :  { %v87_v52 = vadd.f32 %v86_v49, %v60_v47 }
  0xa3   :  { %v88_v53 = vadd.f32 %v87_v52, %v63_v50 }
  0xa4   :  { %v69_v54 = vpop.xlane.xlu0 %68  ;;  %v72_v55 = vpop.xlane.xlu1 %71 }
  0xa5   :  { %v89_v56 = vadd.f32 %v88_v53, %v66_v51 }
  0xa7   :  { %v90_v57 = vadd.f32 %v89_v56, %v69_v54 }
  0xa8   :  { %v75_v58 = vpop.xlane.xlu0 %74  ;;  %v78_v60 = vpop.xlane.xlu1 %77 }
  0xa9   :  { %v91_v59 = vadd.f32 %v90_v57, %v72_v55 }
  0xab   :  { %v92_v61 = vadd.f32 %v91_v59, %v75_v58 }
  0xad   :  { %v93_v62 = vadd.f32 %v92_v61, %v78_v60 }
  0xaf   :  { %v94_v63 = vmul.f32 0.001953125, %v93_v62 }
  0xb1   :  { %v412_v3 = vsub.f32 %v312_v2, %v94_v63  ;;  %v415_v4 = vsub.f32 %v302_v0, %v94_v63  ;;  %v418_v6 = vsub.f32 %v321_v5, %v94_v63  ;;  %v421_v7 = vsub.f32 %v307_v1, %v94_v63 }
  0xb2   :  { %v428_v14 = vsub.f32 %v335_v9, %v94_v63  ;;  %v431_v2 = vsub.f32 %v330_v8, %v94_v63  ;;  %v440_v18 = vsub.f32 %v349_v13, %v94_v63  ;;  %v443_v9 = vsub.f32 %v344_v12, %v94_v63 }
  0xb3   :  { %v112_v10 = vmul.f32 %v412_v3, %v412_v3  ;;  %v111_v11 = vmul.f32 %v415_v4, %v415_v4  ;;  %v114_v1 = vmul.f32 %v418_v6, %v418_v6  ;;  %v113_v15 = vmul.f32 %v421_v7, %v421_v7 }
  0xb4   :  { %v116_v22 = vmul.f32 %v428_v14, %v428_v14  ;;  %v115_v23 = vmul.f32 %v431_v2, %v431_v2  ;;  %v118_v26 = vmul.f32 %v440_v18, %v440_v18  ;;  %v117_v13 = vmul.f32 %v443_v9, %v443_v9 }
  0xb5   :  { %v130_v0 = vsel %vm30_vm0, %v112_v10, 0.0  ;;  %v127_v5 = vsel %vm30_vm0, %v111_v11, 0.0  ;;  %v136_v8 = vsel %vm30_vm0, %v114_v1, 0.0  ;;  %v133_v19 = vsel %vm30_vm0, %v113_v15, 0.0 }
  0xb6   :  { %131 = vadd.xlane.f32.xlu1 %v130_v0  ;;  %128 = vadd.xlane.f32.xlu0 %v127_v5  ;;  %v142_v12 = vsel %vm30_vm0, %v116_v22, 0.0  ;;  %v139_v27 = vsel %vm30_vm0, %v115_v23, 0.0  ;;  %v458_v30 = vsub.f32 %v363_v17, %v94_v63  ;;  %v461_v31 = vsub.f32 %v358_v16, %v94_v63 }
  0xb7   :  { %v148_v32 = vsel %vm30_vm0, %v118_v26, 0.0  ;;  %v145_v33 = vsel %vm30_vm0, %v117_v13, 0.0  ;;  %v470_v36 = vsub.f32 %v377_v21, %v94_v63  ;;  %v473_v17 = vsub.f32 %v372_v20, %v94_v63 }
  0xb8   :  { %v120_v34 = vmul.f32 %v458_v30, %v458_v30  ;;  %v119_v35 = vmul.f32 %v461_v31, %v461_v31  ;;  %v476_v16 = vsub.f32 %v391_v25, %v94_v63  ;;  %v479_v37 = vsub.f32 %v386_v24, %v94_v63 }
  0xb9   :  { %v122_v40 = vmul.f32 %v470_v36, %v470_v36  ;;  %v121_v21 = vmul.f32 %v473_v17, %v473_v17  ;;  %v488_v20 = vsub.f32 %v405_v29, %v94_v63  ;;  %v491_v25 = vsub.f32 %v400_v28, %v94_v63 }
  0xba   :  { %137 = vadd.xlane.f32.xlu1 %v136_v8  ;;  %134 = vadd.xlane.f32.xlu0 %v133_v19  ;;  %v154_v38 = vsel %vm30_vm0, %v120_v34, 0.0  ;;  %v151_v39 = vsel %vm30_vm0, %v119_v35, 0.0  ;;  %v124_v42 = vmul.f32 %v476_v16, %v476_v16  ;;  %v123_v43 = vmul.f32 %v479_v37, %v479_v37 }
  0xbb   :  { %v160_v24 = vsel %vm30_vm0, %v122_v40, 0.0  ;;  %v157_v41 = vsel %vm30_vm0, %v121_v21, 0.0  ;;  %v126_v28 = vmul.f32 %v488_v20, %v488_v20  ;;  %v125_v45 = vmul.f32 %v491_v25, %v491_v25 }
  0xbc   :  { %v166_v44 = vsel %vm30_vm0, %v124_v42, 0.0  ;;  %v163_v29 = vsel %vm30_vm0, %v123_v43, 0.0 }
  0xbd   :  { %v172_v46 = vsel %vm30_vm0, %v126_v28, 0.0  ;;  %v169_v47 = vsel %vm30_vm0, %v125_v45, 0.0 }
  0xbe   :  { %143 = vadd.xlane.f32.xlu1 %v142_v12  ;;  %140 = vadd.xlane.f32.xlu0 %v139_v27 }
  0xc2   :  { %149 = vadd.xlane.f32.xlu1 %v148_v32  ;;  %146 = vadd.xlane.f32.xlu0 %v145_v33 }
  0xc6   :  { %155 = vadd.xlane.f32.xlu1 %v154_v38  ;;  %152 = vadd.xlane.f32.xlu0 %v151_v39 }
  0xca   :  { %161 = vadd.xlane.f32.xlu1 %v160_v24  ;;  %158 = vadd.xlane.f32.xlu0 %v157_v41  ;;  %v275_v24 = vld [vmem:[%s594_s1] ss:$0 sm:$0xff] }
  0xce   :  { %167 = vadd.xlane.f32.xlu1 %v166_v44  ;;  %164 = vadd.xlane.f32.xlu0 %v163_v29 }
  0xd2   :  { %173 = vadd.xlane.f32.xlu1 %v172_v46  ;;  %170 = vadd.xlane.f32.xlu0 %v169_v47 }
 0x13f   :  { %v132_v48 = vpop.xlane.xlu1 %131  ;;  %v129_v49 = vpop.xlane.xlu0 %128 }
 0x140   :  { %v175_v50 = vadd.f32 %v132_v48, %v129_v49 }
 0x143   :  { %v138_v51 = vpop.xlane.xlu1 %137  ;;  %v135_v52 = vpop.xlane.xlu0 %134 }
 0x144   :  { %v176_v53 = vadd.f32 %v175_v50, %v135_v52 }
 0x146   :  { %v177_v54 = vadd.f32 %v176_v53, %v138_v51 }
 0x147   :  { %v144_v55 = vpop.xlane.xlu1 %143  ;;  %v141_v56 = vpop.xlane.xlu0 %140 }
 0x148   :  { %v178_v57 = vadd.f32 %v177_v54, %v141_v56 }
 0x14a   :  { %v179_v58 = vadd.f32 %v178_v57, %v144_v55 }
 0x14b   :  { %v150_v59 = vpop.xlane.xlu1 %149  ;;  %v147_v60 = vpop.xlane.xlu0 %146 }
 0x14c   :  { %v180_v61 = vadd.f32 %v179_v58, %v147_v60 }
 0x14e   :  { %v181_v62 = vadd.f32 %v180_v61, %v150_v59 }
 0x14f   :  { %v156_v63 = vpop.xlane.xlu1 %155  ;;  %v153_v10 = vpop.xlane.xlu0 %152 }
 0x150   :  { %v182_v11 = vadd.f32 %v181_v62, %v153_v10 }
 0x152   :  { %v183_v0 = vadd.f32 %v182_v11, %v156_v63 }
 0x153   :  { %v162_v5 = vpop.xlane.xlu1 %161  ;;  %v159_v1 = vpop.xlane.xlu0 %158 }
 0x154   :  { %v184_v15 = vadd.f32 %v183_v0, %v159_v1 }
 0x156   :  { %v185_v8 = vadd.f32 %v184_v15, %v162_v5 }
 0x157   :  { %v168_v19 = vpop.xlane.xlu1 %167  ;;  %v165_v22 = vpop.xlane.xlu0 %164 }
 0x158   :  { %v186_v23 = vadd.f32 %v185_v8, %v165_v22 }
 0x15a   :  { %v187_v26 = vadd.f32 %v186_v23, %v168_v19 }
 0x15b   :  { %v171_v13 = vpop.xlane.xlu0 %170  ;;  %v174_v27 = vpop.xlane.xlu1 %173 }
 0x15c   :  { %v188_v12 = vadd.f32 %v187_v26, %v171_v13 }
 0x15e   :  { %v189_v32 = vadd.f32 %v188_v12, %v174_v27 }
 0x160   :  { %v190_v33 = vmul.f32 0.001953125, %v189_v32 }
 0x162   :  { %v191_v34 = vadd.f32 1e-05, %v190_v33 }
 0x164   :  { %277 = vrsqrt.f32 %v191_v34 }
 0x171   :  { %v278_v35 = vpop.eup %277 }
 0x172   :  { %v193_v38 = vmul.f32 %v278_v35, %v415_v4  ;;  %v194_v39 = vmul.f32 %v278_v35, %v412_v3  ;;  %v195_v40 = vmul.f32 %v278_v35, %v421_v7  ;;  %v196_v21 = vmul.f32 %v278_v35, %v418_v6 }
 0x173   :  { %v197_v41 = vmul.f32 %v278_v35, %v431_v2  ;;  %v198_v42 = vmul.f32 %v278_v35, %v428_v14  ;;  %v199_v43 = vmul.f32 %v278_v35, %v443_v9  ;;  %v200_v44 = vmul.f32 %v278_v35, %v440_v18 }
 0x174   :  { %v201_v4 = vmul.f32 %v278_v35, %v461_v31  ;;  %v202_v3 = vmul.f32 %v278_v35, %v458_v30  ;;  %v203_v7 = vmul.f32 %v278_v35, %v473_v17  ;;  %v204_v6 = vmul.f32 %v278_v35, %v470_v36  ;;  %v276_v30 = vld [vmem:[%s595_s2] ss:$0 sm:$0xff] }
 0x175   :  { %v205_v29 = vmul.f32 %v278_v35, %v479_v37  ;;  %v206_v28 = vmul.f32 %v278_v35, %v476_v16  ;;  %v207_v2 = vmul.f32 %v278_v35, %v491_v25  ;;  %v208_v14 = vmul.f32 %v278_v35, %v488_v20 }
 0x176   :  { %v216_v45 = vmul.f32 %v275_v24, %v193_v38  ;;  %v217_v9 = vmul.f32 %v275_v24, %v194_v39  ;;  %v218_v46 = vmul.f32 %v275_v24, %v195_v40  ;;  %v219_v18 = vmul.f32 %v275_v24, %v196_v21 }
 0x177   :  { %v220_v31 = vmul.f32 %v275_v24, %v197_v41  ;;  %v221_v17 = vmul.f32 %v275_v24, %v198_v42  ;;  %v222_v47 = vmul.f32 %v275_v24, %v199_v43  ;;  %v223_v36 = vmul.f32 %v275_v24, %v200_v44 }
 0x178   :  { %v224_v48 = vmul.f32 %v275_v24, %v201_v4  ;;  %v225_v37 = vmul.f32 %v275_v24, %v202_v3  ;;  %v226_v49 = vmul.f32 %v275_v24, %v203_v7  ;;  %v227_v16 = vmul.f32 %v275_v24, %v204_v6 }
 0x179   :  { %v228_v50 = vmul.f32 %v275_v24, %v205_v29  ;;  %v229_v25 = vmul.f32 %v275_v24, %v206_v28  ;;  %v230_v51 = vmul.f32 %v275_v24, %v207_v2  ;;  %v231_v20 = vmul.f32 %v275_v24, %v208_v14 }
 0x17a   :  { %v239_v52 = vadd.f32 %v276_v30, %v216_v45  ;;  %v240_v53 = vadd.f32 %v276_v30, %v217_v9  ;;  %v241_v54 = vadd.f32 %v276_v30, %v218_v46  ;;  %v242_v55 = vadd.f32 %v276_v30, %v219_v18 }
 0x17b   :  { %v243_v56 = vadd.f32 %v276_v30, %v220_v31  ;;  %v244_v57 = vadd.f32 %v276_v30, %v221_v17  ;;  %v245_v58 = vadd.f32 %v276_v30, %v222_v47  ;;  %v246_v59 = vadd.f32 %v276_v30, %v223_v36 }
 0x17c   :  { %v247_v60 = vadd.f32 %v276_v30, %v224_v48  ;;  %v248_v61 = vadd.f32 %v276_v30, %v225_v37  ;;  %v249_v62 = vadd.f32 %v276_v30, %v226_v49  ;;  %v250_v63 = vadd.f32 %v276_v30, %v227_v16  ;;  %255 = vst.msk [vmem:[%s596_s3] sm:$0xff] %vm30_vm0, %v239_v52 }
 0x17d   :  { %256 = vst.msk [vmem:[%s596_s3 + $0x8] sm:$0xff] %vm30_vm0, %v240_v53  ;;  %257 = vst.msk [vmem:[%s596_s3 + $0x10] sm:$0xff] %vm30_vm0, %v241_v54  ;;  %v251_v10 = vadd.f32 %v276_v30, %v228_v50  ;;  %v252_v11 = vadd.f32 %v276_v30, %v229_v25  ;;  %v253_v0 = vadd.f32 %v276_v30, %v230_v51 }
 0x17e   :  { %258 = vst.msk [vmem:[%s596_s3 + $0x18] sm:$0xff] %vm30_vm0, %v242_v55  ;;  %v254_v5 = vadd.f32 %v276_v30, %v231_v20  ;;  %259 = vst.msk [vmem:[%s596_s3 + $0x20] sm:$0xff] %vm30_vm0, %v243_v56 }
 0x17f   :  { %260 = vst.msk [vmem:[%s596_s3 + $0x28] sm:$0xff] %vm30_vm0, %v244_v57  ;;  %261 = vst.msk [vmem:[%s596_s3 + $0x30] sm:$0xff] %vm30_vm0, %v245_v58 }
 0x180   :  { %262 = vst.msk [vmem:[%s596_s3 + $0x38] sm:$0xff] %vm30_vm0, %v246_v59  ;;  %263 = vst.msk [vmem:[%s596_s3 + $0x40] sm:$0xff] %vm30_vm0, %v247_v60 }
 0x181   :  { %264 = vst.msk [vmem:[%s596_s3 + $0x48] sm:$0xff] %vm30_vm0, %v248_v61  ;;  %265 = vst.msk [vmem:[%s596_s3 + $0x50] sm:$0xff] %vm30_vm0, %v249_v62 }
 0x182   :  { %266 = vst.msk [vmem:[%s596_s3 + $0x58] sm:$0xff] %vm30_vm0, %v250_v63  ;;  %267 = vst.msk [vmem:[%s596_s3 + $0x60] sm:$0xff] %vm30_vm0, %v251_v10 }
 0x183   :  { %268 = vst.msk [vmem:[%s596_s3 + $0x68] sm:$0xff] %vm30_vm0, %v252_v11  ;;  %269 = vst.msk [vmem:[%s596_s3 + $0x70] sm:$0xff] %vm30_vm0, %v253_v0 }
 0x184   :  { %270 = vst.msk [vmem:[%s596_s3 + $0x78] sm:$0xff] %vm30_vm0, %v254_v5 }

// kernel: _lambda_.23
= control target key start
LH: loop header
LB: loop body
LE: loop exit
PB: predicated region body
PF: predicated region fallthrough
CT: control target
= control target key end

     0   :  { %vm47_vm0 = vcmask 1041408   ;;  %vm48_vm1 = vcmask 1042432   ;;  %v143_v1 = vmov 65535   ;;  %vm40_vm2 = vcmask 171008   ;;  %s203_s1 = inlined_call_operand.vmem [shape: bf16[21,21], index: 1, kind: input, shape index: {}]   ;;  %s204_s0 = inlined_call_operand.vmem [shape: f32[32,21], index: 0, kind: input, shape index: {}]   ;;  %s205_s2 = inlined_call_operand.vmem [shape: f32[1,21], index: 2, kind: input, shape index: {}]   ;;  %s206_s3 = inlined_call_operand.vmem [shape: f32[32,21], index: 3, kind: output, shape index: {}]  }
   0x1   :  { %v141_v0 = vld [vmem:[%s203_s1 + $0x8] ss:$0 sps:$4 sm:$0x77]   ;;  %v49_v2 = vsel %vm47_vm0, 4294967295, %v143_v1  ;;  %v142_v5 = vld [vmem:[%s203_s1] sm:$0xff]   ;;  %v17_v9 = vld [vmem:[%s204_s0 + $0x10] sm:$0xff] }
   0x2   :  { %v50_v3 = vsel %vm48_vm1, %v49_v2, 0  ;;  %v15_v6 = vld [vmem:[%s204_s0] sm:$0xff]  ;;  %v16_v7 = vld [vmem:[%s204_s0 + $0x8] sm:$0xff]  ;;  %v18_v10 = vld [vmem:[%s204_s0 + $0x18] sm:$0xff] }
   0x3   :  { %v52_v4 = vand.u32 %v141_v0, %v50_v3  ;;  %v19_v8 = vpack.c.bf16 %v16_v7, %v15_v6  ;;  %v20_v11 = vpack.c.bf16 %v18_v10, %v17_v9  ;;  %v123_v12 = vld [vmem:[%s205_s2] ss:$0 sm:$0xff] }
   0x5   :  { %132 = vmatprep.subr.bf16.mxu0 %v52_v4  ;;  %136 = vmatprep.mubr.msk.bf16.mxu0 %vm40_vm2, %v19_v8 }
   0x6   :  { %133 = vmatpush3.bf16.msra.mxu0 %v52_v4 }
   0x7   :  { %134 = vmatprep.subr.bf16.mxu0 %v142_v5 }
   0xa   :  { %135 = vmatpush3.bf16.msra.mxu0 %v142_v5 }
   0xd   :  { %137 = vmatmul.mubr.msk.bf16.vlgmr.msra.gmra.mxu0 %vm40_vm2, %v20_v11 }
  0xcd   :  { %v138_v13 = vpop.f32.mrf.mxu0 }
  0xce   :  { %v97_v14 = vadd.f32 %v138_v13, %v123_v12 }
  0xcf   :  { %v88_v15 = vpop.f32.mrf.mxu0 }
  0xd0   :  { %vm105_vm3 = vcmp.ge.f32.partialorder %v97_v14, 0.0  ;;  %v109_v16 = vmul.f32 0.25, %v97_v14  ;;  %v89_v17 = vadd.f32 %v123_v12, %v88_v15 }
  0xd1   :  { %v139_v18 = vpop.f32.mrf.mxu0 }
  0xd2   :  { %v113_v19 = vsel %vm105_vm3, %v97_v14, %v109_v16  ;;  %vm103_vm4 = vcmp.ge.f32.partialorder %v89_v17, 0.0  ;;  %v107_v20 = vmul.f32 0.25, %v89_v17  ;;  %v100_v21 = vadd.f32 %v139_v18, %v123_v12 }
  0xd3   :  { %117 = vst.msk [vmem:[%s206_s3 + $0x10] sm:$0xff] %vm40_vm2, %v113_v19  ;;  %v91_v22 = vpop.f32.mrf.mxu0 }
  0xd4   :  { %v111_v23 = vsel %vm103_vm4, %v89_v17, %v107_v20  ;;  %vm106_vm5 = vcmp.ge.f32.partialorder %v100_v21, 0.0  ;;  %v110_v24 = vmul.f32 0.25, %v100_v21  ;;  %v92_v25 = vadd.f32 %v123_v12, %v91_v22 }
  0xd5   :  { %115 = vst.msk [vmem:[%s206_s3] sm:$0xff] %vm40_vm2, %v111_v23 }
  0xd6   :  { %v114_v26 = vsel %vm106_vm5, %v100_v21, %v110_v24  ;;  %vm104_vm6 = vcmp.ge.f32.partialorder %v92_v25, 0.0  ;;  %v108_v27 = vmul.f32 0.25, %v92_v25 }
  0xd7   :  { %118 = vst.msk [vmem:[%s206_s3 + $0x18] sm:$0xff] %vm40_vm2, %v114_v26 }
  0xd8   :  { %v112_v28 = vsel %vm104_vm6, %v92_v25, %v108_v27 }
  0xd9   :  { %116 = vst.msk [vmem:[%s206_s3 + $0x8] sm:$0xff] %vm40_vm2, %v112_v28 }

// kernel: _lambda_.22
= control target key start
LH: loop header
LB: loop body
LE: loop exit
PB: predicated region body
PF: predicated region fallthrough
CT: control target
= control target key end

     0   :  { %vm62_vm0 = vcmask 261120   ;;  %vm232_vm1 = vcmask 171008   ;;  %s467_s1 = inlined_call_operand.vmem [shape: bf16[32,21], index: 1, kind: input, shape index: {}]   ;;  %s468_s0 = inlined_call_operand.vmem [shape: f32[128,32], index: 0, kind: input, shape index: {}]   ;;  %s469_s2 = inlined_call_operand.vmem [shape: f32[1,21], index: 2, kind: input, shape index: {}]   ;;  %s470_s3 = inlined_call_operand.vmem [shape: f32[128,21], index: 3, kind: output, shape index: {}]  }
   0x1   :  { %v298_v0 = vld [vmem:[%s467_s1 + $0x8] sm:$0xff]   ;;  %v299_v1 = vld [vmem:[%s467_s1] sm:$0xff]   ;;  %v17_v7 = vld [vmem:[%s468_s0 + $0x10] sm:$0xff] }
   0x2   :  { %274 = vmatprep.subr.bf16.mxu0 %v298_v0  ;;  %294 = vmatprep.subr.bf16.mxu1 %v298_v0  ;;  %v15_v2 = vld [vmem:[%s468_s0] sm:$0xff]  ;;  %v16_v3 = vld [vmem:[%s468_s0 + $0x8] sm:$0xff]  ;;  %v18_v8 = vld [vmem:[%s468_s0 + $0x18] sm:$0xff] }
   0x3   :  { %v23_v4 = vld [vmem:[%s468_s0 + $0x40] sm:$0xff]  ;;  %275 = vmatpush3.bf16.msra.mxu0 %v298_v0  ;;  %296 = vmatpush3.bf16.msra.mxu1 %v298_v0  ;;  %v31_v5 = vpack.c.bf16 %v16_v3, %v15_v2  ;;  %v24_v6 = vld [vmem:[%s468_s0 + $0x48] sm:$0xff]  ;;  %v25_v10 = vld [vmem:[%s468_s0 + $0x50] sm:$0xff]  ;;  %v32_v16 = vpack.c.bf16 %v18_v8, %v17_v7 }
   0x4   :  { %276 = vmatprep.subr.bf16.mxu0 %v299_v1  ;;  %295 = vmatprep.subr.bf16.mxu1 %v299_v1  ;;  %v35_v9 = vpack.c.bf16 %v24_v6, %v23_v4  ;;  %v26_v11 = vld [vmem:[%s468_s0 + $0x58] sm:$0xff]  ;;  %v19_v12 = vld [vmem:[%s468_s0 + $0x20] sm:$0xff]  ;;  %v20_v13 = vld [vmem:[%s468_s0 + $0x28] sm:$0xff] }
   0x5   :  { %278 = vmatprep.mubr.msk.bf16.mxu0 %vm62_vm0, %v31_v5  ;;  %v27_v14 = vld [vmem:[%s468_s0 + $0x60] sm:$0xff]  ;;  %v28_v15 = vld [vmem:[%s468_s0 + $0x68] sm:$0xff]  ;;  %v36_v17 = vpack.c.bf16 %v26_v11, %v25_v10  ;;  %v33_v18 = vpack.c.bf16 %v20_v13, %v19_v12  ;;  %v21_v20 = vld [vmem:[%s468_s0 + $0x30] sm:$0xff] }
   0x6   :  { %286 = vmatprep.mubr.msk.bf16.mxu1 %vm62_vm0, %v35_v9  ;;  %v37_v19 = vpack.c.bf16 %v28_v15, %v27_v14  ;;  %v22_v21 = vld [vmem:[%s468_s0 + $0x38] sm:$0xff]  ;;  %v29_v22 = vld [vmem:[%s468_s0 + $0x70] sm:$0xff]  ;;  %v385_v26 = vld [vmem:[%s469_s2] ss:$0 sm:$0xff] }
   0x7   :  { %277 = vmatpush3.bf16.msra.mxu0 %v299_v1  ;;  %297 = vmatpush3.bf16.msra.mxu1 %v299_v1  ;;  %v30_v23 = vld [vmem:[%s468_s0 + $0x78] sm:$0xff]  ;;  %v34_v24 = vpack.c.bf16 %v22_v21, %v21_v20 }
   0x8   :  { %v38_v25 = vpack.c.bf16 %v30_v23, %v29_v22 }
   0xa   :  { %279 = vmatmul.mubr.msk.bf16.vlgmr.msra.gmra.mxu0 %vm62_vm0, %v32_v16  ;;  %287 = vmatmul.mubr.msk.bf16.vlgmr.msra.gmra.mxu1 %vm62_vm0, %v36_v17 }
   0xb   :  { %282 = vmatprep.mubr.msk.bf16.mxu0 %vm62_vm0, %v33_v18  ;;  %290 = vmatprep.mubr.msk.bf16.mxu1 %vm62_vm0, %v37_v19 }
  0x12   :  { %283 = vmatmul.mubr.msk.bf16.gmra.mxu0 %vm62_vm0, %v34_v24  ;;  %291 = vmatmul.mubr.msk.bf16.gmra.mxu1 %vm62_vm0, %v38_v25 }
  0xca   :  { %v280_v27 = vpop.f32.mrf.mxu0  ;;  %v288_v28 = vpop.f32.mrf.mxu1 }
  0xcb   :  { %v130_v29 = vadd.f32 %v280_v27, %v385_v26  ;;  %v162_v30 = vadd.f32 %v288_v28, %v385_v26 }
  0xcc   :  { %v121_v31 = vpop.f32.mrf.mxu0  ;;  %v153_v32 = vpop.f32.mrf.mxu1 }
  0xcd   :  { %vm186_vm2 = vcmp.ge.f32.partialorder %v130_v29, 0.0  ;;  %v202_v33 = vmul.f32 0.25, %v130_v29  ;;  %vm194_vm3 = vcmp.ge.f32.partialorder %v162_v30, 0.0  ;;  %v210_v34 = vmul.f32 0.25, %v162_v30 }
  0xce   :  { %v122_v35 = vadd.f32 %v385_v26, %v121_v31  ;;  %v154_v36 = vadd.f32 %v385_v26, %v153_v32  ;;  %v281_v37 = vpop.f32.mrf.mxu0  ;;  %v289_v38 = vpop.f32.mrf.mxu1 }
  0xcf   :  { %v218_v39 = vsel %vm186_vm2, %v130_v29, %v202_v33  ;;  %v226_v40 = vsel %vm194_vm3, %v162_v30, %v210_v34  ;;  %v133_v41 = vadd.f32 %v281_v37, %v385_v26  ;;  %v165_v42 = vadd.f32 %v289_v38, %v385_v26 }
  0xd0   :  { %235 = vst.msk [vmem:[%s470_s3 + $0x10] sm:$0xff] %vm232_vm1, %v218_v39  ;;  %243 = vst.msk [vmem:[%s470_s3 + $0x50] sm:$0xff] %vm232_vm1, %v226_v40  ;;  %vm184_vm4 = vcmp.ge.f32.partialorder %v122_v35, 0.0  ;;  %v200_v43 = vmul.f32 0.25, %v122_v35  ;;  %vm192_vm5 = vcmp.ge.f32.partialorder %v154_v36, 0.0  ;;  %v208_v44 = vmul.f32 0.25, %v154_v36  ;;  %v124_v45 = vpop.f32.mrf.mxu0  ;;  %v156_v46 = vpop.f32.mrf.mxu1 }
  0xd1   :  { %vm187_vm6 = vcmp.ge.f32.partialorder %v133_v41, 0.0  ;;  %v203_v47 = vmul.f32 0.25, %v133_v41  ;;  %vm195_vm7 = vcmp.ge.f32.partialorder %v165_v42, 0.0  ;;  %v211_v48 = vmul.f32 0.25, %v165_v42 }
  0xd2   :  { %v216_v49 = vsel %vm184_vm4, %v122_v35, %v200_v43  ;;  %v224_v50 = vsel %vm192_vm5, %v154_v36, %v208_v44  ;;  %v125_v51 = vadd.f32 %v385_v26, %v124_v45  ;;  %v157_v52 = vadd.f32 %v385_v26, %v156_v46  ;;  %v284_v53 = vpop.f32.mrf.mxu0  ;;  %v292_v54 = vpop.f32.mrf.mxu1 }
  0xd3   :  { %233 = vst.msk [vmem:[%s470_s3] sm:$0xff] %vm232_vm1, %v216_v49  ;;  %241 = vst.msk [vmem:[%s470_s3 + $0x40] sm:$0xff] %vm232_vm1, %v224_v50  ;;  %v219_v55 = vsel %vm187_vm6, %v133_v41, %v203_v47  ;;  %v227_v56 = vsel %vm195_vm7, %v165_v42, %v211_v48  ;;  %v146_v57 = vadd.f32 %v284_v53, %v385_v26 }
  0xd4   :  { %v178_v58 = vadd.f32 %v292_v54, %v385_v26  ;;  %236 = vst.msk [vmem:[%s470_s3 + $0x18] sm:$0xff] %vm232_vm1, %v219_v55  ;;  %244 = vst.msk [vmem:[%s470_s3 + $0x58] sm:$0xff] %vm232_vm1, %v227_v56  ;;  %vm185_vm8 = vcmp.ge.f32.partialorder %v125_v51, 0.0  ;;  %v201_v59 = vmul.f32 0.25, %v125_v51  ;;  %vm193_vm9 = vcmp.ge.f32.partialorder %v157_v52, 0.0  ;;  %v137_v61 = vpop.f32.mrf.mxu0  ;;  %v169_v62 = vpop.f32.mrf.mxu1 }
  0xd5   :  { %v209_v60 = vmul.f32 0.25, %v157_v52  ;;  %vm190_vm10 = vcmp.ge.f32.partialorder %v146_v57, 0.0  ;;  %v206_v63 = vmul.f32 0.25, %v146_v57  ;;  %v138_v3 = vadd.f32 %v385_v26, %v137_v61 }
  0xd6   :  { %vm198_vm11 = vcmp.ge.f32.partialorder %v178_v58, 0.0  ;;  %v214_v0 = vmul.f32 0.25, %v178_v58  ;;  %v217_v1 = vsel %vm185_vm8, %v125_v51, %v201_v59  ;;  %v170_v4 = vadd.f32 %v385_v26, %v169_v62  ;;  %v285_v5 = vpop.f32.mrf.mxu0  ;;  %v293_v6 = vpop.f32.mrf.mxu1 }
  0xd7   :  { %v225_v2 = vsel %vm193_vm9, %v157_v52, %v209_v60  ;;  %234 = vst.msk [vmem:[%s470_s3 + $0x8] sm:$0xff] %vm232_vm1, %v217_v1  ;;  %v222_v7 = vsel %vm190_vm10, %v146_v57, %v206_v63  ;;  %v149_v9 = vadd.f32 %v285_v5, %v385_v26  ;;  %v181_v10 = vadd.f32 %v293_v6, %v385_v26 }
  0xd8   :  { %242 = vst.msk [vmem:[%s470_s3 + $0x48] sm:$0xff] %vm232_vm1, %v225_v2  ;;  %v230_v8 = vsel %vm198_vm11, %v178_v58, %v214_v0  ;;  %239 = vst.msk [vmem:[%s470_s3 + $0x30] sm:$0xff] %vm232_vm1, %v222_v7  ;;  %vm188_vm12 = vcmp.ge.f32.partialorder %v138_v3, 0.0  ;;  %v204_v11 = vmul.f32 0.25, %v138_v3  ;;  %vm196_vm13 = vcmp.ge.f32.partialorder %v170_v4, 0.0  ;;  %v140_v13 = vpop.f32.mrf.mxu0  ;;  %v172_v14 = vpop.f32.mrf.mxu1 }
  0xd9   :  { %247 = vst.msk [vmem:[%s470_s3 + $0x70] sm:$0xff] %vm232_vm1, %v230_v8  ;;  %v212_v12 = vmul.f32 0.25, %v170_v4  ;;  %vm191_vm14 = vcmp.ge.f32.partialorder %v149_v9, 0.0  ;;  %v207_v15 = vmul.f32 0.25, %v149_v9  ;;  %vm199_vm15 = vcmp.ge.f32.partialorder %v181_v10, 0.0 }
  0xda   :  { %v215_v16 = vmul.f32 0.25, %v181_v10  ;;  %v220_v17 = vsel %vm188_vm12, %v138_v3, %v204_v11  ;;  %v141_v19 = vadd.f32 %v385_v26, %v140_v13  ;;  %v173_v20 = vadd.f32 %v385_v26, %v172_v14 }
  0xdb   :  { %v228_v18 = vsel %vm196_vm13, %v170_v4, %v212_v12  ;;  %237 = vst.msk [vmem:[%s470_s3 + $0x20] sm:$0xff] %vm232_vm1, %v220_v17  ;;  %v223_v21 = vsel %vm191_vm14, %v149_v9, %v207_v15 }
  0xdc   :  { %245 = vst.msk [vmem:[%s470_s3 + $0x60] sm:$0xff] %vm232_vm1, %v228_v18  ;;  %v231_v22 = vsel %vm199_vm15, %v181_v10, %v215_v16  ;;  %240 = vst.msk [vmem:[%s470_s3 + $0x38] sm:$0xff] %vm232_vm1, %v223_v21  ;;  %vm189_vm0 = vcmp.ge.f32.partialorder %v141_v19, 0.0  ;;  %v205_v23 = vmul.f32 0.25, %v141_v19  ;;  %vm197_vm2 = vcmp.ge.f32.partialorder %v173_v20, 0.0 }
  0xdd   :  { %248 = vst.msk [vmem:[%s470_s3 + $0x78] sm:$0xff] %vm232_vm1, %v231_v22  ;;  %v213_v24 = vmul.f32 0.25, %v173_v20 }
  0xde   :  { %v221_v25 = vsel %vm189_vm0, %v141_v19, %v205_v23 }
  0xdf   :  { %v229_v26 = vsel %vm197_vm2, %v173_v20, %v213_v24  ;;  %238 = vst.msk [vmem:[%s470_s3 + $0x28] sm:$0xff] %vm232_vm1, %v221_v25 }
  0xe0   :  { %246 = vst.msk [vmem:[%s470_s3 + $0x68] sm:$0xff] %vm232_vm1, %v229_v26 }

// kernel: _lambda_.24
= control target key start
LH: loop header
LB: loop body
LE: loop exit
PB: predicated region body
PF: predicated region fallthrough
CT: control target
= control target key end

     0   :  { %vm109_vm0 = vcmask 1041408   ;;  %vm110_vm1 = vcmask 1042432   ;;  %v524_v1 = vmov 65535   ;;  %vm84_vm2 = vcmask 171008   ;;  %s764_s3 = inlined_call_operand.vmem [shape: bf16[21,32], index: 3, kind: input, shape index: {}]   ;;  %s765_s2 = inlined_call_operand.vmem [shape: bf16[21,32], index: 2, kind: input, shape index: {}]   ;;  %s766_s1 = inlined_call_operand.vmem [shape: f32[128,21], index: 1, kind: input, shape index: {}]   ;;  %s767_s0 = inlined_call_operand.vmem [shape: f32[128,21], index: 0, kind: input, shape index: {}]   ;;  %s768_s4 = inlined_call_operand.vmem [shape: f32[1,32], index: 4, kind: input, shape index: {}]   ;;  %s769_s5 = inlined_call_operand.vmem [shape: f32[128,32], index: 5, kind: output, shape index: {}]  }
   0x1   :  { %v520_v0 = vld [vmem:[%s764_s3 + $0x8] ss:$0 sps:$4 sm:$0x77]   ;;  %v111_v2 = vsel %vm109_vm0, 4294967295, %v524_v1  ;;  %v522_v6 = vld [vmem:[%s764_s3] sm:$0xff]   ;;  %v50_v14 = vld [vmem:[%s766_s1 + $0x10] sm:$0xff] }
   0x2   :  { %v112_v3 = vsel %vm110_vm1, %v111_v2, 0  ;;  %v521_v4 = vld [vmem:[%s765_s2 + $0x8] ss:$0 sps:$4 sm:$0x77]   ;;  %v523_v8 = vld [vmem:[%s765_s2] sm:$0xff]   ;;  %v51_v15 = vld [vmem:[%s766_s1 + $0x18] sm:$0xff] }
   0x3   :  { %v114_v5 = vand.u32 %v520_v0, %v112_v3  ;;  %v247_v7 = vand.u32 %v521_v4, %v112_v3  ;;  %v48_v9 = vld [vmem:[%s766_s1] sm:$0xff]  ;;  %v49_v10 = vld [vmem:[%s766_s1 + $0x8] sm:$0xff]  ;;  %v23_v17 = vld [vmem:[%s767_s0 + $0x10] sm:$0xff]  ;;  %v65_v23 = vpack.c.bf16 %v51_v15, %v50_v14  ;;  %vm417_vm3 = vcmask 261120  }
   0x4   :  { %v21_v11 = vld [vmem:[%s767_s0] sm:$0xff]  ;;  %v64_v12 = vpack.c.bf16 %v49_v10, %v48_v9  ;;  %v22_v13 = vld [vmem:[%s767_s0 + $0x8] sm:$0xff]  ;;  %v24_v18 = vld [vmem:[%s767_s0 + $0x18] sm:$0xff] }
   0x5   :  { %479 = vmatprep.subr.bf16.mxu0 %v114_v5  ;;  %499 = vmatprep.subr.bf16.mxu1 %v247_v7  ;;  %v37_v16 = vpack.c.bf16 %v22_v13, %v21_v11  ;;  %v52_v19 = vld [vmem:[%s766_s1 + $0x20] sm:$0xff]  ;;  %v53_v20 = vld [vmem:[%s766_s1 + $0x28] sm:$0xff]  ;;  %v38_v24 = vpack.c.bf16 %v24_v18, %v23_v17  ;;  %v54_v27 = vld [vmem:[%s766_s1 + $0x30] sm:$0xff] }
   0x6   :  { %480 = vmatpush3.bf16.msra.mxu0 %v114_v5  ;;  %500 = vmatpush3.bf16.msra.mxu1 %v247_v7  ;;  %v25_v21 = vld [vmem:[%s767_s0 + $0x20] sm:$0xff]  ;;  %v26_v22 = vld [vmem:[%s767_s0 + $0x28] sm:$0xff]  ;;  %v66_v25 = vpack.c.bf16 %v53_v20, %v52_v19  ;;  %v55_v28 = vld [vmem:[%s766_s1 + $0x38] sm:$0xff] }
   0x7   :  { %481 = vmatprep.subr.bf16.mxu0 %v522_v6  ;;  %501 = vmatprep.subr.bf16.mxu1 %v523_v8  ;;  %v39_v26 = vpack.c.bf16 %v26_v22, %v25_v21  ;;  %v27_v29 = vld [vmem:[%s767_s0 + $0x30] sm:$0xff]  ;;  %v28_v30 = vld [vmem:[%s767_s0 + $0x38] sm:$0xff]  ;;  %v56_v31 = vld [vmem:[%s766_s1 + $0x40] sm:$0xff]  ;;  %v67_v35 = vpack.c.bf16 %v55_v28, %v54_v27 }
   0x8   :  { %483 = vmatprep.mubr.msk.bf16.mxu0 %vm84_vm2, %v64_v12  ;;  %503 = vmatprep.mubr.msk.bf16.mxu1 %vm84_vm2, %v37_v16  ;;  %v57_v32 = vld [vmem:[%s766_s1 + $0x48] sm:$0xff]  ;;  %v29_v33 = vld [vmem:[%s767_s0 + $0x40] sm:$0xff]  ;;  %v40_v36 = vpack.c.bf16 %v28_v30, %v27_v29  ;;  %v58_v39 = vld [vmem:[%s766_s1 + $0x50] sm:$0xff] }
   0x9   :  { %v30_v34 = vld [vmem:[%s767_s0 + $0x48] sm:$0xff]  ;;  %v68_v37 = vpack.c.bf16 %v57_v32, %v56_v31  ;;  %v59_v40 = vld [vmem:[%s766_s1 + $0x58] sm:$0xff]  ;;  %v31_v41 = vld [vmem:[%s767_s0 + $0x50] sm:$0xff] }
   0xa   :  { %482 = vmatpush3.bf16.msra.mxu0 %v522_v6  ;;  %502 = vmatpush3.bf16.msra.mxu1 %v523_v8  ;;  %v41_v38 = vpack.c.bf16 %v30_v34, %v29_v33  ;;  %v32_v42 = vld [vmem:[%s767_s0 + $0x58] sm:$0xff]  ;;  %v60_v43 = vld [vmem:[%s766_s1 + $0x60] sm:$0xff]  ;;  %v61_v44 = vld [vmem:[%s766_s1 + $0x68] sm:$0xff]  ;;  %v69_v47 = vpack.c.bf16 %v59_v40, %v58_v39 }
   0xb   :  { %v33_v45 = vld [vmem:[%s767_s0 + $0x60] sm:$0xff]  ;;  %v34_v46 = vld [vmem:[%s767_s0 + $0x68] sm:$0xff]  ;;  %v42_v48 = vpack.c.bf16 %v32_v42, %v31_v41  ;;  %v70_v49 = vpack.c.bf16 %v61_v44, %v60_v43  ;;  %v62_v51 = vld [vmem:[%s766_s1 + $0x70] sm:$0xff] }
   0xc   :  { %v43_v50 = vpack.c.bf16 %v34_v46, %v33_v45  ;;  %v63_v52 = vld [vmem:[%s766_s1 + $0x78] sm:$0xff]  ;;  %v35_v53 = vld [vmem:[%s767_s0 + $0x70] sm:$0xff]  ;;  %v682_v59 = vld [vmem:[%s768_s4] ss:$0 sm:$0xff] }
   0xd   :  { %484 = vmatmul.mubr.msk.bf16.vlgmr.msra.gmra.mxu0 %vm84_vm2, %v65_v23  ;;  %504 = vmatmul.mubr.msk.bf16.vlgmr.msra.gmra.mxu1 %vm84_vm2, %v38_v24  ;;  %v36_v54 = vld [vmem:[%s767_s0 + $0x78] sm:$0xff]  ;;  %v71_v55 = vpack.c.bf16 %v63_v52, %v62_v51 }
   0xe   :  { %487 = vmatprep.mubr.msk.bf16.mxu0 %vm84_vm2, %v66_v25  ;;  %507 = vmatprep.mubr.msk.bf16.mxu1 %vm84_vm2, %v39_v26  ;;  %v44_v56 = vpack.c.bf16 %v36_v54, %v35_v53 }
  0x15   :  { %488 = vmatmul.mubr.msk.bf16.gmra.mxu0 %vm84_vm2, %v67_v35  ;;  %508 = vmatmul.mubr.msk.bf16.gmra.mxu1 %vm84_vm2, %v40_v36 }
  0x16   :  { %491 = vmatprep.mubr.msk.bf16.mxu0 %vm84_vm2, %v68_v37  ;;  %511 = vmatprep.mubr.msk.bf16.mxu1 %vm84_vm2, %v41_v38 }
  0x1d   :  { %492 = vmatmul.mubr.msk.bf16.gmra.mxu0 %vm84_vm2, %v69_v47  ;;  %512 = vmatmul.mubr.msk.bf16.gmra.mxu1 %vm84_vm2, %v42_v48 }
  0x1e   :  { %495 = vmatprep.mubr.msk.bf16.mxu0 %vm84_vm2, %v70_v49  ;;  %515 = vmatprep.mubr.msk.bf16.mxu1 %vm84_vm2, %v43_v50 }
  0x25   :  { %496 = vmatmul.mubr.msk.bf16.gmra.mxu0 %vm84_vm2, %v71_v55  ;;  %516 = vmatmul.mubr.msk.bf16.gmra.mxu1 %vm84_vm2, %v44_v56 }
  0xcd   :  { %v485_v57 = vpop.f32.mrf.mxu0  ;;  %v505_v58 = vpop.f32.mrf.mxu1 }
  0xce   :  { %v292_v60 = vadd.f32 %v505_v58, %v485_v57 }
  0xcf   :  { %v150_v61 = vpop.f32.mrf.mxu0  ;;  %v283_v62 = vpop.f32.mrf.mxu1 }
  0xd0   :  { %v355_v63 = vadd.f32 %v682_v59, %v292_v60  ;;  %v284_v0 = vadd.f32 %v283_v62, %v150_v61 }
  0xd1   :  { %v486_v1 = vpop.f32.mrf.mxu0  ;;  %v506_v2 = vpop.f32.mrf.mxu1 }
  0xd2   :  { %vm371_vm4 = vcmp.ge.f32.partialorder %v355_v63, 0.0  ;;  %v387_v3 = vmul.f32 0.25, %v355_v63  ;;  %v353_v4 = vadd.f32 %v682_v59, %v284_v0  ;;  %v295_v5 = vadd.f32 %v506_v2, %v486_v1 }
  0xd3   :  { %v153_v6 = vpop.f32.mrf.mxu0  ;;  %v286_v7 = vpop.f32.mrf.mxu1 }
  0xd4   :  { %v403_v8 = vsel %vm371_vm4, %v355_v63, %v387_v3  ;;  %vm369_vm5 = vcmp.ge.f32.partialorder %v353_v4, 0.0  ;;  %v385_v9 = vmul.f32 0.25, %v353_v4  ;;  %v356_v10 = vadd.f32 %v682_v59, %v295_v5 }
  0xd5   :  { %v489_v11 = vpop.f32.mrf.mxu0  ;;  %420 = vst.msk [vmem:[%s769_s5 + $0x10] sm:$0xff] %vm417_vm3, %v403_v8  ;;  %v287_v12 = vadd.f32 %v286_v7, %v153_v6  ;;  %v509_v13 = vpop.f32.mrf.mxu1 }
  0xd6   :  { %v401_v14 = vsel %vm369_vm5, %v353_v4, %v385_v9  ;;  %vm372_vm6 = vcmp.ge.f32.partialorder %v356_v10, 0.0  ;;  %v388_v15 = vmul.f32 0.25, %v356_v10  ;;  %v308_v16 = vadd.f32 %v509_v13, %v489_v11 }
  0xd7   :  { %v166_v17 = vpop.f32.mrf.mxu0  ;;  %418 = vst.msk [vmem:[%s769_s5] sm:$0xff] %vm417_vm3, %v401_v14  ;;  %v354_v18 = vadd.f32 %v682_v59, %v287_v12  ;;  %v299_v19 = vpop.f32.mrf.mxu1 }
  0xd8   :  { %v404_v20 = vsel %vm372_vm6, %v356_v10, %v388_v15  ;;  %v359_v21 = vadd.f32 %v682_v59, %v308_v16  ;;  %v300_v22 = vadd.f32 %v299_v19, %v166_v17 }
  0xd9   :  { %v490_v23 = vpop.f32.mrf.mxu0  ;;  %421 = vst.msk [vmem:[%s769_s5 + $0x18] sm:$0xff] %vm417_vm3, %v404_v20  ;;  %vm370_vm7 = vcmp.ge.f32.partialorder %v354_v18, 0.0  ;;  %v386_v24 = vmul.f32 0.25, %v354_v18  ;;  %v510_v25 = vpop.f32.mrf.mxu1 }
  0xda   :  { %vm375_vm8 = vcmp.ge.f32.partialorder %v359_v21, 0.0  ;;  %v391_v26 = vmul.f32 0.25, %v359_v21  ;;  %v357_v27 = vadd.f32 %v682_v59, %v300_v22  ;;  %v311_v28 = vadd.f32 %v510_v25, %v490_v23 }
  0xdb   :  { %v169_v29 = vpop.f32.mrf.mxu0  ;;  %v402_v30 = vsel %vm370_vm7, %v354_v18, %v386_v24  ;;  %v302_v31 = vpop.f32.mrf.mxu1 }
  0xdc   :  { %419 = vst.msk [vmem:[%s769_s5 + $0x8] sm:$0xff] %vm417_vm3, %v402_v30  ;;  %v407_v32 = vsel %vm375_vm8, %v359_v21, %v391_v26  ;;  %vm373_vm9 = vcmp.ge.f32.partialorder %v357_v27, 0.0  ;;  %v389_v33 = vmul.f32 0.25, %v357_v27  ;;  %v360_v34 = vadd.f32 %v682_v59, %v311_v28 }
  0xdd   :  { %v493_v35 = vpop.f32.mrf.mxu0  ;;  %424 = vst.msk [vmem:[%s769_s5 + $0x30] sm:$0xff] %vm417_vm3, %v407_v32  ;;  %v303_v36 = vadd.f32 %v302_v31, %v169_v29  ;;  %v513_v37 = vpop.f32.mrf.mxu1 }
  0xde   :  { %v405_v38 = vsel %vm373_vm9, %v357_v27, %v389_v33  ;;  %vm376_vm10 = vcmp.ge.f32.partialorder %v360_v34, 0.0  ;;  %v392_v39 = vmul.f32 0.25, %v360_v34  ;;  %v324_v40 = vadd.f32 %v513_v37, %v493_v35 }
  0xdf   :  { %v182_v41 = vpop.f32.mrf.mxu0  ;;  %422 = vst.msk [vmem:[%s769_s5 + $0x20] sm:$0xff] %vm417_vm3, %v405_v38  ;;  %v358_v42 = vadd.f32 %v682_v59, %v303_v36  ;;  %v315_v43 = vpop.f32.mrf.mxu1 }
  0xe0   :  { %v408_v44 = vsel %vm376_vm10, %v360_v34, %v392_v39  ;;  %v363_v45 = vadd.f32 %v682_v59, %v324_v40  ;;  %v316_v46 = vadd.f32 %v315_v43, %v182_v41 }
  0xe1   :  { %v494_v47 = vpop.f32.mrf.mxu0  ;;  %425 = vst.msk [vmem:[%s769_s5 + $0x38] sm:$0xff] %vm417_vm3, %v408_v44  ;;  %vm374_vm11 = vcmp.ge.f32.partialorder %v358_v42, 0.0  ;;  %v390_v48 = vmul.f32 0.25, %v358_v42  ;;  %v514_v49 = vpop.f32.mrf.mxu1 }
  0xe2   :  { %vm379_vm12 = vcmp.ge.f32.partialorder %v363_v45, 0.0  ;;  %v395_v50 = vmul.f32 0.25, %v363_v45  ;;  %v361_v51 = vadd.f32 %v682_v59, %v316_v46  ;;  %v327_v52 = vadd.f32 %v514_v49, %v494_v47 }
  0xe3   :  { %v185_v53 = vpop.f32.mrf.mxu0  ;;  %v406_v54 = vsel %vm374_vm11, %v358_v42, %v390_v48  ;;  %v318_v55 = vpop.f32.mrf.mxu1 }
  0xe4   :  { %423 = vst.msk [vmem:[%s769_s5 + $0x28] sm:$0xff] %vm417_vm3, %v406_v54  ;;  %v411_v56 = vsel %vm379_vm12, %v363_v45, %v395_v50  ;;  %vm377_vm13 = vcmp.ge.f32.partialorder %v361_v51, 0.0  ;;  %v393_v57 = vmul.f32 0.25, %v361_v51  ;;  %v364_v58 = vadd.f32 %v682_v59, %v327_v52 }
  0xe5   :  { %v497_v60 = vpop.f32.mrf.mxu0  ;;  %428 = vst.msk [vmem:[%s769_s5 + $0x50] sm:$0xff] %vm417_vm3, %v411_v56  ;;  %v319_v61 = vadd.f32 %v318_v55, %v185_v53  ;;  %v517_v62 = vpop.f32.mrf.mxu1 }
  0xe6   :  { %v409_v63 = vsel %vm377_vm13, %v361_v51, %v393_v57  ;;  %vm380_vm14 = vcmp.ge.f32.partialorder %v364_v58, 0.0  ;;  %v396_v0 = vmul.f32 0.25, %v364_v58  ;;  %v340_v1 = vadd.f32 %v517_v62, %v497_v60 }
  0xe7   :  { %v198_v2 = vpop.f32.mrf.mxu0  ;;  %426 = vst.msk [vmem:[%s769_s5 + $0x40] sm:$0xff] %vm417_vm3, %v409_v63  ;;  %v362_v3 = vadd.f32 %v682_v59, %v319_v61  ;;  %v331_v4 = vpop.f32.mrf.mxu1 }
  0xe8   :  { %v412_v5 = vsel %vm380_vm14, %v364_v58, %v396_v0  ;;  %v367_v6 = vadd.f32 %v682_v59, %v340_v1  ;;  %v332_v7 = vadd.f32 %v331_v4, %v198_v2 }
  0xe9   :  { %v498_v8 = vpop.f32.mrf.mxu0  ;;  %429 = vst.msk [vmem:[%s769_s5 + $0x58] sm:$0xff] %vm417_vm3, %v412_v5  ;;  %vm378_vm15 = vcmp.ge.f32.partialorder %v362_v3, 0.0  ;;  %v394_v9 = vmul.f32 0.25, %v362_v3  ;;  %v518_v10 = vpop.f32.mrf.mxu1 }
  0xea   :  { %vm383_vm0 = vcmp.ge.f32.partialorder %v367_v6, 0.0  ;;  %v399_v11 = vmul.f32 0.25, %v367_v6  ;;  %v365_v12 = vadd.f32 %v682_v59, %v332_v7  ;;  %v343_v13 = vadd.f32 %v518_v10, %v498_v8 }
  0xeb   :  { %v201_v14 = vpop.f32.mrf.mxu0  ;;  %v410_v15 = vsel %vm378_vm15, %v362_v3, %v394_v9  ;;  %v334_v16 = vpop.f32.mrf.mxu1 }
  0xec   :  { %427 = vst.msk [vmem:[%s769_s5 + $0x48] sm:$0xff] %vm417_vm3, %v410_v15  ;;  %v415_v17 = vsel %vm383_vm0, %v367_v6, %v399_v11  ;;  %vm381_vm1 = vcmp.ge.f32.partialorder %v365_v12, 0.0  ;;  %v397_v18 = vmul.f32 0.25, %v365_v12  ;;  %v368_v19 = vadd.f32 %v682_v59, %v343_v13 }
  0xed   :  { %432 = vst.msk [vmem:[%s769_s5 + $0x70] sm:$0xff] %vm417_vm3, %v415_v17  ;;  %v335_v20 = vadd.f32 %v334_v16, %v201_v14 }
  0xee   :  { %v413_v21 = vsel %vm381_vm1, %v365_v12, %v397_v18  ;;  %vm384_vm2 = vcmp.ge.f32.partialorder %v368_v19, 0.0  ;;  %v400_v22 = vmul.f32 0.25, %v368_v19 }
  0xef   :  { %430 = vst.msk [vmem:[%s769_s5 + $0x60] sm:$0xff] %vm417_vm3, %v413_v21  ;;  %v366_v23 = vadd.f32 %v682_v59, %v335_v20 }
  0xf0   :  { %v416_v24 = vsel %vm384_vm2, %v368_v19, %v400_v22 }
  0xf1   :  { %433 = vst.msk [vmem:[%s769_s5 + $0x78] sm:$0xff] %vm417_vm3, %v416_v24  ;;  %vm382_vm4 = vcmp.ge.f32.partialorder %v366_v23, 0.0  ;;  %v398_v25 = vmul.f32 0.25, %v366_v23 }
  0xf3   :  { %v414_v26 = vsel %vm382_vm4, %v366_v23, %v398_v25 }
  0xf4   :  { %431 = vst.msk [vmem:[%s769_s5 + $0x68] sm:$0xff] %vm417_vm3, %v414_v26 }

// kernel: _lambda_.20
= control target key start
LH: loop header
LB: loop body
LE: loop exit
PB: predicated region body
PF: predicated region fallthrough
CT: control target
= control target key end

     0   :  { %vm31_vm0 = vcmask 261120   ;;  %v3389_v0 = vmov 0.0   ;;  %vm3390_vm1 = vmmov 0   ;;  %s4075_s3 = inlined_call_operand.vmem [shape: bf16[32,32], index: 3, kind: input, shape index: {}]   ;;  %s4076_s4 = inlined_call_operand.vmem [shape: bf16[32,32], index: 4, kind: input, shape index: {}]   ;;  %s4077_s5 = inlined_call_operand.vmem [shape: bf16[32,32], index: 5, kind: input, shape index: {}]   ;;  %s4078_s0 = inlined_call_operand.vmem [shape: f32[16,8,32], index: 0, kind: input, shape index: {}]   ;;  %s4079_s1 = inlined_call_operand.vmem [shape: f32[16,8,32], index: 1, kind: input, shape index: {}]   ;;  %s4080_s6 = inlined_call_operand.vmem [shape: f32[1,32], index: 6, kind: input, shape index: {}]   ;;  %s4081_s2 = inlined_call_operand.vmem [shape: f32[16,8,32], index: 2, kind: input, shape index: {}]   ;;  %s4082_s7 = inlined_call_operand.vmem [shape: f32[16,8,32], index: 7, kind: output, shape index: {}]  }
   0x1   :  { %2830 = vmatprep.subr.bf16.mxu0 %v3389_v0  ;;  %v3435_v1 = vld [vmem:[%s4075_s3 + $0x8] sm:$0xff]   ;;  %2834 = vmatprep.mubr.msk.bf16.mxu0 %vm3390_vm1, %v3389_v0  ;;  %32 = vst.msk [vmem:[#allocation2] sm:$0xff] %vm31_vm0, %v3389_v0  ;;  %v3444_v2 = vld [vmem:[%s4075_s3] sm:$0xff]  }
   0x2   :  { %2838 = vmatprep.subr.bf16.mxu1 %v3389_v0  ;;  %2842 = vmatprep.mubr.msk.bf16.mxu1 %vm3390_vm1, %v3389_v0  ;;  %v3453_v3 = vld [vmem:[%s4076_s4 + $0x8] sm:$0xff]   ;;  %v3460_v4 = vld [vmem:[%s4076_s4] sm:$0xff]  }
   0x3   :  { %2831 = vmatpush3.bf16.msra.mxu0 %v3435_v1  ;;  %2839 = vmatpush3.bf16.msra.mxu1 %v3453_v3  ;;  %v3470_v6 = vld [vmem:[%s4077_s5 + $0x8] sm:$0xff]   ;;  %v3482_v8 = vld [vmem:[%s4077_s5] sm:$0xff]  }
   0x4   :  { %2832 = vmatprep.subr.bf16.mxu0 %v3389_v0  ;;  %2840 = vmatprep.subr.bf16.mxu1 %v3389_v0  ;;  %v156_v9 = vld [vmem:[%s4078_s0] sm:$0xff]  ;;  %v2553_v44 = vld [vmem:[%s4078_s0 + $0x8] sm:$0xff] }
   0x5   :  { %v164_v14 = vld [vmem:[%s4079_s1] sm:$0xff]  ;;  %v2555_v51 = vld [vmem:[%s4079_s1 + $0x8] sm:$0xff] }
   0x6   :  { %v3511_v30 = vld [vmem:[%s4080_s6] ss:$0 sm:$0xff] }
   0x7   :  { %2833 = vmatpush3.bf16.msra.mxu0 %v3444_v2  ;;  %2841 = vmatpush3.bf16.msra.mxu1 %v3460_v4  ;;  %v172_v34 = vld [vmem:[%s4081_s2] sm:$0xff] }
   0x8   :  { %v3464_v5 = vld [vmem:[#allocation2] sm:$0xff]  ;;  %2846 = vmatprep.subr.bf16.mxu0 %v3389_v0  ;;  %2854 = vmatprep.subr.bf16.mxu1 %v3389_v0 }
   0x9   :  { %v47_v7 = vpack.c.bf16 %v3464_v5, %v3464_v5 }
   0xb   :  { %2835 = vmatmul.mubr.msk.bf16.vlgmr.msra.gmra.mxu0 %vm31_vm0, %v47_v7  ;;  %2843 = vmatmul.mubr.msk.bf16.vlgmr.msra.gmra.mxu1 %vm31_vm0, %v47_v7 }
   0xc   :  { %2847 = vmatpush3.bf16.msra.mxu0 %v3470_v6  ;;  %2850 = vmatprep.mubr.msk.bf16.mxu0 %vm3390_vm1, %v3389_v0 }
   0xd   :  { %2848 = vmatprep.subr.bf16.mxu0 %v3389_v0  ;;  %2855 = vmatpush3.bf16.msra.mxu1 %v3435_v1 }
   0xe   :  { %2858 = vmatprep.mubr.msk.bf16.mxu1 %vm3390_vm1, %v3389_v0  ;;  %2856 = vmatprep.subr.bf16.mxu1 %v3389_v0 }
  0x10   :  { %2849 = vmatpush3.bf16.msra.mxu0 %v3482_v8 }
  0x11   :  { %2862 = vmatprep.subr.bf16.mxu0 %v3389_v0  ;;  %2857 = vmatpush3.bf16.msra.mxu1 %v3444_v2 }
  0x12   :  { %2870 = vmatprep.subr.bf16.mxu1 %v3389_v0 }
  0x13   :  { %2851 = vmatmul.mubr.msk.bf16.vlgmr.msra.gmra.mxu0 %vm31_vm0, %v47_v7 }
  0x14   :  { %2863 = vmatpush3.bf16.msra.mxu0 %v3453_v3  ;;  %2866 = vmatprep.mubr.msk.bf16.mxu0 %vm3390_vm1, %v3389_v0 }
  0x15   :  { %2864 = vmatprep.subr.bf16.mxu0 %v3389_v0 }
  0x18   :  { %2865 = vmatpush3.bf16.msra.mxu0 %v3460_v4 }
  0x19   :  { %2878 = vmatprep.subr.bf16.mxu0 %v3389_v0 }
  0xcb   :  { %v98_v10 = vpop.f32.mrf.mxu0  ;;  %v150_v12 = vpop.f32.mrf.mxu1 }
  0xcc   :  { %v157_v11 = vadd.f32 %v156_v9, %v98_v10  ;;  %v165_v18 = vadd.f32 %v164_v14, %v150_v12 }
  0xcd   :  { %v2836_v13 = vpop.f32.mrf.mxu0  ;;  %v2844_v16 = vpop.f32.mrf.mxu1 }
  0xce   :  { %v2545_v15 = vmul.f32 -1.442695, %v157_v11  ;;  %v2546_v23 = vmul.f32 -1.442695, %v165_v18  ;;  %v2557_v11 = vld [vmem:[%s4081_s2 + $0x8] sm:$0xff] }
  0xcf   :  { %v101_v17 = vpop.f32.mrf.mxu0  ;;  %v153_v19 = vpop.f32.mrf.mxu1 }
  0xd0   :  { %3222 = vpow2.f32 %v2545_v15 }
  0xd1   :  { %v2837_v20 = vpop.f32.mrf.mxu0  ;;  %v2845_v21 = vpop.f32.mrf.mxu1  ;;  %3224 = vpow2.f32 %v2546_v23 }
  0xd2   :  { %v2562_v21 = vld [vmem:[%s4078_s0 + $0x10] sm:$0xff] }
  0xd3   :  { %v225_v22 = vpop.f32.mrf.mxu0 }
  0xd4   :  { %v226_v32 = vadd.f32 %v3511_v30, %v225_v22 }
  0xd5   :  { %v2852_v24 = vpop.f32.mrf.mxu0 }
  0xd7   :  { %v228_v25 = vpop.f32.mrf.mxu0 }
  0xd9   :  { %v2853_v26 = vpop.f32.mrf.mxu0 }
  0xdd   :  { %v3223_v27 = vpop.eup %3222 }
  0xde   :  { %v161_v28 = vadd.f32 1.0, %v3223_v27  ;;  %v3225_v29 = vpop.eup %3224 }
  0xdf   :  { %v169_v31 = vadd.f32 1.0, %v3225_v29 }
  0xe0   :  { %3226 = vrcp.f32 %v161_v28  ;;  %v2564_v28 = vld [vmem:[%s4079_s1 + $0x10] sm:$0xff] }
  0xe1   :  { %3228 = vrcp.f32 %v169_v31 }
  0xed   :  { %v3227_v33 = vpop.eup %3226 }
  0xee   :  { %v231_v35 = vmul.f32 %v3227_v33, %v226_v32  ;;  %v3229_v37 = vpop.eup %3228 }
  0xef   :  { %v234_v38 = vsub.f32 1.0, %v3229_v37  ;;  %v236_v41 = vmul.f32 %v3229_v37, %v3464_v5 }
  0xf0   :  { %v232_v36 = vadd.f32 %v231_v35, %v172_v34 }
  0xf2   :  { %3230 = vtanh.f32 %v232_v36 }
  0xff   :  { %v3231_v39 = vpop.eup %3230 }
 0x100   :  { %v235_v40 = vmul.f32 %v3231_v39, %v234_v38 }
 0x102   :  { %v237_v42 = vadd.f32 %v236_v41, %v235_v40 }
 0x104   :  { %238 = vst.msk [vmem:[%s4082_s7] sm:$0xff] %vm31_vm0, %v237_v42  ;;  %v239_v43 = vpack.c.bf16 %v237_v42, %v237_v42 }
 0x106   :  { %2859 = vmatmul.mubr.msk.bf16.vlgmr.msra.gmra.mxu1 %vm31_vm0, %v239_v43  ;;  %2867 = vmatmul.mubr.msk.bf16.vlgmr.msra.gmra.mxu0 %vm31_vm0, %v239_v43 }
 0x107   :  { %2871 = vmatpush3.bf16.msra.mxu1 %v3470_v6  ;;  %2874 = vmatprep.mubr.msk.bf16.mxu1 %vm3390_vm1, %v3389_v0 }
 0x108   :  { %2872 = vmatprep.subr.bf16.mxu1 %v3389_v0  ;;  %2879 = vmatpush3.bf16.msra.mxu0 %v3435_v1 }
 0x109   :  { %2880 = vmatprep.subr.bf16.mxu0 %v3389_v0  ;;  %2882 = vmatprep.mubr.msk.bf16.mxu0 %vm3390_vm1, %v3389_v0 }
 0x10b   :  { %2873 = vmatpush3.bf16.msra.mxu1 %v3482_v8 }
 0x10c   :  { %2886 = vmatprep.subr.bf16.mxu1 %v3389_v0  ;;  %2881 = vmatpush3.bf16.msra.mxu0 %v3444_v2 }
 0x10d   :  { %2894 = vmatprep.subr.bf16.mxu0 %v3389_v0 }
 0x10e   :  { %2875 = vmatmul.mubr.msk.bf16.vlgmr.msra.gmra.mxu1 %vm31_vm0, %v239_v43 }
 0x10f   :  { %2887 = vmatpush3.bf16.msra.mxu1 %v3453_v3  ;;  %2890 = vmatprep.mubr.msk.bf16.mxu1 %vm3390_vm1, %v3389_v0 }
 0x110   :  { %2888 = vmatprep.subr.bf16.mxu1 %v3389_v0 }
 0x113   :  { %2889 = vmatpush3.bf16.msra.mxu1 %v3460_v4 }
 0x114   :  { %2902 = vmatprep.subr.bf16.mxu1 %v3389_v0 }
 0x1c6   :  { %v277_v45 = vpop.f32.mrf.mxu1  ;;  %v317_v46 = vpop.f32.mrf.mxu0 }
 0x1c7   :  { %v325_v47 = vadd.f32 %v2553_v44, %v277_v45  ;;  %v334_v56 = vadd.f32 %v2555_v51, %v317_v46  ;;  %v2566_v46 = vld [vmem:[%s4081_s2 + $0x10] sm:$0xff] }
 0x1c8   :  { %v2860_v48 = vpop.f32.mrf.mxu1  ;;  %v2868_v49 = vpop.f32.mrf.mxu0 }
 0x1c9   :  { %v2554_v50 = vmul.f32 -1.442695, %v325_v47  ;;  %v2556_v59 = vmul.f32 -1.442695, %v334_v56  ;;  %v2571_v56 = vld [vmem:[%s4078_s0 + $0x18] sm:$0xff] }
 0x1ca   :  { %v280_v52 = vpop.f32.mrf.mxu1  ;;  %v320_v53 = vpop.f32.mrf.mxu0 }
 0x1cb   :  { %3232 = vpow2.f32 %v2554_v50 }
 0x1cc   :  { %v2861_v54 = vpop.f32.mrf.mxu1  ;;  %v2869_v55 = vpop.f32.mrf.mxu0  ;;  %3234 = vpow2.f32 %v2556_v59 }
 0x1ce   :  { %v377_v57 = vpop.f32.mrf.mxu1 }
 0x1cf   :  { %v378_v9 = vadd.f32 %v3511_v30, %v377_v57 }
 0x1d0   :  { %v2876_v58 = vpop.f32.mrf.mxu1 }
 0x1d2   :  { %v380_v60 = vpop.f32.mrf.mxu1 }
 0x1d4   :  { %v2877_v61 = vpop.f32.mrf.mxu1 }
 0x1d8   :  { %v3233_v62 = vpop.eup %3232 }
 0x1d9   :  { %v329_v63 = vadd.f32 1.0, %v3233_v62  ;;  %v3235_v5 = vpop.eup %3234 }
 0x1da   :  { %v338_v7 = vadd.f32 1.0, %v3235_v5 }
 0x1db   :  { %3236 = vrcp.f32 %v329_v63  ;;  %v2573_v63 = vld [vmem:[%s4079_s1 + $0x18] sm:$0xff] }
 0x1dc   :  { %3238 = vrcp.f32 %v338_v7 }
 0x1e8   :  { %v3237_v10 = vpop.eup %3236 }
 0x1e9   :  { %v383_v12 = vmul.f32 %v3237_v10, %v378_v9  ;;  %v3239_v14 = vpop.eup %3238 }
 0x1ea   :  { %v386_v15 = vsub.f32 1.0, %v3239_v14  ;;  %v388_v18 = vmul.f32 %v3239_v14, %v237_v42 }
 0x1eb   :  { %v384_v13 = vadd.f32 %v2557_v11, %v383_v12 }
 0x1ed   :  { %3240 = vtanh.f32 %v384_v13 }
 0x1fa   :  { %v3241_v16 = vpop.eup %3240 }
 0x1fb   :  { %v387_v17 = vmul.f32 %v3241_v16, %v386_v15 }
 0x1fd   :  { %v389_v19 = vadd.f32 %v388_v18, %v387_v17 }
 0x1ff   :  { %2559 = vst.msk [vmem:[%s4082_s7 + $0x8] sm:$0xff] %vm31_vm0, %v389_v19  ;;  %v392_v20 = vpack.c.bf16 %v389_v19, %v389_v19 }
 0x201   :  { %2883 = vmatmul.mubr.msk.bf16.vlgmr.msra.gmra.mxu0 %vm31_vm0, %v392_v20  ;;  %2891 = vmatmul.mubr.msk.bf16.vlgmr.msra.gmra.mxu1 %vm31_vm0, %v392_v20 }
 0x202   :  { %2895 = vmatpush3.bf16.msra.mxu0 %v3470_v6  ;;  %2898 = vmatprep.mubr.msk.bf16.mxu0 %vm3390_vm1, %v3389_v0 }
 0x203   :  { %2896 = vmatprep.subr.bf16.mxu0 %v3389_v0  ;;  %2903 = vmatpush3.bf16.msra.mxu1 %v3435_v1 }
 0x204   :  { %2904 = vmatprep.subr.bf16.mxu1 %v3389_v0  ;;  %2906 = vmatprep.mubr.msk.bf16.mxu1 %vm3390_vm1, %v3389_v0 }
 0x206   :  { %2897 = vmatpush3.bf16.msra.mxu0 %v3482_v8 }
 0x207   :  { %2910 = vmatprep.subr.bf16.mxu0 %v3389_v0  ;;  %2905 = vmatpush3.bf16.msra.mxu1 %v3444_v2 }
 0x208   :  { %2918 = vmatprep.subr.bf16.mxu1 %v3389_v0 }
 0x209   :  { %2899 = vmatmul.mubr.msk.bf16.vlgmr.msra.gmra.mxu0 %vm31_vm0, %v392_v20 }
 0x20a   :  { %2911 = vmatpush3.bf16.msra.mxu0 %v3453_v3  ;;  %2914 = vmatprep.mubr.msk.bf16.mxu0 %vm3390_vm1, %v3389_v0 }
 0x20b   :  { %2912 = vmatprep.subr.bf16.mxu0 %v3389_v0 }
 0x20e   :  { %2913 = vmatpush3.bf16.msra.mxu0 %v3460_v4 }
 0x20f   :  { %2926 = vmatprep.subr.bf16.mxu0 %v3389_v0 }
 0x2c1   :  { %v430_v22 = vpop.f32.mrf.mxu0  ;;  %v470_v23 = vpop.f32.mrf.mxu1 }
 0x2c2   :  { %v478_v24 = vadd.f32 %v2562_v21, %v430_v22  ;;  %v487_v34 = vadd.f32 %v2564_v28, %v470_v23  ;;  %v2575_v23 = vld [vmem:[%s4081_s2 + $0x18] sm:$0xff] }
 0x2c3   :  { %v2884_v25 = vpop.f32.mrf.mxu0  ;;  %v2892_v26 = vpop.f32.mrf.mxu1 }
 0x2c4   :  { %v2563_v27 = vmul.f32 -1.442695, %v478_v24  ;;  %v2565_v37 = vmul.f32 -1.442695, %v487_v34  ;;  %v2580_v34 = vld [vmem:[%s4078_s0 + $0x20] sm:$0xff] }
 0x2c5   :  { %v433_v29 = vpop.f32.mrf.mxu0  ;;  %v473_v31 = vpop.f32.mrf.mxu1 }
 0x2c6   :  { %3242 = vpow2.f32 %v2563_v27 }
 0x2c7   :  { %v2885_v32 = vpop.f32.mrf.mxu0  ;;  %v2893_v33 = vpop.f32.mrf.mxu1  ;;  %3244 = vpow2.f32 %v2565_v37 }
 0x2c9   :  { %v530_v35 = vpop.f32.mrf.mxu0 }
 0x2ca   :  { %v531_v44 = vadd.f32 %v3511_v30, %v530_v35 }
 0x2cb   :  { %v2900_v36 = vpop.f32.mrf.mxu0 }
 0x2cd   :  { %v533_v38 = vpop.f32.mrf.mxu0 }
 0x2cf   :  { %v2901_v39 = vpop.f32.mrf.mxu0 }
 0x2d3   :  { %v3243_v40 = vpop.eup %3242 }
 0x2d4   :  { %v482_v41 = vadd.f32 1.0, %v3243_v40  ;;  %v3245_v42 = vpop.eup %3244 }
 0x2d5   :  { %v491_v43 = vadd.f32 1.0, %v3245_v42 }
 0x2d6   :  { %3246 = vrcp.f32 %v482_v41  ;;  %v2582_v41 = vld [vmem:[%s4079_s1 + $0x20] sm:$0xff] }
 0x2d7   :  { %3248 = vrcp.f32 %v491_v43 }
 0x2e3   :  { %v3247_v45 = vpop.eup %3246 }
 0x2e4   :  { %v536_v47 = vmul.f32 %v3247_v45, %v531_v44  ;;  %v3249_v49 = vpop.eup %3248 }
 0x2e5   :  { %v539_v50 = vsub.f32 1.0, %v3249_v49  ;;  %v541_v53 = vmul.f32 %v3249_v49, %v389_v19 }
 0x2e6   :  { %v537_v48 = vadd.f32 %v2566_v46, %v536_v47 }
 0x2e8   :  { %3250 = vtanh.f32 %v537_v48 }
 0x2f5   :  { %v3251_v51 = vpop.eup %3250 }
 0x2f6   :  { %v540_v52 = vmul.f32 %v3251_v51, %v539_v50 }
 0x2f8   :  { %v542_v54 = vadd.f32 %v541_v53, %v540_v52 }
 0x2fa   :  { %2568 = vst.msk [vmem:[%s4082_s7 + $0x10] sm:$0xff] %vm31_vm0, %v542_v54  ;;  %v545_v55 = vpack.c.bf16 %v542_v54, %v542_v54 }
 0x2fc   :  { %2907 = vmatmul.mubr.msk.bf16.vlgmr.msra.gmra.mxu1 %vm31_vm0, %v545_v55  ;;  %2915 = vmatmul.mubr.msk.bf16.vlgmr.msra.gmra.mxu0 %vm31_vm0, %v545_v55 }
 0x2fd   :  { %2919 = vmatpush3.bf16.msra.mxu1 %v3470_v6  ;;  %2922 = vmatprep.mubr.msk.bf16.mxu1 %vm3390_vm1, %v3389_v0 }
 0x2fe   :  { %2920 = vmatprep.subr.bf16.mxu1 %v3389_v0  ;;  %2927 = vmatpush3.bf16.msra.mxu0 %v3435_v1 }
 0x2ff   :  { %2928 = vmatprep.subr.bf16.mxu0 %v3389_v0  ;;  %2930 = vmatprep.mubr.msk.bf16.mxu0 %vm3390_vm1, %v3389_v0 }
 0x301   :  { %2921 = vmatpush3.bf16.msra.mxu1 %v3482_v8 }
 0x302   :  { %2934 = vmatprep.subr.bf16.mxu1 %v3389_v0  ;;  %2929 = vmatpush3.bf16.msra.mxu0 %v3444_v2 }
 0x303   :  { %2942 = vmatprep.subr.bf16.mxu0 %v3389_v0 }
 0x304   :  { %2923 = vmatmul.mubr.msk.bf16.vlgmr.msra.gmra.mxu1 %vm31_vm0, %v545_v55 }
 0x305   :  { %2935 = vmatpush3.bf16.msra.mxu1 %v3453_v3  ;;  %2938 = vmatprep.mubr.msk.bf16.mxu1 %vm3390_vm1, %v3389_v0 }
 0x306   :  { %2936 = vmatprep.subr.bf16.mxu1 %v3389_v0 }
 0x309   :  { %2937 = vmatpush3.bf16.msra.mxu1 %v3460_v4 }
 0x30a   :  { %2950 = vmatprep.subr.bf16.mxu1 %v3389_v0 }
 0x3bc   :  { %v583_v57 = vpop.f32.mrf.mxu1  ;;  %v623_v58 = vpop.f32.mrf.mxu0 }
 0x3bd   :  { %v631_v59 = vadd.f32 %v2571_v56, %v583_v57  ;;  %v640_v11 = vadd.f32 %v2573_v63, %v623_v58  ;;  %v2584_v58 = vld [vmem:[%s4081_s2 + $0x20] sm:$0xff] }
 0x3be   :  { %v2908_v60 = vpop.f32.mrf.mxu1  ;;  %v2916_v61 = vpop.f32.mrf.mxu0 }
 0x3bf   :  { %v2572_v62 = vmul.f32 -1.442695, %v631_v59  ;;  %v2574_v14 = vmul.f32 -1.442695, %v640_v11  ;;  %v2589_v11 = vld [vmem:[%s4078_s0 + $0x28] sm:$0xff] }
 0x3c0   :  { %v586_v5 = vpop.f32.mrf.mxu1  ;;  %v626_v7 = vpop.f32.mrf.mxu0 }
 0x3c1   :  { %3252 = vpow2.f32 %v2572_v62 }
 0x3c2   :  { %v2909_v9 = vpop.f32.mrf.mxu1  ;;  %v2917_v10 = vpop.f32.mrf.mxu0  ;;  %3254 = vpow2.f32 %v2574_v14 }
 0x3c4   :  { %v683_v12 = vpop.f32.mrf.mxu1 }
 0x3c5   :  { %v684_v21 = vadd.f32 %v3511_v30, %v683_v12 }
 0x3c6   :  { %v2924_v13 = vpop.f32.mrf.mxu1 }
 0x3c8   :  { %v686_v15 = vpop.f32.mrf.mxu1 }
 0x3ca   :  { %v2925_v16 = vpop.f32.mrf.mxu1 }
 0x3ce   :  { %v3253_v17 = vpop.eup %3252 }
 0x3cf   :  { %v635_v18 = vadd.f32 1.0, %v3253_v17  ;;  %v3255_v19 = vpop.eup %3254 }
 0x3d0   :  { %v644_v20 = vadd.f32 1.0, %v3255_v19 }
 0x3d1   :  { %3256 = vrcp.f32 %v635_v18  ;;  %v2591_v18 = vld [vmem:[%s4079_s1 + $0x28] sm:$0xff] }
 0x3d2   :  { %3258 = vrcp.f32 %v644_v20 }
 0x3de   :  { %v3257_v22 = vpop.eup %3256 }
 0x3df   :  { %v689_v24 = vmul.f32 %v3257_v22, %v684_v21  ;;  %v3259_v26 = vpop.eup %3258 }
 0x3e0   :  { %v692_v27 = vsub.f32 1.0, %v3259_v26  ;;  %v694_v31 = vmul.f32 %v3259_v26, %v542_v54 }
 0x3e1   :  { %v690_v25 = vadd.f32 %v2575_v23, %v689_v24 }
 0x3e3   :  { %3260 = vtanh.f32 %v690_v25 }
 0x3f0   :  { %v3261_v28 = vpop.eup %3260 }
 0x3f1   :  { %v693_v29 = vmul.f32 %v3261_v28, %v692_v27 }
 0x3f3   :  { %v695_v32 = vadd.f32 %v694_v31, %v693_v29 }
 0x3f5   :  { %2577 = vst.msk [vmem:[%s4082_s7 + $0x18] sm:$0xff] %vm31_vm0, %v695_v32  ;;  %v698_v33 = vpack.c.bf16 %v695_v32, %v695_v32 }
 0x3f7   :  { %2931 = vmatmul.mubr.msk.bf16.vlgmr.msra.gmra.mxu0 %vm31_vm0, %v698_v33  ;;  %2939 = vmatmul.mubr.msk.bf16.vlgmr.msra.gmra.mxu1 %vm31_vm0, %v698_v33 }
 0x3f8   :  { %2943 = vmatpush3.bf16.msra.mxu0 %v3470_v6  ;;  %2946 = vmatprep.mubr.msk.bf16.mxu0 %vm3390_vm1, %v3389_v0 }
 0x3f9   :  { %2944 = vmatprep.subr.bf16.mxu0 %v3389_v0  ;;  %2951 = vmatpush3.bf16.msra.mxu1 %v3435_v1 }
 0x3fa   :  { %2952 = vmatprep.subr.bf16.mxu1 %v3389_v0  ;;  %2954 = vmatprep.mubr.msk.bf16.mxu1 %vm3390_vm1, %v3389_v0 }
 0x3fc   :  { %2945 = vmatpush3.bf16.msra.mxu0 %v3482_v8 }
 0x3fd   :  { %2958 = vmatprep.subr.bf16.mxu0 %v3389_v0  ;;  %2953 = vmatpush3.bf16.msra.mxu1 %v3444_v2 }
 0x3fe   :  { %2966 = vmatprep.subr.bf16.mxu1 %v3389_v0 }
 0x3ff   :  { %2947 = vmatmul.mubr.msk.bf16.vlgmr.msra.gmra.mxu0 %vm31_vm0, %v698_v33 }
 0x400   :  { %2959 = vmatpush3.bf16.msra.mxu0 %v3453_v3  ;;  %2962 = vmatprep.mubr.msk.bf16.mxu0 %vm3390_vm1, %v3389_v0 }
 0x401   :  { %2960 = vmatprep.subr.bf16.mxu0 %v3389_v0 }
 0x404   :  { %2961 = vmatpush3.bf16.msra.mxu0 %v3460_v4 }
 0x405   :  { %2974 = vmatprep.subr.bf16.mxu0 %v3389_v0 }
 0x4b7   :  { %v736_v35 = vpop.f32.mrf.mxu0  ;;  %v776_v36 = vpop.f32.mrf.mxu1 }
 0x4b8   :  { %v784_v37 = vadd.f32 %v2580_v34, %v736_v35  ;;  %v793_v46 = vadd.f32 %v2582_v41, %v776_v36  ;;  %v2593_v36 = vld [vmem:[%s4081_s2 + $0x28] sm:$0xff] }
 0x4b9   :  { %v2932_v38 = vpop.f32.mrf.mxu0  ;;  %v2940_v39 = vpop.f32.mrf.mxu1 }
 0x4ba   :  { %v2581_v40 = vmul.f32 -1.442695, %v784_v37  ;;  %v2583_v49 = vmul.f32 -1.442695, %v793_v46  ;;  %v2598_v46 = vld [vmem:[%s4078_s0 + $0x30] sm:$0xff] }
 0x4bb   :  { %v739_v42 = vpop.f32.mrf.mxu0  ;;  %v779_v43 = vpop.f32.mrf.mxu1 }
 0x4bc   :  { %3262 = vpow2.f32 %v2581_v40 }
 0x4bd   :  { %v2933_v44 = vpop.f32.mrf.mxu0  ;;  %v2941_v45 = vpop.f32.mrf.mxu1  ;;  %3264 = vpow2.f32 %v2583_v49 }
 0x4bf   :  { %v836_v47 = vpop.f32.mrf.mxu0 }
 0x4c0   :  { %v837_v56 = vadd.f32 %v3511_v30, %v836_v47 }
 0x4c1   :  { %v2948_v48 = vpop.f32.mrf.mxu0 }
 0x4c3   :  { %v839_v50 = vpop.f32.mrf.mxu0 }
 0x4c5   :  { %v2949_v51 = vpop.f32.mrf.mxu0 }
 0x4c9   :  { %v3263_v52 = vpop.eup %3262 }
 0x4ca   :  { %v788_v53 = vadd.f32 1.0, %v3263_v52  ;;  %v3265_v54 = vpop.eup %3264 }
 0x4cb   :  { %v797_v55 = vadd.f32 1.0, %v3265_v54 }
 0x4cc   :  { %3266 = vrcp.f32 %v788_v53  ;;  %v2600_v53 = vld [vmem:[%s4079_s1 + $0x30] sm:$0xff] }
 0x4cd   :  { %3268 = vrcp.f32 %v797_v55 }
 0x4d9   :  { %v3267_v57 = vpop.eup %3266 }
 0x4da   :  { %v842_v59 = vmul.f32 %v3267_v57, %v837_v56  ;;  %v3269_v61 = vpop.eup %3268 }
 0x4db   :  { %v845_v62 = vsub.f32 1.0, %v3269_v61  ;;  %v847_v7 = vmul.f32 %v3269_v61, %v695_v32 }
 0x4dc   :  { %v843_v60 = vadd.f32 %v2584_v58, %v842_v59 }
 0x4de   :  { %3270 = vtanh.f32 %v843_v60 }
 0x4eb   :  { %v3271_v63 = vpop.eup %3270 }
 0x4ec   :  { %v846_v5 = vmul.f32 %v3271_v63, %v845_v62 }
 0x4ee   :  { %v848_v9 = vadd.f32 %v847_v7, %v846_v5 }
 0x4f0   :  { %2586 = vst.msk [vmem:[%s4082_s7 + $0x20] sm:$0xff] %vm31_vm0, %v848_v9  ;;  %v851_v10 = vpack.c.bf16 %v848_v9, %v848_v9 }
 0x4f2   :  { %2955 = vmatmul.mubr.msk.bf16.vlgmr.msra.gmra.mxu1 %vm31_vm0, %v851_v10  ;;  %2963 = vmatmul.mubr.msk.bf16.vlgmr.msra.gmra.mxu0 %vm31_vm0, %v851_v10 }
 0x4f3   :  { %2967 = vmatpush3.bf16.msra.mxu1 %v3470_v6  ;;  %2970 = vmatprep.mubr.msk.bf16.mxu1 %vm3390_vm1, %v3389_v0 }
 0x4f4   :  { %2968 = vmatprep.subr.bf16.mxu1 %v3389_v0  ;;  %2975 = vmatpush3.bf16.msra.mxu0 %v3435_v1 }
 0x4f5   :  { %2976 = vmatprep.subr.bf16.mxu0 %v3389_v0  ;;  %2978 = vmatprep.mubr.msk.bf16.mxu0 %vm3390_vm1, %v3389_v0 }
 0x4f7   :  { %2969 = vmatpush3.bf16.msra.mxu1 %v3482_v8 }
 0x4f8   :  { %2982 = vmatprep.subr.bf16.mxu1 %v3389_v0  ;;  %2977 = vmatpush3.bf16.msra.mxu0 %v3444_v2 }
 0x4f9   :  { %2990 = vmatprep.subr.bf16.mxu0 %v3389_v0 }
 0x4fa   :  { %2971 = vmatmul.mubr.msk.bf16.vlgmr.msra.gmra.mxu1 %vm31_vm0, %v851_v10 }
 0x4fb   :  { %2983 = vmatpush3.bf16.msra.mxu1 %v3453_v3  ;;  %2986 = vmatprep.mubr.msk.bf16.mxu1 %vm3390_vm1, %v3389_v0 }
 0x4fc   :  { %2984 = vmatprep.subr.bf16.mxu1 %v3389_v0 }
 0x4ff   :  { %2985 = vmatpush3.bf16.msra.mxu1 %v3460_v4 }
 0x500   :  { %2998 = vmatprep.subr.bf16.mxu1 %v3389_v0 }
 0x5b2   :  { %v889_v12 = vpop.f32.mrf.mxu1  ;;  %v929_v13 = vpop.f32.mrf.mxu0 }
 0x5b3   :  { %v937_v14 = vadd.f32 %v2589_v11, %v889_v12  ;;  %v946_v23 = vadd.f32 %v2591_v18, %v929_v13  ;;  %v2602_v13 = vld [vmem:[%s4081_s2 + $0x30] sm:$0xff] }
 0x5b4   :  { %v2956_v15 = vpop.f32.mrf.mxu1  ;;  %v2964_v16 = vpop.f32.mrf.mxu0 }
 0x5b5   :  { %v2590_v17 = vmul.f32 -1.442695, %v937_v14  ;;  %v2592_v26 = vmul.f32 -1.442695, %v946_v23  ;;  %v2607_v23 = vld [vmem:[%s4078_s0 + $0x38] sm:$0xff] }
 0x5b6   :  { %v892_v19 = vpop.f32.mrf.mxu1  ;;  %v932_v20 = vpop.f32.mrf.mxu0 }
 0x5b7   :  { %3272 = vpow2.f32 %v2590_v17 }
 0x5b8   :  { %v2957_v21 = vpop.f32.mrf.mxu1  ;;  %v2965_v22 = vpop.f32.mrf.mxu0  ;;  %3274 = vpow2.f32 %v2592_v26 }
 0x5ba   :  { %v989_v24 = vpop.f32.mrf.mxu1 }
 0x5bb   :  { %v990_v34 = vadd.f32 %v3511_v30, %v989_v24 }
 0x5bc   :  { %v2972_v25 = vpop.f32.mrf.mxu1 }
 0x5be   :  { %v992_v27 = vpop.f32.mrf.mxu1 }
 0x5c0   :  { %v2973_v28 = vpop.f32.mrf.mxu1 }
 0x5c4   :  { %v3273_v29 = vpop.eup %3272 }
 0x5c5   :  { %v941_v31 = vadd.f32 1.0, %v3273_v29  ;;  %v3275_v32 = vpop.eup %3274 }
 0x5c6   :  { %v950_v33 = vadd.f32 1.0, %v3275_v32 }
 0x5c7   :  { %3276 = vrcp.f32 %v941_v31  ;;  %v2609_v31 = vld [vmem:[%s4079_s1 + $0x38] sm:$0xff] }
 0x5c8   :  { %3278 = vrcp.f32 %v950_v33 }
 0x5d4   :  { %v3277_v35 = vpop.eup %3276 }
 0x5d5   :  { %v995_v37 = vmul.f32 %v3277_v35, %v990_v34  ;;  %v3279_v39 = vpop.eup %3278 }
 0x5d6   :  { %v998_v40 = vsub.f32 1.0, %v3279_v39  ;;  %v1000_v43 = vmul.f32 %v3279_v39, %v848_v9 }
 0x5d7   :  { %v996_v38 = vadd.f32 %v2593_v36, %v995_v37 }
 0x5d9   :  { %3280 = vtanh.f32 %v996_v38 }
 0x5e6   :  { %v3281_v41 = vpop.eup %3280 }
 0x5e7   :  { %v999_v42 = vmul.f32 %v3281_v41, %v998_v40 }
 0x5e9   :  { %v1001_v44 = vadd.f32 %v1000_v43, %v999_v42 }
 0x5eb   :  { %2595 = vst.msk [vmem:[%s4082_s7 + $0x28] sm:$0xff] %vm31_vm0, %v1001_v44  ;;  %v1004_v45 = vpack.c.bf16 %v1001_v44, %v1001_v44 }
 0x5ed   :  { %2979 = vmatmul.mubr.msk.bf16.vlgmr.msra.gmra.mxu0 %vm31_vm0, %v1004_v45  ;;  %2987 = vmatmul.mubr.msk.bf16.vlgmr.msra.gmra.mxu1 %vm31_vm0, %v1004_v45 }
 0x5ee   :  { %2991 = vmatpush3.bf16.msra.mxu0 %v3470_v6  ;;  %2994 = vmatprep.mubr.msk.bf16.mxu0 %vm3390_vm1, %v3389_v0 }
 0x5ef   :  { %2992 = vmatprep.subr.bf16.mxu0 %v3389_v0  ;;  %2999 = vmatpush3.bf16.msra.mxu1 %v3435_v1 }
 0x5f0   :  { %3000 = vmatprep.subr.bf16.mxu1 %v3389_v0  ;;  %3002 = vmatprep.mubr.msk.bf16.mxu1 %vm3390_vm1, %v3389_v0 }
 0x5f2   :  { %2993 = vmatpush3.bf16.msra.mxu0 %v3482_v8 }
 0x5f3   :  { %3006 = vmatprep.subr.bf16.mxu0 %v3389_v0  ;;  %3001 = vmatpush3.bf16.msra.mxu1 %v3444_v2 }
 0x5f4   :  { %3014 = vmatprep.subr.bf16.mxu1 %v3389_v0 }
 0x5f5   :  { %2995 = vmatmul.mubr.msk.bf16.vlgmr.msra.gmra.mxu0 %vm31_vm0, %v1004_v45 }
 0x5f6   :  { %3007 = vmatpush3.bf16.msra.mxu0 %v3453_v3  ;;  %3010 = vmatprep.mubr.msk.bf16.mxu0 %vm3390_vm1, %v3389_v0 }
 0x5f7   :  { %3008 = vmatprep.subr.bf16.mxu0 %v3389_v0 }
 0x5fa   :  { %3009 = vmatpush3.bf16.msra.mxu0 %v3460_v4 }
 0x5fb   :  { %3022 = vmatprep.subr.bf16.mxu0 %v3389_v0 }
 0x6ad   :  { %v1042_v47 = vpop.f32.mrf.mxu0  ;;  %v1082_v48 = vpop.f32.mrf.mxu1 }
 0x6ae   :  { %v1090_v49 = vadd.f32 %v2598_v46, %v1042_v47  ;;  %v1099_v58 = vadd.f32 %v2600_v53, %v1082_v48  ;;  %v2611_v48 = vld [vmem:[%s4081_s2 + $0x38] sm:$0xff] }
 0x6af   :  { %v2980_v50 = vpop.f32.mrf.mxu0  ;;  %v2988_v51 = vpop.f32.mrf.mxu1 }
 0x6b0   :  { %v2599_v52 = vmul.f32 -1.442695, %v1090_v49  ;;  %v2601_v61 = vmul.f32 -1.442695, %v1099_v58 }
 0x6b1   :  { %v1045_v54 = vpop.f32.mrf.mxu0  ;;  %v1085_v55 = vpop.f32.mrf.mxu1 }
 0x6b2   :  { %3282 = vpow2.f32 %v2599_v52 }
 0x6b3   :  { %v2981_v56 = vpop.f32.mrf.mxu0  ;;  %v2989_v57 = vpop.f32.mrf.mxu1  ;;  %3284 = vpow2.f32 %v2601_v61 }
 0x6b5   :  { %v1142_v59 = vpop.f32.mrf.mxu0 }
 0x6b6   :  { %v1143_v11 = vadd.f32 %v3511_v30, %v1142_v59 }
 0x6b7   :  { %v2996_v60 = vpop.f32.mrf.mxu0 }
 0x6b9   :  { %v1145_v62 = vpop.f32.mrf.mxu0 }
 0x6bb   :  { %v2997_v63 = vpop.f32.mrf.mxu0 }
 0x6bf   :  { %v3283_v5 = vpop.eup %3282 }
 0x6c0   :  { %v1094_v7 = vadd.f32 1.0, %v3283_v5  ;;  %v3285_v9 = vpop.eup %3284 }
 0x6c1   :  { %v1103_v10 = vadd.f32 1.0, %v3285_v9 }
 0x6c2   :  { %3286 = vrcp.f32 %v1094_v7 }
 0x6c3   :  { %3288 = vrcp.f32 %v1103_v10 }
 0x6cf   :  { %v3287_v12 = vpop.eup %3286 }
 0x6d0   :  { %v1148_v14 = vmul.f32 %v3287_v12, %v1143_v11  ;;  %v3289_v16 = vpop.eup %3288 }
 0x6d1   :  { %v1151_v17 = vsub.f32 1.0, %v3289_v16  ;;  %v1153_v20 = vmul.f32 %v3289_v16, %v1001_v44 }
 0x6d2   :  { %v1149_v15 = vadd.f32 %v2602_v13, %v1148_v14 }
 0x6d4   :  { %3290 = vtanh.f32 %v1149_v15 }
 0x6e1   :  { %v3291_v18 = vpop.eup %3290 }
 0x6e2   :  { %v1152_v19 = vmul.f32 %v3291_v18, %v1151_v17 }
 0x6e4   :  { %v1154_v21 = vadd.f32 %v1153_v20, %v1152_v19  ;;  %v2620_v19 = vld [vmem:[%s4081_s2 + $0x40] sm:$0xff] }
 0x6e6   :  { %2604 = vst.msk [vmem:[%s4082_s7 + $0x30] sm:$0xff] %vm31_vm0, %v1154_v21  ;;  %v1157_v22 = vpack.c.bf16 %v1154_v21, %v1154_v21 }
 0x6e8   :  { %3003 = vmatmul.mubr.msk.bf16.vlgmr.msra.gmra.mxu1 %vm31_vm0, %v1157_v22  ;;  %3011 = vmatmul.mubr.msk.bf16.vlgmr.msra.gmra.mxu0 %vm31_vm0, %v1157_v22 }
 0x6e9   :  { %3015 = vmatpush3.bf16.msra.mxu1 %v3470_v6  ;;  %3018 = vmatprep.mubr.msk.bf16.mxu1 %vm3390_vm1, %v3389_v0 }
 0x6ea   :  { %3016 = vmatprep.subr.bf16.mxu1 %v3389_v0  ;;  %3023 = vmatpush3.bf16.msra.mxu0 %v3435_v1 }
 0x6eb   :  { %3024 = vmatprep.subr.bf16.mxu0 %v3389_v0  ;;  %3026 = vmatprep.mubr.msk.bf16.mxu0 %vm3390_vm1, %v3389_v0 }
 0x6ed   :  { %3017 = vmatpush3.bf16.msra.mxu1 %v3482_v8 }
 0x6ee   :  { %3030 = vmatprep.subr.bf16.mxu1 %v3389_v0  ;;  %3025 = vmatpush3.bf16.msra.mxu0 %v3444_v2 }
 0x6ef   :  { %3038 = vmatprep.subr.bf16.mxu0 %v3389_v0 }
 0x6f0   :  { %3019 = vmatmul.mubr.msk.bf16.vlgmr.msra.gmra.mxu1 %vm31_vm0, %v1157_v22 }
 0x6f1   :  { %3031 = vmatpush3.bf16.msra.mxu1 %v3453_v3  ;;  %3034 = vmatprep.mubr.msk.bf16.mxu1 %vm3390_vm1, %v3389_v0 }
 0x6f2   :  { %3032 = vmatprep.subr.bf16.mxu1 %v3389_v0 }
 0x6f5   :  { %3033 = vmatpush3.bf16.msra.mxu1 %v3460_v4 }
 0x6f6   :  { %3046 = vmatprep.subr.bf16.mxu1 %v3389_v0 }
 0x7a8   :  { %v1195_v24 = vpop.f32.mrf.mxu1  ;;  %v1235_v25 = vpop.f32.mrf.mxu0 }
 0x7a9   :  { %v1243_v26 = vadd.f32 %v2607_v23, %v1195_v24  ;;  %v1252_v36 = vadd.f32 %v2609_v31, %v1235_v25  ;;  %v3830_v31 = vld [vmem:[%s4077_s5] sm:$0xff]  }
 0x7aa   :  { %v3004_v27 = vpop.f32.mrf.mxu1  ;;  %v3012_v28 = vpop.f32.mrf.mxu0 }
 0x7ab   :  { %v2608_v29 = vmul.f32 -1.442695, %v1243_v26  ;;  %v2610_v39 = vmul.f32 -1.442695, %v1252_v36  ;;  %v3812_v28 = vld [vmem:[%s4077_s5 + $0x8] sm:$0xff]  }
 0x7ac   :  { %v1198_v32 = vpop.f32.mrf.mxu1  ;;  %v1238_v33 = vpop.f32.mrf.mxu0 }
 0x7ad   :  { %3292 = vpow2.f32 %v2608_v29  ;;  %v3821_v29 = vld [vmem:[%s4075_s3 + $0x8] sm:$0xff]   ;;  %v3837_v32 = vld [vmem:[%s4075_s3] sm:$0xff]  }
 0x7ae   :  { %v3005_v34 = vpop.f32.mrf.mxu1  ;;  %v3013_v35 = vpop.f32.mrf.mxu0  ;;  %3294 = vpow2.f32 %v2610_v39  ;;  %v3845_v33 = vld [vmem:[%s4076_s4 + $0x8] sm:$0xff]  }
 0x7af   :  { %v3854_v34 = vld [vmem:[%s4076_s4] sm:$0xff]   ;;  %v2625_v35 = vld [vmem:[%s4078_s0 + $0x48] sm:$0xff] }
 0x7b0   :  { %v1295_v37 = vpop.f32.mrf.mxu1 }
 0x7b1   :  { %v1296_v46 = vadd.f32 %v3511_v30, %v1295_v37 }
 0x7b2   :  { %v3020_v38 = vpop.f32.mrf.mxu1 }
 0x7b4   :  { %v1298_v40 = vpop.f32.mrf.mxu1 }
 0x7b6   :  { %v3021_v41 = vpop.f32.mrf.mxu1 }
 0x7ba   :  { %v3293_v42 = vpop.eup %3292 }
 0x7bb   :  { %v1247_v43 = vadd.f32 1.0, %v3293_v42  ;;  %v3295_v44 = vpop.eup %3294  ;;  %v2627_v42 = vld [vmem:[%s4079_s1 + $0x48] sm:$0xff] }
 0x7bc   :  { %v1256_v45 = vadd.f32 1.0, %v3295_v44 }
 0x7bd   :  { %3296 = vrcp.f32 %v1247_v43 }
 0x7be   :  { %3298 = vrcp.f32 %v1256_v45 }
 0x7ca   :  { %v3297_v47 = vpop.eup %3296 }
 0x7cb   :  { %v1301_v49 = vmul.f32 %v3297_v47, %v1296_v46  ;;  %v3299_v51 = vpop.eup %3298 }
 0x7cc   :  { %v1304_v52 = vsub.f32 1.0, %v3299_v51  ;;  %v1306_v55 = vmul.f32 %v3299_v51, %v1154_v21 }
 0x7cd   :  { %v1302_v50 = vadd.f32 %v2611_v48, %v1301_v49 }
 0x7cf   :  { %3300 = vtanh.f32 %v1302_v50 }
 0x7dc   :  { %v3301_v53 = vpop.eup %3300 }
 0x7dd   :  { %v1305_v54 = vmul.f32 %v3301_v53, %v1304_v52 }
 0x7df   :  { %v1307_v56 = vadd.f32 %v1306_v55, %v1305_v54 }
 0x7e1   :  { %2613 = vst.msk [vmem:[%s4082_s7 + $0x38] sm:$0xff] %vm31_vm0, %v1307_v56  ;;  %v1310_v57 = vpack.c.bf16 %v1307_v56, %v1307_v56 }
 0x7e3   :  { %3027 = vmatmul.mubr.msk.bf16.vlgmr.msra.gmra.mxu0 %vm31_vm0, %v1310_v57  ;;  %3035 = vmatmul.mubr.msk.bf16.vlgmr.msra.gmra.mxu1 %vm31_vm0, %v1310_v57 }
 0x7e4   :  { %3039 = vmatpush3.bf16.msra.mxu0 %v3470_v6  ;;  %3042 = vmatprep.mubr.msk.bf16.mxu0 %vm3390_vm1, %v3389_v0 }
 0x7e5   :  { %3040 = vmatprep.subr.bf16.mxu0 %v3389_v0  ;;  %3047 = vmatpush3.bf16.msra.mxu1 %v3435_v1  ;;  %v2616_v1 = vld [vmem:[%s4078_s0 + $0x40] sm:$0xff] }
 0x7e6   :  { %3048 = vmatprep.subr.bf16.mxu1 %v3389_v0  ;;  %3050 = vmatprep.mubr.msk.bf16.mxu1 %vm3390_vm1, %v3389_v0 }
 0x7e8   :  { %3041 = vmatpush3.bf16.msra.mxu0 %v3482_v8 }
 0x7e9   :  { %3054 = vmatprep.subr.bf16.mxu0 %v3389_v0  ;;  %3049 = vmatpush3.bf16.msra.mxu1 %v3444_v2 }
 0x7ea   :  { %3062 = vmatprep.subr.bf16.mxu1 %v3389_v0 }
 0x7eb   :  { %3043 = vmatmul.mubr.msk.bf16.vlgmr.msra.gmra.mxu0 %vm31_vm0, %v1310_v57  ;;  %v3867_v57 = vld [vmem:[%s4080_s6] ss:$0 sm:$0xff] }
 0x7ec   :  { %3055 = vmatpush3.bf16.msra.mxu0 %v3453_v3  ;;  %3058 = vmatprep.mubr.msk.bf16.mxu0 %vm3390_vm1, %v3389_v0  ;;  %v2618_v3 = vld [vmem:[%s4079_s1 + $0x40] sm:$0xff] }
 0x7ed   :  { %3056 = vmatprep.subr.bf16.mxu0 %v3389_v0 }
 0x7f0   :  { %3057 = vmatpush3.bf16.msra.mxu0 %v3460_v4 }
 0x7f1   :  { %3070 = vmatprep.subr.bf16.mxu0 %v3389_v0 }
 0x8a3   :  { %v1348_v2 = vpop.f32.mrf.mxu0  ;;  %v1388_v6 = vpop.f32.mrf.mxu1 }
 0x8a4   :  { %v1396_v8 = vadd.f32 %v2616_v1, %v1348_v2  ;;  %v1405_v5 = vadd.f32 %v2618_v3, %v1388_v6  ;;  %v2629_v6 = vld [vmem:[%s4081_s2 + $0x48] sm:$0xff] }
 0x8a5   :  { %v3028_v58 = vpop.f32.mrf.mxu0  ;;  %v3036_v59 = vpop.f32.mrf.mxu1 }
 0x8a6   :  { %v2617_v60 = vmul.f32 -1.442695, %v1396_v8  ;;  %v2619_v10 = vmul.f32 -1.442695, %v1405_v5  ;;  %v2634_v5 = vld [vmem:[%s4078_s0 + $0x50] sm:$0xff] }
 0x8a7   :  { %v1351_v61 = vpop.f32.mrf.mxu0  ;;  %v1391_v62 = vpop.f32.mrf.mxu1 }
 0x8a8   :  { %3302 = vpow2.f32 %v2617_v60 }
 0x8a9   :  { %v3029_v4 = vpop.f32.mrf.mxu0  ;;  %v3037_v63 = vpop.f32.mrf.mxu1  ;;  %3304 = vpow2.f32 %v2619_v10 }
 0x8ab   :  { %v1448_v7 = vpop.f32.mrf.mxu0 }
 0x8ac   :  { %v1449_v17 = vadd.f32 %v3511_v30, %v1448_v7 }
 0x8ad   :  { %v3044_v9 = vpop.f32.mrf.mxu0 }
 0x8af   :  { %v1451_v11 = vpop.f32.mrf.mxu0 }
 0x8b1   :  { %v3045_v12 = vpop.f32.mrf.mxu0 }
 0x8b5   :  { %v3303_v13 = vpop.eup %3302 }
 0x8b6   :  { %v1400_v14 = vadd.f32 1.0, %v3303_v13  ;;  %v3305_v15 = vpop.eup %3304 }
 0x8b7   :  { %v1409_v16 = vadd.f32 1.0, %v3305_v15 }
 0x8b8   :  { %3306 = vrcp.f32 %v1400_v14  ;;  %v2636_v14 = vld [vmem:[%s4079_s1 + $0x50] sm:$0xff] }
 0x8b9   :  { %3308 = vrcp.f32 %v1409_v16 }
 0x8c5   :  { %v3307_v18 = vpop.eup %3306 }
 0x8c6   :  { %v1454_v20 = vmul.f32 %v3307_v18, %v1449_v17  ;;  %v3309_v22 = vpop.eup %3308 }
 0x8c7   :  { %v1457_v23 = vsub.f32 1.0, %v3309_v22  ;;  %v1459_v26 = vmul.f32 %v3309_v22, %v1307_v56 }
 0x8c8   :  { %v1455_v21 = vadd.f32 %v2620_v19, %v1454_v20 }
 0x8ca   :  { %3310 = vtanh.f32 %v1455_v21 }
 0x8d7   :  { %v3311_v24 = vpop.eup %3310 }
 0x8d8   :  { %v1458_v25 = vmul.f32 %v3311_v24, %v1457_v23 }
 0x8da   :  { %v3798_v27 = vadd.f32 %v1459_v26, %v1458_v25 }
 0x8dc   :  { %2622 = vst.msk [vmem:[%s4082_s7 + $0x40] sm:$0xff] %vm31_vm0, %v3798_v27  ;;  %v1463_v30 = vpack.c.bf16 %v3798_v27, %v3798_v27 }
 0x8de   :  { %3051 = vmatmul.mubr.msk.bf16.vlgmr.msra.gmra.mxu1 %vm31_vm0, %v1463_v30  ;;  %3059 = vmatmul.mubr.msk.bf16.vlgmr.msra.gmra.mxu0 %vm31_vm0, %v1463_v30 }
 0x8df   :  { %3063 = vmatpush3.bf16.msra.mxu1 %v3812_v28  ;;  %3066 = vmatprep.mubr.msk.bf16.mxu1 %vm3390_vm1, %v3389_v0 }
 0x8e0   :  { %3064 = vmatprep.subr.bf16.mxu1 %v3389_v0  ;;  %3071 = vmatpush3.bf16.msra.mxu0 %v3821_v29 }
 0x8e1   :  { %3072 = vmatprep.subr.bf16.mxu0 %v3389_v0  ;;  %3074 = vmatprep.mubr.msk.bf16.mxu0 %vm3390_vm1, %v3389_v0 }
 0x8e3   :  { %3065 = vmatpush3.bf16.msra.mxu1 %v3830_v31 }
 0x8e4   :  { %3078 = vmatprep.subr.bf16.mxu1 %v3389_v0  ;;  %3073 = vmatpush3.bf16.msra.mxu0 %v3837_v32 }
 0x8e5   :  { %3086 = vmatprep.subr.bf16.mxu0 %v3389_v0 }
 0x8e6   :  { %3067 = vmatmul.mubr.msk.bf16.vlgmr.msra.gmra.mxu1 %vm31_vm0, %v1463_v30 }
 0x8e7   :  { %3079 = vmatpush3.bf16.msra.mxu1 %v3845_v33  ;;  %3082 = vmatprep.mubr.msk.bf16.mxu1 %vm3390_vm1, %v3389_v0 }
 0x8e8   :  { %3080 = vmatprep.subr.bf16.mxu1 %v3389_v0 }
 0x8eb   :  { %3081 = vmatpush3.bf16.msra.mxu1 %v3854_v34 }
 0x8ec   :  { %3094 = vmatprep.subr.bf16.mxu1 %v3389_v0 }
 0x99e   :  { %v1501_v36 = vpop.f32.mrf.mxu1  ;;  %v1541_v37 = vpop.f32.mrf.mxu0 }
 0x99f   :  { %v1549_v38 = vadd.f32 %v2625_v35, %v1501_v36  ;;  %v1558_v47 = vadd.f32 %v2627_v42, %v1541_v37  ;;  %v2638_v37 = vld [vmem:[%s4081_s2 + $0x50] sm:$0xff] }
 0x9a0   :  { %v3052_v39 = vpop.f32.mrf.mxu1  ;;  %v3060_v40 = vpop.f32.mrf.mxu0 }
 0x9a1   :  { %v2626_v41 = vmul.f32 -1.442695, %v1549_v38  ;;  %v2628_v50 = vmul.f32 -1.442695, %v1558_v47  ;;  %v2643_v47 = vld [vmem:[%s4078_s0 + $0x58] sm:$0xff] }
 0x9a2   :  { %v1504_v43 = vpop.f32.mrf.mxu1  ;;  %v1544_v44 = vpop.f32.mrf.mxu0 }
 0x9a3   :  { %3312 = vpow2.f32 %v2626_v41 }
 0x9a4   :  { %v3053_v45 = vpop.f32.mrf.mxu1  ;;  %v3061_v46 = vpop.f32.mrf.mxu0  ;;  %3314 = vpow2.f32 %v2628_v50 }
 0x9a6   :  { %v1601_v48 = vpop.f32.mrf.mxu1 }
 0x9a7   :  { %v1602_v1 = vadd.f32 %v3867_v57, %v1601_v48 }
 0x9a8   :  { %v3068_v49 = vpop.f32.mrf.mxu1 }
 0x9aa   :  { %v1604_v51 = vpop.f32.mrf.mxu1 }
 0x9ac   :  { %v3069_v52 = vpop.f32.mrf.mxu1 }
 0x9b0   :  { %v3313_v53 = vpop.eup %3312 }
 0x9b1   :  { %v1553_v54 = vadd.f32 1.0, %v3313_v53  ;;  %v3315_v55 = vpop.eup %3314 }
 0x9b2   :  { %v1562_v56 = vadd.f32 1.0, %v3315_v55 }
 0x9b3   :  { %3316 = vrcp.f32 %v1553_v54  ;;  %v2645_v54 = vld [vmem:[%s4079_s1 + $0x58] sm:$0xff] }
 0x9b4   :  { %3318 = vrcp.f32 %v1562_v56 }
 0x9c0   :  { %v3317_v2 = vpop.eup %3316 }
 0x9c1   :  { %v1607_v8 = vmul.f32 %v3317_v2, %v1602_v1  ;;  %v3319_v59 = vpop.eup %3318 }
 0x9c2   :  { %v1610_v60 = vsub.f32 1.0, %v3319_v59  ;;  %v1612_v62 = vmul.f32 %v3319_v59, %v3798_v27 }
 0x9c3   :  { %v1608_v58 = vadd.f32 %v2629_v6, %v1607_v8 }
 0x9c5   :  { %3320 = vtanh.f32 %v1608_v58 }
 0x9d2   :  { %v3321_v3 = vpop.eup %3320 }
 0x9d3   :  { %v1611_v61 = vmul.f32 %v3321_v3, %v1610_v60 }
 0x9d5   :  { %v1613_v4 = vadd.f32 %v1612_v62, %v1611_v61 }
 0x9d7   :  { %2631 = vst.msk [vmem:[%s4082_s7 + $0x48] sm:$0xff] %vm31_vm0, %v1613_v4  ;;  %v1616_v63 = vpack.c.bf16 %v1613_v4, %v1613_v4 }
 0x9d9   :  { %3075 = vmatmul.mubr.msk.bf16.vlgmr.msra.gmra.mxu0 %vm31_vm0, %v1616_v63  ;;  %3083 = vmatmul.mubr.msk.bf16.vlgmr.msra.gmra.mxu1 %vm31_vm0, %v1616_v63 }
 0x9da   :  { %3087 = vmatpush3.bf16.msra.mxu0 %v3812_v28  ;;  %3090 = vmatprep.mubr.msk.bf16.mxu0 %vm3390_vm1, %v3389_v0 }
 0x9db   :  { %3088 = vmatprep.subr.bf16.mxu0 %v3389_v0  ;;  %3095 = vmatpush3.bf16.msra.mxu1 %v3821_v29 }
 0x9dc   :  { %3096 = vmatprep.subr.bf16.mxu1 %v3389_v0  ;;  %3098 = vmatprep.mubr.msk.bf16.mxu1 %vm3390_vm1, %v3389_v0 }
 0x9de   :  { %3089 = vmatpush3.bf16.msra.mxu0 %v3830_v31 }
 0x9df   :  { %3102 = vmatprep.subr.bf16.mxu0 %v3389_v0  ;;  %3097 = vmatpush3.bf16.msra.mxu1 %v3837_v32 }
 0x9e0   :  { %3110 = vmatprep.subr.bf16.mxu1 %v3389_v0 }
 0x9e1   :  { %3091 = vmatmul.mubr.msk.bf16.vlgmr.msra.gmra.mxu0 %vm31_vm0, %v1616_v63 }
 0x9e2   :  { %3103 = vmatpush3.bf16.msra.mxu0 %v3845_v33  ;;  %3106 = vmatprep.mubr.msk.bf16.mxu0 %vm3390_vm1, %v3389_v0 }
 0x9e3   :  { %3104 = vmatprep.subr.bf16.mxu0 %v3389_v0 }
 0x9e6   :  { %3105 = vmatpush3.bf16.msra.mxu0 %v3854_v34 }
 0x9e7   :  { %3118 = vmatprep.subr.bf16.mxu0 %v3389_v0 }
 0xa99   :  { %v1654_v7 = vpop.f32.mrf.mxu0  ;;  %v1694_v9 = vpop.f32.mrf.mxu1 }
 0xa9a   :  { %v1702_v10 = vadd.f32 %v2634_v5, %v1654_v7  ;;  %v1711_v19 = vadd.f32 %v2636_v14, %v1694_v9  ;;  %v2647_v9 = vld [vmem:[%s4081_s2 + $0x58] sm:$0xff] }
 0xa9b   :  { %v3076_v11 = vpop.f32.mrf.mxu0  ;;  %v3084_v12 = vpop.f32.mrf.mxu1 }
 0xa9c   :  { %v2635_v13 = vmul.f32 -1.442695, %v1702_v10  ;;  %v2637_v22 = vmul.f32 -1.442695, %v1711_v19  ;;  %v2652_v19 = vld [vmem:[%s4078_s0 + $0x60] sm:$0xff] }
 0xa9d   :  { %v1657_v15 = vpop.f32.mrf.mxu0  ;;  %v1697_v16 = vpop.f32.mrf.mxu1 }
 0xa9e   :  { %3322 = vpow2.f32 %v2635_v13 }
 0xa9f   :  { %v3077_v17 = vpop.f32.mrf.mxu0  ;;  %v3085_v18 = vpop.f32.mrf.mxu1  ;;  %3324 = vpow2.f32 %v2637_v22 }
 0xaa1   :  { %v1754_v20 = vpop.f32.mrf.mxu0 }
 0xaa2   :  { %v1755_v35 = vadd.f32 %v3867_v57, %v1754_v20 }
 0xaa3   :  { %v3092_v21 = vpop.f32.mrf.mxu0 }
 0xaa5   :  { %v1757_v23 = vpop.f32.mrf.mxu0 }
 0xaa7   :  { %v3093_v24 = vpop.f32.mrf.mxu0 }
 0xaab   :  { %v3323_v25 = vpop.eup %3322 }
 0xaac   :  { %v1706_v26 = vadd.f32 1.0, %v3323_v25  ;;  %v3325_v27 = vpop.eup %3324 }
 0xaad   :  { %v1715_v30 = vadd.f32 1.0, %v3325_v27 }
 0xaae   :  { %3326 = vrcp.f32 %v1706_v26  ;;  %v2654_v26 = vld [vmem:[%s4079_s1 + $0x60] sm:$0xff] }
 0xaaf   :  { %3328 = vrcp.f32 %v1715_v30 }
 0xabb   :  { %v3327_v36 = vpop.eup %3326 }
 0xabc   :  { %v1760_v38 = vmul.f32 %v3327_v36, %v1755_v35  ;;  %v3329_v40 = vpop.eup %3328 }
 0xabd   :  { %v1763_v41 = vsub.f32 1.0, %v3329_v40  ;;  %v1765_v44 = vmul.f32 %v3329_v40, %v1613_v4 }
 0xabe   :  { %v1761_v39 = vadd.f32 %v2638_v37, %v1760_v38 }
 0xac0   :  { %3330 = vtanh.f32 %v1761_v39 }
 0xacd   :  { %v3331_v42 = vpop.eup %3330 }
 0xace   :  { %v1764_v43 = vmul.f32 %v3331_v42, %v1763_v41 }
 0xad0   :  { %v1766_v45 = vadd.f32 %v1765_v44, %v1764_v43 }
 0xad2   :  { %2640 = vst.msk [vmem:[%s4082_s7 + $0x50] sm:$0xff] %vm31_vm0, %v1766_v45  ;;  %v1769_v46 = vpack.c.bf16 %v1766_v45, %v1766_v45 }
 0xad4   :  { %3099 = vmatmul.mubr.msk.bf16.vlgmr.msra.gmra.mxu1 %vm31_vm0, %v1769_v46  ;;  %3107 = vmatmul.mubr.msk.bf16.vlgmr.msra.gmra.mxu0 %vm31_vm0, %v1769_v46 }
 0xad5   :  { %3111 = vmatpush3.bf16.msra.mxu1 %v3812_v28  ;;  %3114 = vmatprep.mubr.msk.bf16.mxu1 %vm3390_vm1, %v3389_v0 }
 0xad6   :  { %3112 = vmatprep.subr.bf16.mxu1 %v3389_v0  ;;  %3119 = vmatpush3.bf16.msra.mxu0 %v3821_v29 }
 0xad7   :  { %3120 = vmatprep.subr.bf16.mxu0 %v3389_v0  ;;  %3122 = vmatprep.mubr.msk.bf16.mxu0 %vm3390_vm1, %v3389_v0 }
 0xad9   :  { %3113 = vmatpush3.bf16.msra.mxu1 %v3830_v31 }
 0xada   :  { %3126 = vmatprep.subr.bf16.mxu1 %v3389_v0  ;;  %3121 = vmatpush3.bf16.msra.mxu0 %v3837_v32 }
 0xadb   :  { %3134 = vmatprep.subr.bf16.mxu0 %v3389_v0 }
 0xadc   :  { %3115 = vmatmul.mubr.msk.bf16.vlgmr.msra.gmra.mxu1 %vm31_vm0, %v1769_v46 }
 0xadd   :  { %3127 = vmatpush3.bf16.msra.mxu1 %v3845_v33  ;;  %3130 = vmatprep.mubr.msk.bf16.mxu1 %vm3390_vm1, %v3389_v0 }
 0xade   :  { %3128 = vmatprep.subr.bf16.mxu1 %v3389_v0 }
 0xae1   :  { %3129 = vmatpush3.bf16.msra.mxu1 %v3854_v34 }
 0xae2   :  { %3142 = vmatprep.subr.bf16.mxu1 %v3389_v0 }
 0xb94   :  { %v1807_v48 = vpop.f32.mrf.mxu1  ;;  %v1847_v49 = vpop.f32.mrf.mxu0 }
 0xb95   :  { %v1855_v50 = vadd.f32 %v2643_v47, %v1807_v48  ;;  %v1864_v6 = vadd.f32 %v2645_v54, %v1847_v49  ;;  %v2656_v49 = vld [vmem:[%s4081_s2 + $0x60] sm:$0xff] }
 0xb96   :  { %v3100_v51 = vpop.f32.mrf.mxu1  ;;  %v3108_v52 = vpop.f32.mrf.mxu0 }
 0xb97   :  { %v2644_v53 = vmul.f32 -1.442695, %v1855_v50  ;;  %v2646_v59 = vmul.f32 -1.442695, %v1864_v6  ;;  %v2661_v6 = vld [vmem:[%s4078_s0 + $0x68] sm:$0xff] }
 0xb98   :  { %v1810_v55 = vpop.f32.mrf.mxu1  ;;  %v1850_v56 = vpop.f32.mrf.mxu0 }
 0xb99   :  { %3332 = vpow2.f32 %v2644_v53 }
 0xb9a   :  { %v3101_v1 = vpop.f32.mrf.mxu1  ;;  %v3109_v2 = vpop.f32.mrf.mxu0  ;;  %3334 = vpow2.f32 %v2646_v59 }
 0xb9c   :  { %v1907_v8 = vpop.f32.mrf.mxu1 }
 0xb9d   :  { %v1908_v5 = vadd.f32 %v3867_v57, %v1907_v8 }
 0xb9e   :  { %v3116_v58 = vpop.f32.mrf.mxu1 }
 0xba0   :  { %v1910_v60 = vpop.f32.mrf.mxu1 }
 0xba2   :  { %v3117_v3 = vpop.f32.mrf.mxu1 }
 0xba6   :  { %v3333_v61 = vpop.eup %3332 }
 0xba7   :  { %v1859_v62 = vadd.f32 1.0, %v3333_v61  ;;  %v3335_v4 = vpop.eup %3334 }
 0xba8   :  { %v1868_v63 = vadd.f32 1.0, %v3335_v4 }
 0xba9   :  { %3336 = vrcp.f32 %v1859_v62  ;;  %v2663_v62 = vld [vmem:[%s4079_s1 + $0x68] sm:$0xff] }
 0xbaa   :  { %3338 = vrcp.f32 %v1868_v63 }
 0xbb6   :  { %v3337_v7 = vpop.eup %3336 }
 0xbb7   :  { %v1913_v10 = vmul.f32 %v3337_v7, %v1908_v5  ;;  %v3339_v12 = vpop.eup %3338 }
 0xbb8   :  { %v1916_v13 = vsub.f32 1.0, %v3339_v12  ;;  %v1918_v16 = vmul.f32 %v3339_v12, %v1766_v45 }
 0xbb9   :  { %v1914_v11 = vadd.f32 %v2647_v9, %v1913_v10 }
 0xbbb   :  { %3340 = vtanh.f32 %v1914_v11 }
 0xbc8   :  { %v3341_v14 = vpop.eup %3340 }
 0xbc9   :  { %v1917_v15 = vmul.f32 %v3341_v14, %v1916_v13 }
 0xbcb   :  { %v1919_v17 = vadd.f32 %v1918_v16, %v1917_v15 }
 0xbcd   :  { %2649 = vst.msk [vmem:[%s4082_s7 + $0x58] sm:$0xff] %vm31_vm0, %v1919_v17  ;;  %v1922_v18 = vpack.c.bf16 %v1919_v17, %v1919_v17 }
 0xbcf   :  { %3123 = vmatmul.mubr.msk.bf16.vlgmr.msra.gmra.mxu0 %vm31_vm0, %v1922_v18  ;;  %3131 = vmatmul.mubr.msk.bf16.vlgmr.msra.gmra.mxu1 %vm31_vm0, %v1922_v18 }
 0xbd0   :  { %3135 = vmatpush3.bf16.msra.mxu0 %v3812_v28  ;;  %3138 = vmatprep.mubr.msk.bf16.mxu0 %vm3390_vm1, %v3389_v0 }
 0xbd1   :  { %3136 = vmatprep.subr.bf16.mxu0 %v3389_v0  ;;  %3143 = vmatpush3.bf16.msra.mxu1 %v3821_v29 }
 0xbd2   :  { %3144 = vmatprep.subr.bf16.mxu1 %v3389_v0  ;;  %3146 = vmatprep.mubr.msk.bf16.mxu1 %vm3390_vm1, %v3389_v0 }
 0xbd4   :  { %3137 = vmatpush3.bf16.msra.mxu0 %v3830_v31 }
 0xbd5   :  { %3150 = vmatprep.subr.bf16.mxu0 %v3389_v0  ;;  %3145 = vmatpush3.bf16.msra.mxu1 %v3837_v32 }
 0xbd6   :  { %3158 = vmatprep.subr.bf16.mxu1 %v3389_v0 }
 0xbd7   :  { %3139 = vmatmul.mubr.msk.bf16.vlgmr.msra.gmra.mxu0 %vm31_vm0, %v1922_v18 }
 0xbd8   :  { %3151 = vmatpush3.bf16.msra.mxu0 %v3845_v33  ;;  %3154 = vmatprep.mubr.msk.bf16.mxu0 %vm3390_vm1, %v3389_v0 }
 0xbd9   :  { %3152 = vmatprep.subr.bf16.mxu0 %v3389_v0 }
 0xbdc   :  { %3153 = vmatpush3.bf16.msra.mxu0 %v3854_v34 }
 0xbdd   :  { %3166 = vmatprep.subr.bf16.mxu0 %v3389_v0 }
 0xc8f   :  { %v1960_v20 = vpop.f32.mrf.mxu0  ;;  %v2000_v21 = vpop.f32.mrf.mxu1 }
 0xc90   :  { %v2008_v22 = vadd.f32 %v2652_v19, %v1960_v20  ;;  %v2017_v37 = vadd.f32 %v2654_v26, %v2000_v21  ;;  %v2665_v21 = vld [vmem:[%s4081_s2 + $0x68] sm:$0xff] }
 0xc91   :  { %v3124_v23 = vpop.f32.mrf.mxu0  ;;  %v3132_v24 = vpop.f32.mrf.mxu1 }
 0xc92   :  { %v2653_v25 = vmul.f32 -1.442695, %v2008_v22  ;;  %v2655_v40 = vmul.f32 -1.442695, %v2017_v37 }
 0xc93   :  { %v1963_v27 = vpop.f32.mrf.mxu0  ;;  %v2003_v30 = vpop.f32.mrf.mxu1 }
 0xc94   :  { %3342 = vpow2.f32 %v2653_v25 }
 0xc95   :  { %v3125_v35 = vpop.f32.mrf.mxu0  ;;  %v3133_v36 = vpop.f32.mrf.mxu1  ;;  %3344 = vpow2.f32 %v2655_v40 }
 0xc97   :  { %v2060_v38 = vpop.f32.mrf.mxu0 }
 0xc98   :  { %v2061_v47 = vadd.f32 %v3867_v57, %v2060_v38 }
 0xc99   :  { %v3140_v39 = vpop.f32.mrf.mxu0 }
 0xc9b   :  { %v2063_v41 = vpop.f32.mrf.mxu0 }
 0xc9d   :  { %v3141_v42 = vpop.f32.mrf.mxu0 }
 0xca1   :  { %v3343_v43 = vpop.eup %3342 }
 0xca2   :  { %v2012_v44 = vadd.f32 1.0, %v3343_v43  ;;  %v3345_v45 = vpop.eup %3344 }
 0xca3   :  { %v2021_v46 = vadd.f32 1.0, %v3345_v45 }
 0xca4   :  { %3346 = vrcp.f32 %v2012_v44 }
 0xca5   :  { %3348 = vrcp.f32 %v2021_v46 }
 0xcb1   :  { %v3347_v48 = vpop.eup %3346 }
 0xcb2   :  { %v2066_v50 = vmul.f32 %v3347_v48, %v2061_v47  ;;  %v3349_v52 = vpop.eup %3348 }
 0xcb3   :  { %v2069_v53 = vsub.f32 1.0, %v3349_v52  ;;  %v2071_v56 = vmul.f32 %v3349_v52, %v1919_v17 }
 0xcb4   :  { %v2067_v51 = vadd.f32 %v2656_v49, %v2066_v50 }
 0xcb6   :  { %3350 = vtanh.f32 %v2067_v51 }
 0xcc3   :  { %v3351_v54 = vpop.eup %3350 }
 0xcc4   :  { %v2070_v55 = vmul.f32 %v3351_v54, %v2069_v53 }
 0xcc6   :  { %v2072_v1 = vadd.f32 %v2071_v56, %v2070_v55 }
 0xcc8   :  { %2658 = vst.msk [vmem:[%s4082_s7 + $0x60] sm:$0xff] %vm31_vm0, %v2072_v1  ;;  %v2075_v2 = vpack.c.bf16 %v2072_v1, %v2072_v1 }
 0xcca   :  { %3147 = vmatmul.mubr.msk.bf16.vlgmr.msra.gmra.mxu1 %vm31_vm0, %v2075_v2  ;;  %3155 = vmatmul.mubr.msk.bf16.vlgmr.msra.gmra.mxu0 %vm31_vm0, %v2075_v2 }
 0xccb   :  { %3159 = vmatpush3.bf16.msra.mxu1 %v3812_v28  ;;  %3162 = vmatprep.mubr.msk.bf16.mxu1 %vm3390_vm1, %v3389_v0 }
 0xccc   :  { %3160 = vmatprep.subr.bf16.mxu1 %v3389_v0  ;;  %3167 = vmatpush3.bf16.msra.mxu0 %v3821_v29 }
 0xccd   :  { %3168 = vmatprep.subr.bf16.mxu0 %v3389_v0  ;;  %3170 = vmatprep.mubr.msk.bf16.mxu0 %vm3390_vm1, %v3389_v0 }
 0xccf   :  { %3161 = vmatpush3.bf16.msra.mxu1 %v3830_v31 }
 0xcd0   :  { %3174 = vmatprep.subr.bf16.mxu1 %v3389_v0  ;;  %3169 = vmatpush3.bf16.msra.mxu0 %v3837_v32 }
 0xcd1   :  { %3182 = vmatprep.subr.bf16.mxu0 %v3389_v0 }
 0xcd2   :  { %3163 = vmatmul.mubr.msk.bf16.vlgmr.msra.gmra.mxu1 %vm31_vm0, %v2075_v2 }
 0xcd3   :  { %3175 = vmatpush3.bf16.msra.mxu1 %v3845_v33  ;;  %3178 = vmatprep.mubr.msk.bf16.mxu1 %vm3390_vm1, %v3389_v0 }
 0xcd4   :  { %3176 = vmatprep.subr.bf16.mxu1 %v3389_v0 }
 0xcd7   :  { %3177 = vmatpush3.bf16.msra.mxu1 %v3854_v34 }
 0xcd8   :  { %3190 = vmatprep.subr.bf16.mxu1 %v3389_v0 }
 0xd8a   :  { %v2113_v8 = vpop.f32.mrf.mxu1  ;;  %v2153_v58 = vpop.f32.mrf.mxu0 }
 0xd8b   :  { %v2161_v59 = vadd.f32 %v2661_v6, %v2113_v8  ;;  %v2170_v9 = vadd.f32 %v2663_v62, %v2153_v58 }
 0xd8c   :  { %v3148_v60 = vpop.f32.mrf.mxu1  ;;  %v3156_v3 = vpop.f32.mrf.mxu0 }
 0xd8d   :  { %v2662_v61 = vmul.f32 -1.442695, %v2161_v59  ;;  %v2664_v12 = vmul.f32 -1.442695, %v2170_v9 }
 0xd8e   :  { %v2116_v4 = vpop.f32.mrf.mxu1  ;;  %v2156_v63 = vpop.f32.mrf.mxu0 }
 0xd8f   :  { %3352 = vpow2.f32 %v2662_v61  ;;  %v2679_v4 = vld [vmem:[%s4078_s0 + $0x78] sm:$0xff] }
 0xd90   :  { %v3149_v5 = vpop.f32.mrf.mxu1  ;;  %v3157_v7 = vpop.f32.mrf.mxu0  ;;  %3354 = vpow2.f32 %v2664_v12 }
 0xd92   :  { %v2213_v10 = vpop.f32.mrf.mxu1 }
 0xd93   :  { %v2214_v19 = vadd.f32 %v3867_v57, %v2213_v10 }
 0xd94   :  { %v3164_v11 = vpop.f32.mrf.mxu1 }
 0xd96   :  { %v2216_v13 = vpop.f32.mrf.mxu1 }
 0xd98   :  { %v3165_v14 = vpop.f32.mrf.mxu1 }
 0xd9c   :  { %v3353_v15 = vpop.eup %3352 }
 0xd9d   :  { %v2165_v16 = vadd.f32 1.0, %v3353_v15  ;;  %v3355_v17 = vpop.eup %3354 }
 0xd9e   :  { %v2174_v18 = vadd.f32 1.0, %v3355_v17 }
 0xd9f   :  { %3356 = vrcp.f32 %v2165_v16 }
 0xda0   :  { %3358 = vrcp.f32 %v2174_v18 }
 0xdac   :  { %v3357_v20 = vpop.eup %3356 }
 0xdad   :  { %v2219_v22 = vmul.f32 %v3357_v20, %v2214_v19  ;;  %v3359_v24 = vpop.eup %3358 }
 0xdae   :  { %v2222_v25 = vsub.f32 1.0, %v3359_v24  ;;  %v2224_v30 = vmul.f32 %v3359_v24, %v2072_v1  ;;  %v2674_v1 = vld [vmem:[%s4081_s2 + $0x70] sm:$0xff] }
 0xdaf   :  { %v2220_v23 = vadd.f32 %v2665_v21, %v2219_v22 }
 0xdb1   :  { %3360 = vtanh.f32 %v2220_v23 }
 0xdbe   :  { %v3361_v26 = vpop.eup %3360 }
 0xdbf   :  { %v2223_v27 = vmul.f32 %v3361_v26, %v2222_v25  ;;  %v2683_v26 = vld [vmem:[%s4081_s2 + $0x78] sm:$0xff] }
 0xdc1   :  { %v2225_v35 = vadd.f32 %v2224_v30, %v2223_v27 }
 0xdc3   :  { %2667 = vst.msk [vmem:[%s4082_s7 + $0x68] sm:$0xff] %vm31_vm0, %v2225_v35  ;;  %v2228_v36 = vpack.c.bf16 %v2225_v35, %v2225_v35 }
 0xdc5   :  { %3171 = vmatmul.mubr.msk.bf16.vlgmr.msra.gmra.mxu0 %vm31_vm0, %v2228_v36  ;;  %3179 = vmatmul.mubr.msk.bf16.vlgmr.msra.gmra.mxu1 %vm31_vm0, %v2228_v36 }
 0xdc6   :  { %3183 = vmatpush3.bf16.msra.mxu0 %v3812_v28  ;;  %3186 = vmatprep.mubr.msk.bf16.mxu0 %vm3390_vm1, %v3389_v0 }
 0xdc7   :  { %3184 = vmatprep.subr.bf16.mxu0 %v3389_v0  ;;  %3191 = vmatpush3.bf16.msra.mxu1 %v3821_v29  ;;  %v2670_v29 = vld [vmem:[%s4078_s0 + $0x70] sm:$0xff] }
 0xdc8   :  { %3192 = vmatprep.subr.bf16.mxu1 %v3389_v0  ;;  %3194 = vmatprep.mubr.msk.bf16.mxu1 %vm3390_vm1, %v3389_v0 }
 0xdca   :  { %3185 = vmatpush3.bf16.msra.mxu0 %v3830_v31 }
 0xdcb   :  { %3198 = vmatprep.subr.bf16.mxu0 %v3389_v0  ;;  %3193 = vmatpush3.bf16.msra.mxu1 %v3837_v32 }
 0xdcc   :  { %3206 = vmatprep.subr.bf16.mxu1 %v3389_v0 }
 0xdcd   :  { %3187 = vmatmul.mubr.msk.bf16.vlgmr.msra.gmra.mxu0 %vm31_vm0, %v2228_v36 }
 0xdce   :  { %3199 = vmatpush3.bf16.msra.mxu0 %v3845_v33  ;;  %3202 = vmatprep.mubr.msk.bf16.mxu0 %vm3390_vm1, %v3389_v0  ;;  %v2672_v33 = vld [vmem:[%s4079_s1 + $0x70] sm:$0xff] }
 0xdcf   :  { %3200 = vmatprep.subr.bf16.mxu0 %v3389_v0 }
 0xdd2   :  { %3201 = vmatpush3.bf16.msra.mxu0 %v3854_v34 }
 0xe85   :  { %v2266_v37 = vpop.f32.mrf.mxu0  ;;  %v2306_v38 = vpop.f32.mrf.mxu1 }
 0xe86   :  { %v2314_v32 = vadd.f32 %v2670_v29, %v2266_v37  ;;  %v2323_v34 = vadd.f32 %v2672_v33, %v2306_v38 }
 0xe87   :  { %v3172_v39 = vpop.f32.mrf.mxu0  ;;  %v3180_v40 = vpop.f32.mrf.mxu1 }
 0xe88   :  { %v2671_v41 = vmul.f32 -1.442695, %v2314_v32  ;;  %v2673_v48 = vmul.f32 -1.442695, %v2323_v34 }
 0xe89   :  { %v2269_v42 = vpop.f32.mrf.mxu0  ;;  %v2309_v43 = vpop.f32.mrf.mxu1 }
 0xe8a   :  { %3362 = vpow2.f32 %v2671_v41 }
 0xe8b   :  { %v3173_v44 = vpop.f32.mrf.mxu0  ;;  %v3181_v45 = vpop.f32.mrf.mxu1  ;;  %3364 = vpow2.f32 %v2673_v48 }
 0xe8d   :  { %v2366_v46 = vpop.f32.mrf.mxu0 }
 0xe8e   :  { %v2367_v55 = vadd.f32 %v3867_v57, %v2366_v46 }
 0xe8f   :  { %v3188_v47 = vpop.f32.mrf.mxu0 }
 0xe91   :  { %v2369_v49 = vpop.f32.mrf.mxu0 }
 0xe93   :  { %v3189_v50 = vpop.f32.mrf.mxu0 }
 0xe97   :  { %v3363_v51 = vpop.eup %3362 }
 0xe98   :  { %v2318_v52 = vadd.f32 1.0, %v3363_v51  ;;  %v3365_v53 = vpop.eup %3364 }
 0xe99   :  { %v2327_v54 = vadd.f32 1.0, %v3365_v53 }
 0xe9a   :  { %3366 = vrcp.f32 %v2318_v52 }
 0xe9b   :  { %3368 = vrcp.f32 %v2327_v54 }
 0xea7   :  { %v3367_v56 = vpop.eup %3366 }
 0xea8   :  { %v2372_v2 = vmul.f32 %v3367_v56, %v2367_v55  ;;  %v3369_v8 = vpop.eup %3368 }
 0xea9   :  { %v2375_v58 = vsub.f32 1.0, %v3369_v8  ;;  %v2377_v3 = vmul.f32 %v3369_v8, %v2225_v35 }
 0xeaa   :  { %v2373_v6 = vadd.f32 %v2674_v1, %v2372_v2 }
 0xeac   :  { %3370 = vtanh.f32 %v2373_v6 }
 0xeb9   :  { %v3371_v59 = vpop.eup %3370 }
 0xeba   :  { %v2376_v60 = vmul.f32 %v3371_v59, %v2375_v58 }
 0xebc   :  { %v2378_v61 = vadd.f32 %v2377_v3, %v2376_v60 }
 0xebe   :  { %2676 = vst.msk [vmem:[%s4082_s7 + $0x70] sm:$0xff] %vm31_vm0, %v2378_v61  ;;  %v2381_v62 = vpack.c.bf16 %v2378_v61, %v2378_v61 }
 0xec0   :  { %3195 = vmatmul.mubr.msk.bf16.vlgmr.msra.gmra.mxu1 %vm31_vm0, %v2381_v62  ;;  %3203 = vmatmul.mubr.msk.bf16.vlgmr.msra.gmra.mxu0 %vm31_vm0, %v2381_v62 }
 0xec1   :  { %3207 = vmatpush3.bf16.msra.mxu1 %v3812_v28  ;;  %3210 = vmatprep.mubr.msk.bf16.mxu1 %vm3390_vm1, %v3389_v0  ;;  %v2681_v28 = vld [vmem:[%s4079_s1 + $0x78] sm:$0xff] }
 0xec2   :  { %3208 = vmatprep.subr.bf16.mxu1 %v3389_v0 }
 0xec5   :  { %3209 = vmatpush3.bf16.msra.mxu1 %v3830_v31 }
 0xec8   :  { %3211 = vmatmul.mubr.msk.bf16.vlgmr.msra.gmra.mxu1 %vm31_vm0, %v2381_v62 }
 0xf80   :  { %v2419_v63 = vpop.f32.mrf.mxu1  ;;  %v2459_v5 = vpop.f32.mrf.mxu0 }
 0xf81   :  { %v2467_v7 = vadd.f32 %v2679_v4, %v2419_v63  ;;  %v2476_v14 = vadd.f32 %v2681_v28, %v2459_v5 }
 0xf82   :  { %v3196_v9 = vpop.f32.mrf.mxu1  ;;  %v3204_v10 = vpop.f32.mrf.mxu0 }
 0xf83   :  { %v2680_v11 = vmul.f32 -1.442695, %v2467_v7  ;;  %v2682_v17 = vmul.f32 -1.442695, %v2476_v14 }
 0xf84   :  { %v2422_v12 = vpop.f32.mrf.mxu1  ;;  %v2462_v0 = vpop.f32.mrf.mxu0 }
 0xf85   :  { %3372 = vpow2.f32 %v2680_v11 }
 0xf86   :  { %v3197_v31 = vpop.f32.mrf.mxu1  ;;  %v3205_v13 = vpop.f32.mrf.mxu0  ;;  %3374 = vpow2.f32 %v2682_v17 }
 0xf88   :  { %v2519_v15 = vpop.f32.mrf.mxu1 }
 0xf89   :  { %v2520_v24 = vadd.f32 %v3867_v57, %v2519_v15 }
 0xf8a   :  { %v3212_v16 = vpop.f32.mrf.mxu1 }
 0xf8c   :  { %v2522_v18 = vpop.f32.mrf.mxu1 }
 0xf8e   :  { %v3213_v19 = vpop.f32.mrf.mxu1 }
 0xf92   :  { %v3373_v20 = vpop.eup %3372 }
 0xf93   :  { %v2471_v21 = vadd.f32 1.0, %v3373_v20  ;;  %v3375_v22 = vpop.eup %3374 }
 0xf94   :  { %v2480_v23 = vadd.f32 1.0, %v3375_v22 }
 0xf95   :  { %3376 = vrcp.f32 %v2471_v21 }
 0xf96   :  { %3378 = vrcp.f32 %v2480_v23 }
 0xfa2   :  { %v3377_v25 = vpop.eup %3376 }
 0xfa3   :  { %v2525_v27 = vmul.f32 %v3377_v25, %v2520_v24  ;;  %v3379_v35 = vpop.eup %3378 }
 0xfa4   :  { %v2528_v36 = vsub.f32 1.0, %v3379_v35  ;;  %v2530_v37 = vmul.f32 %v3379_v35, %v2378_v61 }
 0xfa5   :  { %v2526_v30 = vadd.f32 %v2683_v26, %v2525_v27 }
 0xfa7   :  { %3380 = vtanh.f32 %v2526_v30 }
 0xfb4   :  { %v3381_v29 = vpop.eup %3380 }
 0xfb5   :  { %v2529_v38 = vmul.f32 %v3381_v29, %v2528_v36 }
 0xfb7   :  { %v2531_v32 = vadd.f32 %v2530_v37, %v2529_v38 }
 0xfb9   :  { %2685 = vst.msk [vmem:[%s4082_s7 + $0x78] sm:$0xff] %vm31_vm0, %v2531_v32  ;;  %2534 = vst.msk [vmem:[#allocation2] sm:$0xff] %vm31_vm0, %v2531_v32 }

// kernel: _lambda_.25
= control target key start
LH: loop header
LB: loop body
LE: loop exit
PB: predicated region body
PF: predicated region fallthrough
CT: control target
= control target key end

     0   :  { %vm33_vm0 = vcmask 261120   ;;  %s681_s0 = inlined_call_operand.vmem [shape: f32[16,8,32], index: 0, kind: input, shape index: {}]   ;;  %s682_s2 = inlined_call_operand.vmem [shape: f32[1,32], index: 2, kind: input, shape index: {}]   ;;  %s683_s3 = inlined_call_operand.vmem [shape: f32[1,32], index: 3, kind: input, shape index: {}]   ;;  %s684_s1 = inlined_call_operand.vmem [shape: f32[16,8,32], index: 1, kind: input, shape index: {}]   ;;  %s685_s4 = inlined_call_operand.vmem [shape: f32[16,8,32], index: 4, kind: output, shape index: {}]  }
   0x1   :  { %v342_v0 = vld [vmem:[%s681_s0] sm:$0xff]  ;;  %v347_v1 = vld [vmem:[%s681_s0 + $0x10] sm:$0xff]  ;;  %v352_v2 = vld [vmem:[%s681_s0 + $0x8] sm:$0xff] }
   0x2   :  { %v34_v3 = vsel %vm33_vm0, %v342_v0, 0.0  ;;  %v40_v4 = vsel %vm33_vm0, %v347_v1, 0.0  ;;  %v361_v5 = vld [vmem:[%s681_s0 + $0x18] sm:$0xff]  ;;  %v37_v6 = vsel %vm33_vm0, %v352_v2, 0.0  ;;  %v370_v8 = vld [vmem:[%s681_s0 + $0x20] sm:$0xff]  ;;  %v375_v9 = vld [vmem:[%s681_s0 + $0x28] sm:$0xff] }
   0x3   :  { %35 = vadd.xlane.f32.xlu0 %v34_v3  ;;  %41 = vadd.xlane.f32.xlu1 %v40_v4  ;;  %v43_v7 = vsel %vm33_vm0, %v361_v5, 0.0  ;;  %v46_v10 = vsel %vm33_vm0, %v370_v8, 0.0  ;;  %v49_v11 = vsel %vm33_vm0, %v375_v9, 0.0  ;;  %v384_v12 = vld [vmem:[%s681_s0 + $0x30] sm:$0xff]  ;;  %v389_v13 = vld [vmem:[%s681_s0 + $0x38] sm:$0xff]  ;;  %v398_v16 = vld [vmem:[%s681_s0 + $0x40] sm:$0xff] }
   0x4   :  { %v52_v14 = vsel %vm33_vm0, %v384_v12, 0.0  ;;  %v55_v15 = vsel %vm33_vm0, %v389_v13, 0.0  ;;  %v403_v17 = vld [vmem:[%s681_s0 + $0x48] sm:$0xff]  ;;  %v58_v18 = vsel %vm33_vm0, %v398_v16, 0.0  ;;  %v412_v20 = vld [vmem:[%s681_s0 + $0x50] sm:$0xff]  ;;  %v417_v21 = vld [vmem:[%s681_s0 + $0x58] sm:$0xff] }
   0x5   :  { %v61_v19 = vsel %vm33_vm0, %v403_v17, 0.0  ;;  %v64_v22 = vsel %vm33_vm0, %v412_v20, 0.0  ;;  %v67_v23 = vsel %vm33_vm0, %v417_v21, 0.0  ;;  %v426_v24 = vld [vmem:[%s681_s0 + $0x60] sm:$0xff]  ;;  %v431_v25 = vld [vmem:[%s681_s0 + $0x68] sm:$0xff]  ;;  %v440_v28 = vld [vmem:[%s681_s0 + $0x70] sm:$0xff] }
   0x6   :  { %v70_v26 = vsel %vm33_vm0, %v426_v24, 0.0  ;;  %v73_v27 = vsel %vm33_vm0, %v431_v25, 0.0  ;;  %v445_v29 = vld [vmem:[%s681_s0 + $0x78] sm:$0xff]  ;;  %v76_v30 = vsel %vm33_vm0, %v440_v28, 0.0 }
   0x7   :  { %38 = vadd.xlane.f32.xlu0 %v37_v6  ;;  %44 = vadd.xlane.f32.xlu1 %v43_v7  ;;  %v79_v31 = vsel %vm33_vm0, %v445_v29, 0.0 }
   0xb   :  { %47 = vadd.xlane.f32.xlu0 %v46_v10  ;;  %50 = vadd.xlane.f32.xlu1 %v49_v11 }
   0xf   :  { %53 = vadd.xlane.f32.xlu0 %v52_v14  ;;  %56 = vadd.xlane.f32.xlu1 %v55_v15 }
  0x13   :  { %59 = vadd.xlane.f32.xlu0 %v58_v18  ;;  %62 = vadd.xlane.f32.xlu1 %v61_v19 }
  0x17   :  { %65 = vadd.xlane.f32.xlu0 %v64_v22  ;;  %68 = vadd.xlane.f32.xlu1 %v67_v23 }
  0x1b   :  { %71 = vadd.xlane.f32.xlu0 %v70_v26  ;;  %74 = vadd.xlane.f32.xlu1 %v73_v27 }
  0x1f   :  { %77 = vadd.xlane.f32.xlu0 %v76_v30  ;;  %80 = vadd.xlane.f32.xlu1 %v79_v31 }
  0x8c   :  { %v36_v32 = vpop.xlane.xlu0 %35  ;;  %v42_v33 = vpop.xlane.xlu1 %41 }
  0x90   :  { %v39_v34 = vpop.xlane.xlu0 %38  ;;  %v45_v35 = vpop.xlane.xlu1 %44 }
  0x91   :  { %v82_v36 = vadd.f32 %v39_v34, %v36_v32 }
  0x93   :  { %v83_v37 = vadd.f32 %v82_v36, %v42_v33 }
  0x94   :  { %v48_v38 = vpop.xlane.xlu0 %47  ;;  %v51_v39 = vpop.xlane.xlu1 %50 }
  0x95   :  { %v84_v40 = vadd.f32 %v83_v37, %v45_v35 }
  0x97   :  { %v85_v41 = vadd.f32 %v84_v40, %v48_v38 }
  0x98   :  { %v54_v42 = vpop.xlane.xlu0 %53  ;;  %v57_v43 = vpop.xlane.xlu1 %56 }
  0x99   :  { %v86_v44 = vadd.f32 %v85_v41, %v51_v39 }
  0x9b   :  { %v87_v45 = vadd.f32 %v86_v44, %v54_v42 }
  0x9c   :  { %v60_v46 = vpop.xlane.xlu0 %59  ;;  %v63_v47 = vpop.xlane.xlu1 %62 }
  0x9d   :  { %v88_v48 = vadd.f32 %v87_v45, %v57_v43 }
  0x9f   :  { %v89_v49 = vadd.f32 %v88_v48, %v60_v46 }
  0xa0   :  { %v66_v50 = vpop.xlane.xlu0 %65  ;;  %v69_v51 = vpop.xlane.xlu1 %68 }
  0xa1   :  { %v90_v52 = vadd.f32 %v89_v49, %v63_v47 }
  0xa3   :  { %v91_v53 = vadd.f32 %v90_v52, %v66_v50 }
  0xa4   :  { %v72_v54 = vpop.xlane.xlu0 %71  ;;  %v75_v55 = vpop.xlane.xlu1 %74 }
  0xa5   :  { %v92_v56 = vadd.f32 %v91_v53, %v69_v51 }
  0xa7   :  { %v93_v57 = vadd.f32 %v92_v56, %v72_v54 }
  0xa8   :  { %v78_v58 = vpop.xlane.xlu0 %77  ;;  %v81_v60 = vpop.xlane.xlu1 %80 }
  0xa9   :  { %v94_v59 = vadd.f32 %v93_v57, %v75_v55 }
  0xab   :  { %v95_v61 = vadd.f32 %v94_v59, %v78_v58 }
  0xad   :  { %v96_v62 = vadd.f32 %v95_v61, %v81_v60 }
  0xaf   :  { %v97_v63 = vmul.f32 0.001953125, %v96_v62 }
  0xb1   :  { %v452_v3 = vsub.f32 %v352_v2, %v97_v63  ;;  %v455_v4 = vsub.f32 %v342_v0, %v97_v63  ;;  %v458_v6 = vsub.f32 %v361_v5, %v97_v63  ;;  %v461_v7 = vsub.f32 %v347_v1, %v97_v63 }
  0xb2   :  { %v468_v14 = vsub.f32 %v375_v9, %v97_v63  ;;  %v471_v2 = vsub.f32 %v370_v8, %v97_v63  ;;  %v480_v18 = vsub.f32 %v389_v13, %v97_v63  ;;  %v483_v9 = vsub.f32 %v384_v12, %v97_v63 }
  0xb3   :  { %v115_v10 = vmul.f32 %v452_v3, %v452_v3  ;;  %v114_v11 = vmul.f32 %v455_v4, %v455_v4  ;;  %v117_v1 = vmul.f32 %v458_v6, %v458_v6  ;;  %v116_v15 = vmul.f32 %v461_v7, %v461_v7 }
  0xb4   :  { %v119_v22 = vmul.f32 %v468_v14, %v468_v14  ;;  %v118_v23 = vmul.f32 %v471_v2, %v471_v2  ;;  %v121_v26 = vmul.f32 %v480_v18, %v480_v18  ;;  %v120_v13 = vmul.f32 %v483_v9, %v483_v9 }
  0xb5   :  { %v133_v0 = vsel %vm33_vm0, %v115_v10, 0.0  ;;  %v130_v5 = vsel %vm33_vm0, %v114_v11, 0.0  ;;  %v139_v8 = vsel %vm33_vm0, %v117_v1, 0.0  ;;  %v136_v19 = vsel %vm33_vm0, %v116_v15, 0.0 }
  0xb6   :  { %134 = vadd.xlane.f32.xlu1 %v133_v0  ;;  %131 = vadd.xlane.f32.xlu0 %v130_v5  ;;  %v145_v12 = vsel %vm33_vm0, %v119_v22, 0.0  ;;  %v142_v27 = vsel %vm33_vm0, %v118_v23, 0.0  ;;  %v498_v30 = vsub.f32 %v403_v17, %v97_v63  ;;  %v501_v31 = vsub.f32 %v398_v16, %v97_v63 }
  0xb7   :  { %v151_v32 = vsel %vm33_vm0, %v121_v26, 0.0  ;;  %v148_v33 = vsel %vm33_vm0, %v120_v13, 0.0  ;;  %v510_v36 = vsub.f32 %v417_v21, %v97_v63  ;;  %v513_v17 = vsub.f32 %v412_v20, %v97_v63 }
  0xb8   :  { %v123_v34 = vmul.f32 %v498_v30, %v498_v30  ;;  %v122_v35 = vmul.f32 %v501_v31, %v501_v31  ;;  %v516_v16 = vsub.f32 %v431_v25, %v97_v63  ;;  %v519_v37 = vsub.f32 %v426_v24, %v97_v63 }
  0xb9   :  { %v125_v40 = vmul.f32 %v510_v36, %v510_v36  ;;  %v124_v21 = vmul.f32 %v513_v17, %v513_v17  ;;  %v528_v20 = vsub.f32 %v445_v29, %v97_v63  ;;  %v531_v25 = vsub.f32 %v440_v28, %v97_v63 }
  0xba   :  { %140 = vadd.xlane.f32.xlu1 %v139_v8  ;;  %137 = vadd.xlane.f32.xlu0 %v136_v19  ;;  %v157_v38 = vsel %vm33_vm0, %v123_v34, 0.0  ;;  %v154_v39 = vsel %vm33_vm0, %v122_v35, 0.0  ;;  %v127_v42 = vmul.f32 %v516_v16, %v516_v16  ;;  %v126_v43 = vmul.f32 %v519_v37, %v519_v37 }
  0xbb   :  { %v163_v24 = vsel %vm33_vm0, %v125_v40, 0.0  ;;  %v160_v41 = vsel %vm33_vm0, %v124_v21, 0.0  ;;  %v129_v28 = vmul.f32 %v528_v20, %v528_v20  ;;  %v128_v45 = vmul.f32 %v531_v25, %v531_v25 }
  0xbc   :  { %v169_v44 = vsel %vm33_vm0, %v127_v42, 0.0  ;;  %v166_v29 = vsel %vm33_vm0, %v126_v43, 0.0 }
  0xbd   :  { %v175_v46 = vsel %vm33_vm0, %v129_v28, 0.0  ;;  %v172_v47 = vsel %vm33_vm0, %v128_v45, 0.0 }
  0xbe   :  { %146 = vadd.xlane.f32.xlu1 %v145_v12  ;;  %143 = vadd.xlane.f32.xlu0 %v142_v27 }
  0xc2   :  { %152 = vadd.xlane.f32.xlu1 %v151_v32  ;;  %149 = vadd.xlane.f32.xlu0 %v148_v33 }
  0xc6   :  { %158 = vadd.xlane.f32.xlu1 %v157_v38  ;;  %155 = vadd.xlane.f32.xlu0 %v154_v39 }
  0xca   :  { %164 = vadd.xlane.f32.xlu1 %v163_v24  ;;  %161 = vadd.xlane.f32.xlu0 %v160_v41  ;;  %v310_v24 = vld [vmem:[%s682_s2] ss:$0 sm:$0xff] }
  0xce   :  { %170 = vadd.xlane.f32.xlu1 %v169_v44  ;;  %167 = vadd.xlane.f32.xlu0 %v166_v29 }
  0xd2   :  { %176 = vadd.xlane.f32.xlu1 %v175_v46  ;;  %173 = vadd.xlane.f32.xlu0 %v172_v47 }
 0x13f   :  { %v135_v48 = vpop.xlane.xlu1 %134  ;;  %v132_v49 = vpop.xlane.xlu0 %131 }
 0x140   :  { %v178_v50 = vadd.f32 %v135_v48, %v132_v49 }
 0x143   :  { %v141_v51 = vpop.xlane.xlu1 %140  ;;  %v138_v52 = vpop.xlane.xlu0 %137 }
 0x144   :  { %v179_v53 = vadd.f32 %v178_v50, %v138_v52 }
 0x146   :  { %v180_v54 = vadd.f32 %v179_v53, %v141_v51  ;;  %v259_v53 = vld [vmem:[%s684_s1 + $0x8] sm:$0xff] }
 0x147   :  { %v147_v55 = vpop.xlane.xlu1 %146  ;;  %v144_v56 = vpop.xlane.xlu0 %143 }
 0x148   :  { %v181_v57 = vadd.f32 %v180_v54, %v144_v56  ;;  %v260_v54 = vld [vmem:[%s684_s1 + $0x10] sm:$0xff] }
 0x14a   :  { %v182_v58 = vadd.f32 %v181_v57, %v147_v55  ;;  %v261_v55 = vld [vmem:[%s684_s1 + $0x18] sm:$0xff] }
 0x14b   :  { %v153_v59 = vpop.xlane.xlu1 %152  ;;  %v150_v60 = vpop.xlane.xlu0 %149 }
 0x14c   :  { %v183_v61 = vadd.f32 %v182_v58, %v150_v60  ;;  %v262_v60 = vld [vmem:[%s684_s1 + $0x20] sm:$0xff] }
 0x14e   :  { %v184_v62 = vadd.f32 %v183_v61, %v153_v59  ;;  %v263_v61 = vld [vmem:[%s684_s1 + $0x28] sm:$0xff] }
 0x14f   :  { %v159_v63 = vpop.xlane.xlu1 %158  ;;  %v156_v10 = vpop.xlane.xlu0 %155 }
 0x150   :  { %v185_v11 = vadd.f32 %v184_v62, %v156_v10  ;;  %v264_v62 = vld [vmem:[%s684_s1 + $0x30] sm:$0xff] }
 0x152   :  { %v186_v0 = vadd.f32 %v185_v11, %v159_v63 }
 0x153   :  { %v165_v5 = vpop.xlane.xlu1 %164  ;;  %v162_v1 = vpop.xlane.xlu0 %161 }
 0x154   :  { %v187_v15 = vadd.f32 %v186_v0, %v162_v1  ;;  %v266_v1 = vld [vmem:[%s684_s1 + $0x40] sm:$0xff] }
 0x156   :  { %v188_v8 = vadd.f32 %v187_v15, %v165_v5  ;;  %v265_v5 = vld [vmem:[%s684_s1 + $0x38] sm:$0xff]  ;;  %v267_v15 = vld [vmem:[%s684_s1 + $0x48] sm:$0xff] }
 0x157   :  { %v171_v19 = vpop.xlane.xlu1 %170  ;;  %v168_v22 = vpop.xlane.xlu0 %167 }
 0x158   :  { %v189_v23 = vadd.f32 %v188_v8, %v168_v22 }
 0x15a   :  { %v190_v26 = vadd.f32 %v189_v23, %v171_v19 }
 0x15b   :  { %v174_v13 = vpop.xlane.xlu0 %173  ;;  %v177_v27 = vpop.xlane.xlu1 %176 }
 0x15c   :  { %v191_v12 = vadd.f32 %v190_v26, %v174_v13  ;;  %v268_v26 = vld [vmem:[%s684_s1 + $0x50] sm:$0xff]  ;;  %v269_v13 = vld [vmem:[%s684_s1 + $0x58] sm:$0xff] }
 0x15e   :  { %v192_v32 = vadd.f32 %v191_v12, %v177_v27  ;;  %v270_v12 = vld [vmem:[%s684_s1 + $0x60] sm:$0xff] }
 0x160   :  { %v193_v33 = vmul.f32 0.001953125, %v192_v32 }
 0x162   :  { %v194_v34 = vadd.f32 1e-05, %v193_v33 }
 0x164   :  { %312 = vrsqrt.f32 %v194_v34 }
 0x171   :  { %v313_v35 = vpop.eup %312 }
 0x172   :  { %v196_v38 = vmul.f32 %v313_v35, %v455_v4  ;;  %v197_v39 = vmul.f32 %v313_v35, %v452_v3  ;;  %v198_v40 = vmul.f32 %v313_v35, %v461_v7  ;;  %v199_v21 = vmul.f32 %v313_v35, %v458_v6 }
 0x173   :  { %v200_v41 = vmul.f32 %v313_v35, %v471_v2  ;;  %v201_v42 = vmul.f32 %v313_v35, %v468_v14  ;;  %v202_v43 = vmul.f32 %v313_v35, %v483_v9  ;;  %v203_v44 = vmul.f32 %v313_v35, %v480_v18 }
 0x174   :  { %v204_v4 = vmul.f32 %v313_v35, %v501_v31  ;;  %v205_v3 = vmul.f32 %v313_v35, %v498_v30  ;;  %v206_v7 = vmul.f32 %v313_v35, %v513_v17  ;;  %v207_v6 = vmul.f32 %v313_v35, %v510_v36  ;;  %v311_v30 = vld [vmem:[%s683_s3] ss:$0 sm:$0xff] }
 0x175   :  { %v208_v29 = vmul.f32 %v313_v35, %v519_v37  ;;  %v209_v28 = vmul.f32 %v313_v35, %v516_v16  ;;  %v210_v2 = vmul.f32 %v313_v35, %v531_v25  ;;  %v211_v14 = vmul.f32 %v313_v35, %v528_v20  ;;  %v258_v20 = vld [vmem:[%s684_s1] sm:$0xff]  ;;  %v271_v35 = vld [vmem:[%s684_s1 + $0x68] sm:$0xff] }
 0x176   :  { %v219_v45 = vmul.f32 %v310_v24, %v196_v38  ;;  %v220_v9 = vmul.f32 %v310_v24, %v197_v39  ;;  %v221_v46 = vmul.f32 %v310_v24, %v198_v40  ;;  %v222_v18 = vmul.f32 %v310_v24, %v199_v21  ;;  %v272_v38 = vld [vmem:[%s684_s1 + $0x70] sm:$0xff]  ;;  %v273_v39 = vld [vmem:[%s684_s1 + $0x78] sm:$0xff] }
 0x177   :  { %v223_v31 = vmul.f32 %v310_v24, %v200_v41  ;;  %v224_v17 = vmul.f32 %v310_v24, %v201_v42  ;;  %v225_v47 = vmul.f32 %v310_v24, %v202_v43  ;;  %v226_v36 = vmul.f32 %v310_v24, %v203_v44 }
 0x178   :  { %v227_v48 = vmul.f32 %v310_v24, %v204_v4  ;;  %v228_v37 = vmul.f32 %v310_v24, %v205_v3  ;;  %v229_v49 = vmul.f32 %v310_v24, %v206_v7  ;;  %v230_v16 = vmul.f32 %v310_v24, %v207_v6 }
 0x179   :  { %v231_v25 = vmul.f32 %v310_v24, %v208_v29  ;;  %v232_v50 = vmul.f32 %v310_v24, %v209_v28  ;;  %v233_v51 = vmul.f32 %v310_v24, %v210_v2  ;;  %v234_v52 = vmul.f32 %v310_v24, %v211_v14 }
 0x17a   :  { %v242_v56 = vadd.f32 %v311_v30, %v219_v45  ;;  %v243_v57 = vadd.f32 %v311_v30, %v220_v9  ;;  %v244_v58 = vadd.f32 %v311_v30, %v221_v46  ;;  %v245_v59 = vadd.f32 %v311_v30, %v222_v18 }
 0x17b   :  { %v246_v63 = vadd.f32 %v311_v30, %v223_v31  ;;  %v247_v10 = vadd.f32 %v311_v30, %v224_v17  ;;  %v248_v11 = vadd.f32 %v311_v30, %v225_v47  ;;  %v249_v0 = vadd.f32 %v311_v30, %v226_v36 }
 0x17c   :  { %v250_v8 = vadd.f32 %v311_v30, %v227_v48  ;;  %v251_v19 = vadd.f32 %v311_v30, %v228_v37  ;;  %v252_v22 = vadd.f32 %v311_v30, %v229_v49  ;;  %v253_v23 = vadd.f32 %v311_v30, %v230_v16 }
 0x17d   :  { %v254_v27 = vadd.f32 %v311_v30, %v231_v25  ;;  %v255_v32 = vadd.f32 %v311_v30, %v232_v50  ;;  %v256_v33 = vadd.f32 %v311_v30, %v233_v51  ;;  %v257_v34 = vadd.f32 %v311_v30, %v234_v52 }
 0x17e   :  { %v274_v40 = vadd.f32 %v258_v20, %v242_v56  ;;  %v275_v21 = vadd.f32 %v259_v53, %v243_v57  ;;  %v276_v24 = vadd.f32 %v260_v54, %v244_v58  ;;  %v277_v41 = vadd.f32 %v261_v55, %v245_v59 }
 0x17f   :  { %v278_v42 = vadd.f32 %v262_v60, %v246_v63  ;;  %v279_v43 = vadd.f32 %v263_v61, %v247_v10  ;;  %v280_v44 = vadd.f32 %v264_v62, %v248_v11  ;;  %v281_v4 = vadd.f32 %v265_v5, %v249_v0 }
 0x180   :  { %v282_v3 = vadd.f32 %v266_v1, %v250_v8  ;;  %v283_v7 = vadd.f32 %v267_v15, %v251_v19  ;;  %v284_v6 = vadd.f32 %v268_v26, %v252_v22  ;;  %v285_v29 = vadd.f32 %v269_v13, %v253_v23  ;;  %290 = vst.msk [vmem:[%s685_s4] sm:$0xff] %vm33_vm0, %v274_v40 }
 0x181   :  { %291 = vst.msk [vmem:[%s685_s4 + $0x8] sm:$0xff] %vm33_vm0, %v275_v21  ;;  %292 = vst.msk [vmem:[%s685_s4 + $0x10] sm:$0xff] %vm33_vm0, %v276_v24  ;;  %v286_v28 = vadd.f32 %v270_v12, %v254_v27  ;;  %v287_v2 = vadd.f32 %v271_v35, %v255_v32  ;;  %v288_v14 = vadd.f32 %v272_v38, %v256_v33 }
 0x182   :  { %293 = vst.msk [vmem:[%s685_s4 + $0x18] sm:$0xff] %vm33_vm0, %v277_v41  ;;  %v289_v45 = vadd.f32 %v273_v39, %v257_v34  ;;  %294 = vst.msk [vmem:[%s685_s4 + $0x20] sm:$0xff] %vm33_vm0, %v278_v42 }
 0x183   :  { %295 = vst.msk [vmem:[%s685_s4 + $0x28] sm:$0xff] %vm33_vm0, %v279_v43  ;;  %296 = vst.msk [vmem:[%s685_s4 + $0x30] sm:$0xff] %vm33_vm0, %v280_v44 }
 0x184   :  { %297 = vst.msk [vmem:[%s685_s4 + $0x38] sm:$0xff] %vm33_vm0, %v281_v4  ;;  %298 = vst.msk [vmem:[%s685_s4 + $0x40] sm:$0xff] %vm33_vm0, %v282_v3 }
 0x185   :  { %299 = vst.msk [vmem:[%s685_s4 + $0x48] sm:$0xff] %vm33_vm0, %v283_v7  ;;  %300 = vst.msk [vmem:[%s685_s4 + $0x50] sm:$0xff] %vm33_vm0, %v284_v6 }
 0x186   :  { %301 = vst.msk [vmem:[%s685_s4 + $0x58] sm:$0xff] %vm33_vm0, %v285_v29  ;;  %302 = vst.msk [vmem:[%s685_s4 + $0x60] sm:$0xff] %vm33_vm0, %v286_v28 }
 0x187   :  { %303 = vst.msk [vmem:[%s685_s4 + $0x68] sm:$0xff] %vm33_vm0, %v287_v2  ;;  %304 = vst.msk [vmem:[%s685_s4 + $0x70] sm:$0xff] %vm33_vm0, %v288_v14 }
 0x188   :  { %305 = vst.msk [vmem:[%s685_s4 + $0x78] sm:$0xff] %vm33_vm0, %v289_v45 }

// kernel: _lambda_.26
= control target key start
LH: loop header
LB: loop body
LE: loop exit
PB: predicated region body
PF: predicated region fallthrough
CT: control target
= control target key end

     0   :  { %vm77_vm0 = vcmask 261120   ;;  %s1009_s1 = inlined_call_operand.vmem [shape: bf16[32,32], index: 1, kind: input, shape index: {}]   ;;  %s1010_s0 = inlined_call_operand.vmem [shape: f32[128,32], index: 0, kind: input, shape index: {}]   ;;  %s1011_s2 = inlined_call_operand.vmem [shape: bf16[32,32], index: 2, kind: input, shape index: {}]   ;;  %s1012_s3 = inlined_call_operand.vmem [shape: bf16[32,32], index: 3, kind: input, shape index: {}]   ;;  %s1013_s4 = inlined_call_operand.vmem [shape: f32[1,32], index: 4, kind: input, shape index: {}]   ;;  %s1014_s7 = inlined_call_operand.vmem [shape: f32[128,32], index: 7, kind: output, shape index: {0}]   ;;  %s1015_s5 = inlined_call_operand.vmem [shape: f32[1,32], index: 5, kind: input, shape index: {}]   ;;  %s1016_s6 = inlined_call_operand.vmem [shape: f32[1,32], index: 6, kind: input, shape index: {}]   ;;  %s1017_s8 = inlined_call_operand.vmem [shape: f32[128,32], index: 8, kind: output, shape index: {1}]   ;;  %s1018_s9 = inlined_call_operand.vmem [shape: f32[128,32], index: 9, kind: output, shape index: {2}]  }
   0x1   :  { %v626_v0 = vld [vmem:[%s1009_s1 + $0x8] sm:$0xff]   ;;  %v627_v1 = vld [vmem:[%s1009_s1] sm:$0xff]   ;;  %v32_v7 = vld [vmem:[%s1010_s0 + $0x10] sm:$0xff] }
   0x2   :  { %562 = vmatprep.subr.bf16.mxu0 %v626_v0  ;;  %622 = vmatprep.subr.bf16.mxu1 %v626_v0  ;;  %v30_v2 = vld [vmem:[%s1010_s0] sm:$0xff]  ;;  %v31_v3 = vld [vmem:[%s1010_s0 + $0x8] sm:$0xff]  ;;  %v33_v8 = vld [vmem:[%s1010_s0 + $0x18] sm:$0xff] }
   0x3   :  { %v38_v4 = vld [vmem:[%s1010_s0 + $0x40] sm:$0xff]  ;;  %563 = vmatpush3.bf16.msra.mxu0 %v626_v0  ;;  %624 = vmatpush3.bf16.msra.mxu1 %v626_v0  ;;  %v46_v5 = vpack.c.bf16 %v31_v3, %v30_v2  ;;  %v39_v6 = vld [vmem:[%s1010_s0 + $0x48] sm:$0xff]  ;;  %v40_v10 = vld [vmem:[%s1010_s0 + $0x50] sm:$0xff]  ;;  %v47_v13 = vpack.c.bf16 %v33_v8, %v32_v7 }
   0x4   :  { %564 = vmatprep.subr.bf16.mxu0 %v627_v1  ;;  %623 = vmatprep.subr.bf16.mxu1 %v627_v1  ;;  %v50_v9 = vpack.c.bf16 %v39_v6, %v38_v4  ;;  %v41_v11 = vld [vmem:[%s1010_s0 + $0x58] sm:$0xff]  ;;  %v628_v12 = vld [vmem:[%s1011_s2 + $0x8] sm:$0xff]   ;;  %v34_v16 = vld [vmem:[%s1010_s0 + $0x20] sm:$0xff] }
   0x5   :  { %566 = vmatprep.mubr.msk.bf16.mxu0 %vm77_vm0, %v46_v5  ;;  %v51_v14 = vpack.c.bf16 %v41_v11, %v40_v10  ;;  %v629_v15 = vld [vmem:[%s1012_s3 + $0x8] sm:$0xff]   ;;  %v42_v18 = vld [vmem:[%s1010_s0 + $0x60] sm:$0xff]  ;;  %v36_v22 = vld [vmem:[%s1010_s0 + $0x30] sm:$0xff] }
   0x6   :  { %574 = vmatprep.mubr.msk.bf16.mxu1 %vm77_vm0, %v50_v9  ;;  %v35_v17 = vld [vmem:[%s1010_s0 + $0x28] sm:$0xff]  ;;  %v37_v23 = vld [vmem:[%s1010_s0 + $0x38] sm:$0xff]  ;;  %v630_v24 = vld [vmem:[%s1011_s2] sm:$0xff]  }
   0x7   :  { %565 = vmatpush3.bf16.msra.mxu0 %v627_v1  ;;  %625 = vmatpush3.bf16.msra.mxu1 %v627_v1  ;;  %v43_v19 = vld [vmem:[%s1010_s0 + $0x68] sm:$0xff]  ;;  %v48_v20 = vpack.c.bf16 %v35_v17, %v34_v16  ;;  %v44_v25 = vld [vmem:[%s1010_s0 + $0x70] sm:$0xff]  ;;  %v45_v26 = vld [vmem:[%s1010_s0 + $0x78] sm:$0xff]  ;;  %v49_v28 = vpack.c.bf16 %v37_v23, %v36_v22 }
   0x8   :  { %582 = vmatprep.subr.bf16.mxu1 %v628_v12  ;;  %602 = vmatprep.subr.bf16.mxu0 %v629_v15  ;;  %v52_v21 = vpack.c.bf16 %v43_v19, %v42_v18  ;;  %v631_v27 = vld [vmem:[%s1012_s3] sm:$0xff]   ;;  %v53_v29 = vpack.c.bf16 %v45_v26, %v44_v25 }
   0x9   :  { %v499_v30 = vld [vmem:[%s1013_s4] ss:$0 sm:$0xff] }
   0xa   :  { %567 = vmatmul.mubr.msk.bf16.vlgmr.msra.gmra.mxu0 %vm77_vm0, %v47_v13  ;;  %575 = vmatmul.mubr.msk.bf16.vlgmr.msra.gmra.mxu1 %vm77_vm0, %v51_v14  ;;  %v826_v61 = vld [vmem:[%s1015_s5] ss:$0 sm:$0xff] }
   0xb   :  { %583 = vmatpush3.bf16.msra.mxu1 %v628_v12  ;;  %603 = vmatpush3.bf16.msra.mxu0 %v629_v15  ;;  %v831_v62 = vld [vmem:[%s1016_s6] ss:$0 sm:$0xff] }
   0xc   :  { %570 = vmatprep.mubr.msk.bf16.mxu0 %vm77_vm0, %v48_v20  ;;  %578 = vmatprep.mubr.msk.bf16.mxu1 %vm77_vm0, %v52_v21 }
   0xd   :  { %584 = vmatprep.subr.bf16.mxu1 %v630_v24  ;;  %604 = vmatprep.subr.bf16.mxu0 %v631_v27 }
   0xf   :  { %585 = vmatpush3.bf16.msra.mxu1 %v630_v24  ;;  %605 = vmatpush3.bf16.msra.mxu0 %v631_v27 }
  0x12   :  { %571 = vmatmul.mubr.msk.bf16.gmra.mxu0 %vm77_vm0, %v49_v28  ;;  %579 = vmatmul.mubr.msk.bf16.gmra.mxu1 %vm77_vm0, %v53_v29 }
  0x13   :  { %586 = vmatprep.mubr.msk.bf16.mxu1 %vm77_vm0, %v46_v5  ;;  %606 = vmatprep.mubr.msk.bf16.mxu0 %vm77_vm0, %v46_v5 }
  0x1a   :  { %587 = vmatmul.mubr.msk.bf16.vlgmr.msra.gmra.mxu1 %vm77_vm0, %v47_v13  ;;  %607 = vmatmul.mubr.msk.bf16.vlgmr.msra.gmra.mxu0 %vm77_vm0, %v47_v13 }
  0x1b   :  { %590 = vmatprep.mubr.msk.bf16.mxu1 %vm77_vm0, %v48_v20  ;;  %610 = vmatprep.mubr.msk.bf16.mxu0 %vm77_vm0, %v48_v20 }
  0x22   :  { %591 = vmatmul.mubr.msk.bf16.gmra.mxu1 %vm77_vm0, %v49_v28  ;;  %611 = vmatmul.mubr.msk.bf16.gmra.mxu0 %vm77_vm0, %v49_v28 }
  0x23   :  { %594 = vmatprep.mubr.msk.bf16.mxu1 %vm77_vm0, %v50_v9  ;;  %614 = vmatprep.mubr.msk.bf16.mxu0 %vm77_vm0, %v50_v9 }
  0x2a   :  { %595 = vmatmul.mubr.msk.bf16.gmra.mxu1 %vm77_vm0, %v51_v14  ;;  %615 = vmatmul.mubr.msk.bf16.gmra.mxu0 %vm77_vm0, %v51_v14 }
  0x2b   :  { %598 = vmatprep.mubr.msk.bf16.mxu1 %vm77_vm0, %v52_v21  ;;  %618 = vmatprep.mubr.msk.bf16.mxu0 %vm77_vm0, %v52_v21 }
  0x32   :  { %599 = vmatmul.mubr.msk.bf16.gmra.mxu1 %vm77_vm0, %v53_v29  ;;  %619 = vmatmul.mubr.msk.bf16.gmra.mxu0 %vm77_vm0, %v53_v29 }
  0xca   :  { %v568_v31 = vpop.f32.mrf.mxu0  ;;  %v576_v32 = vpop.f32.mrf.mxu1 }
  0xcb   :  { %v145_v33 = vadd.f32 %v568_v31, %v499_v30  ;;  %v177_v34 = vadd.f32 %v576_v32, %v499_v30 }
  0xcc   :  { %v136_v35 = vpop.f32.mrf.mxu0  ;;  %v168_v36 = vpop.f32.mrf.mxu1 }
  0xcd   :  { %201 = vst.msk [vmem:[%s1014_s7 + $0x10] sm:$0xff] %vm77_vm0, %v145_v33  ;;  %209 = vst.msk [vmem:[%s1014_s7 + $0x50] sm:$0xff] %vm77_vm0, %v177_v34  ;;  %v137_v37 = vadd.f32 %v499_v30, %v136_v35  ;;  %v169_v38 = vadd.f32 %v499_v30, %v168_v36 }
  0xce   :  { %v569_v39 = vpop.f32.mrf.mxu0  ;;  %v577_v40 = vpop.f32.mrf.mxu1 }
  0xcf   :  { %199 = vst.msk [vmem:[%s1014_s7] sm:$0xff] %vm77_vm0, %v137_v37  ;;  %207 = vst.msk [vmem:[%s1014_s7 + $0x40] sm:$0xff] %vm77_vm0, %v169_v38  ;;  %v148_v41 = vadd.f32 %v569_v39, %v499_v30  ;;  %v180_v42 = vadd.f32 %v577_v40, %v499_v30 }
  0xd0   :  { %v139_v43 = vpop.f32.mrf.mxu0  ;;  %v171_v44 = vpop.f32.mrf.mxu1 }
  0xd1   :  { %202 = vst.msk [vmem:[%s1014_s7 + $0x18] sm:$0xff] %vm77_vm0, %v148_v41  ;;  %210 = vst.msk [vmem:[%s1014_s7 + $0x58] sm:$0xff] %vm77_vm0, %v180_v42  ;;  %v140_v45 = vadd.f32 %v499_v30, %v139_v43  ;;  %v172_v46 = vadd.f32 %v499_v30, %v171_v44 }
  0xd2   :  { %v572_v47 = vpop.f32.mrf.mxu0  ;;  %v580_v48 = vpop.f32.mrf.mxu1 }
  0xd3   :  { %200 = vst.msk [vmem:[%s1014_s7 + $0x8] sm:$0xff] %vm77_vm0, %v140_v45  ;;  %208 = vst.msk [vmem:[%s1014_s7 + $0x48] sm:$0xff] %vm77_vm0, %v172_v46  ;;  %v161_v49 = vadd.f32 %v572_v47, %v499_v30  ;;  %v193_v50 = vadd.f32 %v580_v48, %v499_v30 }
  0xd4   :  { %v152_v51 = vpop.f32.mrf.mxu0  ;;  %v184_v52 = vpop.f32.mrf.mxu1 }
  0xd5   :  { %205 = vst.msk [vmem:[%s1014_s7 + $0x30] sm:$0xff] %vm77_vm0, %v161_v49  ;;  %213 = vst.msk [vmem:[%s1014_s7 + $0x70] sm:$0xff] %vm77_vm0, %v193_v50  ;;  %v153_v53 = vadd.f32 %v499_v30, %v152_v51  ;;  %v185_v54 = vadd.f32 %v499_v30, %v184_v52 }
  0xd6   :  { %v573_v55 = vpop.f32.mrf.mxu0  ;;  %v581_v56 = vpop.f32.mrf.mxu1 }
  0xd7   :  { %203 = vst.msk [vmem:[%s1014_s7 + $0x20] sm:$0xff] %vm77_vm0, %v153_v53  ;;  %211 = vst.msk [vmem:[%s1014_s7 + $0x60] sm:$0xff] %vm77_vm0, %v185_v54  ;;  %v164_v57 = vadd.f32 %v573_v55, %v499_v30  ;;  %v196_v58 = vadd.f32 %v581_v56, %v499_v30 }
  0xd8   :  { %v155_v59 = vpop.f32.mrf.mxu0  ;;  %v187_v60 = vpop.f32.mrf.mxu1 }
  0xd9   :  { %206 = vst.msk [vmem:[%s1014_s7 + $0x38] sm:$0xff] %vm77_vm0, %v164_v57  ;;  %214 = vst.msk [vmem:[%s1014_s7 + $0x78] sm:$0xff] %vm77_vm0, %v196_v58  ;;  %v156_v63 = vadd.f32 %v499_v30, %v155_v59  ;;  %v188_v0 = vadd.f32 %v499_v30, %v187_v60 }
  0xda   :  { %v588_v1 = vpop.f32.mrf.mxu1  ;;  %v608_v2 = vpop.f32.mrf.mxu0 }
  0xdb   :  { %204 = vst.msk [vmem:[%s1014_s7 + $0x28] sm:$0xff] %vm77_vm0, %v156_v63  ;;  %212 = vst.msk [vmem:[%s1014_s7 + $0x68] sm:$0xff] %vm77_vm0, %v188_v0  ;;  %v281_v3 = vadd.f32 %v588_v1, %v826_v61  ;;  %v417_v4 = vadd.f32 %v608_v2, %v831_v62 }
  0xdc   :  { %v272_v5 = vpop.f32.mrf.mxu1  ;;  %v408_v6 = vpop.f32.mrf.mxu0 }
  0xdd   :  { %337 = vst.msk [vmem:[%s1017_s8 + $0x10] sm:$0xff] %vm77_vm0, %v281_v3  ;;  %473 = vst.msk [vmem:[%s1018_s9 + $0x10] sm:$0xff] %vm77_vm0, %v417_v4  ;;  %v273_v7 = vadd.f32 %v826_v61, %v272_v5  ;;  %v409_v8 = vadd.f32 %v831_v62, %v408_v6 }
  0xde   :  { %v589_v9 = vpop.f32.mrf.mxu1  ;;  %v609_v10 = vpop.f32.mrf.mxu0 }
  0xdf   :  { %335 = vst.msk [vmem:[%s1017_s8] sm:$0xff] %vm77_vm0, %v273_v7  ;;  %471 = vst.msk [vmem:[%s1018_s9] sm:$0xff] %vm77_vm0, %v409_v8  ;;  %v284_v11 = vadd.f32 %v589_v9, %v826_v61  ;;  %v420_v12 = vadd.f32 %v609_v10, %v831_v62 }
  0xe0   :  { %v275_v13 = vpop.f32.mrf.mxu1  ;;  %v411_v14 = vpop.f32.mrf.mxu0 }
  0xe1   :  { %338 = vst.msk [vmem:[%s1017_s8 + $0x18] sm:$0xff] %vm77_vm0, %v284_v11  ;;  %474 = vst.msk [vmem:[%s1018_s9 + $0x18] sm:$0xff] %vm77_vm0, %v420_v12  ;;  %v276_v15 = vadd.f32 %v826_v61, %v275_v13  ;;  %v412_v16 = vadd.f32 %v831_v62, %v411_v14 }
  0xe2   :  { %v592_v17 = vpop.f32.mrf.mxu1  ;;  %v612_v18 = vpop.f32.mrf.mxu0 }
  0xe3   :  { %336 = vst.msk [vmem:[%s1017_s8 + $0x8] sm:$0xff] %vm77_vm0, %v276_v15  ;;  %472 = vst.msk [vmem:[%s1018_s9 + $0x8] sm:$0xff] %vm77_vm0, %v412_v16  ;;  %v297_v19 = vadd.f32 %v592_v17, %v826_v61  ;;  %v433_v20 = vadd.f32 %v612_v18, %v831_v62 }
  0xe4   :  { %v288_v21 = vpop.f32.mrf.mxu1  ;;  %v424_v22 = vpop.f32.mrf.mxu0 }
  0xe5   :  { %341 = vst.msk [vmem:[%s1017_s8 + $0x30] sm:$0xff] %vm77_vm0, %v297_v19  ;;  %477 = vst.msk [vmem:[%s1018_s9 + $0x30] sm:$0xff] %vm77_vm0, %v433_v20  ;;  %v289_v23 = vadd.f32 %v826_v61, %v288_v21  ;;  %v425_v24 = vadd.f32 %v831_v62, %v424_v22 }
  0xe6   :  { %v593_v25 = vpop.f32.mrf.mxu1  ;;  %v613_v26 = vpop.f32.mrf.mxu0 }
  0xe7   :  { %339 = vst.msk [vmem:[%s1017_s8 + $0x20] sm:$0xff] %vm77_vm0, %v289_v23  ;;  %475 = vst.msk [vmem:[%s1018_s9 + $0x20] sm:$0xff] %vm77_vm0, %v425_v24  ;;  %v300_v27 = vadd.f32 %v593_v25, %v826_v61  ;;  %v436_v28 = vadd.f32 %v613_v26, %v831_v62 }
  0xe8   :  { %v291_v29 = vpop.f32.mrf.mxu1  ;;  %v427_v30 = vpop.f32.mrf.mxu0 }
  0xe9   :  { %342 = vst.msk [vmem:[%s1017_s8 + $0x38] sm:$0xff] %vm77_vm0, %v300_v27  ;;  %478 = vst.msk [vmem:[%s1018_s9 + $0x38] sm:$0xff] %vm77_vm0, %v436_v28  ;;  %v292_v31 = vadd.f32 %v826_v61, %v291_v29  ;;  %v428_v32 = vadd.f32 %v831_v62, %v427_v30 }
  0xea   :  { %v596_v33 = vpop.f32.mrf.mxu1  ;;  %v616_v34 = vpop.f32.mrf.mxu0 }
  0xeb   :  { %340 = vst.msk [vmem:[%s1017_s8 + $0x28] sm:$0xff] %vm77_vm0, %v292_v31  ;;  %476 = vst.msk [vmem:[%s1018_s9 + $0x28] sm:$0xff] %vm77_vm0, %v428_v32  ;;  %v313_v35 = vadd.f32 %v596_v33, %v826_v61  ;;  %v449_v36 = vadd.f32 %v616_v34, %v831_v62 }
  0xec   :  { %v304_v37 = vpop.f32.mrf.mxu1  ;;  %v440_v38 = vpop.f32.mrf.mxu0 }
  0xed   :  { %345 = vst.msk [vmem:[%s1017_s8 + $0x50] sm:$0xff] %vm77_vm0, %v313_v35  ;;  %481 = vst.msk [vmem:[%s1018_s9 + $0x50] sm:$0xff] %vm77_vm0, %v449_v36  ;;  %v305_v39 = vadd.f32 %v826_v61, %v304_v37  ;;  %v441_v40 = vadd.f32 %v831_v62, %v440_v38 }
  0xee   :  { %v597_v41 = vpop.f32.mrf.mxu1  ;;  %v617_v42 = vpop.f32.mrf.mxu0 }
  0xef   :  { %343 = vst.msk [vmem:[%s1017_s8 + $0x40] sm:$0xff] %vm77_vm0, %v305_v39  ;;  %479 = vst.msk [vmem:[%s1018_s9 + $0x40] sm:$0xff] %vm77_vm0, %v441_v40  ;;  %v316_v43 = vadd.f32 %v597_v41, %v826_v61  ;;  %v452_v44 = vadd.f32 %v617_v42, %v831_v62 }
  0xf0   :  { %v307_v45 = vpop.f32.mrf.mxu1  ;;  %v443_v46 = vpop.f32.mrf.mxu0 }
  0xf1   :  { %346 = vst.msk [vmem:[%s1017_s8 + $0x58] sm:$0xff] %vm77_vm0, %v316_v43  ;;  %482 = vst.msk [vmem:[%s1018_s9 + $0x58] sm:$0xff] %vm77_vm0, %v452_v44  ;;  %v308_v47 = vadd.f32 %v826_v61, %v307_v45  ;;  %v444_v48 = vadd.f32 %v831_v62, %v443_v46 }
  0xf2   :  { %v600_v49 = vpop.f32.mrf.mxu1  ;;  %v620_v50 = vpop.f32.mrf.mxu0 }
  0xf3   :  { %344 = vst.msk [vmem:[%s1017_s8 + $0x48] sm:$0xff] %vm77_vm0, %v308_v47  ;;  %480 = vst.msk [vmem:[%s1018_s9 + $0x48] sm:$0xff] %vm77_vm0, %v444_v48  ;;  %v329_v51 = vadd.f32 %v600_v49, %v826_v61  ;;  %v465_v52 = vadd.f32 %v620_v50, %v831_v62 }
  0xf4   :  { %v320_v53 = vpop.f32.mrf.mxu1  ;;  %v456_v54 = vpop.f32.mrf.mxu0 }
  0xf5   :  { %349 = vst.msk [vmem:[%s1017_s8 + $0x70] sm:$0xff] %vm77_vm0, %v329_v51  ;;  %485 = vst.msk [vmem:[%s1018_s9 + $0x70] sm:$0xff] %vm77_vm0, %v465_v52  ;;  %v321_v55 = vadd.f32 %v826_v61, %v320_v53  ;;  %v457_v56 = vadd.f32 %v831_v62, %v456_v54 }
  0xf6   :  { %v601_v57 = vpop.f32.mrf.mxu1  ;;  %v621_v58 = vpop.f32.mrf.mxu0 }
  0xf7   :  { %347 = vst.msk [vmem:[%s1017_s8 + $0x60] sm:$0xff] %vm77_vm0, %v321_v55  ;;  %483 = vst.msk [vmem:[%s1018_s9 + $0x60] sm:$0xff] %vm77_vm0, %v457_v56  ;;  %v332_v59 = vadd.f32 %v601_v57, %v826_v61  ;;  %v468_v60 = vadd.f32 %v621_v58, %v831_v62 }
  0xf8   :  { %v323_v63 = vpop.f32.mrf.mxu1  ;;  %v459_v0 = vpop.f32.mrf.mxu0 }
  0xf9   :  { %350 = vst.msk [vmem:[%s1017_s8 + $0x78] sm:$0xff] %vm77_vm0, %v332_v59  ;;  %486 = vst.msk [vmem:[%s1018_s9 + $0x78] sm:$0xff] %vm77_vm0, %v468_v60  ;;  %v324_v1 = vadd.f32 %v826_v61, %v323_v63  ;;  %v460_v2 = vadd.f32 %v831_v62, %v459_v0 }
  0xfb   :  { %348 = vst.msk [vmem:[%s1017_s8 + $0x68] sm:$0xff] %vm77_vm0, %v324_v1  ;;  %484 = vst.msk [vmem:[%s1018_s9 + $0x68] sm:$0xff] %vm77_vm0, %v460_v2 }

// kernel: _lambda_.29
= control target key start
LH: loop header
LB: loop body
LE: loop exit
PB: predicated region body
PF: predicated region fallthrough
CT: control target
= control target key end

     0   :  { %vm62_vm0 = vcmask 261120   ;;  %vm200_vm1 = vcmask 130048   ;;  %s449_s1 = inlined_call_operand.vmem [shape: bf16[32,16], index: 1, kind: input, shape index: {}]   ;;  %s450_s0 = inlined_call_operand.vmem [shape: f32[128,32], index: 0, kind: input, shape index: {}]   ;;  %s451_s2 = inlined_call_operand.vmem [shape: f32[1,16], index: 2, kind: input, shape index: {}]   ;;  %s452_s3 = inlined_call_operand.vmem [shape: f32[128,16], index: 3, kind: output, shape index: {}]  }
   0x1   :  { %v266_v0 = vld [vmem:[%s449_s1 + $0x8] sm:$0xff]   ;;  %v267_v1 = vld [vmem:[%s449_s1] sm:$0xff]   ;;  %v17_v7 = vld [vmem:[%s450_s0 + $0x10] sm:$0xff] }
   0x2   :  { %242 = vmatprep.subr.bf16.mxu0 %v266_v0  ;;  %262 = vmatprep.subr.bf16.mxu1 %v266_v0  ;;  %v15_v2 = vld [vmem:[%s450_s0] sm:$0xff]  ;;  %v16_v3 = vld [vmem:[%s450_s0 + $0x8] sm:$0xff]  ;;  %v18_v8 = vld [vmem:[%s450_s0 + $0x18] sm:$0xff] }
   0x3   :  { %v23_v4 = vld [vmem:[%s450_s0 + $0x40] sm:$0xff]  ;;  %243 = vmatpush3.bf16.msra.mxu0 %v266_v0  ;;  %264 = vmatpush3.bf16.msra.mxu1 %v266_v0  ;;  %v31_v5 = vpack.c.bf16 %v16_v3, %v15_v2  ;;  %v24_v6 = vld [vmem:[%s450_s0 + $0x48] sm:$0xff]  ;;  %v25_v10 = vld [vmem:[%s450_s0 + $0x50] sm:$0xff]  ;;  %v32_v16 = vpack.c.bf16 %v18_v8, %v17_v7 }
   0x4   :  { %244 = vmatprep.subr.bf16.mxu0 %v267_v1  ;;  %263 = vmatprep.subr.bf16.mxu1 %v267_v1  ;;  %v35_v9 = vpack.c.bf16 %v24_v6, %v23_v4  ;;  %v26_v11 = vld [vmem:[%s450_s0 + $0x58] sm:$0xff]  ;;  %v19_v12 = vld [vmem:[%s450_s0 + $0x20] sm:$0xff]  ;;  %v20_v13 = vld [vmem:[%s450_s0 + $0x28] sm:$0xff] }
   0x5   :  { %246 = vmatprep.mubr.msk.bf16.mxu0 %vm62_vm0, %v31_v5  ;;  %v27_v14 = vld [vmem:[%s450_s0 + $0x60] sm:$0xff]  ;;  %v28_v15 = vld [vmem:[%s450_s0 + $0x68] sm:$0xff]  ;;  %v36_v17 = vpack.c.bf16 %v26_v11, %v25_v10  ;;  %v33_v18 = vpack.c.bf16 %v20_v13, %v19_v12  ;;  %v21_v20 = vld [vmem:[%s450_s0 + $0x30] sm:$0xff] }
   0x6   :  { %254 = vmatprep.mubr.msk.bf16.mxu1 %vm62_vm0, %v35_v9  ;;  %v37_v19 = vpack.c.bf16 %v28_v15, %v27_v14  ;;  %v22_v21 = vld [vmem:[%s450_s0 + $0x38] sm:$0xff]  ;;  %v29_v22 = vld [vmem:[%s450_s0 + $0x70] sm:$0xff]  ;;  %v221_v26 = vld [vmem:[%s451_s2] ss:$0 sm:$0xff] }
   0x7   :  { %245 = vmatpush3.bf16.msra.mxu0 %v267_v1  ;;  %265 = vmatpush3.bf16.msra.mxu1 %v267_v1  ;;  %v30_v23 = vld [vmem:[%s450_s0 + $0x78] sm:$0xff]  ;;  %v34_v24 = vpack.c.bf16 %v22_v21, %v21_v20 }
   0x8   :  { %v38_v25 = vpack.c.bf16 %v30_v23, %v29_v22 }
   0xa   :  { %247 = vmatmul.mubr.msk.bf16.vlgmr.msra.gmra.mxu0 %vm62_vm0, %v32_v16  ;;  %255 = vmatmul.mubr.msk.bf16.vlgmr.msra.gmra.mxu1 %vm62_vm0, %v36_v17 }
   0xb   :  { %250 = vmatprep.mubr.msk.bf16.mxu0 %vm62_vm0, %v33_v18  ;;  %258 = vmatprep.mubr.msk.bf16.mxu1 %vm62_vm0, %v37_v19 }
  0x12   :  { %251 = vmatmul.mubr.msk.bf16.gmra.mxu0 %vm62_vm0, %v34_v24  ;;  %259 = vmatmul.mubr.msk.bf16.gmra.mxu1 %vm62_vm0, %v38_v25 }
  0xca   :  { %v248_v27 = vpop.f32.mrf.mxu0  ;;  %v256_v28 = vpop.f32.mrf.mxu1 }
  0xcb   :  { %v130_v29 = vadd.f32 %v248_v27, %v221_v26  ;;  %v162_v30 = vadd.f32 %v256_v28, %v221_v26 }
  0xcc   :  { %v121_v31 = vpop.f32.mrf.mxu0  ;;  %v153_v32 = vpop.f32.mrf.mxu1 }
  0xcd   :  { %268 = vtanh.f32 %v130_v29  ;;  %v122_v33 = vadd.f32 %v221_v26, %v121_v31  ;;  %v154_v34 = vadd.f32 %v221_v26, %v153_v32 }
  0xce   :  { %270 = vtanh.f32 %v162_v30  ;;  %v249_v35 = vpop.f32.mrf.mxu0  ;;  %v257_v36 = vpop.f32.mrf.mxu1 }
  0xcf   :  { %272 = vtanh.f32 %v122_v33  ;;  %v133_v37 = vadd.f32 %v249_v35, %v221_v26  ;;  %v165_v38 = vadd.f32 %v257_v36, %v221_v26 }
  0xd0   :  { %274 = vtanh.f32 %v154_v34  ;;  %v124_v39 = vpop.f32.mrf.mxu0  ;;  %v156_v40 = vpop.f32.mrf.mxu1 }
  0xd1   :  { %276 = vtanh.f32 %v133_v37  ;;  %v125_v41 = vadd.f32 %v221_v26, %v124_v39  ;;  %v157_v42 = vadd.f32 %v221_v26, %v156_v40 }
  0xd2   :  { %278 = vtanh.f32 %v165_v38  ;;  %v252_v43 = vpop.f32.mrf.mxu0  ;;  %v260_v44 = vpop.f32.mrf.mxu1 }
  0xd3   :  { %280 = vtanh.f32 %v125_v41  ;;  %v146_v45 = vadd.f32 %v252_v43, %v221_v26  ;;  %v178_v46 = vadd.f32 %v260_v44, %v221_v26 }
  0xd4   :  { %282 = vtanh.f32 %v157_v42  ;;  %v137_v47 = vpop.f32.mrf.mxu0  ;;  %v169_v48 = vpop.f32.mrf.mxu1 }
  0xd5   :  { %284 = vtanh.f32 %v146_v45  ;;  %v138_v49 = vadd.f32 %v221_v26, %v137_v47  ;;  %v170_v50 = vadd.f32 %v221_v26, %v169_v48 }
  0xd6   :  { %286 = vtanh.f32 %v178_v46  ;;  %v253_v51 = vpop.f32.mrf.mxu0  ;;  %v261_v52 = vpop.f32.mrf.mxu1 }
  0xd7   :  { %288 = vtanh.f32 %v138_v49  ;;  %v149_v53 = vadd.f32 %v253_v51, %v221_v26  ;;  %v181_v54 = vadd.f32 %v261_v52, %v221_v26 }
  0xd8   :  { %290 = vtanh.f32 %v170_v50  ;;  %v140_v55 = vpop.f32.mrf.mxu0  ;;  %v172_v56 = vpop.f32.mrf.mxu1 }
  0xd9   :  { %292 = vtanh.f32 %v149_v53  ;;  %v141_v57 = vadd.f32 %v221_v26, %v140_v55  ;;  %v173_v58 = vadd.f32 %v221_v26, %v172_v56 }
  0xda   :  { %v269_v59 = vpop.eup %268  ;;  %294 = vtanh.f32 %v181_v54 }
  0xdb   :  { %v271_v60 = vpop.eup %270  ;;  %203 = vst.msk [vmem:[%s452_s3 + $0x10] sm:$0xff] %vm200_vm1, %v269_v59  ;;  %296 = vtanh.f32 %v141_v57 }
  0xdc   :  { %v273_v61 = vpop.eup %272  ;;  %211 = vst.msk [vmem:[%s452_s3 + $0x50] sm:$0xff] %vm200_vm1, %v271_v60  ;;  %298 = vtanh.f32 %v173_v58 }
  0xdd   :  { %v275_v62 = vpop.eup %274  ;;  %201 = vst.msk [vmem:[%s452_s3] sm:$0xff] %vm200_vm1, %v273_v61 }
  0xde   :  { %v277_v63 = vpop.eup %276  ;;  %209 = vst.msk [vmem:[%s452_s3 + $0x40] sm:$0xff] %vm200_vm1, %v275_v62 }
  0xdf   :  { %v279_v0 = vpop.eup %278  ;;  %204 = vst.msk [vmem:[%s452_s3 + $0x18] sm:$0xff] %vm200_vm1, %v277_v63 }
  0xe0   :  { %v281_v1 = vpop.eup %280  ;;  %212 = vst.msk [vmem:[%s452_s3 + $0x58] sm:$0xff] %vm200_vm1, %v279_v0 }
  0xe1   :  { %v283_v2 = vpop.eup %282  ;;  %202 = vst.msk [vmem:[%s452_s3 + $0x8] sm:$0xff] %vm200_vm1, %v281_v1 }
  0xe2   :  { %v285_v3 = vpop.eup %284  ;;  %210 = vst.msk [vmem:[%s452_s3 + $0x48] sm:$0xff] %vm200_vm1, %v283_v2 }
  0xe3   :  { %v287_v4 = vpop.eup %286  ;;  %207 = vst.msk [vmem:[%s452_s3 + $0x30] sm:$0xff] %vm200_vm1, %v285_v3 }
  0xe4   :  { %v289_v5 = vpop.eup %288  ;;  %215 = vst.msk [vmem:[%s452_s3 + $0x70] sm:$0xff] %vm200_vm1, %v287_v4 }
  0xe5   :  { %v291_v6 = vpop.eup %290  ;;  %205 = vst.msk [vmem:[%s452_s3 + $0x20] sm:$0xff] %vm200_vm1, %v289_v5 }
  0xe6   :  { %v293_v7 = vpop.eup %292  ;;  %213 = vst.msk [vmem:[%s452_s3 + $0x60] sm:$0xff] %vm200_vm1, %v291_v6 }
  0xe7   :  { %v295_v8 = vpop.eup %294  ;;  %208 = vst.msk [vmem:[%s452_s3 + $0x38] sm:$0xff] %vm200_vm1, %v293_v7 }
  0xe8   :  { %v297_v9 = vpop.eup %296  ;;  %216 = vst.msk [vmem:[%s452_s3 + $0x78] sm:$0xff] %vm200_vm1, %v295_v8 }
  0xe9   :  { %v299_v10 = vpop.eup %298  ;;  %206 = vst.msk [vmem:[%s452_s3 + $0x28] sm:$0xff] %vm200_vm1, %v297_v9 }
  0xea   :  { %214 = vst.msk [vmem:[%s452_s3 + $0x68] sm:$0xff] %vm200_vm1, %v299_v10 }

</bundles_post_ra>
